<compile_context>
chip_gen: v7x
topology: tpu7x:2x2x1
jax: 0.10.0
libtpu: 0.0.40
codegen_flags: <defaults>
</compile_context>

<pallas_src>
import functools

import jax
import jax.numpy as jnp
from jax.experimental import pallas as pl
from jax.experimental.pallas import tpu as pltpu


# ------------------------------ tiling helpers ------------------------------

_TM_TARGET = 256                      # rows per M-tile (multiple of 8); raise to 512-1024 on v6e
_VMEM_LIMIT = 48 * 1024 * 1024        # leaves headroom inside v7x's 64 MiB physical VMEM


def _choose_tm(m, target=_TM_TARGET):
    """Largest multiple-of-8 divisor of m that is <= target, else the full extent."""
    if m <= target:
        return m
    start = target - (target % 8)
    for tm in range(start, 7, -8):
        if m % tm == 0:
            return tm
    return m


# ------------------------------ Pallas kernels ------------------------------

def _mm_kernel(x_ref, w_ref, b_ref, o_ref, *, act):
    """(TM,K)@(K,Cout) in bf16 -> f32 acc, + bias, activation, store."""
    acc = jnp.dot(x_ref[...], w_ref[...], preferred_element_type=jnp.float32)
    acc = acc + b_ref[...]
    if act == "relu":
        acc = jnp.maximum(acc, 0.0)
    elif act == "sigmoid":
        acc = jax.nn.sigmoid(acc)
    o_ref[...] = acc.astype(o_ref.dtype)


def _mm_res_kernel(x_ref, w_ref, b_ref, r_ref, o_ref, *, act):
    """Same as _mm_kernel but fuses a residual/skip add AFTER the activation."""
    acc = jnp.dot(x_ref[...], w_ref[...], preferred_element_type=jnp.float32)
    acc = acc + b_ref[...]
    if act == "relu":
        acc = jnp.maximum(acc, 0.0)
    acc = acc + r_ref[...].astype(jnp.float32)
    o_ref[...] = acc.astype(o_ref.dtype)


# ------------------------------ kernel wrapper ------------------------------

def matmul_bias_act(x2d, w2d, b, *, act="none", residual=None,
                    out_dtype=jnp.bfloat16):
    """y = act(x2d @ w2d + b) [+ residual], gridded over rows of x2d."""
    M, K = x2d.shape
    Cout = w2d.shape[-1]
    TM = _choose_tm(M)
    grid = (M // TM,)

    x2d = x2d.astype(jnp.bfloat16)
    w2d = w2d.astype(jnp.bfloat16)
    b2 = b.reshape(1, Cout).astype(jnp.float32)

    in_specs = [
        pl.BlockSpec((TM, K), lambda i: (i, 0)),      # activation tile (pipelined)
        pl.BlockSpec((K, Cout), lambda i: (0, 0)),    # weights stay resident
        pl.BlockSpec((1, Cout), lambda i: (0, 0)),    # bias stays resident
    ]
    args = [x2d, w2d, b2]
    bytes_accessed = 2 * (M * K + K * Cout + M * Cout) + 4 * Cout
    if residual is not None:
        in_specs.append(pl.BlockSpec((TM, Cout), lambda i: (i, 0)))
        args.append(residual.astype(jnp.bfloat16))
        bytes_accessed += 2 * M * Cout
        kernel = functools.partial(_mm_res_kernel, act=act)
    else:
        kernel = functools.partial(_mm_kernel, act=act)

    cost = pl.CostEstimate(
        flops=int(2 * M * K * Cout),
        transcendentals=int(M * Cout) if act == "sigmoid" else 0,
        bytes_accessed=int(bytes_accessed),
    )

    return pl.pallas_call(
        kernel,
        out_shape=jax.ShapeDtypeStruct((M, Cout), out_dtype),
        grid=grid,
        in_specs=in_specs,
        out_specs=pl.BlockSpec((TM, Cout), lambda i: (i, 0)),
        compiler_params=pltpu.CompilerParams(
            dimension_semantics=("parallel",),
            vmem_limit_bytes=_VMEM_LIMIT,
        ),
        cost_estimate=cost,
    )(*args)


# ------------------------------ conv wrappers ------------------------------

def conv3x3(x, w, b, *, relu=True, residual=None):
    """3x3 pad=1 conv.  x:(N,H,W,Cin), w:(3,3,Cin,Cout), b:(Cout,).
    Lowered to a single matmul with K = 9*Cin; optional fused residual add."""
    N, H, W, Cin = x.shape
    Cout = w.shape[-1]
    xpad = jnp.pad(x, ((0, 0), (1, 1), (1, 1), (0, 0)))
    taps = [xpad[:, ky:ky + H, kx:kx + W, :] for ky in range(3) for kx in range(3)]
    x2d = jnp.concatenate(taps, axis=-1).reshape(N * H * W, 9 * Cin)
    w2d = w.reshape(9 * Cin, Cout)                      # (ky, kx, ci) ordering matches taps
    r2d = residual.reshape(N * H * W, Cout) if residual is not None else None
    y = matmul_bias_act(x2d, w2d, b, act=("relu" if relu else "none"), residual=r2d)
    return y.reshape(N, H, W, Cout)


def conv1x1(x, w, b, *, act):
    """1x1 conv.  x:(N,H,W,Cin), w:(Cin,Cout)."""
    N, H, W, Cin = x.shape
    Cout = w.shape[-1]
    out_dtype = jnp.float32 if act == "sigmoid" else jnp.bfloat16
    y = matmul_bias_act(x.reshape(N * H * W, Cin), w, b, act=act, out_dtype=out_dtype)
    return y.reshape(N, H, W, Cout)


def downsample_conv(x, w, b):
    """2x2 stride-2 conv + ReLU.  x:(N,H,W,Cin), w:(2,2,Cin,Cout)."""
    N, H, W, Cin = x.shape
    Cout = w.shape[-1]
    patches = (x.reshape(N, H // 2, 2, W // 2, 2, Cin)
                 .transpose(0, 1, 3, 2, 4, 5)
                 .reshape(N * (H // 2) * (W // 2), 4 * Cin))      # (ky, kx, ci) order
    y = matmul_bias_act(patches, w.reshape(4 * Cin, Cout), b, act="relu")
    return y.reshape(N, H // 2, W // 2, Cout)


def upsample_deconv(x, w, b, *, skip=None):
    """2x2 stride-2 ConvTranspose2d + ReLU (+ fused skip add).
    x:(N,H,W,Cin), w:(Cin,2,2,Cout), skip:(N,2H,2W,Cout) or None."""
    N, H, W, Cin = x.shape
    Cout = w.shape[-1]
    x2d = x.reshape(N * H * W, Cin)
    w2d = w.reshape(Cin, 4 * Cout)                     # columns ordered (ky, kx, co)
    b4 = jnp.tile(b, 4)
    r2d = None
    if skip is not None:
        # Re-layout the skip tensor into the pre-shuffle (ky, kx, co) grouping so the
        # add can be fused into the matmul kernel (ReLU-before-add preserved).
        r2d = (skip.reshape(N, H, 2, W, 2, Cout)
                   .transpose(0, 1, 3, 2, 4, 5)
                   .reshape(N * H * W, 4 * Cout))
    y = matmul_bias_act(x2d, w2d, b4, act="relu", residual=r2d)
    return (y.reshape(N, H, W, 2, 2, Cout)
             .transpose(0, 1, 3, 2, 4, 5)
             .reshape(N, 2 * H, 2 * W, Cout))


# ------------------------------ parameter init ------------------------------

def _uniform(key, shape, fan_in):
    bound = 1.0 / float(fan_in) ** 0.5
    return jax.random.uniform(key, shape, jnp.float32, -bound, bound)


def init_params(key, n_channels, n_classes, nf):
    keys = iter(jax.random.split(key, 256))

    def conv3x3_p(cin, cout):
        fan = cin * 9
        return {"w": _uniform(next(keys), (3, 3, cin, cout), fan),
                "b": _uniform(next(keys), (cout,), fan)}

    def conv1x1_p(cin, cout):
        return {"w": _uniform(next(keys), (cin, cout), cin),
                "b": _uniform(next(keys), (cout,), cin)}

    def down_p(cin, cout):
        fan = cin * 4
        return {"w": _uniform(next(keys), (2, 2, cin, cout), fan),
                "b": _uniform(next(keys), (cout,), fan)}

    def up_p(cin, cout):
        fan = cin * 4
        return {"w": _uniform(next(keys), (cin, 2, 2, cout), fan),
                "b": _uniform(next(keys), (cout,), fan)}

    def res_p(n_stages, cin, cout, expand=False):
        p = {"stages": [conv3x3_p(cin, cout) for _ in range(n_stages)]}
        if expand:
            p["expand"] = conv1x1_p(cin, cout)
        return p

    expand_one = n_channels > 1
    return {
        "block_one":      res_p(1, n_channels, nf, expand=expand_one),
        "block_one_dw":   down_p(nf, 2 * nf),
        "block_two":      res_p(2, 2 * nf, 2 * nf),
        "block_two_dw":   down_p(2 * nf, 4 * nf),
        "block_three":    res_p(3, 4 * nf, 4 * nf),
        "block_three_dw": down_p(4 * nf, 8 * nf),
        "block_four":     res_p(3, 8 * nf, 8 * nf),
        "block_four_dw":  down_p(8 * nf, 16 * nf),
        "block_five":     res_p(3, 16 * nf, 16 * nf),
        "block_five_up":  up_p(16 * nf, 8 * nf),
        "block_six":      res_p(3, 8 * nf, 8 * nf),
        "block_six_up":   up_p(8 * nf, 4 * nf),
        "block_seven":    res_p(3, 4 * nf, 4 * nf),
        "block_seven_up": up_p(4 * nf, 2 * nf),
        "block_eight":    res_p(2, 2 * nf, 2 * nf),
        "block_eight_up": up_p(2 * nf, nf),
        "block_nine":     res_p(1, nf, nf),
        "out_conv":       conv1x1_p(nf, n_classes),
    }


# ------------------------------ forward ------------------------------

def res_block_fwd(p, x):
    """Residual conv block; the residual add is fused into the LAST conv3x3 kernel."""
    if "expand" in p:
        skip = conv1x1(x, p["expand"]["w"], p["expand"]["b"], act="relu")
    else:
        skip = x
    h = x
    stages = p["stages"]
    for s in stages[:-1]:
        h = conv3x3(h, s["w"], s["b"], relu=True)
    last = stages[-1]
    return conv3x3(h, last["w"], last["b"], relu=True, residual=skip)


def unet_forward(params, x_nchw):
    x = jnp.transpose(x_nchw, (0, 2, 3, 1)).astype(jnp.bfloat16)  # -> NHWC, bf16 activations

    x1 = res_block_fwd(params["block_one"], x)
    x1_dw = downsample_conv(x1, params["block_one_dw"]["w"], params["block_one_dw"]["b"])
    x2 = res_block_fwd(params["block_two"], x1_dw)
    x2_dw = downsample_conv(x2, params["block_two_dw"]["w"], params["block_two_dw"]["b"])
    x3 = res_block_fwd(params["block_three"], x2_dw)
    x3_dw = downsample_conv(x3, params["block_three_dw"]["w"], params["block_three_dw"]["b"])
    x4 = res_block_fwd(params["block_four"], x3_dw)
    x4_dw = downsample_conv(x4, params["block_four_dw"]["w"], params["block_four_dw"]["b"])
    x5 = res_block_fwd(params["block_five"], x4_dw)

    # skip adds are fused into the upsample kernels
    x5_up = upsample_deconv(x5, params["block_five_up"]["w"], params["block_five_up"]["b"], skip=x4)
    x6 = res_block_fwd(params["block_six"], x5_up)
    x6_up = upsample_deconv(x6, params["block_six_up"]["w"], params["block_six_up"]["b"], skip=x3)
    x7 = res_block_fwd(params["block_seven"], x6_up)
    x7_up = upsample_deconv(x7, params["block_seven_up"]["w"], params["block_seven_up"]["b"], skip=x2)
    x8 = res_block_fwd(params["block_eight"], x7_up)
    x8_up = upsample_deconv(x8, params["block_eight_up"]["w"], params["block_eight_up"]["b"], skip=x1)
    x9 = res_block_fwd(params["block_nine"], x8_up)

    out = conv1x1(x9, params["out_conv"]["w"], params["out_conv"]["b"], act="sigmoid")
    return jnp.transpose(out, (0, 3, 1, 2))  # -> NCHW, f32


# ------------------------------ main ------------------------------

if __name__ == "__main__":
    N_CHANNELS, N_CLASSES, N_FILTERS = 3, 2, 16
    BATCH, H, W = 2, 16, 16  # spatial must be divisible by 16 (4 stride-2 downsamples)

    key = jax.random.PRNGKey(0)
    pkey, xkey = jax.random.split(key)
    params = init_params(pkey, N_CHANNELS, N_CLASSES, N_FILTERS)
    x = jax.random.normal(xkey, (BATCH, N_CHANNELS, H, W), jnp.float32)  # NCHW input

    fwd = jax.jit(unet_forward)
    out = fwd(params, x)
    out = jax.block_until_ready(out)

    assert out.shape == (BATCH, N_CLASSES, H, W), out.shape
    assert out.dtype == jnp.float32
    assert bool(jnp.all(jnp.isfinite(out)))
    assert bool(jnp.all((out >= 0.0) & (out <= 1.0)))  # sigmoid output range
    print("KERNEL_OK")
</pallas_src>

<mosaic_0001>
module attributes {stable_mosaic.version = 11 : i64} {
  func.func @_mm_kernel(%arg0: i32, %arg1: memref<256x3xbf16, #tpu.memory_space<vmem>>, %arg2: memref<3x16xbf16, #tpu.memory_space<vmem>>, %arg3: memref<1x16xf32, #tpu.memory_space<vmem>>, %arg4: memref<256x16xbf16, #tpu.memory_space<vmem>>) attributes {dimension_semantics = [#tpu.dimension_semantics<parallel>], iteration_bounds = array<i64: 2>, scalar_prefetch = 0 : i64, scratch_operands = 0 : i64, tpu.core_type = #tpu.core_type<tc>, window_params = [{transform_indices = @transform_0, window_bounds = array<i64: 256, 3>}, {pipeline_mode = #tpu.pipeline_mode<synchronous>, transform_indices = @transform_1, window_bounds = array<i64: 3, 16>}, {pipeline_mode = #tpu.pipeline_mode<synchronous>, transform_indices = @transform_2, window_bounds = array<i64: 1, 16>}, {transform_indices = @transform_3, window_bounds = array<i64: 256, 16>}]} {
    %c0 = arith.constant 0 : index
    %c0_0 = arith.constant 0 : index
    %0 = vector.load %arg1[%c0, %c0_0] : memref<256x3xbf16, #tpu.memory_space<vmem>>, vector<256x3xbf16>
    %c0_1 = arith.constant 0 : index
    %c0_2 = arith.constant 0 : index
    %1 = vector.load %arg2[%c0_1, %c0_2] : memref<3x16xbf16, #tpu.memory_space<vmem>>, vector<3x16xbf16>
    %cst = arith.constant dense<0.000000e+00> : vector<256x16xf32>
    %2 = tpu.matmul %0, %1, %cst {dimension_numbers = #tpu.dot_dimension_numbers<[1], [0], [0], [1], [0, 0, 1, 1], [], []>} : vector<256x3xbf16>, vector<3x16xbf16>, vector<256x16xf32> -> vector<256x16xf32>
    %c0_3 = arith.constant 0 : index
    %c0_4 = arith.constant 0 : index
    %3 = vector.load %arg3[%c0_3, %c0_4] : memref<1x16xf32, #tpu.memory_space<vmem>>, vector<1x16xf32>
    %4 = vector.broadcast %3 : vector<1x16xf32> to vector<256x16xf32>
    %5 = arith.addf %2, %4 : vector<256x16xf32>
    %cst_5 = arith.constant 0.000000e+00 : f32
    %6 = vector.broadcast %cst_5 : f32 to vector<256x16xf32>
    %7 = arith.maximumf %5, %6 : vector<256x16xf32>
    %8 = arith.truncf %7 : vector<256x16xf32> to vector<256x16xbf16>
    %c0_6 = arith.constant 0 : index
    %c0_7 = arith.constant 0 : index
    %9 = vector.load %arg4[%c0_6, %c0_7] : memref<256x16xbf16, #tpu.memory_space<vmem>>, vector<256x16xbf16>
    tpu.vector_store %arg4[%c0_6, %c0_7], %8 {strides = array<i32>} : memref<256x16xbf16, #tpu.memory_space<vmem>>, vector<256x16xbf16>,
    return
  }
  func.func @transform_0(%arg0: i32) -> (i32, i32) {
    %c0_i32 = arith.constant 0 : i32
    %c0_i32_0 = arith.constant 0 : i32
    return %arg0, %c0_i32 : i32, i32
  }
  func.func @transform_1(%arg0: i32) -> (i32, i32) {
    %c0_i32 = arith.constant 0 : i32
    %c0_i32_0 = arith.constant 0 : i32
    %c0_i32_1 = arith.constant 0 : i32
    return %c0_i32, %c0_i32_0 : i32, i32
  }
  func.func @transform_2(%arg0: i32) -> (i32, i32) {
    %c0_i32 = arith.constant 0 : i32
    %c0_i32_0 = arith.constant 0 : i32
    %c0_i32_1 = arith.constant 0 : i32
    return %c0_i32, %c0_i32_0 : i32, i32
  }
  func.func @transform_3(%arg0: i32) -> (i32, i32) {
    %c0_i32 = arith.constant 0 : i32
    %c0_i32_0 = arith.constant 0 : i32
    return %arg0, %c0_i32 : i32, i32
  }
}

module attributes {stable_mosaic.version = 11 : i64} {
  func.func @_mm_res_kernel(%arg0: i32, %arg1: memref<256x27xbf16, #tpu.memory_space<vmem>>, %arg2: memref<27x16xbf16, #tpu.memory_space<vmem>>, %arg3: memref<1x16xf32, #tpu.memory_space<vmem>>, %arg4: memref<256x16xbf16, #tpu.memory_space<vmem>>, %arg5: memref<256x16xbf16, #tpu.memory_space<vmem>>) attributes {dimension_semantics = [#tpu.dimension_semantics<parallel>], iteration_bounds = array<i64: 2>, scalar_prefetch = 0 : i64, scratch_operands = 0 : i64, tpu.core_type = #tpu.core_type<tc>, window_params = [{transform_indices = @transform_0, window_bounds = array<i64: 256, 27>}, {pipeline_mode = #tpu.pipeline_mode<synchronous>, transform_indices = @transform_1, window_bounds = array<i64: 27, 16>}, {pipeline_mode = #tpu.pipeline_mode<synchronous>, transform_indices = @transform_2, window_bounds = array<i64: 1, 16>}, {transform_indices = @transform_3, window_bounds = array<i64: 256, 16>}, {transform_indices = @transform_4, window_bounds = array<i64: 256, 16>}]} {
    %c0 = arith.constant 0 : index
    %c0_0 = arith.constant 0 : index
    %0 = vector.load %arg1[%c0, %c0_0] : memref<256x27xbf16, #tpu.memory_space<vmem>>, vector<256x27xbf16>
    %c0_1 = arith.constant 0 : index
    %c0_2 = arith.constant 0 : index
    %1 = vector.load %arg2[%c0_1, %c0_2] : memref<27x16xbf16, #tpu.memory_space<vmem>>, vector<27x16xbf16>
    %cst = arith.constant dense<0.000000e+00> : vector<256x16xf32>
    %2 = tpu.matmul %0, %1, %cst {dimension_numbers = #tpu.dot_dimension_numbers<[1], [0], [0], [1], [0, 0, 1, 1], [], []>} : vector<256x27xbf16>, vector<27x16xbf16>, vector<256x16xf32> -> vector<256x16xf32>
    %c0_3 = arith.constant 0 : index
    %c0_4 = arith.constant 0 : index
    %3 = vector.load %arg3[%c0_3, %c0_4] : memref<1x16xf32, #tpu.memory_space<vmem>>, vector<1x16xf32>
    %4 = vector.broadcast %3 : vector<1x16xf32> to vector<256x16xf32>
    %5 = arith.addf %2, %4 : vector<256x16xf32>
    %cst_5 = arith.constant 0.000000e+00 : f32
    %6 = vector.broadcast %cst_5 : f32 to vector<256x16xf32>
    %7 = arith.maximumf %5, %6 : vector<256x16xf32>
    %c0_6 = arith.constant 0 : index
    %c0_7 = arith.constant 0 : index
    %8 = vector.load %arg4[%c0_6, %c0_7] : memref<256x16xbf16, #tpu.memory_space<vmem>>, vector<256x16xbf16>
    %9 = arith.extf %8 : vector<256x16xbf16> to vector<256x16xf32>
    %10 = arith.addf %7, %9 : vector<256x16xf32>
    %11 = arith.truncf %10 : vector<256x16xf32> to vector<256x16xbf16>
    %c0_8 = arith.constant 0 : index
    %c0_9 = arith.constant 0 : index
    %12 = vector.load %arg5[%c0_8, %c0_9] : memref<256x16xbf16, #tpu.memory_space<vmem>>, vector<256x16xbf16>
    tpu.vector_store %arg5[%c0_8, %c0_9], %11 {strides = array<i32>} : memref<256x16xbf16, #tpu.memory_space<vmem>>, vector<256x16xbf16>,
    return
  }
  func.func @transform_0(%arg0: i32) -> (i32, i32) {
    %c0_i32 = arith.constant 0 : i32
    %c0_i32_0 = arith.constant 0 : i32
    return %arg0, %c0_i32 : i32, i32
  }
  func.func @transform_1(%arg0: i32) -> (i32, i32) {
    %c0_i32 = arith.constant 0 : i32
    %c0_i32_0 = arith.constant 0 : i32
    %c0_i32_1 = arith.constant 0 : i32
    return %c0_i32, %c0_i32_0 : i32, i32
  }
  func.func @transform_2(%arg0: i32) -> (i32, i32) {
    %c0_i32 = arith.constant 0 : i32
    %c0_i32_0 = arith.constant 0 : i32
    %c0_i32_1 = arith.constant 0 : i32
    return %c0_i32, %c0_i32_0 : i32, i32
  }
  func.func @transform_3(%arg0: i32) -> (i32, i32) {
    %c0_i32 = arith.constant 0 : i32
    %c0_i32_0 = arith.constant 0 : i32
    return %arg0, %c0_i32 : i32, i32
  }
  func.func @transform_4(%arg0: i32) -> (i32, i32) {
    %c0_i32 = arith.constant 0 : i32
    %c0_i32_0 = arith.constant 0 : i32
    return %arg0, %c0_i32 : i32, i32
  }
}

module attributes {stable_mosaic.version = 11 : i64} {
  func.func @_mm_kernel(%arg0: i32, %arg1: memref<128x64xbf16, #tpu.memory_space<vmem>>, %arg2: memref<64x32xbf16, #tpu.memory_space<vmem>>, %arg3: memref<1x32xf32, #tpu.memory_space<vmem>>, %arg4: memref<128x32xbf16, #tpu.memory_space<vmem>>) attributes {dimension_semantics = [#tpu.dimension_semantics<parallel>], iteration_bounds = array<i64: 1>, scalar_prefetch = 0 : i64, scratch_operands = 0 : i64, tpu.core_type = #tpu.core_type<tc>, window_params = [{transform_indices = @transform_0, window_bounds = array<i64: 128, 64>}, {pipeline_mode = #tpu.pipeline_mode<synchronous>, transform_indices = @transform_1, window_bounds = array<i64: 64, 32>}, {pipeline_mode = #tpu.pipeline_mode<synchronous>, transform_indices = @transform_2, window_bounds = array<i64: 1, 32>}, {transform_indices = @transform_3, window_bounds = array<i64: 128, 32>}]} {
    %c0 = arith.constant 0 : index
    %c0_0 = arith.constant 0 : index
    %0 = vector.load %arg1[%c0, %c0_0] : memref<128x64xbf16, #tpu.memory_space<vmem>>, vector<128x64xbf16>
    %c0_1 = arith.constant 0 : index
    %c0_2 = arith.constant 0 : index
    %1 = vector.load %arg2[%c0_1, %c0_2] : memref<64x32xbf16, #tpu.memory_space<vmem>>, vector<64x32xbf16>
    %cst = arith.constant dense<0.000000e+00> : vector<128x32xf32>
    %2 = tpu.matmul %0, %1, %cst {dimension_numbers = #tpu.dot_dimension_numbers<[1], [0], [0], [1], [0, 0, 1, 1], [], []>} : vector<128x64xbf16>, vector<64x32xbf16>, vector<128x32xf32> -> vector<128x32xf32>
    %c0_3 = arith.constant 0 : index
    %c0_4 = arith.constant 0 : index
    %3 = vector.load %arg3[%c0_3, %c0_4] : memref<1x32xf32, #tpu.memory_space<vmem>>, vector<1x32xf32>
    %4 = vector.broadcast %3 : vector<1x32xf32> to vector<128x32xf32>
    %5 = arith.addf %2, %4 : vector<128x32xf32>
    %cst_5 = arith.constant 0.000000e+00 : f32
    %6 = vector.broadcast %cst_5 : f32 to vector<128x32xf32>
    %7 = arith.maximumf %5, %6 : vector<128x32xf32>
    %8 = arith.truncf %7 : vector<128x32xf32> to vector<128x32xbf16>
    %c0_6 = arith.constant 0 : index
    %c0_7 = arith.constant 0 : index
    %9 = vector.load %arg4[%c0_6, %c0_7] : memref<128x32xbf16, #tpu.memory_space<vmem>>, vector<128x32xbf16>
    tpu.vector_store %arg4[%c0_6, %c0_7], %8 {strides = array<i32>} : memref<128x32xbf16, #tpu.memory_space<vmem>>, vector<128x32xbf16>,
    return
  }
  func.func @transform_0(%arg0: i32) -> (i32, i32) {
    %c0_i32 = arith.constant 0 : i32
    %c0_i32_0 = arith.constant 0 : i32
    return %arg0, %c0_i32 : i32, i32
  }
  func.func @transform_1(%arg0: i32) -> (i32, i32) {
    %c0_i32 = arith.constant 0 : i32
    %c0_i32_0 = arith.constant 0 : i32
    %c0_i32_1 = arith.constant 0 : i32
    return %c0_i32, %c0_i32_0 : i32, i32
  }
  func.func @transform_2(%arg0: i32) -> (i32, i32) {
    %c0_i32 = arith.constant 0 : i32
    %c0_i32_0 = arith.constant 0 : i32
    %c0_i32_1 = arith.constant 0 : i32
    return %c0_i32, %c0_i32_0 : i32, i32
  }
  func.func @transform_3(%arg0: i32) -> (i32, i32) {
    %c0_i32 = arith.constant 0 : i32
    %c0_i32_0 = arith.constant 0 : i32
    return %arg0, %c0_i32 : i32, i32
  }
}

module attributes {stable_mosaic.version = 11 : i64} {
  func.func @_mm_kernel(%arg0: i32, %arg1: memref<128x288xbf16, #tpu.memory_space<vmem>>, %arg2: memref<288x32xbf16, #tpu.memory_space<vmem>>, %arg3: memref<1x32xf32, #tpu.memory_space<vmem>>, %arg4: memref<128x32xbf16, #tpu.memory_space<vmem>>) attributes {dimension_semantics = [#tpu.dimension_semantics<parallel>], iteration_bounds = array<i64: 1>, scalar_prefetch = 0 : i64, scratch_operands = 0 : i64, tpu.core_type = #tpu.core_type<tc>, window_params = [{transform_indices = @transform_0, window_bounds = array<i64: 128, 288>}, {pipeline_mode = #tpu.pipeline_mode<synchronous>, transform_indices = @transform_1, window_bounds = array<i64: 288, 32>}, {pipeline_mode = #tpu.pipeline_mode<synchronous>, transform_indices = @transform_2, window_bounds = array<i64: 1, 32>}, {transform_indices = @transform_3, window_bounds = array<i64: 128, 32>}]} {
    %c0 = arith.constant 0 : index
    %c0_0 = arith.constant 0 : index
    %0 = vector.load %arg1[%c0, %c0_0] : memref<128x288xbf16, #tpu.memory_space<vmem>>, vector<128x288xbf16>
    %c0_1 = arith.constant 0 : index
    %c0_2 = arith.constant 0 : index
    %1 = vector.load %arg2[%c0_1, %c0_2] : memref<288x32xbf16, #tpu.memory_space<vmem>>, vector<288x32xbf16>
    %cst = arith.constant dense<0.000000e+00> : vector<128x32xf32>
    %2 = tpu.matmul %0, %1, %cst {dimension_numbers = #tpu.dot_dimension_numbers<[1], [0], [0], [1], [0, 0, 1, 1], [], []>} : vector<128x288xbf16>, vector<288x32xbf16>, vector<128x32xf32> -> vector<128x32xf32>
    %c0_3 = arith.constant 0 : index
    %c0_4 = arith.constant 0 : index
    %3 = vector.load %arg3[%c0_3, %c0_4] : memref<1x32xf32, #tpu.memory_space<vmem>>, vector<1x32xf32>
    %4 = vector.broadcast %3 : vector<1x32xf32> to vector<128x32xf32>
    %5 = arith.addf %2, %4 : vector<128x32xf32>
    %cst_5 = arith.constant 0.000000e+00 : f32
    %6 = vector.broadcast %cst_5 : f32 to vector<128x32xf32>
    %7 = arith.maximumf %5, %6 : vector<128x32xf32>
    %8 = arith.truncf %7 : vector<128x32xf32> to vector<128x32xbf16>
    %c0_6 = arith.constant 0 : index
    %c0_7 = arith.constant 0 : index
    %9 = vector.load %arg4[%c0_6, %c0_7] : memref<128x32xbf16, #tpu.memory_space<vmem>>, vector<128x32xbf16>
    tpu.vector_store %arg4[%c0_6, %c0_7], %8 {strides = array<i32>} : memref<128x32xbf16, #tpu.memory_space<vmem>>, vector<128x32xbf16>,
    return
  }
  func.func @transform_0(%arg0: i32) -> (i32, i32) {
    %c0_i32 = arith.constant 0 : i32
    %c0_i32_0 = arith.constant 0 : i32
    return %arg0, %c0_i32 : i32, i32
  }
  func.func @transform_1(%arg0: i32) -> (i32, i32) {
    %c0_i32 = arith.constant 0 : i32
    %c0_i32_0 = arith.constant 0 : i32
    %c0_i32_1 = arith.constant 0 : i32
    return %c0_i32, %c0_i32_0 : i32, i32
  }
  func.func @transform_2(%arg0: i32) -> (i32, i32) {
    %c0_i32 = arith.constant 0 : i32
    %c0_i32_0 = arith.constant 0 : i32
    %c0_i32_1 = arith.constant 0 : i32
    return %c0_i32, %c0_i32_0 : i32, i32
  }
  func.func @transform_3(%arg0: i32) -> (i32, i32) {
    %c0_i32 = arith.constant 0 : i32
    %c0_i32_0 = arith.constant 0 : i32
    return %arg0, %c0_i32 : i32, i32
  }
}

module attributes {stable_mosaic.version = 11 : i64} {
  func.func @_mm_res_kernel(%arg0: i32, %arg1: memref<128x288xbf16, #tpu.memory_space<vmem>>, %arg2: memref<288x32xbf16, #tpu.memory_space<vmem>>, %arg3: memref<1x32xf32, #tpu.memory_space<vmem>>, %arg4: memref<128x32xbf16, #tpu.memory_space<vmem>>, %arg5: memref<128x32xbf16, #tpu.memory_space<vmem>>) attributes {dimension_semantics = [#tpu.dimension_semantics<parallel>], iteration_bounds = array<i64: 1>, scalar_prefetch = 0 : i64, scratch_operands = 0 : i64, tpu.core_type = #tpu.core_type<tc>, window_params = [{transform_indices = @transform_0, window_bounds = array<i64: 128, 288>}, {pipeline_mode = #tpu.pipeline_mode<synchronous>, transform_indices = @transform_1, window_bounds = array<i64: 288, 32>}, {pipeline_mode = #tpu.pipeline_mode<synchronous>, transform_indices = @transform_2, window_bounds = array<i64: 1, 32>}, {transform_indices = @transform_3, window_bounds = array<i64: 128, 32>}, {transform_indices = @transform_4, window_bounds = array<i64: 128, 32>}]} {
    %c0 = arith.constant 0 : index
    %c0_0 = arith.constant 0 : index
    %0 = vector.load %arg1[%c0, %c0_0] : memref<128x288xbf16, #tpu.memory_space<vmem>>, vector<128x288xbf16>
    %c0_1 = arith.constant 0 : index
    %c0_2 = arith.constant 0 : index
    %1 = vector.load %arg2[%c0_1, %c0_2] : memref<288x32xbf16, #tpu.memory_space<vmem>>, vector<288x32xbf16>
    %cst = arith.constant dense<0.000000e+00> : vector<128x32xf32>
    %2 = tpu.matmul %0, %1, %cst {dimension_numbers = #tpu.dot_dimension_numbers<[1], [0], [0], [1], [0, 0, 1, 1], [], []>} : vector<128x288xbf16>, vector<288x32xbf16>, vector<128x32xf32> -> vector<128x32xf32>
    %c0_3 = arith.constant 0 : index
    %c0_4 = arith.constant 0 : index
    %3 = vector.load %arg3[%c0_3, %c0_4] : memref<1x32xf32, #tpu.memory_space<vmem>>, vector<1x32xf32>
    %4 = vector.broadcast %3 : vector<1x32xf32> to vector<128x32xf32>
    %5 = arith.addf %2, %4 : vector<128x32xf32>
    %cst_5 = arith.constant 0.000000e+00 : f32
    %6 = vector.broadcast %cst_5 : f32 to vector<128x32xf32>
    %7 = arith.maximumf %5, %6 : vector<128x32xf32>
    %c0_6 = arith.constant 0 : index
    %c0_7 = arith.constant 0 : index
    %8 = vector.load %arg4[%c0_6, %c0_7] : memref<128x32xbf16, #tpu.memory_space<vmem>>, vector<128x32xbf16>
    %9 = arith.extf %8 : vector<128x32xbf16> to vector<128x32xf32>
    %10 = arith.addf %7, %9 : vector<128x32xf32>
    %11 = arith.truncf %10 : vector<128x32xf32> to vector<128x32xbf16>
    %c0_8 = arith.constant 0 : index
    %c0_9 = arith.constant 0 : index
    %12 = vector.load %arg5[%c0_8, %c0_9] : memref<128x32xbf16, #tpu.memory_space<vmem>>, vector<128x32xbf16>
    tpu.vector_store %arg5[%c0_8, %c0_9], %11 {strides = array<i32>} : memref<128x32xbf16, #tpu.memory_space<vmem>>, vector<128x32xbf16>,
    return
  }
  func.func @transform_0(%arg0: i32) -> (i32, i32) {
    %c0_i32 = arith.constant 0 : i32
    %c0_i32_0 = arith.constant 0 : i32
    return %arg0, %c0_i32 : i32, i32
  }
  func.func @transform_1(%arg0: i32) -> (i32, i32) {
    %c0_i32 = arith.constant 0 : i32
    %c0_i32_0 = arith.constant 0 : i32
    %c0_i32_1 = arith.constant 0 : i32
    return %c0_i32, %c0_i32_0 : i32, i32
  }
  func.func @transform_2(%arg0: i32) -> (i32, i32) {
    %c0_i32 = arith.constant 0 : i32
    %c0_i32_0 = arith.constant 0 : i32
    %c0_i32_1 = arith.constant 0 : i32
    return %c0_i32, %c0_i32_0 : i32, i32
  }
  func.func @transform_3(%arg0: i32) -> (i32, i32) {
    %c0_i32 = arith.constant 0 : i32
    %c0_i32_0 = arith.constant 0 : i32
    return %arg0, %c0_i32 : i32, i32
  }
  func.func @transform_4(%arg0: i32) -> (i32, i32) {
    %c0_i32 = arith.constant 0 : i32
    %c0_i32_0 = arith.constant 0 : i32
    return %arg0, %c0_i32 : i32, i32
  }
}

module attributes {stable_mosaic.version = 11 : i64} {
  func.func @_mm_kernel(%arg0: i32, %arg1: memref<32x128xbf16, #tpu.memory_space<vmem>>, %arg2: memref<128x64xbf16, #tpu.memory_space<vmem>>, %arg3: memref<1x64xf32, #tpu.memory_space<vmem>>, %arg4: memref<32x64xbf16, #tpu.memory_space<vmem>>) attributes {dimension_semantics = [#tpu.dimension_semantics<parallel>], iteration_bounds = array<i64: 1>, scalar_prefetch = 0 : i64, scratch_operands = 0 : i64, tpu.core_type = #tpu.core_type<tc>, window_params = [{transform_indices = @transform_0, window_bounds = array<i64: 32, 128>}, {pipeline_mode = #tpu.pipeline_mode<synchronous>, transform_indices = @transform_1, window_bounds = array<i64: 128, 64>}, {pipeline_mode = #tpu.pipeline_mode<synchronous>, transform_indices = @transform_2, window_bounds = array<i64: 1, 64>}, {transform_indices = @transform_3, window_bounds = array<i64: 32, 64>}]} {
    %c0 = arith.constant 0 : index
    %c0_0 = arith.constant 0 : index
    %0 = vector.load %arg1[%c0, %c0_0] : memref<32x128xbf16, #tpu.memory_space<vmem>>, vector<32x128xbf16>
    %c0_1 = arith.constant 0 : index
    %c0_2 = arith.constant 0 : index
    %1 = vector.load %arg2[%c0_1, %c0_2] : memref<128x64xbf16, #tpu.memory_space<vmem>>, vector<128x64xbf16>
    %cst = arith.constant dense<0.000000e+00> : vector<32x64xf32>
    %2 = tpu.matmul %0, %1, %cst {dimension_numbers = #tpu.dot_dimension_numbers<[1], [0], [0], [1], [0, 0, 1, 1], [], []>} : vector<32x128xbf16>, vector<128x64xbf16>, vector<32x64xf32> -> vector<32x64xf32>
    %c0_3 = arith.constant 0 : index
    %c0_4 = arith.constant 0 : index
    %3 = vector.load %arg3[%c0_3, %c0_4] : memref<1x64xf32, #tpu.memory_space<vmem>>, vector<1x64xf32>
    %4 = vector.broadcast %3 : vector<1x64xf32> to vector<32x64xf32>
    %5 = arith.addf %2, %4 : vector<32x64xf32>
    %cst_5 = arith.constant 0.000000e+00 : f32
    %6 = vector.broadcast %cst_5 : f32 to vector<32x64xf32>
    %7 = arith.maximumf %5, %6 : vector<32x64xf32>
    %8 = arith.truncf %7 : vector<32x64xf32> to vector<32x64xbf16>
    %c0_6 = arith.constant 0 : index
    %c0_7 = arith.constant 0 : index
    %9 = vector.load %arg4[%c0_6, %c0_7] : memref<32x64xbf16, #tpu.memory_space<vmem>>, vector<32x64xbf16>
    tpu.vector_store %arg4[%c0_6, %c0_7], %8 {strides = array<i32>} : memref<32x64xbf16, #tpu.memory_space<vmem>>, vector<32x64xbf16>,
    return
  }
  func.func @transform_0(%arg0: i32) -> (i32, i32) {
    %c0_i32 = arith.constant 0 : i32
    %c0_i32_0 = arith.constant 0 : i32
    return %arg0, %c0_i32 : i32, i32
  }
  func.func @transform_1(%arg0: i32) -> (i32, i32) {
    %c0_i32 = arith.constant 0 : i32
    %c0_i32_0 = arith.constant 0 : i32
    %c0_i32_1 = arith.constant 0 : i32
    return %c0_i32, %c0_i32_0 : i32, i32
  }
  func.func @transform_2(%arg0: i32) -> (i32, i32) {
    %c0_i32 = arith.constant 0 : i32
    %c0_i32_0 = arith.constant 0 : i32
    %c0_i32_1 = arith.constant 0 : i32
    return %c0_i32, %c0_i32_0 : i32, i32
  }
  func.func @transform_3(%arg0: i32) -> (i32, i32) {
    %c0_i32 = arith.constant 0 : i32
    %c0_i32_0 = arith.constant 0 : i32
    return %arg0, %c0_i32 : i32, i32
  }
}

module attributes {stable_mosaic.version = 11 : i64} {
  func.func @_mm_kernel(%arg0: i32, %arg1: memref<32x576xbf16, #tpu.memory_space<vmem>>, %arg2: memref<576x64xbf16, #tpu.memory_space<vmem>>, %arg3: memref<1x64xf32, #tpu.memory_space<vmem>>, %arg4: memref<32x64xbf16, #tpu.memory_space<vmem>>) attributes {dimension_semantics = [#tpu.dimension_semantics<parallel>], iteration_bounds = array<i64: 1>, scalar_prefetch = 0 : i64, scratch_operands = 0 : i64, tpu.core_type = #tpu.core_type<tc>, window_params = [{transform_indices = @transform_0, window_bounds = array<i64: 32, 576>}, {pipeline_mode = #tpu.pipeline_mode<synchronous>, transform_indices = @transform_1, window_bounds = array<i64: 576, 64>}, {pipeline_mode = #tpu.pipeline_mode<synchronous>, transform_indices = @transform_2, window_bounds = array<i64: 1, 64>}, {transform_indices = @transform_3, window_bounds = array<i64: 32, 64>}]} {
    %c0 = arith.constant 0 : index
    %c0_0 = arith.constant 0 : index
    %0 = vector.load %arg1[%c0, %c0_0] : memref<32x576xbf16, #tpu.memory_space<vmem>>, vector<32x576xbf16>
    %c0_1 = arith.constant 0 : index
    %c0_2 = arith.constant 0 : index
    %1 = vector.load %arg2[%c0_1, %c0_2] : memref<576x64xbf16, #tpu.memory_space<vmem>>, vector<576x64xbf16>
    %cst = arith.constant dense<0.000000e+00> : vector<32x64xf32>
    %2 = tpu.matmul %0, %1, %cst {dimension_numbers = #tpu.dot_dimension_numbers<[1], [0], [0], [1], [0, 0, 1, 1], [], []>} : vector<32x576xbf16>, vector<576x64xbf16>, vector<32x64xf32> -> vector<32x64xf32>
    %c0_3 = arith.constant 0 : index
    %c0_4 = arith.constant 0 : index
    %3 = vector.load %arg3[%c0_3, %c0_4] : memref<1x64xf32, #tpu.memory_space<vmem>>, vector<1x64xf32>
    %4 = vector.broadcast %3 : vector<1x64xf32> to vector<32x64xf32>
    %5 = arith.addf %2, %4 : vector<32x64xf32>
    %cst_5 = arith.constant 0.000000e+00 : f32
    %6 = vector.broadcast %cst_5 : f32 to vector<32x64xf32>
    %7 = arith.maximumf %5, %6 : vector<32x64xf32>
    %8 = arith.truncf %7 : vector<32x64xf32> to vector<32x64xbf16>
    %c0_6 = arith.constant 0 : index
    %c0_7 = arith.constant 0 : index
    %9 = vector.load %arg4[%c0_6, %c0_7] : memref<32x64xbf16, #tpu.memory_space<vmem>>, vector<32x64xbf16>
    tpu.vector_store %arg4[%c0_6, %c0_7], %8 {strides = array<i32>} : memref<32x64xbf16, #tpu.memory_space<vmem>>, vector<32x64xbf16>,
    return
  }
  func.func @transform_0(%arg0: i32) -> (i32, i32) {
    %c0_i32 = arith.constant 0 : i32
    %c0_i32_0 = arith.constant 0 : i32
    return %arg0, %c0_i32 : i32, i32
  }
  func.func @transform_1(%arg0: i32) -> (i32, i32) {
    %c0_i32 = arith.constant 0 : i32
    %c0_i32_0 = arith.constant 0 : i32
    %c0_i32_1 = arith.constant 0 : i32
    return %c0_i32, %c0_i32_0 : i32, i32
  }
  func.func @transform_2(%arg0: i32) -> (i32, i32) {
    %c0_i32 = arith.constant 0 : i32
    %c0_i32_0 = arith.constant 0 : i32
    %c0_i32_1 = arith.constant 0 : i32
    return %c0_i32, %c0_i32_0 : i32, i32
  }
  func.func @transform_3(%arg0: i32) -> (i32, i32) {
    %c0_i32 = arith.constant 0 : i32
    %c0_i32_0 = arith.constant 0 : i32
    return %arg0, %c0_i32 : i32, i32
  }
}

module attributes {stable_mosaic.version = 11 : i64} {
  func.func @_mm_res_kernel(%arg0: i32, %arg1: memref<32x576xbf16, #tpu.memory_space<vmem>>, %arg2: memref<576x64xbf16, #tpu.memory_space<vmem>>, %arg3: memref<1x64xf32, #tpu.memory_space<vmem>>, %arg4: memref<32x64xbf16, #tpu.memory_space<vmem>>, %arg5: memref<32x64xbf16, #tpu.memory_space<vmem>>) attributes {dimension_semantics = [#tpu.dimension_semantics<parallel>], iteration_bounds = array<i64: 1>, scalar_prefetch = 0 : i64, scratch_operands = 0 : i64, tpu.core_type = #tpu.core_type<tc>, window_params = [{transform_indices = @transform_0, window_bounds = array<i64: 32, 576>}, {pipeline_mode = #tpu.pipeline_mode<synchronous>, transform_indices = @transform_1, window_bounds = array<i64: 576, 64>}, {pipeline_mode = #tpu.pipeline_mode<synchronous>, transform_indices = @transform_2, window_bounds = array<i64: 1, 64>}, {transform_indices = @transform_3, window_bounds = array<i64: 32, 64>}, {transform_indices = @transform_4, window_bounds = array<i64: 32, 64>}]} {
    %c0 = arith.constant 0 : index
    %c0_0 = arith.constant 0 : index
    %0 = vector.load %arg1[%c0, %c0_0] : memref<32x576xbf16, #tpu.memory_space<vmem>>, vector<32x576xbf16>
    %c0_1 = arith.constant 0 : index
    %c0_2 = arith.constant 0 : index
    %1 = vector.load %arg2[%c0_1, %c0_2] : memref<576x64xbf16, #tpu.memory_space<vmem>>, vector<576x64xbf16>
    %cst = arith.constant dense<0.000000e+00> : vector<32x64xf32>
    %2 = tpu.matmul %0, %1, %cst {dimension_numbers = #tpu.dot_dimension_numbers<[1], [0], [0], [1], [0, 0, 1, 1], [], []>} : vector<32x576xbf16>, vector<576x64xbf16>, vector<32x64xf32> -> vector<32x64xf32>
    %c0_3 = arith.constant 0 : index
    %c0_4 = arith.constant 0 : index
    %3 = vector.load %arg3[%c0_3, %c0_4] : memref<1x64xf32, #tpu.memory_space<vmem>>, vector<1x64xf32>
    %4 = vector.broadcast %3 : vector<1x64xf32> to vector<32x64xf32>
    %5 = arith.addf %2, %4 : vector<32x64xf32>
    %cst_5 = arith.constant 0.000000e+00 : f32
    %6 = vector.broadcast %cst_5 : f32 to vector<32x64xf32>
    %7 = arith.maximumf %5, %6 : vector<32x64xf32>
    %c0_6 = arith.constant 0 : index
    %c0_7 = arith.constant 0 : index
    %8 = vector.load %arg4[%c0_6, %c0_7] : memref<32x64xbf16, #tpu.memory_space<vmem>>, vector<32x64xbf16>
    %9 = arith.extf %8 : vector<32x64xbf16> to vector<32x64xf32>
    %10 = arith.addf %7, %9 : vector<32x64xf32>
    %11 = arith.truncf %10 : vector<32x64xf32> to vector<32x64xbf16>
    %c0_8 = arith.constant 0 : index
    %c0_9 = arith.constant 0 : index
    %12 = vector.load %arg5[%c0_8, %c0_9] : memref<32x64xbf16, #tpu.memory_space<vmem>>, vector<32x64xbf16>
    tpu.vector_store %arg5[%c0_8, %c0_9], %11 {strides = array<i32>} : memref<32x64xbf16, #tpu.memory_space<vmem>>, vector<32x64xbf16>,
    return
  }
  func.func @transform_0(%arg0: i32) -> (i32, i32) {
    %c0_i32 = arith.constant 0 : i32
    %c0_i32_0 = arith.constant 0 : i32
    return %arg0, %c0_i32 : i32, i32
  }
  func.func @transform_1(%arg0: i32) -> (i32, i32) {
    %c0_i32 = arith.constant 0 : i32
    %c0_i32_0 = arith.constant 0 : i32
    %c0_i32_1 = arith.constant 0 : i32
    return %c0_i32, %c0_i32_0 : i32, i32
  }
  func.func @transform_2(%arg0: i32) -> (i32, i32) {
    %c0_i32 = arith.constant 0 : i32
    %c0_i32_0 = arith.constant 0 : i32
    %c0_i32_1 = arith.constant 0 : i32
    return %c0_i32, %c0_i32_0 : i32, i32
  }
  func.func @transform_3(%arg0: i32) -> (i32, i32) {
    %c0_i32 = arith.constant 0 : i32
    %c0_i32_0 = arith.constant 0 : i32
    return %arg0, %c0_i32 : i32, i32
  }
  func.func @transform_4(%arg0: i32) -> (i32, i32) {
    %c0_i32 = arith.constant 0 : i32
    %c0_i32_0 = arith.constant 0 : i32
    return %arg0, %c0_i32 : i32, i32
  }
}

module attributes {stable_mosaic.version = 11 : i64} {
  func.func @_mm_kernel(%arg0: i32, %arg1: memref<8x256xbf16, #tpu.memory_space<vmem>>, %arg2: memref<256x128xbf16, #tpu.memory_space<vmem>>, %arg3: memref<1x128xf32, #tpu.memory_space<vmem>>, %arg4: memref<8x128xbf16, #tpu.memory_space<vmem>>) attributes {dimension_semantics = [#tpu.dimension_semantics<parallel>], iteration_bounds = array<i64: 1>, scalar_prefetch = 0 : i64, scratch_operands = 0 : i64, tpu.core_type = #tpu.core_type<tc>, window_params = [{transform_indices = @transform_0, window_bounds = array<i64: 8, 256>}, {pipeline_mode = #tpu.pipeline_mode<synchronous>, transform_indices = @transform_1, window_bounds = array<i64: 256, 128>}, {pipeline_mode = #tpu.pipeline_mode<synchronous>, transform_indices = @transform_2, window_bounds = array<i64: 1, 128>}, {transform_indices = @transform_3, window_bounds = array<i64: 8, 128>}]} {
    %c0 = arith.constant 0 : index
    %c0_0 = arith.constant 0 : index
    %0 = vector.load %arg1[%c0, %c0_0] : memref<8x256xbf16, #tpu.memory_space<vmem>>, vector<8x256xbf16>
    %c0_1 = arith.constant 0 : index
    %c0_2 = arith.constant 0 : index
    %1 = vector.load %arg2[%c0_1, %c0_2] : memref<256x128xbf16, #tpu.memory_space<vmem>>, vector<256x128xbf16>
    %cst = arith.constant dense<0.000000e+00> : vector<8x128xf32>
    %2 = tpu.matmul %0, %1, %cst {dimension_numbers = #tpu.dot_dimension_numbers<[1], [0], [0], [1], [0, 0, 1, 1], [], []>} : vector<8x256xbf16>, vector<256x128xbf16>, vector<8x128xf32> -> vector<8x128xf32>
    %c0_3 = arith.constant 0 : index
    %c0_4 = arith.constant 0 : index
    %3 = vector.load %arg3[%c0_3, %c0_4] : memref<1x128xf32, #tpu.memory_space<vmem>>, vector<1x128xf32>
    %4 = vector.broadcast %3 : vector<1x128xf32> to vector<8x128xf32>
    %5 = arith.addf %2, %4 : vector<8x128xf32>
    %cst_5 = arith.constant 0.000000e+00 : f32
    %6 = vector.broadcast %cst_5 : f32 to vector<8x128xf32>
    %7 = arith.maximumf %5, %6 : vector<8x128xf32>
    %8 = arith.truncf %7 : vector<8x128xf32> to vector<8x128xbf16>
    %c0_6 = arith.constant 0 : index
    %c0_7 = arith.constant 0 : index
    %9 = vector.load %arg4[%c0_6, %c0_7] : memref<8x128xbf16, #tpu.memory_space<vmem>>, vector<8x128xbf16>
    tpu.vector_store %arg4[%c0_6, %c0_7], %8 {strides = array<i32>} : memref<8x128xbf16, #tpu.memory_space<vmem>>, vector<8x128xbf16>,
    return
  }
  func.func @transform_0(%arg0: i32) -> (i32, i32) {
    %c0_i32 = arith.constant 0 : i32
    %c0_i32_0 = arith.constant 0 : i32
    return %arg0, %c0_i32 : i32, i32
  }
  func.func @transform_1(%arg0: i32) -> (i32, i32) {
    %c0_i32 = arith.constant 0 : i32
    %c0_i32_0 = arith.constant 0 : i32
    %c0_i32_1 = arith.constant 0 : i32
    return %c0_i32, %c0_i32_0 : i32, i32
  }
  func.func @transform_2(%arg0: i32) -> (i32, i32) {
    %c0_i32 = arith.constant 0 : i32
    %c0_i32_0 = arith.constant 0 : i32
    %c0_i32_1 = arith.constant 0 : i32
    return %c0_i32, %c0_i32_0 : i32, i32
  }
  func.func @transform_3(%arg0: i32) -> (i32, i32) {
    %c0_i32 = arith.constant 0 : i32
    %c0_i32_0 = arith.constant 0 : i32
    return %arg0, %c0_i32 : i32, i32
  }
}

module attributes {stable_mosaic.version = 11 : i64} {
  func.func @_mm_kernel(%arg0: i32, %arg1: memref<8x1152xbf16, #tpu.memory_space<vmem>>, %arg2: memref<1152x128xbf16, #tpu.memory_space<vmem>>, %arg3: memref<1x128xf32, #tpu.memory_space<vmem>>, %arg4: memref<8x128xbf16, #tpu.memory_space<vmem>>) attributes {dimension_semantics = [#tpu.dimension_semantics<parallel>], iteration_bounds = array<i64: 1>, scalar_prefetch = 0 : i64, scratch_operands = 0 : i64, tpu.core_type = #tpu.core_type<tc>, window_params = [{transform_indices = @transform_0, window_bounds = array<i64: 8, 1152>}, {pipeline_mode = #tpu.pipeline_mode<synchronous>, transform_indices = @transform_1, window_bounds = array<i64: 1152, 128>}, {pipeline_mode = #tpu.pipeline_mode<synchronous>, transform_indices = @transform_2, window_bounds = array<i64: 1, 128>}, {transform_indices = @transform_3, window_bounds = array<i64: 8, 128>}]} {
    %c0 = arith.constant 0 : index
    %c0_0 = arith.constant 0 : index
    %0 = vector.load %arg1[%c0, %c0_0] : memref<8x1152xbf16, #tpu.memory_space<vmem>>, vector<8x1152xbf16>
    %c0_1 = arith.constant 0 : index
    %c0_2 = arith.constant 0 : index
    %1 = vector.load %arg2[%c0_1, %c0_2] : memref<1152x128xbf16, #tpu.memory_space<vmem>>, vector<1152x128xbf16>
    %cst = arith.constant dense<0.000000e+00> : vector<8x128xf32>
    %2 = tpu.matmul %0, %1, %cst {dimension_numbers = #tpu.dot_dimension_numbers<[1], [0], [0], [1], [0, 0, 1, 1], [], []>} : vector<8x1152xbf16>, vector<1152x128xbf16>, vector<8x128xf32> -> vector<8x128xf32>
    %c0_3 = arith.constant 0 : index
    %c0_4 = arith.constant 0 : index
    %3 = vector.load %arg3[%c0_3, %c0_4] : memref<1x128xf32, #tpu.memory_space<vmem>>, vector<1x128xf32>
    %4 = vector.broadcast %3 : vector<1x128xf32> to vector<8x128xf32>
    %5 = arith.addf %2, %4 : vector<8x128xf32>
    %cst_5 = arith.constant 0.000000e+00 : f32
    %6 = vector.broadcast %cst_5 : f32 to vector<8x128xf32>
    %7 = arith.maximumf %5, %6 : vector<8x128xf32>
    %8 = arith.truncf %7 : vector<8x128xf32> to vector<8x128xbf16>
    %c0_6 = arith.constant 0 : index
    %c0_7 = arith.constant 0 : index
    %9 = vector.load %arg4[%c0_6, %c0_7] : memref<8x128xbf16, #tpu.memory_space<vmem>>, vector<8x128xbf16>
    tpu.vector_store %arg4[%c0_6, %c0_7], %8 {strides = array<i32>} : memref<8x128xbf16, #tpu.memory_space<vmem>>, vector<8x128xbf16>,
    return
  }
  func.func @transform_0(%arg0: i32) -> (i32, i32) {
    %c0_i32 = arith.constant 0 : i32
    %c0_i32_0 = arith.constant 0 : i32
    return %arg0, %c0_i32 : i32, i32
  }
  func.func @transform_1(%arg0: i32) -> (i32, i32) {
    %c0_i32 = arith.constant 0 : i32
    %c0_i32_0 = arith.constant 0 : i32
    %c0_i32_1 = arith.constant 0 : i32
    return %c0_i32, %c0_i32_0 : i32, i32
  }
  func.func @transform_2(%arg0: i32) -> (i32, i32) {
    %c0_i32 = arith.constant 0 : i32
    %c0_i32_0 = arith.constant 0 : i32
    %c0_i32_1 = arith.constant 0 : i32
    return %c0_i32, %c0_i32_0 : i32, i32
  }
  func.func @transform_3(%arg0: i32) -> (i32, i32) {
    %c0_i32 = arith.constant 0 : i32
    %c0_i32_0 = arith.constant 0 : i32
    return %arg0, %c0_i32 : i32, i32
  }
}

module attributes {stable_mosaic.version = 11 : i64} {
  func.func @_mm_res_kernel(%arg0: i32, %arg1: memref<8x1152xbf16, #tpu.memory_space<vmem>>, %arg2: memref<1152x128xbf16, #tpu.memory_space<vmem>>, %arg3: memref<1x128xf32, #tpu.memory_space<vmem>>, %arg4: memref<8x128xbf16, #tpu.memory_space<vmem>>, %arg5: memref<8x128xbf16, #tpu.memory_space<vmem>>) attributes {dimension_semantics = [#tpu.dimension_semantics<parallel>], iteration_bounds = array<i64: 1>, scalar_prefetch = 0 : i64, scratch_operands = 0 : i64, tpu.core_type = #tpu.core_type<tc>, window_params = [{transform_indices = @transform_0, window_bounds = array<i64: 8, 1152>}, {pipeline_mode = #tpu.pipeline_mode<synchronous>, transform_indices = @transform_1, window_bounds = array<i64: 1152, 128>}, {pipeline_mode = #tpu.pipeline_mode<synchronous>, transform_indices = @transform_2, window_bounds = array<i64: 1, 128>}, {transform_indices = @transform_3, window_bounds = array<i64: 8, 128>}, {transform_indices = @transform_4, window_bounds = array<i64: 8, 128>}]} {
    %c0 = arith.constant 0 : index
    %c0_0 = arith.constant 0 : index
    %0 = vector.load %arg1[%c0, %c0_0] : memref<8x1152xbf16, #tpu.memory_space<vmem>>, vector<8x1152xbf16>
    %c0_1 = arith.constant 0 : index
    %c0_2 = arith.constant 0 : index
    %1 = vector.load %arg2[%c0_1, %c0_2] : memref<1152x128xbf16, #tpu.memory_space<vmem>>, vector<1152x128xbf16>
    %cst = arith.constant dense<0.000000e+00> : vector<8x128xf32>
    %2 = tpu.matmul %0, %1, %cst {dimension_numbers = #tpu.dot_dimension_numbers<[1], [0], [0], [1], [0, 0, 1, 1], [], []>} : vector<8x1152xbf16>, vector<1152x128xbf16>, vector<8x128xf32> -> vector<8x128xf32>
    %c0_3 = arith.constant 0 : index
    %c0_4 = arith.constant 0 : index
    %3 = vector.load %arg3[%c0_3, %c0_4] : memref<1x128xf32, #tpu.memory_space<vmem>>, vector<1x128xf32>
    %4 = vector.broadcast %3 : vector<1x128xf32> to vector<8x128xf32>
    %5 = arith.addf %2, %4 : vector<8x128xf32>
    %cst_5 = arith.constant 0.000000e+00 : f32
    %6 = vector.broadcast %cst_5 : f32 to vector<8x128xf32>
    %7 = arith.maximumf %5, %6 : vector<8x128xf32>
    %c0_6 = arith.constant 0 : index
    %c0_7 = arith.constant 0 : index
    %8 = vector.load %arg4[%c0_6, %c0_7] : memref<8x128xbf16, #tpu.memory_space<vmem>>, vector<8x128xbf16>
    %9 = arith.extf %8 : vector<8x128xbf16> to vector<8x128xf32>
    %10 = arith.addf %7, %9 : vector<8x128xf32>
    %11 = arith.truncf %10 : vector<8x128xf32> to vector<8x128xbf16>
    %c0_8 = arith.constant 0 : index
    %c0_9 = arith.constant 0 : index
    %12 = vector.load %arg5[%c0_8, %c0_9] : memref<8x128xbf16, #tpu.memory_space<vmem>>, vector<8x128xbf16>
    tpu.vector_store %arg5[%c0_8, %c0_9], %11 {strides = array<i32>} : memref<8x128xbf16, #tpu.memory_space<vmem>>, vector<8x128xbf16>,
    return
  }
  func.func @transform_0(%arg0: i32) -> (i32, i32) {
    %c0_i32 = arith.constant 0 : i32
    %c0_i32_0 = arith.constant 0 : i32
    return %arg0, %c0_i32 : i32, i32
  }
  func.func @transform_1(%arg0: i32) -> (i32, i32) {
    %c0_i32 = arith.constant 0 : i32
    %c0_i32_0 = arith.constant 0 : i32
    %c0_i32_1 = arith.constant 0 : i32
    return %c0_i32, %c0_i32_0 : i32, i32
  }
  func.func @transform_2(%arg0: i32) -> (i32, i32) {
    %c0_i32 = arith.constant 0 : i32
    %c0_i32_0 = arith.constant 0 : i32
    %c0_i32_1 = arith.constant 0 : i32
    return %c0_i32, %c0_i32_0 : i32, i32
  }
  func.func @transform_3(%arg0: i32) -> (i32, i32) {
    %c0_i32 = arith.constant 0 : i32
    %c0_i32_0 = arith.constant 0 : i32
    return %arg0, %c0_i32 : i32, i32
  }
  func.func @transform_4(%arg0: i32) -> (i32, i32) {
    %c0_i32 = arith.constant 0 : i32
    %c0_i32_0 = arith.constant 0 : i32
    return %arg0, %c0_i32 : i32, i32
  }
}

module attributes {stable_mosaic.version = 11 : i64} {
  func.func @_mm_kernel(%arg0: i32, %arg1: memref<2x512xbf16, #tpu.memory_space<vmem>>, %arg2: memref<512x256xbf16, #tpu.memory_space<vmem>>, %arg3: memref<1x256xf32, #tpu.memory_space<vmem>>, %arg4: memref<2x256xbf16, #tpu.memory_space<vmem>>) attributes {dimension_semantics = [#tpu.dimension_semantics<parallel>], iteration_bounds = array<i64: 1>, scalar_prefetch = 0 : i64, scratch_operands = 0 : i64, tpu.core_type = #tpu.core_type<tc>, window_params = [{transform_indices = @transform_0, window_bounds = array<i64: 2, 512>}, {pipeline_mode = #tpu.pipeline_mode<synchronous>, transform_indices = @transform_1, window_bounds = array<i64: 512, 256>}, {pipeline_mode = #tpu.pipeline_mode<synchronous>, transform_indices = @transform_2, window_bounds = array<i64: 1, 256>}, {transform_indices = @transform_3, window_bounds = array<i64: 2, 256>}]} {
    %c0 = arith.constant 0 : index
    %c0_0 = arith.constant 0 : index
    %0 = vector.load %arg1[%c0, %c0_0] : memref<2x512xbf16, #tpu.memory_space<vmem>>, vector<2x512xbf16>
    %c0_1 = arith.constant 0 : index
    %c0_2 = arith.constant 0 : index
    %1 = vector.load %arg2[%c0_1, %c0_2] : memref<512x256xbf16, #tpu.memory_space<vmem>>, vector<512x256xbf16>
    %cst = arith.constant dense<0.000000e+00> : vector<2x256xf32>
    %2 = tpu.matmul %0, %1, %cst {dimension_numbers = #tpu.dot_dimension_numbers<[1], [0], [0], [1], [0, 0, 1, 1], [], []>} : vector<2x512xbf16>, vector<512x256xbf16>, vector<2x256xf32> -> vector<2x256xf32>
    %c0_3 = arith.constant 0 : index
    %c0_4 = arith.constant 0 : index
    %3 = vector.load %arg3[%c0_3, %c0_4] : memref<1x256xf32, #tpu.memory_space<vmem>>, vector<1x256xf32>
    %4 = vector.broadcast %3 : vector<1x256xf32> to vector<2x256xf32>
    %5 = arith.addf %2, %4 : vector<2x256xf32>
    %cst_5 = arith.constant 0.000000e+00 : f32
    %6 = vector.broadcast %cst_5 : f32 to vector<2x256xf32>
    %7 = arith.maximumf %5, %6 : vector<2x256xf32>
    %8 = arith.truncf %7 : vector<2x256xf32> to vector<2x256xbf16>
    %c0_6 = arith.constant 0 : index
    %c0_7 = arith.constant 0 : index
    %9 = vector.load %arg4[%c0_6, %c0_7] : memref<2x256xbf16, #tpu.memory_space<vmem>>, vector<2x256xbf16>
    tpu.vector_store %arg4[%c0_6, %c0_7], %8 {strides = array<i32>} : memref<2x256xbf16, #tpu.memory_space<vmem>>, vector<2x256xbf16>,
    return
  }
  func.func @transform_0(%arg0: i32) -> (i32, i32) {
    %c0_i32 = arith.constant 0 : i32
    %c0_i32_0 = arith.constant 0 : i32
    return %arg0, %c0_i32 : i32, i32
  }
  func.func @transform_1(%arg0: i32) -> (i32, i32) {
    %c0_i32 = arith.constant 0 : i32
    %c0_i32_0 = arith.constant 0 : i32
    %c0_i32_1 = arith.constant 0 : i32
    return %c0_i32, %c0_i32_0 : i32, i32
  }
  func.func @transform_2(%arg0: i32) -> (i32, i32) {
    %c0_i32 = arith.constant 0 : i32
    %c0_i32_0 = arith.constant 0 : i32
    %c0_i32_1 = arith.constant 0 : i32
    return %c0_i32, %c0_i32_0 : i32, i32
  }
  func.func @transform_3(%arg0: i32) -> (i32, i32) {
    %c0_i32 = arith.constant 0 : i32
    %c0_i32_0 = arith.constant 0 : i32
    return %arg0, %c0_i32 : i32, i32
  }
}

module attributes {stable_mosaic.version = 11 : i64} {
  func.func @_mm_kernel(%arg0: i32, %arg1: memref<2x2304xbf16, #tpu.memory_space<vmem>>, %arg2: memref<2304x256xbf16, #tpu.memory_space<vmem>>, %arg3: memref<1x256xf32, #tpu.memory_space<vmem>>, %arg4: memref<2x256xbf16, #tpu.memory_space<vmem>>) attributes {dimension_semantics = [#tpu.dimension_semantics<parallel>], iteration_bounds = array<i64: 1>, scalar_prefetch = 0 : i64, scratch_operands = 0 : i64, tpu.core_type = #tpu.core_type<tc>, window_params = [{transform_indices = @transform_0, window_bounds = array<i64: 2, 2304>}, {pipeline_mode = #tpu.pipeline_mode<synchronous>, transform_indices = @transform_1, window_bounds = array<i64: 2304, 256>}, {pipeline_mode = #tpu.pipeline_mode<synchronous>, transform_indices = @transform_2, window_bounds = array<i64: 1, 256>}, {transform_indices = @transform_3, window_bounds = array<i64: 2, 256>}]} {
    %c0 = arith.constant 0 : index
    %c0_0 = arith.constant 0 : index
    %0 = vector.load %arg1[%c0, %c0_0] : memref<2x2304xbf16, #tpu.memory_space<vmem>>, vector<2x2304xbf16>
    %c0_1 = arith.constant 0 : index
    %c0_2 = arith.constant 0 : index
    %1 = vector.load %arg2[%c0_1, %c0_2] : memref<2304x256xbf16, #tpu.memory_space<vmem>>, vector<2304x256xbf16>
    %cst = arith.constant dense<0.000000e+00> : vector<2x256xf32>
    %2 = tpu.matmul %0, %1, %cst {dimension_numbers = #tpu.dot_dimension_numbers<[1], [0], [0], [1], [0, 0, 1, 1], [], []>} : vector<2x2304xbf16>, vector<2304x256xbf16>, vector<2x256xf32> -> vector<2x256xf32>
    %c0_3 = arith.constant 0 : index
    %c0_4 = arith.constant 0 : index
    %3 = vector.load %arg3[%c0_3, %c0_4] : memref<1x256xf32, #tpu.memory_space<vmem>>, vector<1x256xf32>
    %4 = vector.broadcast %3 : vector<1x256xf32> to vector<2x256xf32>
    %5 = arith.addf %2, %4 : vector<2x256xf32>
    %cst_5 = arith.constant 0.000000e+00 : f32
    %6 = vector.broadcast %cst_5 : f32 to vector<2x256xf32>
    %7 = arith.maximumf %5, %6 : vector<2x256xf32>
    %8 = arith.truncf %7 : vector<2x256xf32> to vector<2x256xbf16>
    %c0_6 = arith.constant 0 : index
    %c0_7 = arith.constant 0 : index
    %9 = vector.load %arg4[%c0_6, %c0_7] : memref<2x256xbf16, #tpu.memory_space<vmem>>, vector<2x256xbf16>
    tpu.vector_store %arg4[%c0_6, %c0_7], %8 {strides = array<i32>} : memref<2x256xbf16, #tpu.memory_space<vmem>>, vector<2x256xbf16>,
    return
  }
  func.func @transform_0(%arg0: i32) -> (i32, i32) {
    %c0_i32 = arith.constant 0 : i32
    %c0_i32_0 = arith.constant 0 : i32
    return %arg0, %c0_i32 : i32, i32
  }
  func.func @transform_1(%arg0: i32) -> (i32, i32) {
    %c0_i32 = arith.constant 0 : i32
    %c0_i32_0 = arith.constant 0 : i32
    %c0_i32_1 = arith.constant 0 : i32
    return %c0_i32, %c0_i32_0 : i32, i32
  }
  func.func @transform_2(%arg0: i32) -> (i32, i32) {
    %c0_i32 = arith.constant 0 : i32
    %c0_i32_0 = arith.constant 0 : i32
    %c0_i32_1 = arith.constant 0 : i32
    return %c0_i32, %c0_i32_0 : i32, i32
  }
  func.func @transform_3(%arg0: i32) -> (i32, i32) {
    %c0_i32 = arith.constant 0 : i32
    %c0_i32_0 = arith.constant 0 : i32
    return %arg0, %c0_i32 : i32, i32
  }
}

module attributes {stable_mosaic.version = 11 : i64} {
  func.func @_mm_res_kernel(%arg0: i32, %arg1: memref<2x2304xbf16, #tpu.memory_space<vmem>>, %arg2: memref<2304x256xbf16, #tpu.memory_space<vmem>>, %arg3: memref<1x256xf32, #tpu.memory_space<vmem>>, %arg4: memref<2x256xbf16, #tpu.memory_space<vmem>>, %arg5: memref<2x256xbf16, #tpu.memory_space<vmem>>) attributes {dimension_semantics = [#tpu.dimension_semantics<parallel>], iteration_bounds = array<i64: 1>, scalar_prefetch = 0 : i64, scratch_operands = 0 : i64, tpu.core_type = #tpu.core_type<tc>, window_params = [{transform_indices = @transform_0, window_bounds = array<i64: 2, 2304>}, {pipeline_mode = #tpu.pipeline_mode<synchronous>, transform_indices = @transform_1, window_bounds = array<i64: 2304, 256>}, {pipeline_mode = #tpu.pipeline_mode<synchronous>, transform_indices = @transform_2, window_bounds = array<i64: 1, 256>}, {transform_indices = @transform_3, window_bounds = array<i64: 2, 256>}, {transform_indices = @transform_4, window_bounds = array<i64: 2, 256>}]} {
    %c0 = arith.constant 0 : index
    %c0_0 = arith.constant 0 : index
    %0 = vector.load %arg1[%c0, %c0_0] : memref<2x2304xbf16, #tpu.memory_space<vmem>>, vector<2x2304xbf16>
    %c0_1 = arith.constant 0 : index
    %c0_2 = arith.constant 0 : index
    %1 = vector.load %arg2[%c0_1, %c0_2] : memref<2304x256xbf16, #tpu.memory_space<vmem>>, vector<2304x256xbf16>
    %cst = arith.constant dense<0.000000e+00> : vector<2x256xf32>
    %2 = tpu.matmul %0, %1, %cst {dimension_numbers = #tpu.dot_dimension_numbers<[1], [0], [0], [1], [0, 0, 1, 1], [], []>} : vector<2x2304xbf16>, vector<2304x256xbf16>, vector<2x256xf32> -> vector<2x256xf32>
    %c0_3 = arith.constant 0 : index
    %c0_4 = arith.constant 0 : index
    %3 = vector.load %arg3[%c0_3, %c0_4] : memref<1x256xf32, #tpu.memory_space<vmem>>, vector<1x256xf32>
    %4 = vector.broadcast %3 : vector<1x256xf32> to vector<2x256xf32>
    %5 = arith.addf %2, %4 : vector<2x256xf32>
    %cst_5 = arith.constant 0.000000e+00 : f32
    %6 = vector.broadcast %cst_5 : f32 to vector<2x256xf32>
    %7 = arith.maximumf %5, %6 : vector<2x256xf32>
    %c0_6 = arith.constant 0 : index
    %c0_7 = arith.constant 0 : index
    %8 = vector.load %arg4[%c0_6, %c0_7] : memref<2x256xbf16, #tpu.memory_space<vmem>>, vector<2x256xbf16>
    %9 = arith.extf %8 : vector<2x256xbf16> to vector<2x256xf32>
    %10 = arith.addf %7, %9 : vector<2x256xf32>
    %11 = arith.truncf %10 : vector<2x256xf32> to vector<2x256xbf16>
    %c0_8 = arith.constant 0 : index
    %c0_9 = arith.constant 0 : index
    %12 = vector.load %arg5[%c0_8, %c0_9] : memref<2x256xbf16, #tpu.memory_space<vmem>>, vector<2x256xbf16>
    tpu.vector_store %arg5[%c0_8, %c0_9], %11 {strides = array<i32>} : memref<2x256xbf16, #tpu.memory_space<vmem>>, vector<2x256xbf16>,
    return
  }
  func.func @transform_0(%arg0: i32) -> (i32, i32) {
    %c0_i32 = arith.constant 0 : i32
    %c0_i32_0 = arith.constant 0 : i32
    return %arg0, %c0_i32 : i32, i32
  }
  func.func @transform_1(%arg0: i32) -> (i32, i32) {
    %c0_i32 = arith.constant 0 : i32
    %c0_i32_0 = arith.constant 0 : i32
    %c0_i32_1 = arith.constant 0 : i32
    return %c0_i32, %c0_i32_0 : i32, i32
  }
  func.func @transform_2(%arg0: i32) -> (i32, i32) {
    %c0_i32 = arith.constant 0 : i32
    %c0_i32_0 = arith.constant 0 : i32
    %c0_i32_1 = arith.constant 0 : i32
    return %c0_i32, %c0_i32_0 : i32, i32
  }
  func.func @transform_3(%arg0: i32) -> (i32, i32) {
    %c0_i32 = arith.constant 0 : i32
    %c0_i32_0 = arith.constant 0 : i32
    return %arg0, %c0_i32 : i32, i32
  }
  func.func @transform_4(%arg0: i32) -> (i32, i32) {
    %c0_i32 = arith.constant 0 : i32
    %c0_i32_0 = arith.constant 0 : i32
    return %arg0, %c0_i32 : i32, i32
  }
}

module attributes {stable_mosaic.version = 11 : i64} {
  func.func @_mm_res_kernel(%arg0: i32, %arg1: memref<2x256xbf16, #tpu.memory_space<vmem>>, %arg2: memref<256x512xbf16, #tpu.memory_space<vmem>>, %arg3: memref<1x512xf32, #tpu.memory_space<vmem>>, %arg4: memref<2x512xbf16, #tpu.memory_space<vmem>>, %arg5: memref<2x512xbf16, #tpu.memory_space<vmem>>) attributes {dimension_semantics = [#tpu.dimension_semantics<parallel>], iteration_bounds = array<i64: 1>, scalar_prefetch = 0 : i64, scratch_operands = 0 : i64, tpu.core_type = #tpu.core_type<tc>, window_params = [{transform_indices = @transform_0, window_bounds = array<i64: 2, 256>}, {pipeline_mode = #tpu.pipeline_mode<synchronous>, transform_indices = @transform_1, window_bounds = array<i64: 256, 512>}, {pipeline_mode = #tpu.pipeline_mode<synchronous>, transform_indices = @transform_2, window_bounds = array<i64: 1, 512>}, {transform_indices = @transform_3, window_bounds = array<i64: 2, 512>}, {transform_indices = @transform_4, window_bounds = array<i64: 2, 512>}]} {
    %c0 = arith.constant 0 : index
    %c0_0 = arith.constant 0 : index
    %0 = vector.load %arg1[%c0, %c0_0] : memref<2x256xbf16, #tpu.memory_space<vmem>>, vector<2x256xbf16>
    %c0_1 = arith.constant 0 : index
    %c0_2 = arith.constant 0 : index
    %1 = vector.load %arg2[%c0_1, %c0_2] : memref<256x512xbf16, #tpu.memory_space<vmem>>, vector<256x512xbf16>
    %cst = arith.constant dense<0.000000e+00> : vector<2x512xf32>
    %2 = tpu.matmul %0, %1, %cst {dimension_numbers = #tpu.dot_dimension_numbers<[1], [0], [0], [1], [0, 0, 1, 1], [], []>} : vector<2x256xbf16>, vector<256x512xbf16>, vector<2x512xf32> -> vector<2x512xf32>
    %c0_3 = arith.constant 0 : index
    %c0_4 = arith.constant 0 : index
    %3 = vector.load %arg3[%c0_3, %c0_4] : memref<1x512xf32, #tpu.memory_space<vmem>>, vector<1x512xf32>
    %4 = vector.broadcast %3 : vector<1x512xf32> to vector<2x512xf32>
    %5 = arith.addf %2, %4 : vector<2x512xf32>
    %cst_5 = arith.constant 0.000000e+00 : f32
    %6 = vector.broadcast %cst_5 : f32 to vector<2x512xf32>
    %7 = arith.maximumf %5, %6 : vector<2x512xf32>
    %c0_6 = arith.constant 0 : index
    %c0_7 = arith.constant 0 : index
    %8 = vector.load %arg4[%c0_6, %c0_7] : memref<2x512xbf16, #tpu.memory_space<vmem>>, vector<2x512xbf16>
    %9 = arith.extf %8 : vector<2x512xbf16> to vector<2x512xf32>
    %10 = arith.addf %7, %9 : vector<2x512xf32>
    %11 = arith.truncf %10 : vector<2x512xf32> to vector<2x512xbf16>
    %c0_8 = arith.constant 0 : index
    %c0_9 = arith.constant 0 : index
    %12 = vector.load %arg5[%c0_8, %c0_9] : memref<2x512xbf16, #tpu.memory_space<vmem>>, vector<2x512xbf16>
    tpu.vector_store %arg5[%c0_8, %c0_9], %11 {strides = array<i32>} : memref<2x512xbf16, #tpu.memory_space<vmem>>, vector<2x512xbf16>,
    return
  }
  func.func @transform_0(%arg0: i32) -> (i32, i32) {
    %c0_i32 = arith.constant 0 : i32
    %c0_i32_0 = arith.constant 0 : i32
    return %arg0, %c0_i32 : i32, i32
  }
  func.func @transform_1(%arg0: i32) -> (i32, i32) {
    %c0_i32 = arith.constant 0 : i32
    %c0_i32_0 = arith.constant 0 : i32
    %c0_i32_1 = arith.constant 0 : i32
    return %c0_i32, %c0_i32_0 : i32, i32
  }
  func.func @transform_2(%arg0: i32) -> (i32, i32) {
    %c0_i32 = arith.constant 0 : i32
    %c0_i32_0 = arith.constant 0 : i32
    %c0_i32_1 = arith.constant 0 : i32
    return %c0_i32, %c0_i32_0 : i32, i32
  }
  func.func @transform_3(%arg0: i32) -> (i32, i32) {
    %c0_i32 = arith.constant 0 : i32
    %c0_i32_0 = arith.constant 0 : i32
    return %arg0, %c0_i32 : i32, i32
  }
  func.func @transform_4(%arg0: i32) -> (i32, i32) {
    %c0_i32 = arith.constant 0 : i32
    %c0_i32_0 = arith.constant 0 : i32
    return %arg0, %c0_i32 : i32, i32
  }
}

module attributes {stable_mosaic.version = 11 : i64} {
  func.func @_mm_res_kernel(%arg0: i32, %arg1: memref<8x128xbf16, #tpu.memory_space<vmem>>, %arg2: memref<128x256xbf16, #tpu.memory_space<vmem>>, %arg3: memref<1x256xf32, #tpu.memory_space<vmem>>, %arg4: memref<8x256xbf16, #tpu.memory_space<vmem>>, %arg5: memref<8x256xbf16, #tpu.memory_space<vmem>>) attributes {dimension_semantics = [#tpu.dimension_semantics<parallel>], iteration_bounds = array<i64: 1>, scalar_prefetch = 0 : i64, scratch_operands = 0 : i64, tpu.core_type = #tpu.core_type<tc>, window_params = [{transform_indices = @transform_0, window_bounds = array<i64: 8, 128>}, {pipeline_mode = #tpu.pipeline_mode<synchronous>, transform_indices = @transform_1, window_bounds = array<i64: 128, 256>}, {pipeline_mode = #tpu.pipeline_mode<synchronous>, transform_indices = @transform_2, window_bounds = array<i64: 1, 256>}, {transform_indices = @transform_3, window_bounds = array<i64: 8, 256>}, {transform_indices = @transform_4, window_bounds = array<i64: 8, 256>}]} {
    %c0 = arith.constant 0 : index
    %c0_0 = arith.constant 0 : index
    %0 = vector.load %arg1[%c0, %c0_0] : memref<8x128xbf16, #tpu.memory_space<vmem>>, vector<8x128xbf16>
    %c0_1 = arith.constant 0 : index
    %c0_2 = arith.constant 0 : index
    %1 = vector.load %arg2[%c0_1, %c0_2] : memref<128x256xbf16, #tpu.memory_space<vmem>>, vector<128x256xbf16>
    %cst = arith.constant dense<0.000000e+00> : vector<8x256xf32>
    %2 = tpu.matmul %0, %1, %cst {dimension_numbers = #tpu.dot_dimension_numbers<[1], [0], [0], [1], [0, 0, 1, 1], [], []>} : vector<8x128xbf16>, vector<128x256xbf16>, vector<8x256xf32> -> vector<8x256xf32>
    %c0_3 = arith.constant 0 : index
    %c0_4 = arith.constant 0 : index
    %3 = vector.load %arg3[%c0_3, %c0_4] : memref<1x256xf32, #tpu.memory_space<vmem>>, vector<1x256xf32>
    %4 = vector.broadcast %3 : vector<1x256xf32> to vector<8x256xf32>
    %5 = arith.addf %2, %4 : vector<8x256xf32>
    %cst_5 = arith.constant 0.000000e+00 : f32
    %6 = vector.broadcast %cst_5 : f32 to vector<8x256xf32>
    %7 = arith.maximumf %5, %6 : vector<8x256xf32>
    %c0_6 = arith.constant 0 : index
    %c0_7 = arith.constant 0 : index
    %8 = vector.load %arg4[%c0_6, %c0_7] : memref<8x256xbf16, #tpu.memory_space<vmem>>, vector<8x256xbf16>
    %9 = arith.extf %8 : vector<8x256xbf16> to vector<8x256xf32>
    %10 = arith.addf %7, %9 : vector<8x256xf32>
    %11 = arith.truncf %10 : vector<8x256xf32> to vector<8x256xbf16>
    %c0_8 = arith.constant 0 : index
    %c0_9 = arith.constant 0 : index
    %12 = vector.load %arg5[%c0_8, %c0_9] : memref<8x256xbf16, #tpu.memory_space<vmem>>, vector<8x256xbf16>
    tpu.vector_store %arg5[%c0_8, %c0_9], %11 {strides = array<i32>} : memref<8x256xbf16, #tpu.memory_space<vmem>>, vector<8x256xbf16>,
    return
  }
  func.func @transform_0(%arg0: i32) -> (i32, i32) {
    %c0_i32 = arith.constant 0 : i32
    %c0_i32_0 = arith.constant 0 : i32
    return %arg0, %c0_i32 : i32, i32
  }
  func.func @transform_1(%arg0: i32) -> (i32, i32) {
    %c0_i32 = arith.constant 0 : i32
    %c0_i32_0 = arith.constant 0 : i32
    %c0_i32_1 = arith.constant 0 : i32
    return %c0_i32, %c0_i32_0 : i32, i32
  }
  func.func @transform_2(%arg0: i32) -> (i32, i32) {
    %c0_i32 = arith.constant 0 : i32
    %c0_i32_0 = arith.constant 0 : i32
    %c0_i32_1 = arith.constant 0 : i32
    return %c0_i32, %c0_i32_0 : i32, i32
  }
  func.func @transform_3(%arg0: i32) -> (i32, i32) {
    %c0_i32 = arith.constant 0 : i32
    %c0_i32_0 = arith.constant 0 : i32
    return %arg0, %c0_i32 : i32, i32
  }
  func.func @transform_4(%arg0: i32) -> (i32, i32) {
    %c0_i32 = arith.constant 0 : i32
    %c0_i32_0 = arith.constant 0 : i32
    return %arg0, %c0_i32 : i32, i32
  }
}

module attributes {stable_mosaic.version = 11 : i64} {
  func.func @_mm_res_kernel(%arg0: i32, %arg1: memref<32x64xbf16, #tpu.memory_space<vmem>>, %arg2: memref<64x128xbf16, #tpu.memory_space<vmem>>, %arg3: memref<1x128xf32, #tpu.memory_space<vmem>>, %arg4: memref<32x128xbf16, #tpu.memory_space<vmem>>, %arg5: memref<32x128xbf16, #tpu.memory_space<vmem>>) attributes {dimension_semantics = [#tpu.dimension_semantics<parallel>], iteration_bounds = array<i64: 1>, scalar_prefetch = 0 : i64, scratch_operands = 0 : i64, tpu.core_type = #tpu.core_type<tc>, window_params = [{transform_indices = @transform_0, window_bounds = array<i64: 32, 64>}, {pipeline_mode = #tpu.pipeline_mode<synchronous>, transform_indices = @transform_1, window_bounds = array<i64: 64, 128>}, {pipeline_mode = #tpu.pipeline_mode<synchronous>, transform_indices = @transform_2, window_bounds = array<i64: 1, 128>}, {transform_indices = @transform_3, window_bounds = array<i64: 32, 128>}, {transform_indices = @transform_4, window_bounds = array<i64: 32, 128>}]} {
    %c0 = arith.constant 0 : index
    %c0_0 = arith.constant 0 : index
    %0 = vector.load %arg1[%c0, %c0_0] : memref<32x64xbf16, #tpu.memory_space<vmem>>, vector<32x64xbf16>
    %c0_1 = arith.constant 0 : index
    %c0_2 = arith.constant 0 : index
    %1 = vector.load %arg2[%c0_1, %c0_2] : memref<64x128xbf16, #tpu.memory_space<vmem>>, vector<64x128xbf16>
    %cst = arith.constant dense<0.000000e+00> : vector<32x128xf32>
    %2 = tpu.matmul %0, %1, %cst {dimension_numbers = #tpu.dot_dimension_numbers<[1], [0], [0], [1], [0, 0, 1, 1], [], []>} : vector<32x64xbf16>, vector<64x128xbf16>, vector<32x128xf32> -> vector<32x128xf32>
    %c0_3 = arith.constant 0 : index
    %c0_4 = arith.constant 0 : index
    %3 = vector.load %arg3[%c0_3, %c0_4] : memref<1x128xf32, #tpu.memory_space<vmem>>, vector<1x128xf32>
    %4 = vector.broadcast %3 : vector<1x128xf32> to vector<32x128xf32>
    %5 = arith.addf %2, %4 : vector<32x128xf32>
    %cst_5 = arith.constant 0.000000e+00 : f32
    %6 = vector.broadcast %cst_5 : f32 to vector<32x128xf32>
    %7 = arith.maximumf %5, %6 : vector<32x128xf32>
    %c0_6 = arith.constant 0 : index
    %c0_7 = arith.constant 0 : index
    %8 = vector.load %arg4[%c0_6, %c0_7] : memref<32x128xbf16, #tpu.memory_space<vmem>>, vector<32x128xbf16>
    %9 = arith.extf %8 : vector<32x128xbf16> to vector<32x128xf32>
    %10 = arith.addf %7, %9 : vector<32x128xf32>
    %11 = arith.truncf %10 : vector<32x128xf32> to vector<32x128xbf16>
    %c0_8 = arith.constant 0 : index
    %c0_9 = arith.constant 0 : index
    %12 = vector.load %arg5[%c0_8, %c0_9] : memref<32x128xbf16, #tpu.memory_space<vmem>>, vector<32x128xbf16>
    tpu.vector_store %arg5[%c0_8, %c0_9], %11 {strides = array<i32>} : memref<32x128xbf16, #tpu.memory_space<vmem>>, vector<32x128xbf16>,
    return
  }
  func.func @transform_0(%arg0: i32) -> (i32, i32) {
    %c0_i32 = arith.constant 0 : i32
    %c0_i32_0 = arith.constant 0 : i32
    return %arg0, %c0_i32 : i32, i32
  }
  func.func @transform_1(%arg0: i32) -> (i32, i32) {
    %c0_i32 = arith.constant 0 : i32
    %c0_i32_0 = arith.constant 0 : i32
    %c0_i32_1 = arith.constant 0 : i32
    return %c0_i32, %c0_i32_0 : i32, i32
  }
  func.func @transform_2(%arg0: i32) -> (i32, i32) {
    %c0_i32 = arith.constant 0 : i32
    %c0_i32_0 = arith.constant 0 : i32
    %c0_i32_1 = arith.constant 0 : i32
    return %c0_i32, %c0_i32_0 : i32, i32
  }
  func.func @transform_3(%arg0: i32) -> (i32, i32) {
    %c0_i32 = arith.constant 0 : i32
    %c0_i32_0 = arith.constant 0 : i32
    return %arg0, %c0_i32 : i32, i32
  }
  func.func @transform_4(%arg0: i32) -> (i32, i32) {
    %c0_i32 = arith.constant 0 : i32
    %c0_i32_0 = arith.constant 0 : i32
    return %arg0, %c0_i32 : i32, i32
  }
}

module attributes {stable_mosaic.version = 11 : i64} {
  func.func @_mm_res_kernel(%arg0: i32, %arg1: memref<128x32xbf16, #tpu.memory_space<vmem>>, %arg2: memref<32x64xbf16, #tpu.memory_space<vmem>>, %arg3: memref<1x64xf32, #tpu.memory_space<vmem>>, %arg4: memref<128x64xbf16, #tpu.memory_space<vmem>>, %arg5: memref<128x64xbf16, #tpu.memory_space<vmem>>) attributes {dimension_semantics = [#tpu.dimension_semantics<parallel>], iteration_bounds = array<i64: 1>, scalar_prefetch = 0 : i64, scratch_operands = 0 : i64, tpu.core_type = #tpu.core_type<tc>, window_params = [{transform_indices = @transform_0, window_bounds = array<i64: 128, 32>}, {pipeline_mode = #tpu.pipeline_mode<synchronous>, transform_indices = @transform_1, window_bounds = array<i64: 32, 64>}, {pipeline_mode = #tpu.pipeline_mode<synchronous>, transform_indices = @transform_2, window_bounds = array<i64: 1, 64>}, {transform_indices = @transform_3, window_bounds = array<i64: 128, 64>}, {transform_indices = @transform_4, window_bounds = array<i64: 128, 64>}]} {
    %c0 = arith.constant 0 : index
    %c0_0 = arith.constant 0 : index
    %0 = vector.load %arg1[%c0, %c0_0] : memref<128x32xbf16, #tpu.memory_space<vmem>>, vector<128x32xbf16>
    %c0_1 = arith.constant 0 : index
    %c0_2 = arith.constant 0 : index
    %1 = vector.load %arg2[%c0_1, %c0_2] : memref<32x64xbf16, #tpu.memory_space<vmem>>, vector<32x64xbf16>
    %cst = arith.constant dense<0.000000e+00> : vector<128x64xf32>
    %2 = tpu.matmul %0, %1, %cst {dimension_numbers = #tpu.dot_dimension_numbers<[1], [0], [0], [1], [0, 0, 1, 1], [], []>} : vector<128x32xbf16>, vector<32x64xbf16>, vector<128x64xf32> -> vector<128x64xf32>
    %c0_3 = arith.constant 0 : index
    %c0_4 = arith.constant 0 : index
    %3 = vector.load %arg3[%c0_3, %c0_4] : memref<1x64xf32, #tpu.memory_space<vmem>>, vector<1x64xf32>
    %4 = vector.broadcast %3 : vector<1x64xf32> to vector<128x64xf32>
    %5 = arith.addf %2, %4 : vector<128x64xf32>
    %cst_5 = arith.constant 0.000000e+00 : f32
    %6 = vector.broadcast %cst_5 : f32 to vector<128x64xf32>
    %7 = arith.maximumf %5, %6 : vector<128x64xf32>
    %c0_6 = arith.constant 0 : index
    %c0_7 = arith.constant 0 : index
    %8 = vector.load %arg4[%c0_6, %c0_7] : memref<128x64xbf16, #tpu.memory_space<vmem>>, vector<128x64xbf16>
    %9 = arith.extf %8 : vector<128x64xbf16> to vector<128x64xf32>
    %10 = arith.addf %7, %9 : vector<128x64xf32>
    %11 = arith.truncf %10 : vector<128x64xf32> to vector<128x64xbf16>
    %c0_8 = arith.constant 0 : index
    %c0_9 = arith.constant 0 : index
    %12 = vector.load %arg5[%c0_8, %c0_9] : memref<128x64xbf16, #tpu.memory_space<vmem>>, vector<128x64xbf16>
    tpu.vector_store %arg5[%c0_8, %c0_9], %11 {strides = array<i32>} : memref<128x64xbf16, #tpu.memory_space<vmem>>, vector<128x64xbf16>,
    return
  }
  func.func @transform_0(%arg0: i32) -> (i32, i32) {
    %c0_i32 = arith.constant 0 : i32
    %c0_i32_0 = arith.constant 0 : i32
    return %arg0, %c0_i32 : i32, i32
  }
  func.func @transform_1(%arg0: i32) -> (i32, i32) {
    %c0_i32 = arith.constant 0 : i32
    %c0_i32_0 = arith.constant 0 : i32
    %c0_i32_1 = arith.constant 0 : i32
    return %c0_i32, %c0_i32_0 : i32, i32
  }
  func.func @transform_2(%arg0: i32) -> (i32, i32) {
    %c0_i32 = arith.constant 0 : i32
    %c0_i32_0 = arith.constant 0 : i32
    %c0_i32_1 = arith.constant 0 : i32
    return %c0_i32, %c0_i32_0 : i32, i32
  }
  func.func @transform_3(%arg0: i32) -> (i32, i32) {
    %c0_i32 = arith.constant 0 : i32
    %c0_i32_0 = arith.constant 0 : i32
    return %arg0, %c0_i32 : i32, i32
  }
  func.func @transform_4(%arg0: i32) -> (i32, i32) {
    %c0_i32 = arith.constant 0 : i32
    %c0_i32_0 = arith.constant 0 : i32
    return %arg0, %c0_i32 : i32, i32
  }
}

module attributes {stable_mosaic.version = 11 : i64} {
  func.func @_mm_res_kernel(%arg0: i32, %arg1: memref<256x144xbf16, #tpu.memory_space<vmem>>, %arg2: memref<144x16xbf16, #tpu.memory_space<vmem>>, %arg3: memref<1x16xf32, #tpu.memory_space<vmem>>, %arg4: memref<256x16xbf16, #tpu.memory_space<vmem>>, %arg5: memref<256x16xbf16, #tpu.memory_space<vmem>>) attributes {dimension_semantics = [#tpu.dimension_semantics<parallel>], iteration_bounds = array<i64: 2>, scalar_prefetch = 0 : i64, scratch_operands = 0 : i64, tpu.core_type = #tpu.core_type<tc>, window_params = [{transform_indices = @transform_0, window_bounds = array<i64: 256, 144>}, {pipeline_mode = #tpu.pipeline_mode<synchronous>, transform_indices = @transform_1, window_bounds = array<i64: 144, 16>}, {pipeline_mode = #tpu.pipeline_mode<synchronous>, transform_indices = @transform_2, window_bounds = array<i64: 1, 16>}, {transform_indices = @transform_3, window_bounds = array<i64: 256, 16>}, {transform_indices = @transform_4, window_bounds = array<i64: 256, 16>}]} {
    %c0 = arith.constant 0 : index
    %c0_0 = arith.constant 0 : index
    %0 = vector.load %arg1[%c0, %c0_0] : memref<256x144xbf16, #tpu.memory_space<vmem>>, vector<256x144xbf16>
    %c0_1 = arith.constant 0 : index
    %c0_2 = arith.constant 0 : index
    %1 = vector.load %arg2[%c0_1, %c0_2] : memref<144x16xbf16, #tpu.memory_space<vmem>>, vector<144x16xbf16>
    %cst = arith.constant dense<0.000000e+00> : vector<256x16xf32>
    %2 = tpu.matmul %0, %1, %cst {dimension_numbers = #tpu.dot_dimension_numbers<[1], [0], [0], [1], [0, 0, 1, 1], [], []>} : vector<256x144xbf16>, vector<144x16xbf16>, vector<256x16xf32> -> vector<256x16xf32>
    %c0_3 = arith.constant 0 : index
    %c0_4 = arith.constant 0 : index
    %3 = vector.load %arg3[%c0_3, %c0_4] : memref<1x16xf32, #tpu.memory_space<vmem>>, vector<1x16xf32>
    %4 = vector.broadcast %3 : vector<1x16xf32> to vector<256x16xf32>
    %5 = arith.addf %2, %4 : vector<256x16xf32>
    %cst_5 = arith.constant 0.000000e+00 : f32
    %6 = vector.broadcast %cst_5 : f32 to vector<256x16xf32>
    %7 = arith.maximumf %5, %6 : vector<256x16xf32>
    %c0_6 = arith.constant 0 : index
    %c0_7 = arith.constant 0 : index
    %8 = vector.load %arg4[%c0_6, %c0_7] : memref<256x16xbf16, #tpu.memory_space<vmem>>, vector<256x16xbf16>
    %9 = arith.extf %8 : vector<256x16xbf16> to vector<256x16xf32>
    %10 = arith.addf %7, %9 : vector<256x16xf32>
    %11 = arith.truncf %10 : vector<256x16xf32> to vector<256x16xbf16>
    %c0_8 = arith.constant 0 : index
    %c0_9 = arith.constant 0 : index
    %12 = vector.load %arg5[%c0_8, %c0_9] : memref<256x16xbf16, #tpu.memory_space<vmem>>, vector<256x16xbf16>
    tpu.vector_store %arg5[%c0_8, %c0_9], %11 {strides = array<i32>} : memref<256x16xbf16, #tpu.memory_space<vmem>>, vector<256x16xbf16>,
    return
  }
  func.func @transform_0(%arg0: i32) -> (i32, i32) {
    %c0_i32 = arith.constant 0 : i32
    %c0_i32_0 = arith.constant 0 : i32
    return %arg0, %c0_i32 : i32, i32
  }
  func.func @transform_1(%arg0: i32) -> (i32, i32) {
    %c0_i32 = arith.constant 0 : i32
    %c0_i32_0 = arith.constant 0 : i32
    %c0_i32_1 = arith.constant 0 : i32
    return %c0_i32, %c0_i32_0 : i32, i32
  }
  func.func @transform_2(%arg0: i32) -> (i32, i32) {
    %c0_i32 = arith.constant 0 : i32
    %c0_i32_0 = arith.constant 0 : i32
    %c0_i32_1 = arith.constant 0 : i32
    return %c0_i32, %c0_i32_0 : i32, i32
  }
  func.func @transform_3(%arg0: i32) -> (i32, i32) {
    %c0_i32 = arith.constant 0 : i32
    %c0_i32_0 = arith.constant 0 : i32
    return %arg0, %c0_i32 : i32, i32
  }
  func.func @transform_4(%arg0: i32) -> (i32, i32) {
    %c0_i32 = arith.constant 0 : i32
    %c0_i32_0 = arith.constant 0 : i32
    return %arg0, %c0_i32 : i32, i32
  }
}

module attributes {stable_mosaic.version = 11 : i64} {
  func.func @_mm_kernel(%arg0: i32, %arg1: memref<256x16xbf16, #tpu.memory_space<vmem>>, %arg2: memref<16x2xbf16, #tpu.memory_space<vmem>>, %arg3: memref<1x2xf32, #tpu.memory_space<vmem>>, %arg4: memref<256x2xf32, #tpu.memory_space<vmem>>) attributes {dimension_semantics = [#tpu.dimension_semantics<parallel>], iteration_bounds = array<i64: 2>, scalar_prefetch = 0 : i64, scratch_operands = 0 : i64, tpu.core_type = #tpu.core_type<tc>, window_params = [{transform_indices = @transform_0, window_bounds = array<i64: 256, 16>}, {pipeline_mode = #tpu.pipeline_mode<synchronous>, transform_indices = @transform_1, window_bounds = array<i64: 16, 2>}, {pipeline_mode = #tpu.pipeline_mode<synchronous>, transform_indices = @transform_2, window_bounds = array<i64: 1, 2>}, {transform_indices = @transform_3, window_bounds = array<i64: 256, 2>}]} {
    %c0 = arith.constant 0 : index
    %c0_0 = arith.constant 0 : index
    %0 = vector.load %arg1[%c0, %c0_0] : memref<256x16xbf16, #tpu.memory_space<vmem>>, vector<256x16xbf16>
    %c0_1 = arith.constant 0 : index
    %c0_2 = arith.constant 0 : index
    %1 = vector.load %arg2[%c0_1, %c0_2] : memref<16x2xbf16, #tpu.memory_space<vmem>>, vector<16x2xbf16>
    %cst = arith.constant dense<0.000000e+00> : vector<256x2xf32>
    %2 = tpu.matmul %0, %1, %cst {dimension_numbers = #tpu.dot_dimension_numbers<[1], [0], [0], [1], [0, 0, 1, 1], [], []>} : vector<256x16xbf16>, vector<16x2xbf16>, vector<256x2xf32> -> vector<256x2xf32>
    %c0_3 = arith.constant 0 : index
    %c0_4 = arith.constant 0 : index
    %3 = vector.load %arg3[%c0_3, %c0_4] : memref<1x2xf32, #tpu.memory_space<vmem>>, vector<1x2xf32>
    %4 = vector.broadcast %3 : vector<1x2xf32> to vector<256x2xf32>
    %5 = arith.addf %2, %4 : vector<256x2xf32>
    %6 = arith.negf %5 : vector<256x2xf32>
    %7 = math.exp %6 : vector<256x2xf32>
    %cst_5 = arith.constant 1.000000e+00 : f32
    %8 = vector.broadcast %cst_5 : f32 to vector<256x2xf32>
    %9 = arith.addf %8, %7 : vector<256x2xf32>
    %10 = arith.divf %8, %9 : vector<256x2xf32>
    %c0_6 = arith.constant 0 : index
    %c0_7 = arith.constant 0 : index
    %11 = vector.load %arg4[%c0_6, %c0_7] : memref<256x2xf32, #tpu.memory_space<vmem>>, vector<256x2xf32>
    tpu.vector_store %arg4[%c0_6, %c0_7], %10 {strides = array<i32>} : memref<256x2xf32, #tpu.memory_space<vmem>>, vector<256x2xf32>,
    return
  }
  func.func @transform_0(%arg0: i32) -> (i32, i32) {
    %c0_i32 = arith.constant 0 : i32
    %c0_i32_0 = arith.constant 0 : i32
    return %arg0, %c0_i32 : i32, i32
  }
  func.func @transform_1(%arg0: i32) -> (i32, i32) {
    %c0_i32 = arith.constant 0 : i32
    %c0_i32_0 = arith.constant 0 : i32
    %c0_i32_1 = arith.constant 0 : i32
    return %c0_i32, %c0_i32_0 : i32, i32
  }
  func.func @transform_2(%arg0: i32) -> (i32, i32) {
    %c0_i32 = arith.constant 0 : i32
    %c0_i32_0 = arith.constant 0 : i32
    %c0_i32_1 = arith.constant 0 : i32
    return %c0_i32, %c0_i32_0 : i32, i32
  }
  func.func @transform_3(%arg0: i32) -> (i32, i32) {
    %c0_i32 = arith.constant 0 : i32
    %c0_i32_0 = arith.constant 0 : i32
    return %arg0, %c0_i32 : i32, i32
  }
}

</mosaic_0001>

<bundles_post_ra>
// kernel: unet_forward.31
= control target key start
LH: loop header
LB: loop body
LE: loop exit
PB: predicated region body
PF: predicated region fallthrough
CT: control target
= control target key end

     0   :  { %8 = vsyncpa [#allocation3], 0  ;;  %s1047_s12 = smov 0   ;;  %s1250_s0 = inlined_call_operand.vmem [shape: bf16[512,3], index: 0, kind: input, shape index: {}]   ;;  %s1251_s1 = inlined_call_operand.vmem [shape: bf16[3,16], index: 1, kind: input, shape index: {}]   ;;  %s1252_s2 = inlined_call_operand.hbm [shape: f32[1,16], index: 2, kind: input, shape index: {}]   ;;  %s1253_s3 = inlined_call_operand.vmem [shape: bf16[512,16], index: 3, kind: output, shape index: {}]  }
   0x1 LB: > { %s786_s13 = sadd.s32 4294967295, %s1023_s12   ;;  %p788_p0 = scmp.ge.s32.totalorder %s1023_s12, 1  ;;  %s1023_s12 = sphi %s1047_s12, %s14_s12  }
   0x2   : > { %p113_p1 = scmp.lt.s32.totalorder %s1023_s12, 3  ;;  %p1061_p3 = scmp.eq.s32.totalorder %s786_s13, 0 }
   0x3   : > { %s1025_s16 = smov [#allocation2]   ;;  %s985_s21 = scalar_lea.hbm %s1252_s2, 16 }
   0x4   : > { %p1055_p2 = pnand %p788_p0, %p113_p1  ;;  %s129_s17 = sshll.u32 %s1025_s16, 4  ;;  %s130_s17 = int_to_ptr.vmem [resolvable:$true] %s129_s17 }
   0x5   : > { %s1258_s15 = scalar_select %p1061_p3, 1, 0 }
   0x6   : > { %s1257_s14 = scalar_select %p1055_p2, 1, 0 }
   0x7   : > { %p953_p4 = pneg %p1055_p2  ;;  %p986_p6 = scmp.ne.s32.totalorder %s1252_s2, %s985_s21 }
   0x8   : > { %p992_p10 = scmp.lt.u32.totalorder %s985_s21, %s1252_s2 }
   0x9   : > { %p1069_p5 = pnand %p1061_p3, %p953_p4 }
   0xb   : > { %p987_p7 = pneg %p1069_p5 }
   0xd   : > { %p988_p8 = pnand %p987_p7, %p986_p6 }
   0xf   : > { %p989_p9 = pneg %p988_p8 }
  0x11   : > { %p994_p11 = pnand %p992_p10, %p989_p9 }
  0x13   : > { %997 = shalt.err (!%p994_p11)
}
  0x14   : > { %s998_s26 = scalar_lea.vmem %s130_s17, 16  ;;  %s1005_s27 = scalar_lea.vmem %s130_s17, 32 }
  0x15   : > { %p999_p12 = scmp.ne.s32.totalorder %s130_s17, %s998_s26  ;;  %p1006_p1 = scmp.lt.s32.totalorder %s130_s17, %s130_s17 }
  0x16   : > { %p1007_p4 = scmp.lt.s32.totalorder %s1005_s27, %s998_s26 }
  0x17   : > { %p1001_p13 = pnand %p999_p12, %p987_p7 }
  0x18   : > { %p1008_p3 = por %p1007_p4, %p1006_p1 }
  0x19   : > { %p1002_p0 = pneg %p1001_p13 }
  0x1b   : > { %p1009_p2 = pnand %p1008_p3, %p1002_p0 }
  0x1d   : > { %1012 = shalt.err (!%p1009_p2)
}
  0x1e   : > { %956 = dma.hbm_to_vmem [thread:$0]  (!%p1069_p5), %s1252_s2, 16, %s130_s17, [#allocation3]  }
  0x1f   : > { %p1260_p6 = scmp.ne.s32.totalorder %s1257_s14, 0 }
  0x20   : > { %p1261_p8 = scmp.ne.s32.totalorder (!%p1260_p6), %s1258_s15, 0 }
  0x21   : > { %151 = sbr.rel (%p1260_p6) target bundleno = 296 (0x128), region = 32 }
  0x28   : > { %1018 = dma.done.wait (%p1261_p8), [#allocation3], 16  }
  0x29   : > { %1020 = vsyncadd (%p1261_p8), [#allocation3], 4294967280  ;;  %vm357_vm0 = vcmask 1040384   ;;  %s793_s30 = sshll.u32 %s786_s13, 5  ;;  %vm358_vm1 = vcmask 1041408   ;;  %v1026_v0 = vmov 65535  }
  0x2a   : > { %p176_p2 = scmp.lt.s32.totalorder %s793_s30, 63  ;;  %v359_v1 = vsel %vm357_vm0, 4294967295, %v1026_v0  ;;  %v220_v3 = vld [vmem:[%s1251_s1] sm:$0x3]  ;;  %vm308_vm2 = vcmask 23552   ;;  %vm685_vm3 = vcmask 125952  }
  0x2b   : > { %v360_v2 = vsel %vm358_vm1, %v359_v1, 0  ;;  %v1142_v21 = vld [vmem:[#allocation2] ss:$0 sm:$0xff] }
  0x2c   : > { %s1263_s30 = smov (!%p176_p2, %s793_s30), 63  ;;  %v362_v4 = vand.u32 %v360_v2, %v220_v3 }
  0x2d   : > { %s794_s4 = sshll.u32 %s1263_s30, 2 }
  0x2e   : > { %s1105_s7 = scalar_lea.vmem %s1250_s0, %s794_s4  ;;  %913 = vmatprep.subr.bf16.mxu0 %v362_v4  ;;  %947 = vmatprep.subr.bf16.mxu1 %v362_v4  ;;  %s1155_s13 = scalar_lea.vmem %s1253_s3, %s794_s4 }
  0x2f   : > { %v969_v5 = vld [vmem:[%s1105_s7] sm:$0xff]   ;;  %v971_v7 = vld [vmem:[%s1105_s7 + $0x8] sm:$0xff]   ;;  %914 = vmatpush3.bf16.msra.mxu0 %v362_v4  ;;  %948 = vmatpush3.bf16.msra.mxu1 %v362_v4  ;;  %v973_v9 = vld [vmem:[%s1105_s7 + $0x10] sm:$0xff]  }
  0x30   : > { %v970_v6 = vld [vmem:[%s1105_s7 + $0x40] sm:$0xff]   ;;  %v972_v8 = vld [vmem:[%s1105_s7 + $0x48] sm:$0xff]   ;;  %915 = vmatprep.mubr.msk.bf16.mxu0 %vm308_vm2, %v969_v5  ;;  %v974_v10 = vld [vmem:[%s1105_s7 + $0x50] sm:$0xff]  }
  0x31   : > { %931 = vmatprep.mubr.msk.bf16.mxu1 %vm308_vm2, %v970_v6  ;;  %v975_v11 = vld [vmem:[%s1105_s7 + $0x18] sm:$0xff]   ;;  %v977_v13 = vld [vmem:[%s1105_s7 + $0x20] sm:$0xff]   ;;  %v979_v15 = vld [vmem:[%s1105_s7 + $0x28] sm:$0xff]  }
  0x32   : > { %916 = vmatmul.mubr.msk.bf16.vlgmr.msra.gmra.mrb[0].mxu0 %vm308_vm2, %v971_v7  ;;  %932 = vmatmul.mubr.msk.bf16.vlgmr.msra.gmra.mrb[0].mxu1 %vm308_vm2, %v972_v8  ;;  %v976_v12 = vld [vmem:[%s1105_s7 + $0x58] sm:$0xff]   ;;  %v978_v14 = vld [vmem:[%s1105_s7 + $0x60] sm:$0xff]   ;;  %v980_v16 = vld [vmem:[%s1105_s7 + $0x68] sm:$0xff]  }
  0x33   : > { %919 = vmatprep.mubr.msk.bf16.mxu0 %vm308_vm2, %v973_v9  ;;  %935 = vmatprep.mubr.msk.bf16.mxu1 %vm308_vm2, %v974_v10  ;;  %v981_v17 = vld [vmem:[%s1105_s7 + $0x30] sm:$0xff]   ;;  %v983_v19 = vld [vmem:[%s1105_s7 + $0x38] sm:$0xff]  }
  0x34   : > { %v982_v18 = vld [vmem:[%s1105_s7 + $0x70] sm:$0xff]   ;;  %v984_v20 = vld [vmem:[%s1105_s7 + $0x78] sm:$0xff]  }
  0x3a   : > { %920 = vmatmul.mubr.msk.bf16.gmra.mrb[4].mxu0 %vm308_vm2, %v975_v11  ;;  %936 = vmatmul.mubr.msk.bf16.gmra.mrb[4].mxu1 %vm308_vm2, %v976_v12 }
  0x3b   : > { %923 = vmatprep.mubr.msk.bf16.mxu0 %vm308_vm2, %v977_v13  ;;  %939 = vmatprep.mubr.msk.bf16.mxu1 %vm308_vm2, %v978_v14 }
  0x42   : > { %924 = vmatmul.mubr.msk.bf16.gmra.mrb[8].mxu0 %vm308_vm2, %v979_v15  ;;  %940 = vmatmul.mubr.msk.bf16.gmra.mrb[8].mxu1 %vm308_vm2, %v980_v16 }
  0x43   : > { %927 = vmatprep.mubr.msk.bf16.mxu0 %vm308_vm2, %v981_v17  ;;  %943 = vmatprep.mubr.msk.bf16.mxu1 %vm308_vm2, %v982_v18 }
  0x4a   : > { %928 = vmatmul.mubr.msk.bf16.gmra.mrb[12].mxu0 %vm308_vm2, %v983_v19  ;;  %944 = vmatmul.mubr.msk.bf16.gmra.mrb[12].mxu1 %vm308_vm2, %v984_v20 }
 0x105   : > { %v917_v22 = vpop.f32.mrb[0].mxu0  ;;  %v933_v23 = vpop.f32.mrb[0].mxu1 }
 0x106   : > { %v407_v24 = vadd.f32 %v917_v22, %v1142_v21  ;;  %v471_v25 = vadd.f32 %v933_v23, %v1142_v21  ;;  %v398_v26 = vpop.f32.mrb[1].mxu0  ;;  %v462_v27 = vpop.f32.mrb[1].mxu1 }
 0x107   : > { %v399_v28 = vadd.f32 %v1142_v21, %v398_v26  ;;  %v463_v29 = vadd.f32 %v1142_v21, %v462_v27  ;;  %v918_v30 = vpop.f32.mrb[2].mxu0  ;;  %v934_v31 = vpop.f32.mrb[2].mxu1 }
 0x108   : > { %v527_v32 = vmax.f32 %v407_v24, 0.0  ;;  %v543_v33 = vmax.f32 %v471_v25, 0.0  ;;  %v410_v34 = vadd.f32 %v918_v30, %v1142_v21  ;;  %v474_v35 = vadd.f32 %v934_v31, %v1142_v21  ;;  %v401_v36 = vpop.f32.mrb[3].mxu0  ;;  %v465_v37 = vpop.f32.mrb[3].mxu1 }
 0x109   : > { %v525_v38 = vmax.f32 %v399_v28, 0.0  ;;  %v541_v39 = vmax.f32 %v463_v29, 0.0  ;;  %v402_v40 = vadd.f32 %v1142_v21, %v401_v36  ;;  %v466_v41 = vadd.f32 %v1142_v21, %v465_v37 }
 0x10a   : > { %v866_v42 = vpack.c.bf16 %v527_v32, %v527_v32  ;;  %v882_v43 = vpack.c.bf16 %v543_v33, %v543_v33  ;;  %v528_v44 = vmax.f32 %v410_v34, 0.0  ;;  %v544_v45 = vmax.f32 %v474_v35, 0.0 }
 0x10b   : > { %v864_v46 = vpack.c.bf16 %v525_v38, %v525_v38  ;;  %v880_v47 = vpack.c.bf16 %v541_v39, %v541_v39  ;;  %v526_v48 = vmax.f32 %v402_v40, 0.0  ;;  %v542_v49 = vmax.f32 %v466_v41, 0.0 }
 0x10c   : > { %688 = vst.msk [vmem:[%s1155_s13 + $0x8] sm:$0xf] %vm685_vm3, %v866_v42  ;;  %704 = vst.msk [vmem:[%s1155_s13 + $0x48] sm:$0xf] %vm685_vm3, %v882_v43  ;;  %v867_v50 = vpack.c.bf16 %v528_v44, %v528_v44  ;;  %v883_v51 = vpack.c.bf16 %v544_v45, %v544_v45 }
 0x10d   : > { %686 = vst.msk [vmem:[%s1155_s13] sm:$0xf] %vm685_vm3, %v864_v46  ;;  %702 = vst.msk [vmem:[%s1155_s13 + $0x40] sm:$0xf] %vm685_vm3, %v880_v47  ;;  %v865_v52 = vpack.c.bf16 %v526_v48, %v526_v48  ;;  %v881_v53 = vpack.c.bf16 %v542_v49, %v542_v49  ;;  %v921_v54 = vpop.f32.mrb[4].mxu0  ;;  %v937_v55 = vpop.f32.mrb[4].mxu1 }
 0x10e   : > { %689 = vst.msk [vmem:[%s1155_s13 + $0xc] sm:$0xf] %vm685_vm3, %v867_v50  ;;  %705 = vst.msk [vmem:[%s1155_s13 + $0x4c] sm:$0xf] %vm685_vm3, %v883_v51  ;;  %v423_v56 = vadd.f32 %v921_v54, %v1142_v21  ;;  %v487_v57 = vadd.f32 %v937_v55, %v1142_v21  ;;  %v414_v58 = vpop.f32.mrb[5].mxu0  ;;  %v478_v59 = vpop.f32.mrb[5].mxu1 }
 0x10f   : > { %687 = vst.msk [vmem:[%s1155_s13 + $0x4] sm:$0xf] %vm685_vm3, %v865_v52  ;;  %703 = vst.msk [vmem:[%s1155_s13 + $0x44] sm:$0xf] %vm685_vm3, %v881_v53  ;;  %v415_v60 = vadd.f32 %v1142_v21, %v414_v58  ;;  %v479_v61 = vadd.f32 %v1142_v21, %v478_v59  ;;  %v922_v62 = vpop.f32.mrb[6].mxu0  ;;  %v938_v63 = vpop.f32.mrb[6].mxu1 }
 0x110   : > { %v531_v0 = vmax.f32 %v423_v56, 0.0  ;;  %v547_v1 = vmax.f32 %v487_v57, 0.0  ;;  %v426_v2 = vadd.f32 %v922_v62, %v1142_v21  ;;  %v490_v3 = vadd.f32 %v938_v63, %v1142_v21  ;;  %v417_v4 = vpop.f32.mrb[7].mxu0  ;;  %v481_v5 = vpop.f32.mrb[7].mxu1 }
 0x111   : > { %v529_v6 = vmax.f32 %v415_v60, 0.0  ;;  %v545_v7 = vmax.f32 %v479_v61, 0.0  ;;  %v418_v8 = vadd.f32 %v1142_v21, %v417_v4  ;;  %v482_v9 = vadd.f32 %v1142_v21, %v481_v5 }
 0x112   : > { %v870_v10 = vpack.c.bf16 %v531_v0, %v531_v0  ;;  %v886_v11 = vpack.c.bf16 %v547_v1, %v547_v1  ;;  %v532_v12 = vmax.f32 %v426_v2, 0.0  ;;  %v548_v13 = vmax.f32 %v490_v3, 0.0 }
 0x113   : > { %v868_v14 = vpack.c.bf16 %v529_v6, %v529_v6  ;;  %v884_v15 = vpack.c.bf16 %v545_v7, %v545_v7  ;;  %v530_v16 = vmax.f32 %v418_v8, 0.0  ;;  %v546_v17 = vmax.f32 %v482_v9, 0.0 }
 0x114   : > { %692 = vst.msk [vmem:[%s1155_s13 + $0x18] sm:$0xf] %vm685_vm3, %v870_v10  ;;  %708 = vst.msk [vmem:[%s1155_s13 + $0x58] sm:$0xf] %vm685_vm3, %v886_v11  ;;  %v871_v18 = vpack.c.bf16 %v532_v12, %v532_v12  ;;  %v887_v19 = vpack.c.bf16 %v548_v13, %v548_v13 }
 0x115   : > { %690 = vst.msk [vmem:[%s1155_s13 + $0x10] sm:$0xf] %vm685_vm3, %v868_v14  ;;  %706 = vst.msk [vmem:[%s1155_s13 + $0x50] sm:$0xf] %vm685_vm3, %v884_v15  ;;  %v869_v20 = vpack.c.bf16 %v530_v16, %v530_v16  ;;  %v885_v22 = vpack.c.bf16 %v546_v17, %v546_v17  ;;  %v925_v23 = vpop.f32.mrb[8].mxu0  ;;  %v941_v24 = vpop.f32.mrb[8].mxu1 }
 0x116   : > { %693 = vst.msk [vmem:[%s1155_s13 + $0x1c] sm:$0xf] %vm685_vm3, %v871_v18  ;;  %709 = vst.msk [vmem:[%s1155_s13 + $0x5c] sm:$0xf] %vm685_vm3, %v887_v19  ;;  %v439_v25 = vadd.f32 %v925_v23, %v1142_v21  ;;  %v503_v26 = vadd.f32 %v941_v24, %v1142_v21  ;;  %v430_v27 = vpop.f32.mrb[9].mxu0  ;;  %v494_v28 = vpop.f32.mrb[9].mxu1 }
 0x117   : > { %691 = vst.msk [vmem:[%s1155_s13 + $0x14] sm:$0xf] %vm685_vm3, %v869_v20  ;;  %707 = vst.msk [vmem:[%s1155_s13 + $0x54] sm:$0xf] %vm685_vm3, %v885_v22  ;;  %v431_v29 = vadd.f32 %v1142_v21, %v430_v27  ;;  %v495_v30 = vadd.f32 %v1142_v21, %v494_v28  ;;  %v926_v31 = vpop.f32.mrb[10].mxu0  ;;  %v942_v32 = vpop.f32.mrb[10].mxu1 }
 0x118   : > { %v535_v33 = vmax.f32 %v439_v25, 0.0  ;;  %v551_v34 = vmax.f32 %v503_v26, 0.0  ;;  %v442_v35 = vadd.f32 %v926_v31, %v1142_v21  ;;  %v506_v36 = vadd.f32 %v942_v32, %v1142_v21  ;;  %v433_v37 = vpop.f32.mrb[11].mxu0  ;;  %v497_v38 = vpop.f32.mrb[11].mxu1 }
 0x119   : > { %v533_v39 = vmax.f32 %v431_v29, 0.0  ;;  %v549_v40 = vmax.f32 %v495_v30, 0.0  ;;  %v434_v41 = vadd.f32 %v1142_v21, %v433_v37  ;;  %v498_v42 = vadd.f32 %v1142_v21, %v497_v38 }
 0x11a   : > { %v874_v43 = vpack.c.bf16 %v535_v33, %v535_v33  ;;  %v890_v44 = vpack.c.bf16 %v551_v34, %v551_v34  ;;  %v536_v45 = vmax.f32 %v442_v35, 0.0  ;;  %v552_v46 = vmax.f32 %v506_v36, 0.0 }
 0x11b   : > { %v872_v47 = vpack.c.bf16 %v533_v39, %v533_v39  ;;  %v888_v48 = vpack.c.bf16 %v549_v40, %v549_v40  ;;  %v534_v49 = vmax.f32 %v434_v41, 0.0  ;;  %v550_v50 = vmax.f32 %v498_v42, 0.0 }
 0x11c   : > { %696 = vst.msk [vmem:[%s1155_s13 + $0x28] sm:$0xf] %vm685_vm3, %v874_v43  ;;  %712 = vst.msk [vmem:[%s1155_s13 + $0x68] sm:$0xf] %vm685_vm3, %v890_v44  ;;  %v875_v51 = vpack.c.bf16 %v536_v45, %v536_v45  ;;  %v891_v52 = vpack.c.bf16 %v552_v46, %v552_v46 }
 0x11d   : > { %694 = vst.msk [vmem:[%s1155_s13 + $0x20] sm:$0xf] %vm685_vm3, %v872_v47  ;;  %710 = vst.msk [vmem:[%s1155_s13 + $0x60] sm:$0xf] %vm685_vm3, %v888_v48  ;;  %v873_v53 = vpack.c.bf16 %v534_v49, %v534_v49  ;;  %v889_v54 = vpack.c.bf16 %v550_v50, %v550_v50  ;;  %v929_v55 = vpop.f32.mrb[12].mxu0  ;;  %v945_v56 = vpop.f32.mrb[12].mxu1 }
 0x11e   : > { %697 = vst.msk [vmem:[%s1155_s13 + $0x2c] sm:$0xf] %vm685_vm3, %v875_v51  ;;  %713 = vst.msk [vmem:[%s1155_s13 + $0x6c] sm:$0xf] %vm685_vm3, %v891_v52  ;;  %v455_v57 = vadd.f32 %v929_v55, %v1142_v21  ;;  %v519_v58 = vadd.f32 %v945_v56, %v1142_v21  ;;  %v446_v59 = vpop.f32.mrb[13].mxu0  ;;  %v510_v60 = vpop.f32.mrb[13].mxu1 }
 0x11f   : > { %695 = vst.msk [vmem:[%s1155_s13 + $0x24] sm:$0xf] %vm685_vm3, %v873_v53  ;;  %711 = vst.msk [vmem:[%s1155_s13 + $0x64] sm:$0xf] %vm685_vm3, %v889_v54  ;;  %v447_v61 = vadd.f32 %v1142_v21, %v446_v59  ;;  %v511_v62 = vadd.f32 %v1142_v21, %v510_v60  ;;  %v930_v63 = vpop.f32.mrb[14].mxu0  ;;  %v946_v0 = vpop.f32.mrb[14].mxu1 }
 0x120   : > { %v539_v1 = vmax.f32 %v455_v57, 0.0  ;;  %v555_v2 = vmax.f32 %v519_v58, 0.0  ;;  %v458_v3 = vadd.f32 %v930_v63, %v1142_v21  ;;  %v522_v4 = vadd.f32 %v946_v0, %v1142_v21  ;;  %v449_v5 = vpop.f32.mrb[15].mxu0  ;;  %v513_v6 = vpop.f32.mrb[15].mxu1 }
 0x121   : > { %v537_v7 = vmax.f32 %v447_v61, 0.0  ;;  %v553_v8 = vmax.f32 %v511_v62, 0.0  ;;  %v450_v9 = vadd.f32 %v1142_v21, %v449_v5  ;;  %v514_v10 = vadd.f32 %v1142_v21, %v513_v6 }
 0x122   : > { %v878_v11 = vpack.c.bf16 %v539_v1, %v539_v1  ;;  %v894_v12 = vpack.c.bf16 %v555_v2, %v555_v2  ;;  %v540_v13 = vmax.f32 %v458_v3, 0.0  ;;  %v556_v14 = vmax.f32 %v522_v4, 0.0 }
 0x123   : > { %v876_v15 = vpack.c.bf16 %v537_v7, %v537_v7  ;;  %v892_v16 = vpack.c.bf16 %v553_v8, %v553_v8  ;;  %v538_v17 = vmax.f32 %v450_v9, 0.0  ;;  %v554_v18 = vmax.f32 %v514_v10, 0.0 }
 0x124   : > { %700 = vst.msk [vmem:[%s1155_s13 + $0x38] sm:$0xf] %vm685_vm3, %v878_v11  ;;  %716 = vst.msk [vmem:[%s1155_s13 + $0x78] sm:$0xf] %vm685_vm3, %v894_v12  ;;  %v879_v19 = vpack.c.bf16 %v540_v13, %v540_v13  ;;  %v895_v20 = vpack.c.bf16 %v556_v14, %v556_v14 }
 0x125   : > { %698 = vst.msk [vmem:[%s1155_s13 + $0x30] sm:$0xf] %vm685_vm3, %v876_v15  ;;  %714 = vst.msk [vmem:[%s1155_s13 + $0x70] sm:$0xf] %vm685_vm3, %v892_v16  ;;  %v877_v21 = vpack.c.bf16 %v538_v17, %v538_v17  ;;  %v893_v22 = vpack.c.bf16 %v554_v18, %v554_v18 }
 0x126   : > { %701 = vst.msk [vmem:[%s1155_s13 + $0x3c] sm:$0xf] %vm685_vm3, %v879_v19  ;;  %717 = vst.msk [vmem:[%s1155_s13 + $0x7c] sm:$0xf] %vm685_vm3, %v895_v20 }
 0x127   : > { %699 = vst.msk [vmem:[%s1155_s13 + $0x34] sm:$0xf] %vm685_vm3, %v877_v21  ;;  %715 = vst.msk [vmem:[%s1155_s13 + $0x74] sm:$0xf] %vm685_vm3, %v893_v22 }
 0x128 PF: > { %s14_s12 = sadd.s32 1, %s1023_s12  }
 0x129   : > { %p11_p3 = scmp.ge.s32.totalorder %s14_s12, 4  }
 0x12b   :  { %13 = sbr.rel (!%p11_p3) target bundleno = 1 (0x1), region = 67 }
 0x132   :  { %740 = vsyncpa [#allocation3], 1 }
 0x133   :  { %742 = vsyncpa [#allocation3 + $0x1], 1 }

// kernel: unet_forward.32
= control target key start
LH: loop header
LB: loop body
LE: loop exit
PB: predicated region body
PF: predicated region fallthrough
CT: control target
= control target key end

     0   :  { %9 = vsyncpa [#allocation3], 0  ;;  %s1313_s15 = smov 0   ;;  %s1662_s0 = inlined_call_operand.vmem [shape: bf16[512,27], index: 0, kind: input, shape index: {}]   ;;  %s1663_s1 = inlined_call_operand.vmem [shape: bf16[27,16], index: 1, kind: input, shape index: {}]   ;;  %s1664_s2 = inlined_call_operand.hbm [shape: f32[1,16], index: 2, kind: input, shape index: {}]   ;;  %s1665_s3 = inlined_call_operand.vmem [shape: bf16[512,16], index: 3, kind: input, shape index: {}]   ;;  %s1666_s4 = inlined_call_operand.vmem [shape: bf16[512,16], index: 4, kind: output, shape index: {}]  }
   0x1 LB: > { %s957_s16 = sadd.s32 4294967295, %s1284_s15   ;;  %p959_p0 = scmp.ge.s32.totalorder %s1284_s15, 1  ;;  %s1284_s15 = sphi %s1313_s15, %s15_s15  }
   0x2   : > { %p140_p1 = scmp.lt.s32.totalorder %s1284_s15, 3  ;;  %p1327_p3 = scmp.eq.s32.totalorder %s957_s16, 0 }
   0x3   : > { %s1286_s19 = smov [#allocation2]   ;;  %s1246_s24 = scalar_lea.hbm %s1664_s2, 16 }
   0x4   : > { %p1321_p2 = pnand %p959_p0, %p140_p1  ;;  %s156_s20 = sshll.u32 %s1286_s19, 4  ;;  %s157_s20 = int_to_ptr.vmem [resolvable:$true] %s156_s20 }
   0x5   : > { %s1671_s18 = scalar_select %p1327_p3, 1, 0 }
   0x6   : > { %s1670_s17 = scalar_select %p1321_p2, 1, 0 }
   0x7   : > { %p1212_p4 = pneg %p1321_p2  ;;  %p1247_p6 = scmp.ne.s32.totalorder %s1664_s2, %s1246_s24 }
   0x8   : > { %p1253_p10 = scmp.lt.u32.totalorder %s1246_s24, %s1664_s2 }
   0x9   : > { %p1335_p5 = pnand %p1327_p3, %p1212_p4 }
   0xb   : > { %p1248_p7 = pneg %p1335_p5 }
   0xd   : > { %p1249_p8 = pnand %p1248_p7, %p1247_p6 }
   0xf   : > { %p1250_p9 = pneg %p1249_p8 }
  0x11   : > { %p1255_p11 = pnand %p1253_p10, %p1250_p9 }
  0x13   : > { %1258 = shalt.err (!%p1255_p11)
}
  0x14   : > { %s1259_s29 = scalar_lea.vmem %s157_s20, 16  ;;  %s1266_s30 = scalar_lea.vmem %s157_s20, 32 }
  0x15   : > { %p1260_p12 = scmp.ne.s32.totalorder %s157_s20, %s1259_s29  ;;  %p1267_p1 = scmp.lt.s32.totalorder %s157_s20, %s157_s20 }
  0x16   : > { %p1268_p4 = scmp.lt.s32.totalorder %s1266_s30, %s1259_s29 }
  0x17   : > { %p1262_p13 = pnand %p1260_p12, %p1248_p7 }
  0x18   : > { %p1269_p3 = por %p1268_p4, %p1267_p1 }
  0x19   : > { %p1263_p0 = pneg %p1262_p13 }
  0x1b   : > { %p1270_p2 = pnand %p1269_p3, %p1263_p0 }
  0x1d   : > { %1273 = shalt.err (!%p1270_p2)
}
  0x1e   : > { %1215 = dma.hbm_to_vmem [thread:$0]  (!%p1335_p5), %s1664_s2, 16, %s157_s20, [#allocation3]  }
  0x1f   : > { %p1673_p6 = scmp.ne.s32.totalorder %s1670_s17, 0 }
  0x20   : > { %p1674_p8 = scmp.ne.s32.totalorder (!%p1673_p6), %s1671_s18, 0 }
  0x21   : > { %187 = sbr.rel (%p1673_p6) target bundleno = 303 (0x12f), region = 36 }
  0x28   : > { %1279 = dma.done.wait (%p1674_p8), [#allocation3], 16  }
  0x29   : > { %1281 = vsyncadd (%p1674_p8), [#allocation3], 4294967280  ;;  %s964_s7 = sshll.u32 %s957_s16, 5  ;;  %vm420_vm0 = vcmask 1044480   ;;  %vm421_vm1 = vcmask 1045504   ;;  %v1287_v0 = vmov 65535  }
  0x2a   : > { %p219_p2 = scmp.lt.s32.totalorder %s964_s7, 63  ;;  %v422_v1 = vsel %vm420_vm0, 4294967295, %v1287_v0  ;;  %vm371_vm2 = vcmask 220160   ;;  %v1228_v2 = vld [vmem:[%s1663_s1] sm:$0xff]   ;;  %v1229_v4 = vld [vmem:[%s1663_s1 + $0x8] sm:$0x3f]  }
  0x2b   : > { %v423_v3 = vsel %vm421_vm1, %v422_v1, 0  ;;  %1168 = vmatprep.subr.bf16.mxu0 %v1228_v2  ;;  %1204 = vmatprep.subr.bf16.mxu1 %v1228_v2  ;;  %v1479_v54 = vld [vmem:[#allocation2] ss:$0 sm:$0xff]  ;;  %vm844_vm3 = vcmask 125952  }
  0x2c   : > { %s1681_s7 = smov (!%p219_p2, %s964_s7), 63  ;;  %1169 = vmatpush3.bf16.msra.mxu0 %v1228_v2  ;;  %1206 = vmatpush3.bf16.msra.mxu1 %v1228_v2  ;;  %v425_v6 = vand.u32 %v1229_v4, %v423_v3 }
  0x2d   : > { %s1363_s8 = sshll.u32 %s1681_s7, 2 }
  0x2e   : > { %s1369_s11 = scalar_lea.vmem %s1662_s0, %s1363_s8  ;;  %1170 = vmatprep.subr.bf16.mxu0 %v425_v6  ;;  %1205 = vmatprep.subr.bf16.mxu1 %v425_v6  ;;  %s1413_s19 = scalar_lea.vmem %s1665_s3, %s1363_s8 }
  0x2f   : > { %v1230_v5 = vld [vmem:[%s1369_s11] sm:$0xff]   ;;  %v1232_v8 = vld [vmem:[%s1369_s11 + $0x8] sm:$0xff]   ;;  %v1234_v10 = vld [vmem:[%s1369_s11 + $0x10] sm:$0xff]   ;;  %s1509_s22 = scalar_lea.vmem %s1666_s4, %s1363_s8 }
  0x30   : > { %v1231_v7 = vld [vmem:[%s1369_s11 + $0x40] sm:$0xff]   ;;  %1172 = vmatprep.mubr.msk.bf16.mxu0 %vm371_vm2, %v1230_v5  ;;  %v1233_v9 = vld [vmem:[%s1369_s11 + $0x48] sm:$0xff]   ;;  %1171 = vmatpush3.bf16.msra.mxu0 %v425_v6  ;;  %v1235_v11 = vld [vmem:[%s1369_s11 + $0x50] sm:$0xff]  }
  0x31   : > { %1188 = vmatprep.mubr.msk.bf16.mxu1 %vm371_vm2, %v1231_v7  ;;  %1207 = vmatpush3.bf16.msra.mxu1 %v425_v6  ;;  %v1236_v12 = vld [vmem:[%s1369_s11 + $0x18] sm:$0xff]   ;;  %v1238_v14 = vld [vmem:[%s1369_s11 + $0x20] sm:$0xff]   ;;  %v1240_v16 = vld [vmem:[%s1369_s11 + $0x28] sm:$0xff]  }
  0x32   : > { %v1237_v13 = vld [vmem:[%s1369_s11 + $0x58] sm:$0xff]   ;;  %v1239_v15 = vld [vmem:[%s1369_s11 + $0x60] sm:$0xff]   ;;  %v1241_v17 = vld [vmem:[%s1369_s11 + $0x68] sm:$0xff]  }
  0x33   : > { %1173 = vmatmul.mubr.msk.bf16.vlgmr.msra.gmra.mrb[0].mxu0 %vm371_vm2, %v1232_v8  ;;  %v1242_v18 = vld [vmem:[%s1369_s11 + $0x30] sm:$0xff]   ;;  %v1244_v20 = vld [vmem:[%s1369_s11 + $0x38] sm:$0xff]   ;;  %v1416_v22 = vld [vmem:[%s1413_s19 + $0x8] sm:$0xff]  }
  0x34   : > { %1189 = vmatmul.mubr.msk.bf16.vlgmr.msra.gmra.mrb[0].mxu1 %vm371_vm2, %v1233_v9  ;;  %1176 = vmatprep.mubr.msk.bf16.mxu0 %vm371_vm2, %v1234_v10  ;;  %v1243_v19 = vld [vmem:[%s1369_s11 + $0x70] sm:$0xff]   ;;  %v1245_v21 = vld [vmem:[%s1369_s11 + $0x78] sm:$0xff]   ;;  %v1419_v23 = vld [vmem:[%s1413_s19 + $0x48] sm:$0xff]   ;;  %v1077_v30 = vunpack.c.l.bf16 %v1416_v22  ;;  %v1078_v35 = vunpack.c.h.bf16 %v1416_v22 }
  0x35   : > { %1192 = vmatprep.mubr.msk.bf16.mxu1 %vm371_vm2, %v1235_v11  ;;  %v1422_v24 = vld [vmem:[%s1413_s19] sm:$0xff]   ;;  %v1428_v26 = vld [vmem:[%s1413_s19 + $0x18] sm:$0xff]   ;;  %v1434_v28 = vld [vmem:[%s1413_s19 + $0x10] sm:$0xff]   ;;  %v1109_v31 = vunpack.c.l.bf16 %v1419_v23  ;;  %v1110_v36 = vunpack.c.h.bf16 %v1419_v23 }
  0x36   : > { %v1425_v25 = vld [vmem:[%s1413_s19 + $0x40] sm:$0xff]   ;;  %v1431_v27 = vld [vmem:[%s1413_s19 + $0x58] sm:$0xff]   ;;  %v1437_v29 = vld [vmem:[%s1413_s19 + $0x50] sm:$0xff]   ;;  %v1073_v32 = vunpack.c.l.bf16 %v1422_v24  ;;  %v1074_v37 = vunpack.c.h.bf16 %v1422_v24  ;;  %v1085_v42 = vunpack.c.l.bf16 %v1428_v26  ;;  %v1081_v44 = vunpack.c.l.bf16 %v1434_v28 }
  0x37   : > { %v1105_v33 = vunpack.c.l.bf16 %v1425_v25  ;;  %v1444_v34 = vld [vmem:[%s1413_s19 + $0x28] sm:$0xff]   ;;  %v1106_v38 = vunpack.c.h.bf16 %v1425_v25  ;;  %v1454_v40 = vld [vmem:[%s1413_s19 + $0x20] sm:$0xff]   ;;  %v1117_v43 = vunpack.c.l.bf16 %v1431_v27  ;;  %v1113_v45 = vunpack.c.l.bf16 %v1437_v29  ;;  %v1464_v46 = vld [vmem:[%s1413_s19 + $0x38] sm:$0xff]  }
  0x38   : > { %v1451_v39 = vld [vmem:[%s1413_s19 + $0x68] sm:$0xff]   ;;  %v1457_v41 = vld [vmem:[%s1413_s19 + $0x60] sm:$0xff]   ;;  %v1086_v47 = vunpack.c.h.bf16 %v1428_v26  ;;  %v1118_v48 = vunpack.c.h.bf16 %v1431_v27  ;;  %v1082_v49 = vunpack.c.h.bf16 %v1434_v28  ;;  %v1114_v50 = vunpack.c.h.bf16 %v1437_v29  ;;  %v1471_v51 = vld [vmem:[%s1413_s19 + $0x78] sm:$0xff]  }
  0x39   : > { %v1474_v52 = vld [vmem:[%s1413_s19 + $0x30] sm:$0xff]   ;;  %v1093_v55 = vunpack.c.l.bf16 %v1444_v34  ;;  %v1125_v56 = vunpack.c.l.bf16 %v1451_v39  ;;  %v1089_v57 = vunpack.c.l.bf16 %v1454_v40  ;;  %v1121_v58 = vunpack.c.l.bf16 %v1457_v41 }
  0x3a   : > { %v1477_v53 = vld [vmem:[%s1413_s19 + $0x70] sm:$0xff]   ;;  %v1094_v59 = vunpack.c.h.bf16 %v1444_v34  ;;  %v1126_v60 = vunpack.c.h.bf16 %v1451_v39  ;;  %v1090_v61 = vunpack.c.h.bf16 %v1454_v40  ;;  %v1122_v62 = vunpack.c.h.bf16 %v1457_v41 }
  0x3b   : > { %1177 = vmatmul.mubr.msk.bf16.gmra.mrb[4].mxu0 %vm371_vm2, %v1236_v12  ;;  %v1101_v1 = vunpack.c.l.bf16 %v1464_v46  ;;  %v1133_v2 = vunpack.c.l.bf16 %v1471_v51 }
  0x3c   : > { %1193 = vmatmul.mubr.msk.bf16.gmra.mrb[4].mxu1 %vm371_vm2, %v1237_v13  ;;  %1180 = vmatprep.mubr.msk.bf16.mxu0 %vm371_vm2, %v1238_v14 }
  0x3d   : > { %1196 = vmatprep.mubr.msk.bf16.mxu1 %vm371_vm2, %v1239_v15 }
  0x43   : > { %1181 = vmatmul.mubr.msk.bf16.gmra.mrb[8].mxu0 %vm371_vm2, %v1240_v16  ;;  %v1130_v16 = vunpack.c.h.bf16 %v1477_v53 }
  0x44   : > { %1197 = vmatmul.mubr.msk.bf16.gmra.mrb[8].mxu1 %vm371_vm2, %v1241_v17  ;;  %1184 = vmatprep.mubr.msk.bf16.mxu0 %vm371_vm2, %v1242_v18 }
  0x45   : > { %1200 = vmatprep.mubr.msk.bf16.mxu1 %vm371_vm2, %v1243_v19 }
  0x4b   : > { %1185 = vmatmul.mubr.msk.bf16.gmra.mrb[12].mxu0 %vm371_vm2, %v1244_v20 }
  0x4c   : > { %1201 = vmatmul.mubr.msk.bf16.gmra.mrb[12].mxu1 %vm371_vm2, %v1245_v21 }
 0x106   : > { %v1174_v63 = vpop.f32.mrb[0].mxu0 }
 0x107   : > { %v1190_v0 = vpop.f32.mrb[0].mxu1  ;;  %v470_v5 = vadd.f32 %v1174_v63, %v1479_v54  ;;  %v461_v7 = vpop.f32.mrb[1].mxu0 }
 0x108   : > { %v534_v6 = vadd.f32 %v1190_v0, %v1479_v54  ;;  %v525_v8 = vpop.f32.mrb[1].mxu1  ;;  %v462_v11 = vadd.f32 %v1479_v54, %v461_v7  ;;  %v1175_v13 = vpop.f32.mrb[2].mxu0 }
 0x109   : > { %v526_v12 = vadd.f32 %v1479_v54, %v525_v8  ;;  %v1191_v14 = vpop.f32.mrb[2].mxu1  ;;  %v590_v17 = vmax.f32 %v470_v5, 0.0  ;;  %v473_v19 = vadd.f32 %v1175_v13, %v1479_v54  ;;  %v464_v21 = vpop.f32.mrb[3].mxu0 }
 0x10a   : > { %v606_v18 = vmax.f32 %v534_v6, 0.0  ;;  %v537_v20 = vadd.f32 %v1191_v14, %v1479_v54  ;;  %v528_v63 = vpop.f32.mrb[3].mxu1  ;;  %v588_v0 = vmax.f32 %v462_v11, 0.0  ;;  %v465_v7 = vadd.f32 %v1479_v54, %v464_v21 }
 0x10b   : > { %v604_v10 = vmax.f32 %v526_v12, 0.0  ;;  %v529_v8 = vadd.f32 %v1479_v54, %v528_v63  ;;  %v686_v9 = vadd.f32 %v1077_v30, %v590_v17  ;;  %v591_v15 = vmax.f32 %v473_v19, 0.0 }
 0x10c   : > { %v702_v4 = vadd.f32 %v1109_v31, %v606_v18  ;;  %v607_v3 = vmax.f32 %v537_v20, 0.0  ;;  %v684_v5 = vadd.f32 %v1073_v32, %v588_v0  ;;  %v589_v11 = vmax.f32 %v465_v7, 0.0 }
 0x10d   : > { %v700_v6 = vadd.f32 %v1105_v33, %v604_v10  ;;  %v605_v12 = vmax.f32 %v529_v8, 0.0  ;;  %v1041_v13 = vpack.c.bf16 %v686_v9, %v686_v9  ;;  %v687_v31 = vadd.f32 %v1078_v35, %v591_v15 }
 0x10e   : > { %v1057_v30 = vpack.c.bf16 %v702_v4, %v702_v4  ;;  %v703_v14 = vadd.f32 %v1110_v36, %v607_v3  ;;  %v1039_v17 = vpack.c.bf16 %v684_v5, %v684_v5  ;;  %v685_v32 = vadd.f32 %v1074_v37, %v589_v11  ;;  %v1178_v10 = vpop.f32.mrb[4].mxu0 }
 0x10f   : > { %v1055_v18 = vpack.c.bf16 %v700_v6, %v700_v6  ;;  %v701_v33 = vadd.f32 %v1106_v38, %v605_v12  ;;  %v1194_v19 = vpop.f32.mrb[4].mxu1  ;;  %847 = vst.msk [vmem:[%s1509_s22 + $0x8] sm:$0xf] %vm844_vm3, %v1041_v13  ;;  %v1042_v22 = vpack.c.bf16 %v687_v31, %v687_v31  ;;  %v486_v35 = vadd.f32 %v1178_v10, %v1479_v54  ;;  %v477_v3 = vpop.f32.mrb[5].mxu0 }
 0x110   : > { %863 = vst.msk [vmem:[%s1509_s22 + $0x48] sm:$0xf] %vm844_vm3, %v1057_v30  ;;  %v1058_v23 = vpack.c.bf16 %v703_v14, %v703_v14  ;;  %v550_v36 = vadd.f32 %v1194_v19, %v1479_v54  ;;  %v541_v24 = vpop.f32.mrb[5].mxu1  ;;  %845 = vst.msk [vmem:[%s1509_s22] sm:$0xf] %vm844_vm3, %v1039_v17  ;;  %v1040_v25 = vpack.c.bf16 %v685_v32, %v685_v32  ;;  %v1179_v9 = vpop.f32.mrb[6].mxu0 }
 0x111   : > { %861 = vst.msk [vmem:[%s1509_s22 + $0x40] sm:$0xf] %vm844_vm3, %v1055_v18  ;;  %v1056_v37 = vpack.c.bf16 %v701_v33, %v701_v33  ;;  %v478_v38 = vadd.f32 %v1479_v54, %v477_v3  ;;  %v542_v4 = vadd.f32 %v1479_v54, %v541_v24  ;;  %v1195_v15 = vpop.f32.mrb[6].mxu1  ;;  %848 = vst.msk [vmem:[%s1509_s22 + $0xc] sm:$0xf] %vm844_vm3, %v1042_v22  ;;  %v594_v20 = vmax.f32 %v486_v35, 0.0 }
 0x112   : > { %864 = vst.msk [vmem:[%s1509_s22 + $0x4c] sm:$0xf] %vm844_vm3, %v1058_v23  ;;  %v610_v21 = vmax.f32 %v550_v36, 0.0  ;;  %v489_v63 = vadd.f32 %v1179_v9, %v1479_v54  ;;  %v553_v0 = vadd.f32 %v1195_v15, %v1479_v54  ;;  %v480_v7 = vpop.f32.mrb[7].mxu0  ;;  %v544_v8 = vpop.f32.mrb[7].mxu1 }
 0x113   : > { %846 = vst.msk [vmem:[%s1509_s22 + $0x4] sm:$0xf] %vm844_vm3, %v1040_v25  ;;  %862 = vst.msk [vmem:[%s1509_s22 + $0x44] sm:$0xf] %vm844_vm3, %v1056_v37  ;;  %v592_v5 = vmax.f32 %v478_v38, 0.0  ;;  %v608_v6 = vmax.f32 %v542_v4, 0.0  ;;  %v481_v11 = vadd.f32 %v1479_v54, %v480_v7  ;;  %v545_v12 = vadd.f32 %v1479_v54, %v544_v8 }
 0x114   : > { %v690_v13 = vadd.f32 %v1085_v42, %v594_v20  ;;  %v706_v30 = vadd.f32 %v1117_v43, %v610_v21  ;;  %v595_v31 = vmax.f32 %v489_v63, 0.0  ;;  %v611_v14 = vmax.f32 %v553_v0, 0.0 }
 0x115   : > { %v688_v17 = vadd.f32 %v1081_v44, %v592_v5  ;;  %v704_v18 = vadd.f32 %v1113_v45, %v608_v6  ;;  %v593_v32 = vmax.f32 %v481_v11, 0.0  ;;  %v609_v33 = vmax.f32 %v545_v12, 0.0 }
 0x116   : > { %v1045_v10 = vpack.c.bf16 %v690_v13, %v690_v13  ;;  %v1061_v19 = vpack.c.bf16 %v706_v30, %v706_v30  ;;  %v691_v42 = vadd.f32 %v1086_v47, %v595_v31  ;;  %v707_v43 = vadd.f32 %v1118_v48, %v611_v14  ;;  %v1182_v35 = vpop.f32.mrb[8].mxu0 }
 0x117   : > { %v1043_v22 = vpack.c.bf16 %v688_v17, %v688_v17  ;;  %v1059_v23 = vpack.c.bf16 %v704_v18, %v704_v18  ;;  %v689_v44 = vadd.f32 %v1082_v49, %v593_v32  ;;  %v705_v45 = vadd.f32 %v1114_v50, %v609_v33  ;;  %v1198_v36 = vpop.f32.mrb[8].mxu1  ;;  %v493_v3 = vpop.f32.mrb[9].mxu0 }
 0x118   : > { %851 = vst.msk [vmem:[%s1509_s22 + $0x18] sm:$0xf] %vm844_vm3, %v1045_v10  ;;  %867 = vst.msk [vmem:[%s1509_s22 + $0x58] sm:$0xf] %vm844_vm3, %v1061_v19  ;;  %v1046_v26 = vpack.c.bf16 %v691_v42, %v691_v42  ;;  %v1062_v27 = vpack.c.bf16 %v707_v43, %v707_v43  ;;  %v502_v47 = vadd.f32 %v1182_v35, %v1479_v54  ;;  %v557_v28 = vpop.f32.mrb[9].mxu1  ;;  %v1183_v25 = vpop.f32.mrb[10].mxu0 }
 0x119   : > { %v566_v48 = vadd.f32 %v1198_v36, %v1479_v54  ;;  %849 = vst.msk [vmem:[%s1509_s22 + $0x10] sm:$0xf] %vm844_vm3, %v1043_v22  ;;  %865 = vst.msk [vmem:[%s1509_s22 + $0x50] sm:$0xf] %vm844_vm3, %v1059_v23  ;;  %v1044_v29 = vpack.c.bf16 %v689_v44, %v689_v44  ;;  %v1060_v49 = vpack.c.bf16 %v705_v45, %v705_v45  ;;  %v1199_v37 = vpop.f32.mrb[10].mxu1  ;;  %v496_v20 = vpop.f32.mrb[11].mxu0 }
 0x11a   : > { %v494_v50 = vadd.f32 %v1479_v54, %v493_v3  ;;  %v558_v24 = vadd.f32 %v1479_v54, %v557_v28  ;;  %852 = vst.msk [vmem:[%s1509_s22 + $0x1c] sm:$0xf] %vm844_vm3, %v1046_v26  ;;  %868 = vst.msk [vmem:[%s1509_s22 + $0x5c] sm:$0xf] %vm844_vm3, %v1062_v27  ;;  %v598_v38 = vmax.f32 %v502_v47, 0.0  ;;  %v505_v9 = vadd.f32 %v1183_v25, %v1479_v54  ;;  %v560_v21 = vpop.f32.mrb[11].mxu1 }
 0x11b   : > { %v614_v4 = vmax.f32 %v566_v48, 0.0  ;;  %v569_v15 = vadd.f32 %v1199_v37, %v1479_v54  ;;  %850 = vst.msk [vmem:[%s1509_s22 + $0x14] sm:$0xf] %vm844_vm3, %v1044_v29  ;;  %866 = vst.msk [vmem:[%s1509_s22 + $0x54] sm:$0xf] %vm844_vm3, %v1060_v49  ;;  %v497_v7 = vadd.f32 %v1479_v54, %v496_v20  ;;  %v561_v8 = vadd.f32 %v1479_v54, %v560_v21 }
 0x11c   : > { %v596_v63 = vmax.f32 %v494_v50, 0.0  ;;  %v612_v0 = vmax.f32 %v558_v24, 0.0  ;;  %v694_v5 = vadd.f32 %v1093_v55, %v598_v38  ;;  %v599_v11 = vmax.f32 %v505_v9, 0.0 }
 0x11d   : > { %v710_v6 = vadd.f32 %v1125_v56, %v614_v4  ;;  %v615_v12 = vmax.f32 %v569_v15, 0.0  ;;  %v597_v31 = vmax.f32 %v497_v7, 0.0  ;;  %v613_v14 = vmax.f32 %v561_v8, 0.0 }
 0x11e   : > { %v692_v13 = vadd.f32 %v1089_v57, %v596_v63  ;;  %v708_v30 = vadd.f32 %v1121_v58, %v612_v0  ;;  %v1049_v17 = vpack.c.bf16 %v694_v5, %v694_v5  ;;  %v695_v55 = vadd.f32 %v1094_v59, %v599_v11  ;;  %v1186_v10 = vpop.f32.mrb[12].mxu0 }
 0x11f   : > { %v1065_v18 = vpack.c.bf16 %v710_v6, %v710_v6  ;;  %v711_v56 = vadd.f32 %v1126_v60, %v615_v12  ;;  %v693_v57 = vadd.f32 %v1090_v61, %v597_v31  ;;  %v709_v58 = vadd.f32 %v1122_v62, %v613_v14  ;;  %v1202_v19 = vpop.f32.mrb[12].mxu1  ;;  %v509_v42 = vpop.f32.mrb[13].mxu0 }
 0x120   : > { %v1047_v32 = vpack.c.bf16 %v692_v13, %v692_v13  ;;  %v1063_v33 = vpack.c.bf16 %v708_v30, %v708_v30  ;;  %855 = vst.msk [vmem:[%s1509_s22 + $0x28] sm:$0xf] %vm844_vm3, %v1049_v17  ;;  %v1050_v34 = vpack.c.bf16 %v695_v55, %v695_v55  ;;  %v518_v59 = vadd.f32 %v1186_v10, %v1479_v54  ;;  %v573_v40 = vpop.f32.mrb[13].mxu1  ;;  %v1187_v22 = vpop.f32.mrb[14].mxu0 }
 0x121   : > { %871 = vst.msk [vmem:[%s1509_s22 + $0x68] sm:$0xf] %vm844_vm3, %v1065_v18  ;;  %v1066_v39 = vpack.c.bf16 %v711_v56, %v711_v56  ;;  %v582_v60 = vadd.f32 %v1202_v19, %v1479_v54  ;;  %v1048_v41 = vpack.c.bf16 %v693_v57, %v693_v57  ;;  %v1064_v61 = vpack.c.bf16 %v709_v58, %v709_v58  ;;  %v1203_v23 = vpop.f32.mrb[14].mxu1  ;;  %v512_v26 = vpop.f32.mrb[15].mxu0 }
 0x122   : > { %853 = vst.msk [vmem:[%s1509_s22 + $0x20] sm:$0xf] %vm844_vm3, %v1047_v32  ;;  %869 = vst.msk [vmem:[%s1509_s22 + $0x60] sm:$0xf] %vm844_vm3, %v1063_v33  ;;  %v510_v62 = vadd.f32 %v1479_v54, %v509_v42  ;;  %v574_v43 = vadd.f32 %v1479_v54, %v573_v40  ;;  %v602_v44 = vmax.f32 %v518_v59, 0.0  ;;  %v521_v35 = vadd.f32 %v1187_v22, %v1479_v54  ;;  %v576_v27 = vpop.f32.mrb[15].mxu1 }
 0x123   : > { %856 = vst.msk [vmem:[%s1509_s22 + $0x2c] sm:$0xf] %vm844_vm3, %v1050_v34  ;;  %872 = vst.msk [vmem:[%s1509_s22 + $0x6c] sm:$0xf] %vm844_vm3, %v1066_v39  ;;  %v618_v45 = vmax.f32 %v582_v60, 0.0  ;;  %v585_v36 = vadd.f32 %v1203_v23, %v1479_v54  ;;  %v513_v3 = vadd.f32 %v1479_v54, %v512_v26  ;;  %v577_v28 = vadd.f32 %v1479_v54, %v576_v27 }
 0x124   : > { %854 = vst.msk [vmem:[%s1509_s22 + $0x24] sm:$0xf] %vm844_vm3, %v1048_v41  ;;  %870 = vst.msk [vmem:[%s1509_s22 + $0x64] sm:$0xf] %vm844_vm3, %v1064_v61  ;;  %v600_v47 = vmax.f32 %v510_v62, 0.0  ;;  %v616_v48 = vmax.f32 %v574_v43, 0.0  ;;  %v698_v29 = vadd.f32 %v1101_v1, %v602_v44  ;;  %v1675_v25 = vunpack.c.l.bf16 %v1474_v52 }
 0x125   : > { %v714_v49 = vadd.f32 %v1133_v2, %v618_v45  ;;  %v603_v50 = vmax.f32 %v521_v35, 0.0  ;;  %v619_v24 = vmax.f32 %v585_v36, 0.0  ;;  %v1676_v38 = vunpack.c.l.bf16 %v1477_v53 }
 0x126   : > { %v696_v37 = vadd.f32 %v1675_v25, %v600_v47  ;;  %v601_v9 = vmax.f32 %v513_v3, 0.0  ;;  %v617_v54 = vmax.f32 %v577_v28, 0.0  ;;  %v1053_v15 = vpack.c.bf16 %v698_v29, %v698_v29 }
 0x127   : > { %v712_v4 = vadd.f32 %v1676_v38, %v616_v48  ;;  %v1069_v1 = vpack.c.bf16 %v714_v49, %v714_v49  ;;  %v1677_v20 = vunpack.c.h.bf16 %v1464_v46  ;;  %v1678_v21 = vunpack.c.h.bf16 %v1471_v51 }
 0x128   : > { %v1051_v0 = vpack.c.bf16 %v696_v37, %v696_v37  ;;  %v1679_v8 = vunpack.c.h.bf16 %v1474_v52  ;;  %v713_v6 = vadd.f32 %v1130_v16, %v617_v54  ;;  %859 = vst.msk [vmem:[%s1509_s22 + $0x38] sm:$0xf] %vm844_vm3, %v1053_v15 }
 0x129   : > { %v699_v2 = vadd.f32 %v1677_v20, %v603_v50  ;;  %v715_v63 = vadd.f32 %v1678_v21, %v619_v24  ;;  %v1067_v7 = vpack.c.bf16 %v712_v4, %v712_v4  ;;  %875 = vst.msk [vmem:[%s1509_s22 + $0x78] sm:$0xf] %vm844_vm3, %v1069_v1 }
 0x12a   : > { %v697_v5 = vadd.f32 %v1679_v8, %v601_v9  ;;  %857 = vst.msk [vmem:[%s1509_s22 + $0x30] sm:$0xf] %vm844_vm3, %v1051_v0  ;;  %v1068_v12 = vpack.c.bf16 %v713_v6, %v713_v6 }
 0x12b   : > { %v1054_v46 = vpack.c.bf16 %v699_v2, %v699_v2  ;;  %v1070_v11 = vpack.c.bf16 %v715_v63, %v715_v63  ;;  %873 = vst.msk [vmem:[%s1509_s22 + $0x70] sm:$0xf] %vm844_vm3, %v1067_v7 }
 0x12c   : > { %v1052_v51 = vpack.c.bf16 %v697_v5, %v697_v5  ;;  %874 = vst.msk [vmem:[%s1509_s22 + $0x74] sm:$0xf] %vm844_vm3, %v1068_v12 }
 0x12d   : > { %860 = vst.msk [vmem:[%s1509_s22 + $0x3c] sm:$0xf] %vm844_vm3, %v1054_v46  ;;  %876 = vst.msk [vmem:[%s1509_s22 + $0x7c] sm:$0xf] %vm844_vm3, %v1070_v11 }
 0x12e   : > { %858 = vst.msk [vmem:[%s1509_s22 + $0x34] sm:$0xf] %vm844_vm3, %v1052_v51 }
 0x12f PF: > { %s15_s15 = sadd.s32 1, %s1284_s15  }
 0x130   : > { %p12_p3 = scmp.ge.s32.totalorder %s15_s15, 4  }
 0x132   :  { %14 = sbr.rel (!%p12_p3) target bundleno = 1 (0x1), region = 74 }
 0x139   :  { %899 = vsyncpa [#allocation3], 1 }
 0x13a   :  { %901 = vsyncpa [#allocation3 + $0x1], 1 }

// kernel: unet_forward.33
= control target key start
LH: loop header
LB: loop body
LE: loop exit
PB: predicated region body
PF: predicated region fallthrough
CT: control target
= control target key end

     0   :  { %vm110_vm0 = vcmask 523264   ;;  %vm312_vm1 = vcmask 257024   ;;  %s573_s1 = inlined_call_operand.vmem [shape: bf16[64,32], index: 1, kind: input, shape index: {}]   ;;  %s574_s0 = inlined_call_operand.vmem [shape: bf16[128,64], index: 0, kind: input, shape index: {}]   ;;  %s575_s2 = inlined_call_operand.vmem [shape: f32[1,32], index: 2, kind: input, shape index: {}]   ;;  %s576_s3 = inlined_call_operand.vmem [shape: bf16[128,32], index: 3, kind: output, shape index: {}]  }
   0x1   :  { %v430_v0 = vld [vmem:[%s573_s1] sm:$0xff]   ;;  %v431_v1 = vld [vmem:[%s573_s1 + $0x8] sm:$0xff]   ;;  %v432_v2 = vld [vmem:[%s573_s1 + $0x10] sm:$0xff]  }
   0x2   :  { %398 = vmatprep.subr.bf16.mxu0 %v430_v0  ;;  %422 = vmatprep.subr.bf16.mxu1 %v430_v0  ;;  %v434_v3 = vld [vmem:[%s574_s0] sm:$0xff]   ;;  %v433_v5 = vld [vmem:[%s573_s1 + $0x18] sm:$0xff]   ;;  %v436_v6 = vld [vmem:[%s574_s0 + $0x8] sm:$0xff]  }
   0x3   :  { %399 = vmatpush3.bf16.msra.mxu0 %v430_v0  ;;  %426 = vmatpush3.bf16.msra.mxu1 %v430_v0  ;;  %v435_v4 = vld [vmem:[%s574_s0 + $0x20] sm:$0xff]   ;;  %v437_v7 = vld [vmem:[%s574_s0 + $0x28] sm:$0xff]   ;;  %v438_v8 = vld [vmem:[%s574_s0 + $0x10] sm:$0xff]  }
   0x4   :  { %400 = vmatprep.subr.bf16.mxu0 %v431_v1  ;;  %423 = vmatprep.subr.bf16.mxu1 %v431_v1  ;;  %v439_v9 = vld [vmem:[%s574_s0 + $0x30] sm:$0xff]   ;;  %v440_v10 = vld [vmem:[%s574_s0 + $0x18] sm:$0xff]   ;;  %v333_v12 = vld [vmem:[%s575_s2] ss:$0 sm:$0xff] }
   0x5   :  { %406 = vmatprep.mubr.msk.bf16.mxu0 %vm110_vm0, %v434_v3  ;;  %414 = vmatprep.mubr.msk.bf16.mxu1 %vm110_vm0, %v435_v4  ;;  %v441_v11 = vld [vmem:[%s574_s0 + $0x38] sm:$0xff]  }
   0x7   :  { %401 = vmatpush3.bf16.msra.mxu0 %v431_v1  ;;  %427 = vmatpush3.bf16.msra.mxu1 %v431_v1 }
   0x8   :  { %402 = vmatprep.subr.bf16.mxu0 %v432_v2  ;;  %424 = vmatprep.subr.bf16.mxu1 %v432_v2 }
   0xb   :  { %403 = vmatpush3.bf16.msra.mxu0 %v432_v2  ;;  %428 = vmatpush3.bf16.msra.mxu1 %v432_v2 }
   0xc   :  { %404 = vmatprep.subr.bf16.mxu0 %v433_v5  ;;  %425 = vmatprep.subr.bf16.mxu1 %v433_v5 }
   0xf   :  { %405 = vmatpush3.bf16.msra.mxu0 %v433_v5  ;;  %429 = vmatpush3.bf16.msra.mxu1 %v433_v5 }
  0x12   :  { %407 = vmatmul.mubr.msk.bf16.vlgmr.msra.gmra.mrb[0].mxu0 %vm110_vm0, %v436_v6  ;;  %415 = vmatmul.mubr.msk.bf16.vlgmr.msra.gmra.mrb[0].mxu1 %vm110_vm0, %v437_v7 }
  0x13   :  { %410 = vmatprep.mubr.msk.bf16.mxu0 %vm110_vm0, %v438_v8  ;;  %418 = vmatprep.mubr.msk.bf16.mxu1 %vm110_vm0, %v439_v9 }
  0x1a   :  { %411 = vmatmul.mubr.msk.bf16.gmra.mrb[4].mxu0 %vm110_vm0, %v440_v10  ;;  %419 = vmatmul.mubr.msk.bf16.gmra.mrb[4].mxu1 %vm110_vm0, %v441_v11 }
  0xe5   :  { %v408_v13 = vpop.f32.mrb[0].mxu0  ;;  %v416_v14 = vpop.f32.mrb[0].mxu1 }
  0xe6   :  { %v178_v15 = vadd.f32 %v408_v13, %v333_v12  ;;  %v210_v16 = vadd.f32 %v416_v14, %v333_v12  ;;  %v169_v17 = vpop.f32.mrb[1].mxu0  ;;  %v201_v18 = vpop.f32.mrb[1].mxu1 }
  0xe7   :  { %v170_v19 = vadd.f32 %v333_v12, %v169_v17  ;;  %v202_v20 = vadd.f32 %v333_v12, %v201_v18  ;;  %v409_v21 = vpop.f32.mrb[2].mxu0  ;;  %v417_v22 = vpop.f32.mrb[2].mxu1 }
  0xe8   :  { %v234_v23 = vmax.f32 %v178_v15, 0.0  ;;  %v242_v24 = vmax.f32 %v210_v16, 0.0  ;;  %v181_v25 = vadd.f32 %v409_v21, %v333_v12  ;;  %v213_v26 = vadd.f32 %v417_v22, %v333_v12  ;;  %v172_v27 = vpop.f32.mrb[3].mxu0  ;;  %v204_v28 = vpop.f32.mrb[3].mxu1 }
  0xe9   :  { %v232_v29 = vmax.f32 %v170_v19, 0.0  ;;  %v240_v30 = vmax.f32 %v202_v20, 0.0  ;;  %v173_v31 = vadd.f32 %v333_v12, %v172_v27  ;;  %v205_v32 = vadd.f32 %v333_v12, %v204_v28 }
  0xea   :  { %v372_v33 = vpack.c.bf16 %v234_v23, %v234_v23  ;;  %v380_v34 = vpack.c.bf16 %v242_v24, %v242_v24  ;;  %v235_v35 = vmax.f32 %v181_v25, 0.0  ;;  %v243_v36 = vmax.f32 %v213_v26, 0.0 }
  0xeb   :  { %v370_v37 = vpack.c.bf16 %v232_v29, %v232_v29  ;;  %v378_v38 = vpack.c.bf16 %v240_v30, %v240_v30  ;;  %v233_v39 = vmax.f32 %v173_v31, 0.0  ;;  %v241_v40 = vmax.f32 %v205_v32, 0.0 }
  0xec   :  { %315 = vst.msk [vmem:[%s576_s3 + $0x8] sm:$0xf] %vm312_vm1, %v372_v33  ;;  %323 = vst.msk [vmem:[%s576_s3 + $0x28] sm:$0xf] %vm312_vm1, %v380_v34  ;;  %v373_v41 = vpack.c.bf16 %v235_v35, %v235_v35  ;;  %v381_v42 = vpack.c.bf16 %v243_v36, %v243_v36 }
  0xed   :  { %313 = vst.msk [vmem:[%s576_s3] sm:$0xf] %vm312_vm1, %v370_v37  ;;  %321 = vst.msk [vmem:[%s576_s3 + $0x20] sm:$0xf] %vm312_vm1, %v378_v38  ;;  %v371_v43 = vpack.c.bf16 %v233_v39, %v233_v39  ;;  %v379_v44 = vpack.c.bf16 %v241_v40, %v241_v40  ;;  %v412_v45 = vpop.f32.mrb[4].mxu0  ;;  %v420_v46 = vpop.f32.mrb[4].mxu1 }
  0xee   :  { %316 = vst.msk [vmem:[%s576_s3 + $0xc] sm:$0xf] %vm312_vm1, %v373_v41  ;;  %324 = vst.msk [vmem:[%s576_s3 + $0x2c] sm:$0xf] %vm312_vm1, %v381_v42  ;;  %v194_v47 = vadd.f32 %v412_v45, %v333_v12  ;;  %v226_v48 = vadd.f32 %v420_v46, %v333_v12  ;;  %v185_v49 = vpop.f32.mrb[5].mxu0  ;;  %v217_v50 = vpop.f32.mrb[5].mxu1 }
  0xef   :  { %314 = vst.msk [vmem:[%s576_s3 + $0x4] sm:$0xf] %vm312_vm1, %v371_v43  ;;  %322 = vst.msk [vmem:[%s576_s3 + $0x24] sm:$0xf] %vm312_vm1, %v379_v44  ;;  %v186_v51 = vadd.f32 %v333_v12, %v185_v49  ;;  %v218_v52 = vadd.f32 %v333_v12, %v217_v50  ;;  %v413_v53 = vpop.f32.mrb[6].mxu0  ;;  %v421_v54 = vpop.f32.mrb[6].mxu1 }
  0xf0   :  { %v238_v55 = vmax.f32 %v194_v47, 0.0  ;;  %v246_v56 = vmax.f32 %v226_v48, 0.0  ;;  %v197_v57 = vadd.f32 %v413_v53, %v333_v12  ;;  %v229_v58 = vadd.f32 %v421_v54, %v333_v12  ;;  %v188_v59 = vpop.f32.mrb[7].mxu0  ;;  %v220_v60 = vpop.f32.mrb[7].mxu1 }
  0xf1   :  { %v236_v61 = vmax.f32 %v186_v51, 0.0  ;;  %v244_v62 = vmax.f32 %v218_v52, 0.0  ;;  %v189_v63 = vadd.f32 %v333_v12, %v188_v59  ;;  %v221_v0 = vadd.f32 %v333_v12, %v220_v60 }
  0xf2   :  { %v376_v1 = vpack.c.bf16 %v238_v55, %v238_v55  ;;  %v384_v2 = vpack.c.bf16 %v246_v56, %v246_v56  ;;  %v239_v3 = vmax.f32 %v197_v57, 0.0  ;;  %v247_v4 = vmax.f32 %v229_v58, 0.0 }
  0xf3   :  { %v374_v5 = vpack.c.bf16 %v236_v61, %v236_v61  ;;  %v382_v6 = vpack.c.bf16 %v244_v62, %v244_v62  ;;  %v237_v7 = vmax.f32 %v189_v63, 0.0  ;;  %v245_v8 = vmax.f32 %v221_v0, 0.0 }
  0xf4   :  { %319 = vst.msk [vmem:[%s576_s3 + $0x18] sm:$0xf] %vm312_vm1, %v376_v1  ;;  %327 = vst.msk [vmem:[%s576_s3 + $0x38] sm:$0xf] %vm312_vm1, %v384_v2  ;;  %v377_v9 = vpack.c.bf16 %v239_v3, %v239_v3  ;;  %v385_v10 = vpack.c.bf16 %v247_v4, %v247_v4 }
  0xf5   :  { %317 = vst.msk [vmem:[%s576_s3 + $0x10] sm:$0xf] %vm312_vm1, %v374_v5  ;;  %325 = vst.msk [vmem:[%s576_s3 + $0x30] sm:$0xf] %vm312_vm1, %v382_v6  ;;  %v375_v11 = vpack.c.bf16 %v237_v7, %v237_v7  ;;  %v383_v12 = vpack.c.bf16 %v245_v8, %v245_v8 }
  0xf6   :  { %320 = vst.msk [vmem:[%s576_s3 + $0x1c] sm:$0xf] %vm312_vm1, %v377_v9  ;;  %328 = vst.msk [vmem:[%s576_s3 + $0x3c] sm:$0xf] %vm312_vm1, %v385_v10 }
  0xf7   :  { %318 = vst.msk [vmem:[%s576_s3 + $0x14] sm:$0xf] %vm312_vm1, %v375_v11  ;;  %326 = vst.msk [vmem:[%s576_s3 + $0x34] sm:$0xf] %vm312_vm1, %v383_v12 }

// kernel: unet_forward.34
= control target key start
LH: loop header
LB: loop body
LE: loop exit
PB: predicated region body
PF: predicated region fallthrough
CT: control target
= control target key end

     0   :  { %vm318_vm0 = vcmask 261120   ;;  %vm617_vm1 = vcmask 257024   ;;  %s1132_s1 = inlined_call_operand.vmem [shape: bf16[288,32], index: 1, kind: input, shape index: {}]   ;;  %s1133_s0 = inlined_call_operand.vmem [shape: bf16[128,288], index: 0, kind: input, shape index: {}]   ;;  %s1134_s2 = inlined_call_operand.vmem [shape: f32[1,32], index: 2, kind: input, shape index: {}]   ;;  %s1135_s3 = inlined_call_operand.vmem [shape: bf16[128,32], index: 3, kind: output, shape index: {}]  }
   0x1   :  { %v831_v0 = vld [vmem:[%s1132_s1 + $0x40] sm:$0xff]   ;;  %v833_v2 = vld [vmem:[%s1132_s1 + $0x48] sm:$0xff]   ;;  %v835_v4 = vld [vmem:[%s1132_s1 + $0x50] sm:$0xff]  }
   0x2   :  { %v832_v1 = vld [vmem:[%s1132_s1] sm:$0xff]   ;;  %721 = vmatprep.subr.bf16.mxu0 %v831_v0  ;;  %815 = vmatprep.subr.bf16.mxu1 %v831_v0  ;;  %v834_v3 = vld [vmem:[%s1132_s1 + $0x8] sm:$0xff]   ;;  %v836_v5 = vld [vmem:[%s1132_s1 + $0x10] sm:$0xff]  }
   0x3   :  { %722 = vmatpush3.bf16.msra.mxu0 %v832_v1  ;;  %823 = vmatpush3.bf16.msra.mxu1 %v832_v1  ;;  %v837_v6 = vld [vmem:[%s1132_s1 + $0x58] sm:$0xff]   ;;  %v839_v8 = vld [vmem:[%s1132_s1 + $0x60] sm:$0xff]   ;;  %v841_v10 = vld [vmem:[%s1132_s1 + $0x68] sm:$0xff]  }
   0x4   :  { %723 = vmatprep.subr.bf16.mxu0 %v833_v2  ;;  %816 = vmatprep.subr.bf16.mxu1 %v833_v2  ;;  %v838_v7 = vld [vmem:[%s1132_s1 + $0x18] sm:$0xff]   ;;  %v840_v9 = vld [vmem:[%s1132_s1 + $0x20] sm:$0xff]   ;;  %v842_v13 = vld [vmem:[%s1132_s1 + $0x28] sm:$0xff]  }
   0x5   :  { %v849_v11 = vld [vmem:[%s1133_s0 + $0x4] ss:$12 sps:$4 sm:$0xff]   ;;  %v852_v12 = vld [vmem:[%s1133_s0 + $0x94] ss:$12 sps:$4 sm:$0xff]   ;;  %v845_v16 = vld [vmem:[%s1132_s1 + $0x78] sm:$0xff]  }
   0x6   :  { %v843_v14 = vld [vmem:[%s1132_s1 + $0x70] sm:$0xff]   ;;  %375 = vmatprep.mubr.bf16.mxu0 %v849_v11  ;;  %423 = vmatprep.mubr.bf16.mxu1 %v852_v12  ;;  %v846_v17 = vld [vmem:[%s1132_s1 + $0x38] sm:$0xff]   ;;  %v847_v18 = vld [vmem:[%s1133_s0] ss:$12 sps:$4 sm:$0xff]  }
   0x7   :  { %724 = vmatpush3.bf16.msra.mxu0 %v834_v3  ;;  %824 = vmatpush3.bf16.msra.mxu1 %v834_v3  ;;  %v844_v15 = vld [vmem:[%s1132_s1 + $0x30] sm:$0xff]   ;;  %v853_v19 = vld [vmem:[%s1132_s1 + $0x80] sm:$0xff]   ;;  %v854_v21 = vld [vmem:[%s1133_s0 + $0x1c] ss:$12 sps:$4 sm:$0xff]  }
   0x8   :  { %725 = vmatprep.subr.bf16.mxu0 %v835_v4  ;;  %817 = vmatprep.subr.bf16.mxu1 %v835_v4  ;;  %v850_v20 = vld [vmem:[%s1133_s0 + $0x90] ss:$12 sps:$4 sm:$0xff]   ;;  %v856_v22 = vld [vmem:[%s1133_s0 + $0xac] ss:$12 sps:$4 sm:$0xff]   ;;  %v859_v25 = vld [vmem:[%s1133_s0 + $0xa8] ss:$12 sps:$4 sm:$0xff]  }
   0x9   :  { %v860_v23 = vld [vmem:[%s1132_s1 + $0x88] sm:$0xff]   ;;  %v858_v24 = vld [vmem:[%s1133_s0 + $0x18] ss:$12 sps:$4 sm:$0xff]   ;;  %v861_v26 = vld [vmem:[%s1133_s0 + $0x34] ss:$12 sps:$4 sm:$0xff]  }
   0xa   :  { %v863_v27 = vld [vmem:[%s1133_s0 + $0x8] ss:$12 sps:$4 sm:$0xff]   ;;  %v864_v28 = vld [vmem:[%s1133_s0 + $0x30] ss:$12 sps:$4 sm:$0xff]   ;;  %v865_v29 = vld [vmem:[%s1133_s0 + $0x20] ss:$12 sps:$4 sm:$0xff]  }
   0xb   :  { %726 = vmatpush3.bf16.msra.mxu0 %v836_v5  ;;  %825 = vmatpush3.bf16.msra.mxu1 %v836_v5  ;;  %v866_v30 = vld [vmem:[%s1133_s0 + $0x4c] ss:$12 sps:$4 sm:$0xff]   ;;  %v869_v32 = vld [vmem:[%s1133_s0 + $0x48] ss:$12 sps:$4 sm:$0xff]   ;;  %v870_v33 = vld [vmem:[%s1133_s0 + $0x50] ss:$12 sps:$4 sm:$0xff]  }
   0xc   :  { %727 = vmatprep.subr.bf16.mxu0 %v837_v6  ;;  %818 = vmatprep.subr.bf16.mxu1 %v837_v6  ;;  %v868_v31 = vld [vmem:[%s1133_s0 + $0x38] ss:$12 sps:$4 sm:$0xff]   ;;  %v873_v35 = vld [vmem:[%s1133_s0 + $0x68] ss:$12 sps:$4 sm:$0xff]   ;;  %v874_v36 = vld [vmem:[%s1133_s0 + $0x60] ss:$12 sps:$4 sm:$0xff]  }
   0xd   :  { %v871_v34 = vld [vmem:[%s1133_s0 + $0x64] ss:$12 sps:$4 sm:$0xff]   ;;  %v875_v37 = vld [vmem:[%s1133_s0 + $0x80] ss:$12 sps:$4 sm:$0xff]   ;;  %v876_v38 = vld [vmem:[%s1133_s0 + $0x7c] ss:$12 sps:$4 sm:$0xff]  }
   0xe   :  { %v878_v39 = vld [vmem:[%s1133_s0 + $0x98] ss:$12 sps:$4 sm:$0xff]   ;;  %v880_v41 = vld [vmem:[%s1133_s0 + $0xb0] ss:$12 sps:$4 sm:$0xff]   ;;  %v1046_v2 = vld [vmem:[%s1134_s2] ss:$0 sm:$0xff] }
   0xf   :  { %728 = vmatpush3.bf16.msra.mxu0 %v838_v7  ;;  %826 = vmatpush3.bf16.msra.mxu1 %v838_v7  ;;  %v879_v40 = vld [vmem:[%s1133_s0 + $0x78] ss:$12 sps:$4 sm:$0xff]  }
  0x10   :  { %729 = vmatprep.subr.bf16.mxu0 %v839_v8  ;;  %819 = vmatprep.subr.bf16.mxu1 %v839_v8 }
  0x13   :  { %730 = vmatpush3.bf16.msra.mxu0 %v840_v9  ;;  %827 = vmatpush3.bf16.msra.mxu1 %v840_v9 }
  0x14   :  { %731 = vmatprep.subr.bf16.mxu0 %v841_v10  ;;  %820 = vmatprep.subr.bf16.mxu1 %v841_v10 }
  0x17   :  { %732 = vmatpush3.bf16.msra.mxu0 %v842_v13  ;;  %828 = vmatpush3.bf16.msra.mxu1 %v842_v13 }
  0x18   :  { %733 = vmatprep.subr.bf16.mxu0 %v843_v14  ;;  %821 = vmatprep.subr.bf16.mxu1 %v843_v14 }
  0x1b   :  { %734 = vmatpush3.bf16.msra.mxu0 %v844_v15  ;;  %829 = vmatpush3.bf16.msra.mxu1 %v844_v15 }
  0x1c   :  { %735 = vmatprep.subr.bf16.mxu0 %v845_v16  ;;  %822 = vmatprep.subr.bf16.mxu1 %v845_v16 }
  0x1f   :  { %736 = vmatpush3.bf16.msra.mxu0 %v846_v17  ;;  %830 = vmatpush3.bf16.msra.mxu1 %v846_v17 }
  0x20   :  { %795 = vmatprep.subr.bf16.mxu1 %v853_v19 }
  0x22   :  { %376 = vmatmul.mubr.bf16.vlgmr.msra.gmra.mrb[0].mxu0 %v847_v18  ;;  %424 = vmatmul.mubr.bf16.vlgmr.msra.gmra.mrb[0].mxu1 %v850_v20 }
  0x23   :  { %796 = vmatpush3.bf16.msra.mxu1 %v853_v19  ;;  %383 = vmatprep.mubr.bf16.mxu0 %v854_v21 }
  0x24   :  { %431 = vmatprep.mubr.bf16.mxu1 %v856_v22  ;;  %797 = vmatprep.subr.bf16.mxu1 %v860_v23 }
  0x27   :  { %798 = vmatpush3.bf16.msra.mxu1 %v860_v23 }
  0x2a   :  { %384 = vmatmul.mubr.bf16.gmra.mrb[4].mxu0 %v858_v24  ;;  %432 = vmatmul.mubr.bf16.gmra.mrb[4].mxu1 %v859_v25 }
  0x2b   :  { %391 = vmatprep.mubr.bf16.mxu0 %v861_v26  ;;  %799 = vmatprep.mubr.msk.bf16.mxu1 %vm318_vm0, %v863_v27 }
  0x32   :  { %392 = vmatmul.mubr.bf16.gmra.mrb[8].mxu0 %v864_v28  ;;  %800 = vmatmul.mubr.msk.bf16.vlgmr.msra.gmra.mrb[8].mxu1 %vm318_vm0, %v865_v29 }
  0x33   :  { %399 = vmatprep.mubr.bf16.mxu0 %v866_v30  ;;  %803 = vmatprep.mubr.msk.bf16.mxu1 %vm318_vm0, %v868_v31 }
  0x3a   :  { %400 = vmatmul.mubr.bf16.gmra.mrb[12].mxu0 %v869_v32  ;;  %804 = vmatmul.mubr.msk.bf16.gmra.mrb[12].mxu1 %vm318_vm0, %v870_v33 }
  0x3b   :  { %407 = vmatprep.mubr.bf16.mxu0 %v871_v34  ;;  %807 = vmatprep.mubr.msk.bf16.mxu1 %vm318_vm0, %v873_v35 }
  0x42   :  { %408 = vmatmul.mubr.bf16.gmra.mrb[16].mxu0 %v874_v36  ;;  %808 = vmatmul.mubr.msk.bf16.gmra.mrb[16].mxu1 %vm318_vm0, %v875_v37 }
  0x43   :  { %415 = vmatprep.mubr.bf16.mxu0 %v876_v38  ;;  %811 = vmatprep.mubr.msk.bf16.mxu1 %vm318_vm0, %v878_v39 }
  0x4a   :  { %416 = vmatmul.mubr.bf16.gmra.mrb[20].mxu0 %v879_v40  ;;  %812 = vmatmul.mubr.msk.bf16.gmra.mrb[20].mxu1 %vm318_vm0, %v880_v41 }
  0xf5   :  { %v737_v42 = vpop.f32.mrb[0].mxu0  ;;  %v773_v43 = vpop.f32.mrb[0].mxu1 }
  0xf6   :  { %v738_v44 = vpop.f32.mrb[1].mxu0  ;;  %v774_v45 = vpop.f32.mrb[1].mxu1 }
  0xf7   :  { %v739_v46 = vadd.f32 %v738_v44, %v737_v42  ;;  %v740_v47 = vpop.f32.mrb[2].mxu0  ;;  %v1035_v48 = vadd.f32 %v774_v45, %v773_v43  ;;  %v776_v49 = vpop.f32.mrb[2].mxu1 }
  0xf8   :  { %v741_v50 = vpop.f32.mrb[3].mxu0  ;;  %v777_v51 = vpop.f32.mrb[3].mxu1 }
  0xf9   :  { %v742_v52 = vadd.f32 %v741_v50, %v740_v47  ;;  %v1037_v53 = vadd.f32 %v777_v51, %v776_v49  ;;  %v378_v6 = vadd.f32 %v739_v46, %v1046_v2 }
  0xfb   :  { %v381_v15 = vadd.f32 %v742_v52, %v1046_v2 }
  0xfd   :  { %v743_v54 = vpop.f32.mrb[4].mxu0  ;;  %v779_v55 = vpop.f32.mrb[4].mxu1 }
  0xfe   :  { %v744_v56 = vpop.f32.mrb[5].mxu0  ;;  %v780_v57 = vpop.f32.mrb[5].mxu1 }
  0xff   :  { %v745_v58 = vadd.f32 %v744_v56, %v743_v54  ;;  %v746_v59 = vpop.f32.mrb[6].mxu0  ;;  %v1039_v60 = vadd.f32 %v780_v57, %v779_v55  ;;  %v782_v61 = vpop.f32.mrb[6].mxu1 }
 0x100   :  { %v747_v62 = vpop.f32.mrb[7].mxu0  ;;  %v783_v63 = vpop.f32.mrb[7].mxu1 }
 0x101   :  { %v748_v0 = vadd.f32 %v747_v62, %v746_v59  ;;  %v1041_v1 = vadd.f32 %v783_v63, %v782_v61  ;;  %v386_v3 = vadd.f32 %v745_v58, %v1046_v2 }
 0x103   :  { %v389_v10 = vadd.f32 %v748_v0, %v1046_v2 }
 0x105   :  { %v749_v4 = vpop.f32.mrb[8].mxu0  ;;  %v801_v5 = vpop.f32.mrb[8].mxu1 }
 0x106   :  { %v483_v7 = vadd.f32 %v801_v5, %v386_v3  ;;  %v750_v8 = vpop.f32.mrb[9].mxu0  ;;  %v474_v9 = vpop.f32.mrb[9].mxu1 }
 0x107   :  { %v751_v11 = vadd.f32 %v750_v8, %v749_v4  ;;  %v475_v12 = vadd.f32 %v474_v9, %v378_v6  ;;  %v752_v13 = vpop.f32.mrb[10].mxu0  ;;  %v802_v14 = vpop.f32.mrb[10].mxu1  ;;  %v434_v9 = vadd.f32 %v1039_v60, %v1046_v2 }
 0x108   :  { %v539_v16 = vmax.f32 %v483_v7, 0.0  ;;  %v486_v17 = vadd.f32 %v802_v14, %v389_v10  ;;  %v753_v18 = vpop.f32.mrb[11].mxu0  ;;  %v477_v19 = vpop.f32.mrb[11].mxu1  ;;  %v426_v14 = vadd.f32 %v1035_v48, %v1046_v2 }
 0x109   :  { %v537_v20 = vmax.f32 %v475_v12, 0.0  ;;  %v754_v21 = vadd.f32 %v753_v18, %v752_v13  ;;  %v478_v22 = vadd.f32 %v477_v19, %v381_v15  ;;  %v394_v31 = vadd.f32 %v751_v11, %v1046_v2 }
 0x10a   :  { %v707_v23 = vpack.c.bf16 %v539_v16, %v539_v16  ;;  %v540_v24 = vmax.f32 %v486_v17, 0.0  ;;  %v437_v18 = vadd.f32 %v1041_v1, %v1046_v2 }
 0x10b   :  { %v705_v25 = vpack.c.bf16 %v537_v20, %v537_v20  ;;  %v538_v26 = vmax.f32 %v478_v22, 0.0  ;;  %v397_v38 = vadd.f32 %v754_v21, %v1046_v2 }
 0x10c   :  { %620 = vst.msk [vmem:[%s1135_s3 + $0x8] sm:$0xf] %vm617_vm1, %v707_v23  ;;  %v708_v27 = vpack.c.bf16 %v540_v24, %v540_v24 }
 0x10d   :  { %618 = vst.msk [vmem:[%s1135_s3] sm:$0xf] %vm617_vm1, %v705_v25  ;;  %v706_v28 = vpack.c.bf16 %v538_v26, %v538_v26  ;;  %v755_v29 = vpop.f32.mrb[12].mxu0  ;;  %v805_v30 = vpop.f32.mrb[12].mxu1 }
 0x10e   :  { %621 = vst.msk [vmem:[%s1135_s3 + $0xc] sm:$0xf] %vm617_vm1, %v708_v27  ;;  %v756_v32 = vpop.f32.mrb[13].mxu0  ;;  %v490_v33 = vpop.f32.mrb[13].mxu1  ;;  %v429_v27 = vadd.f32 %v1037_v53, %v1046_v2 }
 0x10f   :  { %619 = vst.msk [vmem:[%s1135_s3 + $0x4] sm:$0xf] %vm617_vm1, %v706_v28  ;;  %v757_v34 = vadd.f32 %v756_v32, %v755_v29  ;;  %v491_v35 = vadd.f32 %v490_v33, %v394_v31  ;;  %v758_v36 = vpop.f32.mrb[14].mxu0  ;;  %v806_v37 = vpop.f32.mrb[14].mxu1 }
 0x110   :  { %v759_v39 = vpop.f32.mrb[15].mxu0  ;;  %v493_v40 = vpop.f32.mrb[15].mxu1 }
 0x111   :  { %v402_v41 = vadd.f32 %v757_v34, %v1046_v2  ;;  %v541_v42 = vmax.f32 %v491_v35, 0.0  ;;  %v760_v43 = vadd.f32 %v759_v39, %v758_v36  ;;  %v494_v44 = vadd.f32 %v493_v40, %v397_v38 }
 0x113   :  { %v499_v45 = vadd.f32 %v805_v30, %v402_v41  ;;  %v709_v46 = vpack.c.bf16 %v541_v42, %v541_v42  ;;  %v405_v47 = vadd.f32 %v760_v43, %v1046_v2  ;;  %v542_v49 = vmax.f32 %v494_v44, 0.0 }
 0x115   :  { %v543_v50 = vmax.f32 %v499_v45, 0.0  ;;  %622 = vst.msk [vmem:[%s1135_s3 + $0x10] sm:$0xf] %vm617_vm1, %v709_v46  ;;  %v502_v51 = vadd.f32 %v806_v37, %v405_v47  ;;  %v710_v52 = vpack.c.bf16 %v542_v49, %v542_v49  ;;  %v761_v54 = vpop.f32.mrb[16].mxu0  ;;  %v809_v55 = vpop.f32.mrb[16].mxu1 }
 0x116   :  { %v762_v56 = vpop.f32.mrb[17].mxu0  ;;  %v506_v57 = vpop.f32.mrb[17].mxu1 }
 0x117   :  { %v711_v58 = vpack.c.bf16 %v543_v50, %v543_v50  ;;  %v544_v59 = vmax.f32 %v502_v51, 0.0  ;;  %623 = vst.msk [vmem:[%s1135_s3 + $0x14] sm:$0xf] %vm617_vm1, %v710_v52  ;;  %v763_v61 = vadd.f32 %v762_v56, %v761_v54  ;;  %v764_v62 = vpop.f32.mrb[18].mxu0  ;;  %v810_v63 = vpop.f32.mrb[18].mxu1 }
 0x118   :  { %v765_v0 = vpop.f32.mrb[19].mxu0  ;;  %v509_v3 = vpop.f32.mrb[19].mxu1 }
 0x119   :  { %624 = vst.msk [vmem:[%s1135_s3 + $0x18] sm:$0xf] %vm617_vm1, %v711_v58  ;;  %v712_v4 = vpack.c.bf16 %v544_v59, %v544_v59  ;;  %v410_v5 = vadd.f32 %v763_v61, %v1046_v2  ;;  %v766_v6 = vadd.f32 %v765_v0, %v764_v62 }
 0x11b   :  { %625 = vst.msk [vmem:[%s1135_s3 + $0x1c] sm:$0xf] %vm617_vm1, %v712_v4  ;;  %v507_v7 = vadd.f32 %v506_v57, %v410_v5  ;;  %v413_v8 = vadd.f32 %v766_v6, %v1046_v2 }
 0x11d   :  { %v545_v10 = vmax.f32 %v507_v7, 0.0  ;;  %v510_v11 = vadd.f32 %v509_v3, %v413_v8  ;;  %v767_v12 = vpop.f32.mrb[20].mxu0  ;;  %v813_v13 = vpop.f32.mrb[20].mxu1 }
 0x11e   :  { %v531_v15 = vadd.f32 %v813_v13, %v434_v9  ;;  %v768_v16 = vpop.f32.mrb[21].mxu0  ;;  %v522_v17 = vpop.f32.mrb[21].mxu1 }
 0x11f   :  { %v713_v19 = vpack.c.bf16 %v545_v10, %v545_v10  ;;  %v546_v20 = vmax.f32 %v510_v11, 0.0  ;;  %v769_v21 = vadd.f32 %v768_v16, %v767_v12  ;;  %v523_v22 = vadd.f32 %v522_v17, %v426_v14  ;;  %v770_v23 = vpop.f32.mrb[22].mxu0  ;;  %v814_v24 = vpop.f32.mrb[22].mxu1 }
 0x120   :  { %v551_v60 = vmax.f32 %v531_v15, 0.0  ;;  %v534_v25 = vadd.f32 %v814_v24, %v437_v18  ;;  %v771_v26 = vpop.f32.mrb[23].mxu0  ;;  %v525_v28 = vpop.f32.mrb[23].mxu1 }
 0x121   :  { %626 = vst.msk [vmem:[%s1135_s3 + $0x20] sm:$0xf] %vm617_vm1, %v713_v19  ;;  %v714_v48 = vpack.c.bf16 %v546_v20, %v546_v20  ;;  %v418_v1 = vadd.f32 %v769_v21, %v1046_v2  ;;  %v549_v29 = vmax.f32 %v523_v22, 0.0  ;;  %v772_v30 = vadd.f32 %v771_v26, %v770_v23 }
 0x122   :  { %v719_v31 = vpack.c.bf16 %v551_v60, %v551_v60  ;;  %v552_v32 = vmax.f32 %v534_v25, 0.0  ;;  %v526_v33 = vadd.f32 %v525_v28, %v429_v27 }
 0x123   :  { %627 = vst.msk [vmem:[%s1135_s3 + $0x24] sm:$0xf] %vm617_vm1, %v714_v48  ;;  %v515_v53 = vadd.f32 %v809_v55, %v418_v1  ;;  %v717_v34 = vpack.c.bf16 %v549_v29, %v549_v29  ;;  %v421_v35 = vadd.f32 %v772_v30, %v1046_v2 }
 0x124   :  { %632 = vst.msk [vmem:[%s1135_s3 + $0x38] sm:$0xf] %vm617_vm1, %v719_v31  ;;  %v720_v36 = vpack.c.bf16 %v552_v32, %v552_v32  ;;  %v550_v37 = vmax.f32 %v526_v33, 0.0 }
 0x125   :  { %v547_v38 = vmax.f32 %v515_v53, 0.0  ;;  %630 = vst.msk [vmem:[%s1135_s3 + $0x30] sm:$0xf] %vm617_vm1, %v717_v34  ;;  %v518_v39 = vadd.f32 %v810_v63, %v421_v35 }
 0x126   :  { %633 = vst.msk [vmem:[%s1135_s3 + $0x3c] sm:$0xf] %vm617_vm1, %v720_v36  ;;  %v718_v2 = vpack.c.bf16 %v550_v37, %v550_v37 }
 0x127   :  { %v715_v40 = vpack.c.bf16 %v547_v38, %v547_v38  ;;  %v548_v41 = vmax.f32 %v518_v39, 0.0 }
 0x128   :  { %631 = vst.msk [vmem:[%s1135_s3 + $0x34] sm:$0xf] %vm617_vm1, %v718_v2 }
 0x129   :  { %628 = vst.msk [vmem:[%s1135_s3 + $0x28] sm:$0xf] %vm617_vm1, %v715_v40  ;;  %v716_v42 = vpack.c.bf16 %v548_v41, %v548_v41 }
 0x12b   :  { %629 = vst.msk [vmem:[%s1135_s3 + $0x2c] sm:$0xf] %vm617_vm1, %v716_v42 }

// kernel: unet_forward.35
= control target key start
LH: loop header
LB: loop body
LE: loop exit
PB: predicated region body
PF: predicated region fallthrough
CT: control target
= control target key end

     0   :  { %vm321_vm0 = vcmask 261120   ;;  %vm668_vm1 = vcmask 257024   ;;  %s1257_s1 = inlined_call_operand.vmem [shape: bf16[288,32], index: 1, kind: input, shape index: {}]   ;;  %s1258_s0 = inlined_call_operand.vmem [shape: bf16[128,288], index: 0, kind: input, shape index: {}]   ;;  %s1259_s2 = inlined_call_operand.vmem [shape: f32[1,32], index: 2, kind: input, shape index: {}]   ;;  %s1260_s3 = inlined_call_operand.vmem [shape: bf16[128,32], index: 3, kind: input, shape index: {}]   ;;  %s1261_s4 = inlined_call_operand.vmem [shape: bf16[128,32], index: 4, kind: output, shape index: {}]  }
   0x1   :  { %v921_v0 = vld [vmem:[%s1257_s1 + $0x40] sm:$0xff]   ;;  %v923_v2 = vld [vmem:[%s1257_s1 + $0x48] sm:$0xff]   ;;  %v925_v4 = vld [vmem:[%s1257_s1 + $0x50] sm:$0xff]  }
   0x2   :  { %v922_v1 = vld [vmem:[%s1257_s1] sm:$0xff]   ;;  %811 = vmatprep.subr.bf16.mxu0 %v921_v0  ;;  %905 = vmatprep.subr.bf16.mxu1 %v921_v0  ;;  %v924_v3 = vld [vmem:[%s1257_s1 + $0x8] sm:$0xff]   ;;  %v926_v5 = vld [vmem:[%s1257_s1 + $0x10] sm:$0xff]  }
   0x3   :  { %812 = vmatpush3.bf16.msra.mxu0 %v922_v1  ;;  %913 = vmatpush3.bf16.msra.mxu1 %v922_v1  ;;  %v927_v6 = vld [vmem:[%s1257_s1 + $0x58] sm:$0xff]   ;;  %v929_v8 = vld [vmem:[%s1257_s1 + $0x60] sm:$0xff]   ;;  %v931_v10 = vld [vmem:[%s1257_s1 + $0x68] sm:$0xff]  }
   0x4   :  { %813 = vmatprep.subr.bf16.mxu0 %v923_v2  ;;  %906 = vmatprep.subr.bf16.mxu1 %v923_v2  ;;  %v928_v7 = vld [vmem:[%s1257_s1 + $0x18] sm:$0xff]   ;;  %v930_v9 = vld [vmem:[%s1257_s1 + $0x20] sm:$0xff]   ;;  %v932_v13 = vld [vmem:[%s1257_s1 + $0x28] sm:$0xff]  }
   0x5   :  { %v939_v11 = vld [vmem:[%s1258_s0 + $0x4] ss:$12 sps:$4 sm:$0xff]   ;;  %v942_v12 = vld [vmem:[%s1258_s0 + $0x94] ss:$12 sps:$4 sm:$0xff]   ;;  %v935_v16 = vld [vmem:[%s1257_s1 + $0x78] sm:$0xff]  }
   0x6   :  { %v933_v14 = vld [vmem:[%s1257_s1 + $0x70] sm:$0xff]   ;;  %378 = vmatprep.mubr.bf16.mxu0 %v939_v11  ;;  %426 = vmatprep.mubr.bf16.mxu1 %v942_v12  ;;  %v936_v17 = vld [vmem:[%s1257_s1 + $0x38] sm:$0xff]   ;;  %v937_v18 = vld [vmem:[%s1258_s0] ss:$12 sps:$4 sm:$0xff]  }
   0x7   :  { %814 = vmatpush3.bf16.msra.mxu0 %v924_v3  ;;  %914 = vmatpush3.bf16.msra.mxu1 %v924_v3  ;;  %v934_v15 = vld [vmem:[%s1257_s1 + $0x30] sm:$0xff]   ;;  %v943_v19 = vld [vmem:[%s1257_s1 + $0x80] sm:$0xff]   ;;  %v944_v21 = vld [vmem:[%s1258_s0 + $0x1c] ss:$12 sps:$4 sm:$0xff]  }
   0x8   :  { %815 = vmatprep.subr.bf16.mxu0 %v925_v4  ;;  %907 = vmatprep.subr.bf16.mxu1 %v925_v4  ;;  %v940_v20 = vld [vmem:[%s1258_s0 + $0x90] ss:$12 sps:$4 sm:$0xff]   ;;  %v946_v22 = vld [vmem:[%s1258_s0 + $0xac] ss:$12 sps:$4 sm:$0xff]   ;;  %v949_v25 = vld [vmem:[%s1258_s0 + $0xa8] ss:$12 sps:$4 sm:$0xff]  }
   0x9   :  { %v950_v23 = vld [vmem:[%s1257_s1 + $0x88] sm:$0xff]   ;;  %v948_v24 = vld [vmem:[%s1258_s0 + $0x18] ss:$12 sps:$4 sm:$0xff]   ;;  %v951_v26 = vld [vmem:[%s1258_s0 + $0x34] ss:$12 sps:$4 sm:$0xff]  }
   0xa   :  { %v953_v27 = vld [vmem:[%s1258_s0 + $0x8] ss:$12 sps:$4 sm:$0xff]   ;;  %v954_v28 = vld [vmem:[%s1258_s0 + $0x30] ss:$12 sps:$4 sm:$0xff]   ;;  %v955_v29 = vld [vmem:[%s1258_s0 + $0x20] ss:$12 sps:$4 sm:$0xff]  }
   0xb   :  { %816 = vmatpush3.bf16.msra.mxu0 %v926_v5  ;;  %915 = vmatpush3.bf16.msra.mxu1 %v926_v5  ;;  %v956_v30 = vld [vmem:[%s1258_s0 + $0x4c] ss:$12 sps:$4 sm:$0xff]   ;;  %v959_v32 = vld [vmem:[%s1258_s0 + $0x48] ss:$12 sps:$4 sm:$0xff]   ;;  %v960_v33 = vld [vmem:[%s1258_s0 + $0x50] ss:$12 sps:$4 sm:$0xff]  }
   0xc   :  { %817 = vmatprep.subr.bf16.mxu0 %v927_v6  ;;  %908 = vmatprep.subr.bf16.mxu1 %v927_v6  ;;  %v958_v31 = vld [vmem:[%s1258_s0 + $0x38] ss:$12 sps:$4 sm:$0xff]   ;;  %v963_v35 = vld [vmem:[%s1258_s0 + $0x68] ss:$12 sps:$4 sm:$0xff]   ;;  %v964_v36 = vld [vmem:[%s1258_s0 + $0x60] ss:$12 sps:$4 sm:$0xff]  }
   0xd   :  { %v961_v34 = vld [vmem:[%s1258_s0 + $0x64] ss:$12 sps:$4 sm:$0xff]   ;;  %v965_v37 = vld [vmem:[%s1258_s0 + $0x80] ss:$12 sps:$4 sm:$0xff]   ;;  %v966_v38 = vld [vmem:[%s1258_s0 + $0x7c] ss:$12 sps:$4 sm:$0xff]  }
   0xe   :  { %v968_v39 = vld [vmem:[%s1258_s0 + $0x98] ss:$12 sps:$4 sm:$0xff]   ;;  %v970_v41 = vld [vmem:[%s1258_s0 + $0xb0] ss:$12 sps:$4 sm:$0xff]   ;;  %v1141_v2 = vld [vmem:[%s1259_s2] ss:$0 sm:$0xff] }
   0xf   :  { %818 = vmatpush3.bf16.msra.mxu0 %v928_v7  ;;  %916 = vmatpush3.bf16.msra.mxu1 %v928_v7  ;;  %v969_v40 = vld [vmem:[%s1258_s0 + $0x78] ss:$12 sps:$4 sm:$0xff]   ;;  %v804_v3 = vld [vmem:[%s1260_s3 + $0x8] sm:$0xff]  }
  0x10   :  { %819 = vmatprep.subr.bf16.mxu0 %v929_v8  ;;  %909 = vmatprep.subr.bf16.mxu1 %v929_v8  ;;  %v773_v5 = vld [vmem:[%s1260_s3] sm:$0xff]  }
  0x13   :  { %820 = vmatpush3.bf16.msra.mxu0 %v930_v9  ;;  %917 = vmatpush3.bf16.msra.mxu1 %v930_v9 }
  0x14   :  { %821 = vmatprep.subr.bf16.mxu0 %v931_v10  ;;  %910 = vmatprep.subr.bf16.mxu1 %v931_v10  ;;  %v778_v10 = vunpack.c.l.bf16 %v804_v3 }
  0x17   :  { %822 = vmatpush3.bf16.msra.mxu0 %v932_v13  ;;  %918 = vmatpush3.bf16.msra.mxu1 %v932_v13 }
  0x18   :  { %823 = vmatprep.subr.bf16.mxu0 %v933_v14  ;;  %911 = vmatprep.subr.bf16.mxu1 %v933_v14 }
  0x1b   :  { %824 = vmatpush3.bf16.msra.mxu0 %v934_v15  ;;  %919 = vmatpush3.bf16.msra.mxu1 %v934_v15 }
  0x1c   :  { %825 = vmatprep.subr.bf16.mxu0 %v935_v16  ;;  %912 = vmatprep.subr.bf16.mxu1 %v935_v16  ;;  %v774_v16 = vunpack.c.l.bf16 %v773_v5 }
  0x1f   :  { %826 = vmatpush3.bf16.msra.mxu0 %v936_v17  ;;  %920 = vmatpush3.bf16.msra.mxu1 %v936_v17 }
  0x20   :  { %885 = vmatprep.subr.bf16.mxu1 %v943_v19 }
  0x22   :  { %379 = vmatmul.mubr.bf16.vlgmr.msra.gmra.mrb[0].mxu0 %v937_v18  ;;  %427 = vmatmul.mubr.bf16.vlgmr.msra.gmra.mrb[0].mxu1 %v940_v20 }
  0x23   :  { %886 = vmatpush3.bf16.msra.mxu1 %v943_v19  ;;  %386 = vmatprep.mubr.bf16.mxu0 %v944_v21 }
  0x24   :  { %434 = vmatprep.mubr.bf16.mxu1 %v946_v22  ;;  %887 = vmatprep.subr.bf16.mxu1 %v950_v23  ;;  %v779_v22 = vunpack.c.h.bf16 %v804_v3 }
  0x27   :  { %888 = vmatpush3.bf16.msra.mxu1 %v950_v23 }
  0x2a   :  { %387 = vmatmul.mubr.bf16.gmra.mrb[4].mxu0 %v948_v24  ;;  %435 = vmatmul.mubr.bf16.gmra.mrb[4].mxu1 %v949_v25 }
  0x2b   :  { %394 = vmatprep.mubr.bf16.mxu0 %v951_v26  ;;  %889 = vmatprep.mubr.msk.bf16.mxu1 %vm321_vm0, %v953_v27 }
  0x32   :  { %395 = vmatmul.mubr.bf16.gmra.mrb[8].mxu0 %v954_v28  ;;  %890 = vmatmul.mubr.msk.bf16.vlgmr.msra.gmra.mrb[8].mxu1 %vm321_vm0, %v955_v29  ;;  %v775_v28 = vunpack.c.h.bf16 %v773_v5 }
  0x33   :  { %402 = vmatprep.mubr.bf16.mxu0 %v956_v30  ;;  %893 = vmatprep.mubr.msk.bf16.mxu1 %vm321_vm0, %v958_v31 }
  0x3a   :  { %403 = vmatmul.mubr.bf16.gmra.mrb[12].mxu0 %v959_v32  ;;  %894 = vmatmul.mubr.msk.bf16.gmra.mrb[12].mxu1 %vm321_vm0, %v960_v33  ;;  %v805_v33 = vld [vmem:[%s1260_s3 + $0x10] sm:$0xff]  }
  0x3b   :  { %410 = vmatprep.mubr.bf16.mxu0 %v961_v34  ;;  %897 = vmatprep.mubr.msk.bf16.mxu1 %vm321_vm0, %v963_v35 }
  0x42   :  { %411 = vmatmul.mubr.bf16.gmra.mrb[16].mxu0 %v964_v36  ;;  %898 = vmatmul.mubr.msk.bf16.gmra.mrb[16].mxu1 %vm321_vm0, %v965_v37 }
  0x43   :  { %418 = vmatprep.mubr.bf16.mxu0 %v966_v38  ;;  %901 = vmatprep.mubr.msk.bf16.mxu1 %vm321_vm0, %v968_v39 }
  0x4a   :  { %419 = vmatmul.mubr.bf16.gmra.mrb[20].mxu0 %v969_v40  ;;  %902 = vmatmul.mubr.msk.bf16.gmra.mrb[20].mxu1 %vm321_vm0, %v970_v41 }
  0xf5   :  { %v827_v42 = vpop.f32.mrb[0].mxu0  ;;  %v863_v43 = vpop.f32.mrb[0].mxu1 }
  0xf6   :  { %v828_v44 = vpop.f32.mrb[1].mxu0  ;;  %v864_v45 = vpop.f32.mrb[1].mxu1 }
  0xf7   :  { %v829_v46 = vadd.f32 %v828_v44, %v827_v42  ;;  %v830_v47 = vpop.f32.mrb[2].mxu0  ;;  %v1130_v48 = vadd.f32 %v864_v45, %v863_v43  ;;  %v866_v49 = vpop.f32.mrb[2].mxu1  ;;  %v782_v44 = vunpack.c.l.bf16 %v805_v33 }
  0xf8   :  { %v831_v50 = vpop.f32.mrb[3].mxu0  ;;  %v867_v51 = vpop.f32.mrb[3].mxu1 }
  0xf9   :  { %v832_v52 = vadd.f32 %v831_v50, %v830_v47  ;;  %v1132_v53 = vadd.f32 %v867_v51, %v866_v49  ;;  %v381_v8 = vadd.f32 %v829_v46, %v1141_v2  ;;  %v806_v47 = vld [vmem:[%s1260_s3 + $0x18] sm:$0xff]  }
  0xfa   :  { %v787_v5 = vunpack.c.h.bf16 %v806_v47 }
  0xfb   :  { %v384_v19 = vadd.f32 %v832_v52, %v1141_v2 }
  0xfd   :  { %v833_v54 = vpop.f32.mrb[4].mxu0  ;;  %v869_v55 = vpop.f32.mrb[4].mxu1 }
  0xfe   :  { %v834_v56 = vpop.f32.mrb[5].mxu0  ;;  %v870_v57 = vpop.f32.mrb[5].mxu1 }
  0xff   :  { %v835_v58 = vadd.f32 %v834_v56, %v833_v54  ;;  %v836_v59 = vpop.f32.mrb[6].mxu0  ;;  %v1134_v60 = vadd.f32 %v870_v57, %v869_v55  ;;  %v872_v61 = vpop.f32.mrb[6].mxu1  ;;  %v783_v56 = vunpack.c.h.bf16 %v805_v33 }
 0x100   :  { %v837_v62 = vpop.f32.mrb[7].mxu0  ;;  %v873_v63 = vpop.f32.mrb[7].mxu1 }
 0x101   :  { %v838_v0 = vadd.f32 %v837_v62, %v836_v59  ;;  %v1136_v1 = vadd.f32 %v873_v63, %v872_v61  ;;  %v389_v4 = vadd.f32 %v835_v58, %v1141_v2  ;;  %v786_v62 = vunpack.c.l.bf16 %v806_v47 }
 0x103   :  { %v392_v13 = vadd.f32 %v838_v0, %v1141_v2 }
 0x105   :  { %v839_v6 = vpop.f32.mrb[8].mxu0  ;;  %v891_v7 = vpop.f32.mrb[8].mxu1 }
 0x106   :  { %v486_v9 = vadd.f32 %v891_v7, %v389_v4  ;;  %v840_v11 = vpop.f32.mrb[9].mxu0  ;;  %v477_v12 = vpop.f32.mrb[9].mxu1 }
 0x107   :  { %v841_v14 = vadd.f32 %v840_v11, %v839_v6  ;;  %v478_v15 = vadd.f32 %v477_v12, %v381_v8  ;;  %v842_v17 = vpop.f32.mrb[10].mxu0  ;;  %v892_v18 = vpop.f32.mrb[10].mxu1 }
 0x108   :  { %v542_v20 = vmax.f32 %v486_v9, 0.0  ;;  %v489_v21 = vadd.f32 %v892_v18, %v392_v13  ;;  %v843_v23 = vpop.f32.mrb[11].mxu0  ;;  %v480_v24 = vpop.f32.mrb[11].mxu1 }
 0x109   :  { %v540_v25 = vmax.f32 %v478_v15, 0.0  ;;  %v844_v26 = vadd.f32 %v843_v23, %v842_v17  ;;  %v481_v27 = vadd.f32 %v480_v24, %v384_v19  ;;  %v397_v40 = vadd.f32 %v841_v14, %v1141_v2 }
 0x10a   :  { %v590_v29 = vadd.f32 %v778_v10, %v542_v20  ;;  %v543_v30 = vmax.f32 %v489_v21, 0.0  ;;  %v807_v20 = vld [vmem:[%s1260_s3 + $0x20] sm:$0xff]  }
 0x10b   :  { %v588_v31 = vadd.f32 %v774_v16, %v540_v25  ;;  %v541_v32 = vmax.f32 %v481_v27, 0.0  ;;  %v400_v52 = vadd.f32 %v844_v26, %v1141_v2  ;;  %v810_v27 = vld [vmem:[%s1260_s3 + $0x38] sm:$0xff]   ;;  %v791_v33 = vunpack.c.h.bf16 %v807_v20 }
 0x10c   :  { %v758_v34 = vpack.c.bf16 %v590_v29, %v590_v29  ;;  %v591_v35 = vadd.f32 %v779_v22, %v543_v30  ;;  %v790_v30 = vunpack.c.l.bf16 %v807_v20 }
 0x10d   :  { %v756_v36 = vpack.c.bf16 %v588_v31, %v588_v31  ;;  %v589_v37 = vadd.f32 %v775_v28, %v541_v32  ;;  %v845_v38 = vpop.f32.mrb[12].mxu0  ;;  %v895_v39 = vpop.f32.mrb[12].mxu1  ;;  %v809_v32 = vld [vmem:[%s1260_s3 + $0x30] sm:$0xff]  }
 0x10e   :  { %671 = vst.msk [vmem:[%s1261_s4 + $0x8] sm:$0xf] %vm668_vm1, %v758_v34  ;;  %v759_v41 = vpack.c.bf16 %v591_v35, %v591_v35  ;;  %v846_v42 = vpop.f32.mrb[13].mxu0  ;;  %v493_v43 = vpop.f32.mrb[13].mxu1  ;;  %v437_v34 = vadd.f32 %v1134_v60, %v1141_v2  ;;  %v440_v60 = vadd.f32 %v1136_v1, %v1141_v2 }
 0x10f   :  { %669 = vst.msk [vmem:[%s1261_s4] sm:$0xf] %vm668_vm1, %v756_v36  ;;  %v757_v45 = vpack.c.bf16 %v589_v37, %v589_v37  ;;  %v847_v46 = vadd.f32 %v846_v42, %v845_v38  ;;  %v494_v49 = vadd.f32 %v493_v43, %v397_v40  ;;  %v848_v50 = vpop.f32.mrb[14].mxu0  ;;  %v896_v51 = vpop.f32.mrb[14].mxu1  ;;  %v429_v40 = vadd.f32 %v1130_v48, %v1141_v2 }
 0x110   :  { %672 = vst.msk [vmem:[%s1261_s4 + $0xc] sm:$0xf] %vm668_vm1, %v759_v41  ;;  %v849_v54 = vpop.f32.mrb[15].mxu0  ;;  %v496_v55 = vpop.f32.mrb[15].mxu1 }
 0x111   :  { %670 = vst.msk [vmem:[%s1261_s4 + $0x4] sm:$0xf] %vm668_vm1, %v757_v45  ;;  %v405_v57 = vadd.f32 %v847_v46, %v1141_v2  ;;  %v544_v58 = vmax.f32 %v494_v49, 0.0  ;;  %v850_v59 = vadd.f32 %v849_v54, %v848_v50  ;;  %v497_v61 = vadd.f32 %v496_v55, %v400_v52  ;;  %v808_v55 = vld [vmem:[%s1260_s3 + $0x28] sm:$0xff]  }
 0x112   :  { %v803_v45 = vunpack.c.h.bf16 %v810_v27 }
 0x113   :  { %v502_v63 = vadd.f32 %v895_v39, %v405_v57  ;;  %v592_v0 = vadd.f32 %v782_v44, %v544_v58  ;;  %v408_v3 = vadd.f32 %v850_v59, %v1141_v2  ;;  %v545_v4 = vmax.f32 %v497_v61, 0.0 }
 0x114   :  { %v802_v39 = vunpack.c.l.bf16 %v810_v27  ;;  %v798_v44 = vunpack.c.l.bf16 %v809_v32  ;;  %v432_v57 = vadd.f32 %v1132_v53, %v1141_v2  ;;  %v799_v59 = vunpack.c.h.bf16 %v809_v32 }
 0x115   :  { %v546_v6 = vmax.f32 %v502_v63, 0.0  ;;  %v760_v7 = vpack.c.bf16 %v592_v0, %v592_v0  ;;  %v505_v8 = vadd.f32 %v896_v51, %v408_v3  ;;  %v593_v9 = vadd.f32 %v783_v56, %v545_v4  ;;  %v851_v10 = vpop.f32.mrb[16].mxu0  ;;  %v1179_v11 = vpop.f32.mrb[16].mxu1 }
 0x116   :  { %v852_v12 = vpop.f32.mrb[17].mxu0  ;;  %v509_v13 = vpop.f32.mrb[17].mxu1  ;;  %v794_v53 = vunpack.c.l.bf16 %v808_v55 }
 0x117   :  { %v594_v14 = vadd.f32 %v786_v62, %v546_v6  ;;  %673 = vst.msk [vmem:[%s1261_s4 + $0x10] sm:$0xf] %vm668_vm1, %v760_v7  ;;  %v547_v15 = vmax.f32 %v505_v8, 0.0  ;;  %v761_v16 = vpack.c.bf16 %v593_v9, %v593_v9  ;;  %v853_v17 = vadd.f32 %v852_v12, %v851_v10  ;;  %v854_v18 = vpop.f32.mrb[18].mxu0  ;;  %v1185_v19 = vpop.f32.mrb[18].mxu1 }
 0x118   :  { %v855_v21 = vpop.f32.mrb[19].mxu0  ;;  %v512_v22 = vpop.f32.mrb[19].mxu1 }
 0x119   :  { %v762_v23 = vpack.c.bf16 %v594_v14, %v594_v14  ;;  %v595_v24 = vadd.f32 %v787_v5, %v547_v15  ;;  %674 = vst.msk [vmem:[%s1261_s4 + $0x14] sm:$0xf] %vm668_vm1, %v761_v16  ;;  %v413_v25 = vadd.f32 %v853_v17, %v1141_v2  ;;  %v856_v26 = vadd.f32 %v855_v21, %v854_v18 }
 0x11a   :  { %v795_v17 = vunpack.c.h.bf16 %v808_v55 }
 0x11b   :  { %675 = vst.msk [vmem:[%s1261_s4 + $0x18] sm:$0xf] %vm668_vm1, %v762_v23  ;;  %v763_v28 = vpack.c.bf16 %v595_v24, %v595_v24  ;;  %v510_v29 = vadd.f32 %v509_v13, %v413_v25  ;;  %v416_v31 = vadd.f32 %v856_v26, %v1141_v2 }
 0x11d   :  { %676 = vst.msk [vmem:[%s1261_s4 + $0x1c] sm:$0xf] %vm668_vm1, %v763_v28  ;;  %v548_v35 = vmax.f32 %v510_v29, 0.0  ;;  %v513_v36 = vadd.f32 %v512_v22, %v416_v31  ;;  %v857_v37 = vpop.f32.mrb[20].mxu0  ;;  %v903_v38 = vpop.f32.mrb[20].mxu1 }
 0x11e   :  { %v534_v41 = vadd.f32 %v903_v38, %v437_v34  ;;  %v858_v42 = vpop.f32.mrb[21].mxu0  ;;  %v525_v43 = vpop.f32.mrb[21].mxu1 }
 0x11f   :  { %v596_v46 = vadd.f32 %v790_v30, %v548_v35  ;;  %v549_v47 = vmax.f32 %v513_v36, 0.0  ;;  %v859_v49 = vadd.f32 %v858_v42, %v857_v37  ;;  %v526_v50 = vadd.f32 %v525_v43, %v429_v40  ;;  %v860_v51 = vpop.f32.mrb[22].mxu0  ;;  %v904_v52 = vpop.f32.mrb[22].mxu1 }
 0x120   :  { %v554_v54 = vmax.f32 %v534_v41, 0.0  ;;  %v537_v48 = vadd.f32 %v904_v52, %v440_v60  ;;  %v861_v56 = vpop.f32.mrb[23].mxu0  ;;  %v528_v58 = vpop.f32.mrb[23].mxu1 }
 0x121   :  { %v764_v1 = vpack.c.bf16 %v596_v46, %v596_v46  ;;  %v597_v61 = vadd.f32 %v791_v33, %v549_v47  ;;  %v421_v62 = vadd.f32 %v859_v49, %v1141_v2  ;;  %v552_v63 = vmax.f32 %v526_v50, 0.0 }
 0x122   :  { %v602_v0 = vadd.f32 %v802_v39, %v554_v54  ;;  %v555_v3 = vmax.f32 %v537_v48, 0.0  ;;  %v862_v4 = vadd.f32 %v861_v56, %v860_v51  ;;  %v529_v5 = vadd.f32 %v528_v58, %v432_v57 }
 0x123   :  { %677 = vst.msk [vmem:[%s1261_s4 + $0x20] sm:$0xf] %vm668_vm1, %v764_v1  ;;  %v765_v6 = vpack.c.bf16 %v597_v61, %v597_v61  ;;  %v518_v7 = vadd.f32 %v1179_v11, %v421_v62  ;;  %v600_v8 = vadd.f32 %v798_v44, %v552_v63 }
 0x124   :  { %v770_v9 = vpack.c.bf16 %v602_v0, %v602_v0  ;;  %v603_v10 = vadd.f32 %v803_v45, %v555_v3  ;;  %v424_v12 = vadd.f32 %v862_v4, %v1141_v2  ;;  %v553_v13 = vmax.f32 %v529_v5, 0.0 }
 0x125   :  { %678 = vst.msk [vmem:[%s1261_s4 + $0x24] sm:$0xf] %vm668_vm1, %v765_v6  ;;  %v550_v14 = vmax.f32 %v518_v7, 0.0  ;;  %v768_v15 = vpack.c.bf16 %v600_v8, %v600_v8 }
 0x126   :  { %683 = vst.msk [vmem:[%s1261_s4 + $0x38] sm:$0xf] %vm668_vm1, %v770_v9  ;;  %v771_v11 = vpack.c.bf16 %v603_v10, %v603_v10  ;;  %v521_v16 = vadd.f32 %v1185_v19, %v424_v12  ;;  %v601_v18 = vadd.f32 %v799_v59, %v553_v13 }
 0x127   :  { %v598_v20 = vadd.f32 %v794_v53, %v550_v14  ;;  %681 = vst.msk [vmem:[%s1261_s4 + $0x30] sm:$0xf] %vm668_vm1, %v768_v15 }
 0x128   :  { %684 = vst.msk [vmem:[%s1261_s4 + $0x3c] sm:$0xf] %vm668_vm1, %v771_v11  ;;  %v551_v2 = vmax.f32 %v521_v16, 0.0  ;;  %v769_v21 = vpack.c.bf16 %v601_v18, %v601_v18 }
 0x129   :  { %v766_v22 = vpack.c.bf16 %v598_v20, %v598_v20 }
 0x12a   :  { %v599_v23 = vadd.f32 %v795_v17, %v551_v2  ;;  %682 = vst.msk [vmem:[%s1261_s4 + $0x34] sm:$0xf] %vm668_vm1, %v769_v21 }
 0x12b   :  { %679 = vst.msk [vmem:[%s1261_s4 + $0x28] sm:$0xf] %vm668_vm1, %v766_v22 }
 0x12c   :  { %v767_v19 = vpack.c.bf16 %v599_v23, %v599_v23 }
 0x12e   :  { %680 = vst.msk [vmem:[%s1261_s4 + $0x2c] sm:$0xf] %vm668_vm1, %v767_v19 }

// kernel: unet_forward.36
= control target key start
LH: loop header
LB: loop body
LE: loop exit
PB: predicated region body
PF: predicated region fallthrough
CT: control target
= control target key end

     0   :  { %vm171_vm0 = vcmask 519168   ;;  %s304_s1 = inlined_call_operand.vmem [shape: bf16[128,64], index: 1, kind: input, shape index: {}]   ;;  %s305_s0 = inlined_call_operand.vmem [shape: bf16[32,128], index: 0, kind: input, shape index: {}]   ;;  %s306_s2 = inlined_call_operand.vmem [shape: f32[1,64], index: 2, kind: input, shape index: {}]   ;;  %s307_s3 = inlined_call_operand.vmem [shape: bf16[32,64], index: 3, kind: output, shape index: {}]  }
   0x1   :  { %v229_v0 = vld [vmem:[%s304_s1] sm:$0xff]   ;;  %v230_v1 = vld [vmem:[%s304_s1 + $0x8] sm:$0xff]   ;;  %v231_v2 = vld [vmem:[%s304_s1 + $0x10] sm:$0xff]  }
   0x2   :  { %209 = vmatprep.subr.bf16.mxu0 %v229_v0  ;;  %v232_v3 = vld [vmem:[%s304_s1 + $0x18] sm:$0xff]   ;;  %v237_v4 = vld [vmem:[%s305_s0] sm:$0xff]   ;;  %v234_v6 = vld [vmem:[%s304_s1 + $0x28] sm:$0xff]  }
   0x3   :  { %210 = vmatpush3.bf16.msra.mxu0 %v229_v0  ;;  %225 = vmatprep.mubr.bf16.mxu0 %v237_v4  ;;  %v233_v5 = vld [vmem:[%s304_s1 + $0x20] sm:$0xff]   ;;  %v235_v7 = vld [vmem:[%s304_s1 + $0x30] sm:$0xff]   ;;  %v236_v8 = vld [vmem:[%s304_s1 + $0x38] sm:$0xff]  }
   0x4   :  { %211 = vmatprep.subr.bf16.mxu0 %v230_v1  ;;  %v238_v9 = vld [vmem:[%s305_s0 + $0x8] sm:$0xff]   ;;  %v180_v10 = vld [vmem:[%s306_s2] ss:$0 sm:$0xff] }
   0x7   :  { %212 = vmatpush3.bf16.msra.mxu0 %v230_v1 }
   0x8   :  { %213 = vmatprep.subr.bf16.mxu0 %v231_v2 }
   0xb   :  { %214 = vmatpush3.bf16.msra.mxu0 %v231_v2 }
   0xc   :  { %215 = vmatprep.subr.bf16.mxu0 %v232_v3 }
   0xf   :  { %216 = vmatpush3.bf16.msra.mxu0 %v232_v3 }
  0x10   :  { %217 = vmatprep.subr.bf16.mxu0 %v233_v5 }
  0x13   :  { %218 = vmatpush3.bf16.msra.mxu0 %v233_v5 }
  0x14   :  { %219 = vmatprep.subr.bf16.mxu0 %v234_v6 }
  0x17   :  { %220 = vmatpush3.bf16.msra.mxu0 %v234_v6 }
  0x18   :  { %221 = vmatprep.subr.bf16.mxu0 %v235_v7 }
  0x1b   :  { %222 = vmatpush3.bf16.msra.mxu0 %v235_v7 }
  0x1c   :  { %223 = vmatprep.subr.bf16.mxu0 %v236_v8 }
  0x1f   :  { %224 = vmatpush3.bf16.msra.mxu0 %v236_v8 }
  0x22   :  { %226 = vmatmul.mubr.bf16.vlgmr.msra.gmra.mrb[0].mxu0 %v238_v9 }
  0xf5   :  { %v227_v11 = vpop.f32.mrb[0].mxu0 }
  0xf6   :  { %v145_v12 = vadd.f32 %v227_v11, %v180_v10  ;;  %v136_v13 = vpop.f32.mrb[1].mxu0 }
  0xf7   :  { %v137_v14 = vadd.f32 %v180_v10, %v136_v13  ;;  %v228_v15 = vpop.f32.mrb[2].mxu0 }
  0xf8   :  { %v153_v16 = vmax.f32 %v145_v12, 0.0  ;;  %v148_v17 = vadd.f32 %v228_v15, %v180_v10  ;;  %v139_v18 = vpop.f32.mrb[3].mxu0 }
  0xf9   :  { %v151_v19 = vmax.f32 %v137_v14, 0.0  ;;  %v140_v20 = vadd.f32 %v180_v10, %v139_v18 }
  0xfa   :  { %v197_v21 = vpack.c.bf16 %v153_v16, %v153_v16  ;;  %v154_v22 = vmax.f32 %v148_v17, 0.0 }
  0xfb   :  { %v195_v23 = vpack.c.bf16 %v151_v19, %v151_v19  ;;  %v152_v24 = vmax.f32 %v140_v20, 0.0 }
  0xfc   :  { %174 = vst.msk [vmem:[%s307_s3 + $0x8] sm:$0xf] %vm171_vm0, %v197_v21  ;;  %v198_v25 = vpack.c.bf16 %v154_v22, %v154_v22 }
  0xfd   :  { %172 = vst.msk [vmem:[%s307_s3] sm:$0xf] %vm171_vm0, %v195_v23  ;;  %v196_v26 = vpack.c.bf16 %v152_v24, %v152_v24 }
  0xfe   :  { %175 = vst.msk [vmem:[%s307_s3 + $0xc] sm:$0xf] %vm171_vm0, %v198_v25 }
  0xff   :  { %173 = vst.msk [vmem:[%s307_s3 + $0x4] sm:$0xf] %vm171_vm0, %v196_v26 }

// kernel: unet_forward.39
= control target key start
LH: loop header
LB: loop body
LE: loop exit
PB: predicated region body
PF: predicated region fallthrough
CT: control target
= control target key end

     0   :  { %vm375_vm0 = vcmask 523264   ;;  %vm561_vm1 = vcmask 519168   ;;  %s944_s1 = inlined_call_operand.vmem [shape: bf16[576,64], index: 1, kind: input, shape index: {}]   ;;  %s945_s0 = inlined_call_operand.vmem [shape: bf16[32,576], index: 0, kind: input, shape index: {}]   ;;  %s946_s2 = inlined_call_operand.vmem [shape: f32[1,64], index: 2, kind: input, shape index: {}]   ;;  %s947_s3 = inlined_call_operand.vmem [shape: bf16[32,64], index: 3, kind: input, shape index: {}]   ;;  %s948_s4 = inlined_call_operand.vmem [shape: bf16[32,64], index: 4, kind: output, shape index: {}]  }
   0x1   :  { %v710_v0 = vld [vmem:[%s944_s1 + $0x40] sm:$0xff]   ;;  %v714_v4 = vld [vmem:[%s944_s1 + $0x48] sm:$0xff]   ;;  %v718_v8 = vld [vmem:[%s944_s1 + $0x50] sm:$0xff]  }
   0x2   :  { %v711_v1 = vld [vmem:[%s944_s1] sm:$0xff]   ;;  %636 = vmatprep.subr.bf16.mxu0 %v710_v0  ;;  %v715_v5 = vld [vmem:[%s944_s1 + $0x8] sm:$0xff]   ;;  %v719_v9 = vld [vmem:[%s944_s1 + $0x10] sm:$0xff]  }
   0x3   :  { %v712_v2 = vld [vmem:[%s944_s1 + $0xc0] sm:$0xff]   ;;  %637 = vmatpush3.bf16.msra.mxu0 %v711_v1  ;;  %v716_v6 = vld [vmem:[%s944_s1 + $0xc8] sm:$0xff]   ;;  %v720_v10 = vld [vmem:[%s944_s1 + $0xd0] sm:$0xff]  }
   0x4   :  { %v713_v3 = vld [vmem:[%s944_s1 + $0x80] sm:$0xff]   ;;  %664 = vmatprep.subr.bf16.mxu1 %v712_v2  ;;  %638 = vmatprep.subr.bf16.mxu0 %v714_v4  ;;  %v717_v7 = vld [vmem:[%s944_s1 + $0x88] sm:$0xff]   ;;  %v721_v11 = vld [vmem:[%s944_s1 + $0x90] sm:$0xff]  }
   0x5   :  { %665 = vmatpush3.bf16.msra.mxu1 %v713_v3  ;;  %v722_v12 = vld [vmem:[%s944_s1 + $0x58] sm:$0xff]   ;;  %v726_v16 = vld [vmem:[%s944_s1 + $0x60] sm:$0xff]   ;;  %v730_v20 = vld [vmem:[%s944_s1 + $0x68] sm:$0xff]  }
   0x6   :  { %666 = vmatprep.subr.bf16.mxu1 %v716_v6  ;;  %v723_v13 = vld [vmem:[%s944_s1 + $0x18] sm:$0xff]   ;;  %v727_v17 = vld [vmem:[%s944_s1 + $0x20] sm:$0xff]   ;;  %v731_v21 = vld [vmem:[%s944_s1 + $0x28] sm:$0xff]  }
   0x7   :  { %639 = vmatpush3.bf16.msra.mxu0 %v715_v5  ;;  %v724_v14 = vld [vmem:[%s944_s1 + $0xd8] sm:$0xff]   ;;  %v728_v18 = vld [vmem:[%s944_s1 + $0xe0] sm:$0xff]   ;;  %v732_v22 = vld [vmem:[%s944_s1 + $0xe8] sm:$0xff]  }
   0x8   :  { %640 = vmatprep.subr.bf16.mxu0 %v718_v8  ;;  %v725_v15 = vld [vmem:[%s944_s1 + $0x98] sm:$0xff]   ;;  %v729_v19 = vld [vmem:[%s944_s1 + $0xa0] sm:$0xff]   ;;  %v733_v23 = vld [vmem:[%s944_s1 + $0xa8] sm:$0xff]  }
   0x9   :  { %667 = vmatpush3.bf16.msra.mxu1 %v717_v7  ;;  %v734_v24 = vld [vmem:[%s944_s1 + $0x70] sm:$0xff]   ;;  %v738_v28 = vld [vmem:[%s944_s1 + $0x78] sm:$0xff]   ;;  %v745_v34 = vld [vmem:[%s944_s1 + $0x100] sm:$0xff]  }
   0xa   :  { %668 = vmatprep.subr.bf16.mxu1 %v720_v10  ;;  %v735_v25 = vld [vmem:[%s944_s1 + $0x30] sm:$0xff]   ;;  %v739_v29 = vld [vmem:[%s944_s1 + $0x38] sm:$0xff]   ;;  %v748_v36 = vld [vmem:[%s945_s0 + $0xc] ss:$20 sps:$4 sm:$0xff]  }
   0xb   :  { %641 = vmatpush3.bf16.msra.mxu0 %v719_v9  ;;  %v736_v26 = vld [vmem:[%s944_s1 + $0xf0] sm:$0xff]   ;;  %v740_v30 = vld [vmem:[%s944_s1 + $0xf8] sm:$0xff]   ;;  %v749_v37 = vld [vmem:[%s944_s1 + $0x108] sm:$0xff]   ;;  %463 = vmatprep.mubr.bf16.mxu1 %v748_v36 }
   0xc   :  { %642 = vmatprep.subr.bf16.mxu0 %v722_v12  ;;  %v737_v27 = vld [vmem:[%s944_s1 + $0xb0] sm:$0xff]   ;;  %v743_v32 = vld [vmem:[%s945_s0 + $0x4] ss:$20 sps:$4 sm:$0xff]   ;;  %v746_v35 = vld [vmem:[%s945_s0 + $0x8] ss:$20 sps:$4 sm:$0xff]  }
   0xd   :  { %669 = vmatpush3.bf16.msra.mxu1 %v721_v11  ;;  %v741_v31 = vld [vmem:[%s945_s0] ss:$20 sps:$4 sm:$0xff]   ;;  %v744_v33 = vld [vmem:[%s944_s1 + $0xb8] sm:$0xff]   ;;  %414 = vmatprep.mubr.bf16.mxu0 %v743_v32  ;;  %v756_v42 = vld [vmem:[%s945_s0 + $0x30] ss:$20 sps:$4 sm:$0xff]  }
   0xe   :  { %670 = vmatprep.subr.bf16.mxu1 %v724_v14  ;;  %v750_v38 = vld [vmem:[%s945_s0 + $0x2c] ss:$20 sps:$4 sm:$0xff]   ;;  %v752_v39 = vld [vmem:[%s945_s0 + $0x28] ss:$20 sps:$4 sm:$0xff]   ;;  %v753_v40 = vld [vmem:[%s944_s1 + $0x110] sm:$0xff]  }
   0xf   :  { %643 = vmatpush3.bf16.msra.mxu0 %v723_v13  ;;  %v754_v41 = vld [vmem:[%s945_s0 + $0x34] ss:$20 sps:$4 sm:$0xff]   ;;  %v757_v43 = vld [vmem:[%s944_s1 + $0x118] sm:$0xff]   ;;  %v758_v44 = vld [vmem:[%s945_s0 + $0x10] ss:$20 sps:$4 sm:$0xff]  }
  0x10   :  { %644 = vmatprep.subr.bf16.mxu0 %v726_v16  ;;  %v759_v45 = vld [vmem:[%s945_s0 + $0x38] ss:$20 sps:$4 sm:$0xff]   ;;  %v570_v47 = vld [vmem:[%s946_s2] ss:$0 sm:$0xff] }
  0x11   :  { %671 = vmatpush3.bf16.msra.mxu1 %v725_v15  ;;  %v635_v14 = vld [vmem:[%s947_s3 + $0x8] sm:$0xff]   ;;  %v628_v15 = vld [vmem:[%s947_s3] sm:$0xff]  }
  0x12   :  { %672 = vmatprep.subr.bf16.mxu1 %v728_v18 }
  0x13   :  { %645 = vmatpush3.bf16.msra.mxu0 %v727_v17 }
  0x14   :  { %646 = vmatprep.subr.bf16.mxu0 %v730_v20 }
  0x15   :  { %673 = vmatpush3.bf16.msra.mxu1 %v729_v19  ;;  %v633_v19 = vunpack.c.l.bf16 %v635_v14 }
  0x16   :  { %674 = vmatprep.subr.bf16.mxu1 %v732_v22  ;;  %v629_v22 = vunpack.c.l.bf16 %v628_v15 }
  0x17   :  { %647 = vmatpush3.bf16.msra.mxu0 %v731_v21 }
  0x18   :  { %648 = vmatprep.subr.bf16.mxu0 %v734_v24 }
  0x19   :  { %675 = vmatpush3.bf16.msra.mxu1 %v733_v23 }
  0x1a   :  { %676 = vmatprep.subr.bf16.mxu1 %v736_v26  ;;  %v634_v26 = vunpack.c.h.bf16 %v635_v14 }
  0x1b   :  { %649 = vmatpush3.bf16.msra.mxu0 %v735_v25 }
  0x1c   :  { %650 = vmatprep.subr.bf16.mxu0 %v738_v28 }
  0x1d   :  { %677 = vmatpush3.bf16.msra.mxu1 %v737_v27 }
  0x1e   :  { %678 = vmatprep.subr.bf16.mxu1 %v740_v30  ;;  %v630_v30 = vunpack.c.h.bf16 %v628_v15 }
  0x1f   :  { %651 = vmatpush3.bf16.msra.mxu0 %v739_v29 }
  0x20   :  { %698 = vmatprep.subr.bf16.mxu0 %v745_v34 }
  0x21   :  { %679 = vmatpush3.bf16.msra.mxu1 %v744_v33 }
  0x22   :  { %415 = vmatmul.mubr.bf16.vlgmr.msra.gmra.mrb[0].mxu0 %v741_v31 }
  0x23   :  { %699 = vmatpush3.bf16.msra.mxu0 %v745_v34  ;;  %422 = vmatprep.mubr.bf16.mxu0 %v750_v38 }
  0x24   :  { %464 = vmatmul.mubr.bf16.vlgmr.msra.gmra.mrb[0].mxu1 %v746_v35  ;;  %700 = vmatprep.subr.bf16.mxu0 %v749_v37 }
  0x25   :  { %471 = vmatprep.mubr.bf16.mxu1 %v754_v41 }
  0x27   :  { %701 = vmatpush3.bf16.msra.mxu0 %v749_v37 }
  0x28   :  { %702 = vmatprep.subr.bf16.mxu0 %v753_v40 }
  0x2a   :  { %423 = vmatmul.mubr.bf16.gmra.mrb[4].mxu0 %v752_v39 }
  0x2b   :  { %706 = vmatprep.mubr.msk.bf16.mxu0 %vm375_vm0, %v758_v44  ;;  %703 = vmatpush3.bf16.msra.mxu0 %v753_v40 }
  0x2c   :  { %472 = vmatmul.mubr.bf16.gmra.mrb[4].mxu1 %v756_v42  ;;  %704 = vmatprep.subr.bf16.mxu0 %v757_v43 }
  0x2f   :  { %705 = vmatpush3.bf16.msra.mxu0 %v757_v43 }
  0x32   :  { %707 = vmatmul.mubr.msk.bf16.vlgmr.msra.gmra.mrb[8].mxu0 %vm375_vm0, %v759_v45 }
  0xf5   :  { %v652_v46 = vpop.f32.mrb[0].mxu0 }
  0xf6   :  { %v653_v48 = vpop.f32.mrb[1].mxu0 }
  0xf7   :  { %v654_v49 = vadd.f32 %v653_v48, %v652_v46  ;;  %v655_v50 = vpop.f32.mrb[2].mxu0  ;;  %v680_v51 = vpop.f32.mrb[0].mxu1 }
  0xf8   :  { %v656_v52 = vpop.f32.mrb[3].mxu0  ;;  %v681_v55 = vpop.f32.mrb[1].mxu1 }
  0xf9   :  { %v417_v53 = vadd.f32 %v654_v49, %v570_v47  ;;  %v657_v54 = vadd.f32 %v656_v52, %v655_v50  ;;  %v682_v56 = vadd.f32 %v681_v55, %v680_v51  ;;  %v683_v57 = vpop.f32.mrb[2].mxu1 }
  0xfa   :  { %v684_v59 = vpop.f32.mrb[3].mxu1 }
  0xfb   :  { %v420_v58 = vadd.f32 %v657_v54, %v570_v47  ;;  %v685_v60 = vadd.f32 %v684_v59, %v683_v57  ;;  %v466_v61 = vadd.f32 %v682_v56, %v417_v53 }
  0xfd   :  { %v658_v62 = vpop.f32.mrb[4].mxu0  ;;  %v469_v0 = vadd.f32 %v685_v60, %v420_v58 }
  0xfe   :  { %v659_v63 = vpop.f32.mrb[5].mxu0 }
  0xff   :  { %v660_v1 = vadd.f32 %v659_v63, %v658_v62  ;;  %v661_v2 = vpop.f32.mrb[6].mxu0  ;;  %v686_v3 = vpop.f32.mrb[4].mxu1 }
 0x100   :  { %v662_v4 = vpop.f32.mrb[7].mxu0  ;;  %v687_v7 = vpop.f32.mrb[5].mxu1 }
 0x101   :  { %v425_v5 = vadd.f32 %v660_v1, %v570_v47  ;;  %v663_v6 = vadd.f32 %v662_v4, %v661_v2  ;;  %v688_v8 = vadd.f32 %v687_v7, %v686_v3  ;;  %v689_v9 = vpop.f32.mrb[6].mxu1 }
 0x102   :  { %v690_v11 = vpop.f32.mrb[7].mxu1 }
 0x103   :  { %v428_v10 = vadd.f32 %v663_v6, %v570_v47  ;;  %v691_v12 = vadd.f32 %v690_v11, %v689_v9  ;;  %v474_v13 = vadd.f32 %v688_v8, %v425_v5 }
 0x105   :  { %v708_v16 = vpop.f32.mrb[8].mxu0  ;;  %v477_v17 = vadd.f32 %v691_v12, %v428_v10 }
 0x106   :  { %v523_v18 = vadd.f32 %v708_v16, %v474_v13  ;;  %v514_v20 = vpop.f32.mrb[9].mxu0 }
 0x107   :  { %v515_v21 = vadd.f32 %v514_v20, %v466_v61  ;;  %v709_v23 = vpop.f32.mrb[10].mxu0 }
 0x108   :  { %v531_v24 = vmax.f32 %v523_v18, 0.0  ;;  %v526_v25 = vadd.f32 %v709_v23, %v477_v17  ;;  %v517_v27 = vpop.f32.mrb[11].mxu0 }
 0x109   :  { %v529_v28 = vmax.f32 %v515_v21, 0.0  ;;  %v518_v29 = vadd.f32 %v517_v27, %v469_v0 }
 0x10a   :  { %v543_v31 = vadd.f32 %v633_v19, %v531_v24  ;;  %v532_v32 = vmax.f32 %v526_v25, 0.0 }
 0x10b   :  { %v541_v33 = vadd.f32 %v629_v22, %v529_v28  ;;  %v530_v34 = vmax.f32 %v518_v29, 0.0 }
 0x10c   :  { %v625_v35 = vpack.c.bf16 %v543_v31, %v543_v31  ;;  %v544_v36 = vadd.f32 %v634_v26, %v532_v32 }
 0x10d   :  { %v623_v37 = vpack.c.bf16 %v541_v33, %v541_v33  ;;  %v542_v38 = vadd.f32 %v630_v30, %v530_v34 }
 0x10e   :  { %564 = vst.msk [vmem:[%s948_s4 + $0x8] sm:$0xf] %vm561_vm1, %v625_v35  ;;  %v626_v39 = vpack.c.bf16 %v544_v36, %v544_v36 }
 0x10f   :  { %562 = vst.msk [vmem:[%s948_s4] sm:$0xf] %vm561_vm1, %v623_v37  ;;  %v624_v40 = vpack.c.bf16 %v542_v38, %v542_v38 }
 0x110   :  { %565 = vst.msk [vmem:[%s948_s4 + $0xc] sm:$0xf] %vm561_vm1, %v626_v39 }
 0x111   :  { %563 = vst.msk [vmem:[%s948_s4 + $0x4] sm:$0xf] %vm561_vm1, %v624_v40 }

// kernel: unet_forward.40
= control target key start
LH: loop header
LB: loop body
LE: loop exit
PB: predicated region body
PF: predicated region fallthrough
CT: control target
= control target key end

     0   :  { %s341_s1 = inlined_call_operand.vmem [shape: bf16[256,128], index: 1, kind: input, shape index: {}]   ;;  %s342_s0 = inlined_call_operand.vmem [shape: bf16[8,256], index: 0, kind: input, shape index: {}]   ;;  %s343_s2 = inlined_call_operand.vmem [shape: f32[1,128], index: 2, kind: input, shape index: {}]   ;;  %s344_s3 = inlined_call_operand.vmem [shape: bf16[8,128], index: 3, kind: output, shape index: {}]  }
   0x1   :  { %v246_v0 = vld [vmem:[%s341_s1 + $0x40] sm:$0xff]   ;;  %v248_v2 = vld [vmem:[%s341_s1 + $0x48] sm:$0xff]   ;;  %v250_v4 = vld [vmem:[%s341_s1 + $0x50] sm:$0xff]  }
   0x2   :  { %v247_v1 = vld [vmem:[%s341_s1] sm:$0xff]   ;;  %224 = vmatprep.subr.bf16.mxu0 %v246_v0  ;;  %v249_v3 = vld [vmem:[%s341_s1 + $0x8] sm:$0xff]   ;;  %v251_v5 = vld [vmem:[%s341_s1 + $0x10] sm:$0xff]  }
   0x3   :  { %225 = vmatpush3.bf16.msra.mxu0 %v247_v1  ;;  %v252_v6 = vld [vmem:[%s341_s1 + $0x58] sm:$0xff]   ;;  %v254_v8 = vld [vmem:[%s341_s1 + $0x60] sm:$0xff]   ;;  %v256_v10 = vld [vmem:[%s341_s1 + $0x68] sm:$0xff]  }
   0x4   :  { %226 = vmatprep.subr.bf16.mxu0 %v248_v2  ;;  %v253_v7 = vld [vmem:[%s341_s1 + $0x18] sm:$0xff]   ;;  %v255_v9 = vld [vmem:[%s341_s1 + $0x20] sm:$0xff]   ;;  %v257_v13 = vld [vmem:[%s341_s1 + $0x28] sm:$0xff]  }
   0x5   :  { %v15_v11 = vld [vmem:[%s342_s0] sm:$0xff]  ;;  %v258_v14 = vld [vmem:[%s341_s1 + $0x70] sm:$0xff]   ;;  %v260_v16 = vld [vmem:[%s341_s1 + $0x78] sm:$0xff]  }
   0x6   :  { %v207_v12 = vcombine.high %v15_v11, %v15_v11  ;;  %v259_v15 = vld [vmem:[%s341_s1 + $0x30] sm:$0xff]   ;;  %v261_v17 = vld [vmem:[%s341_s1 + $0x38] sm:$0xff]   ;;  %v206_v18 = vcombine.low %v15_v11, %v15_v11  ;;  %v205_v20 = vld [vmem:[%s343_s2] ss:$0 sm:$0xff] }
   0x7   :  { %227 = vmatpush3.bf16.msra.mxu0 %v249_v3 }
   0x8   :  { %228 = vmatprep.subr.bf16.mxu0 %v250_v4  ;;  %190 = vmatprep.mubr.bf16.mxu0 %v207_v12 }
   0xb   :  { %229 = vmatpush3.bf16.msra.mxu0 %v251_v5 }
   0xc   :  { %230 = vmatprep.subr.bf16.mxu0 %v252_v6 }
   0xf   :  { %231 = vmatpush3.bf16.msra.mxu0 %v253_v7 }
  0x10   :  { %232 = vmatprep.subr.bf16.mxu0 %v254_v8 }
  0x13   :  { %233 = vmatpush3.bf16.msra.mxu0 %v255_v9 }
  0x14   :  { %234 = vmatprep.subr.bf16.mxu0 %v256_v10 }
  0x17   :  { %235 = vmatpush3.bf16.msra.mxu0 %v257_v13 }
  0x18   :  { %236 = vmatprep.subr.bf16.mxu0 %v258_v14 }
  0x1b   :  { %237 = vmatpush3.bf16.msra.mxu0 %v259_v15 }
  0x1c   :  { %238 = vmatprep.subr.bf16.mxu0 %v260_v16 }
  0x1f   :  { %239 = vmatpush3.bf16.msra.mxu0 %v261_v17 }
  0x22   :  { %191 = vmatmul.mubr.bf16.vlgmr.msra.gmra.mrb[0].mxu0 %v206_v18 }
  0xf5   :  { %v240_v19 = vpop.f32.mrb[0].mxu0 }
  0xf6   :  { %v241_v21 = vpop.f32.mrb[1].mxu0 }
  0xf7   :  { %v242_v22 = vadd.f32 %v241_v21, %v240_v19  ;;  %v243_v23 = vpop.f32.mrb[2].mxu0 }
  0xf8   :  { %v244_v24 = vpop.f32.mrb[3].mxu0 }
  0xf9   :  { %v193_v25 = vadd.f32 %v242_v22, %v205_v20 }
  0xfb   :  { %v198_v26 = vmax.f32 %v193_v25, 0.0 }
  0xfd   :  { %v199_v27 = vpack.c.bf16 %v198_v26, %v198_v26 }
  0xff   :  { %200 = vst [vmem:[%s344_s3] sm:$0xf] %v199_v27 }

// kernel: unet_forward.37
= control target key start
LH: loop header
LB: loop body
LE: loop exit
PB: predicated region body
PF: predicated region fallthrough
CT: control target
= control target key end

     0   :  { %vm372_vm0 = vcmask 523264   ;;  %vm546_vm1 = vcmask 519168   ;;  %s909_s1 = inlined_call_operand.vmem [shape: bf16[576,64], index: 1, kind: input, shape index: {}]   ;;  %s910_s0 = inlined_call_operand.vmem [shape: bf16[32,576], index: 0, kind: input, shape index: {}]   ;;  %s911_s2 = inlined_call_operand.vmem [shape: f32[1,64], index: 2, kind: input, shape index: {}]   ;;  %s912_s3 = inlined_call_operand.vmem [shape: bf16[32,64], index: 3, kind: output, shape index: {}]  }
   0x1   :  { %v686_v0 = vld [vmem:[%s909_s1 + $0x40] sm:$0xff]   ;;  %v690_v4 = vld [vmem:[%s909_s1 + $0x48] sm:$0xff]   ;;  %v694_v8 = vld [vmem:[%s909_s1 + $0x50] sm:$0xff]  }
   0x2   :  { %v687_v1 = vld [vmem:[%s909_s1] sm:$0xff]   ;;  %612 = vmatprep.subr.bf16.mxu0 %v686_v0  ;;  %v691_v5 = vld [vmem:[%s909_s1 + $0x8] sm:$0xff]   ;;  %v695_v9 = vld [vmem:[%s909_s1 + $0x10] sm:$0xff]  }
   0x3   :  { %v688_v2 = vld [vmem:[%s909_s1 + $0xc0] sm:$0xff]   ;;  %613 = vmatpush3.bf16.msra.mxu0 %v687_v1  ;;  %v692_v6 = vld [vmem:[%s909_s1 + $0xc8] sm:$0xff]   ;;  %v696_v10 = vld [vmem:[%s909_s1 + $0xd0] sm:$0xff]  }
   0x4   :  { %v689_v3 = vld [vmem:[%s909_s1 + $0x80] sm:$0xff]   ;;  %640 = vmatprep.subr.bf16.mxu1 %v688_v2  ;;  %614 = vmatprep.subr.bf16.mxu0 %v690_v4  ;;  %v693_v7 = vld [vmem:[%s909_s1 + $0x88] sm:$0xff]   ;;  %v697_v11 = vld [vmem:[%s909_s1 + $0x90] sm:$0xff]  }
   0x5   :  { %641 = vmatpush3.bf16.msra.mxu1 %v689_v3  ;;  %v698_v12 = vld [vmem:[%s909_s1 + $0x58] sm:$0xff]   ;;  %v702_v16 = vld [vmem:[%s909_s1 + $0x60] sm:$0xff]   ;;  %v706_v20 = vld [vmem:[%s909_s1 + $0x68] sm:$0xff]  }
   0x6   :  { %642 = vmatprep.subr.bf16.mxu1 %v692_v6  ;;  %v699_v13 = vld [vmem:[%s909_s1 + $0x18] sm:$0xff]   ;;  %v703_v17 = vld [vmem:[%s909_s1 + $0x20] sm:$0xff]   ;;  %v707_v21 = vld [vmem:[%s909_s1 + $0x28] sm:$0xff]  }
   0x7   :  { %615 = vmatpush3.bf16.msra.mxu0 %v691_v5  ;;  %v700_v14 = vld [vmem:[%s909_s1 + $0xd8] sm:$0xff]   ;;  %v704_v18 = vld [vmem:[%s909_s1 + $0xe0] sm:$0xff]   ;;  %v708_v22 = vld [vmem:[%s909_s1 + $0xe8] sm:$0xff]  }
   0x8   :  { %616 = vmatprep.subr.bf16.mxu0 %v694_v8  ;;  %v701_v15 = vld [vmem:[%s909_s1 + $0x98] sm:$0xff]   ;;  %v705_v19 = vld [vmem:[%s909_s1 + $0xa0] sm:$0xff]   ;;  %v709_v23 = vld [vmem:[%s909_s1 + $0xa8] sm:$0xff]  }
   0x9   :  { %643 = vmatpush3.bf16.msra.mxu1 %v693_v7  ;;  %v710_v24 = vld [vmem:[%s909_s1 + $0x70] sm:$0xff]   ;;  %v714_v28 = vld [vmem:[%s909_s1 + $0x78] sm:$0xff]   ;;  %v721_v34 = vld [vmem:[%s909_s1 + $0x100] sm:$0xff]  }
   0xa   :  { %644 = vmatprep.subr.bf16.mxu1 %v696_v10  ;;  %v711_v25 = vld [vmem:[%s909_s1 + $0x30] sm:$0xff]   ;;  %v715_v29 = vld [vmem:[%s909_s1 + $0x38] sm:$0xff]   ;;  %v724_v36 = vld [vmem:[%s910_s0 + $0xc] ss:$20 sps:$4 sm:$0xff]  }
   0xb   :  { %617 = vmatpush3.bf16.msra.mxu0 %v695_v9  ;;  %v712_v26 = vld [vmem:[%s909_s1 + $0xf0] sm:$0xff]   ;;  %v716_v30 = vld [vmem:[%s909_s1 + $0xf8] sm:$0xff]   ;;  %v725_v37 = vld [vmem:[%s909_s1 + $0x108] sm:$0xff]   ;;  %460 = vmatprep.mubr.bf16.mxu1 %v724_v36 }
   0xc   :  { %618 = vmatprep.subr.bf16.mxu0 %v698_v12  ;;  %v713_v27 = vld [vmem:[%s909_s1 + $0xb0] sm:$0xff]   ;;  %v719_v32 = vld [vmem:[%s910_s0 + $0x4] ss:$20 sps:$4 sm:$0xff]   ;;  %v722_v35 = vld [vmem:[%s910_s0 + $0x8] ss:$20 sps:$4 sm:$0xff]  }
   0xd   :  { %645 = vmatpush3.bf16.msra.mxu1 %v697_v11  ;;  %v717_v31 = vld [vmem:[%s910_s0] ss:$20 sps:$4 sm:$0xff]   ;;  %v720_v33 = vld [vmem:[%s909_s1 + $0xb8] sm:$0xff]   ;;  %411 = vmatprep.mubr.bf16.mxu0 %v719_v32  ;;  %v732_v42 = vld [vmem:[%s910_s0 + $0x30] ss:$20 sps:$4 sm:$0xff]  }
   0xe   :  { %646 = vmatprep.subr.bf16.mxu1 %v700_v14  ;;  %v726_v38 = vld [vmem:[%s910_s0 + $0x2c] ss:$20 sps:$4 sm:$0xff]   ;;  %v728_v39 = vld [vmem:[%s910_s0 + $0x28] ss:$20 sps:$4 sm:$0xff]   ;;  %v729_v40 = vld [vmem:[%s909_s1 + $0x110] sm:$0xff]  }
   0xf   :  { %619 = vmatpush3.bf16.msra.mxu0 %v699_v13  ;;  %v730_v41 = vld [vmem:[%s910_s0 + $0x34] ss:$20 sps:$4 sm:$0xff]   ;;  %v733_v43 = vld [vmem:[%s909_s1 + $0x118] sm:$0xff]   ;;  %v734_v44 = vld [vmem:[%s910_s0 + $0x10] ss:$20 sps:$4 sm:$0xff]  }
  0x10   :  { %620 = vmatprep.subr.bf16.mxu0 %v702_v16  ;;  %v735_v45 = vld [vmem:[%s910_s0 + $0x38] ss:$20 sps:$4 sm:$0xff]   ;;  %v555_v47 = vld [vmem:[%s911_s2] ss:$0 sm:$0xff] }
  0x11   :  { %647 = vmatpush3.bf16.msra.mxu1 %v701_v15 }
  0x12   :  { %648 = vmatprep.subr.bf16.mxu1 %v704_v18 }
  0x13   :  { %621 = vmatpush3.bf16.msra.mxu0 %v703_v17 }
  0x14   :  { %622 = vmatprep.subr.bf16.mxu0 %v706_v20 }
  0x15   :  { %649 = vmatpush3.bf16.msra.mxu1 %v705_v19 }
  0x16   :  { %650 = vmatprep.subr.bf16.mxu1 %v708_v22 }
  0x17   :  { %623 = vmatpush3.bf16.msra.mxu0 %v707_v21 }
  0x18   :  { %624 = vmatprep.subr.bf16.mxu0 %v710_v24 }
  0x19   :  { %651 = vmatpush3.bf16.msra.mxu1 %v709_v23 }
  0x1a   :  { %652 = vmatprep.subr.bf16.mxu1 %v712_v26 }
  0x1b   :  { %625 = vmatpush3.bf16.msra.mxu0 %v711_v25 }
  0x1c   :  { %626 = vmatprep.subr.bf16.mxu0 %v714_v28 }
  0x1d   :  { %653 = vmatpush3.bf16.msra.mxu1 %v713_v27 }
  0x1e   :  { %654 = vmatprep.subr.bf16.mxu1 %v716_v30 }
  0x1f   :  { %627 = vmatpush3.bf16.msra.mxu0 %v715_v29 }
  0x20   :  { %674 = vmatprep.subr.bf16.mxu0 %v721_v34 }
  0x21   :  { %655 = vmatpush3.bf16.msra.mxu1 %v720_v33 }
  0x22   :  { %412 = vmatmul.mubr.bf16.vlgmr.msra.gmra.mrb[0].mxu0 %v717_v31 }
  0x23   :  { %675 = vmatpush3.bf16.msra.mxu0 %v721_v34  ;;  %419 = vmatprep.mubr.bf16.mxu0 %v726_v38 }
  0x24   :  { %461 = vmatmul.mubr.bf16.vlgmr.msra.gmra.mrb[0].mxu1 %v722_v35  ;;  %676 = vmatprep.subr.bf16.mxu0 %v725_v37 }
  0x25   :  { %468 = vmatprep.mubr.bf16.mxu1 %v730_v41 }
  0x27   :  { %677 = vmatpush3.bf16.msra.mxu0 %v725_v37 }
  0x28   :  { %678 = vmatprep.subr.bf16.mxu0 %v729_v40 }
  0x2a   :  { %420 = vmatmul.mubr.bf16.gmra.mrb[4].mxu0 %v728_v39 }
  0x2b   :  { %682 = vmatprep.mubr.msk.bf16.mxu0 %vm372_vm0, %v734_v44  ;;  %679 = vmatpush3.bf16.msra.mxu0 %v729_v40 }
  0x2c   :  { %469 = vmatmul.mubr.bf16.gmra.mrb[4].mxu1 %v732_v42  ;;  %680 = vmatprep.subr.bf16.mxu0 %v733_v43 }
  0x2f   :  { %681 = vmatpush3.bf16.msra.mxu0 %v733_v43 }
  0x32   :  { %683 = vmatmul.mubr.msk.bf16.vlgmr.msra.gmra.mrb[8].mxu0 %vm372_vm0, %v735_v45 }
  0xf5   :  { %v628_v46 = vpop.f32.mrb[0].mxu0 }
  0xf6   :  { %v629_v48 = vpop.f32.mrb[1].mxu0 }
  0xf7   :  { %v630_v49 = vadd.f32 %v629_v48, %v628_v46  ;;  %v631_v50 = vpop.f32.mrb[2].mxu0  ;;  %v656_v51 = vpop.f32.mrb[0].mxu1 }
  0xf8   :  { %v632_v52 = vpop.f32.mrb[3].mxu0  ;;  %v657_v55 = vpop.f32.mrb[1].mxu1 }
  0xf9   :  { %v414_v53 = vadd.f32 %v630_v49, %v555_v47  ;;  %v633_v54 = vadd.f32 %v632_v52, %v631_v50  ;;  %v658_v56 = vadd.f32 %v657_v55, %v656_v51  ;;  %v659_v57 = vpop.f32.mrb[2].mxu1 }
  0xfa   :  { %v660_v59 = vpop.f32.mrb[3].mxu1 }
  0xfb   :  { %v417_v58 = vadd.f32 %v633_v54, %v555_v47  ;;  %v661_v60 = vadd.f32 %v660_v59, %v659_v57  ;;  %v463_v61 = vadd.f32 %v658_v56, %v414_v53 }
  0xfd   :  { %v634_v62 = vpop.f32.mrb[4].mxu0  ;;  %v466_v0 = vadd.f32 %v661_v60, %v417_v58 }
  0xfe   :  { %v635_v63 = vpop.f32.mrb[5].mxu0 }
  0xff   :  { %v636_v1 = vadd.f32 %v635_v63, %v634_v62  ;;  %v637_v2 = vpop.f32.mrb[6].mxu0  ;;  %v662_v3 = vpop.f32.mrb[4].mxu1 }
 0x100   :  { %v638_v4 = vpop.f32.mrb[7].mxu0  ;;  %v663_v7 = vpop.f32.mrb[5].mxu1 }
 0x101   :  { %v422_v5 = vadd.f32 %v636_v1, %v555_v47  ;;  %v639_v6 = vadd.f32 %v638_v4, %v637_v2  ;;  %v664_v8 = vadd.f32 %v663_v7, %v662_v3  ;;  %v665_v9 = vpop.f32.mrb[6].mxu1 }
 0x102   :  { %v666_v11 = vpop.f32.mrb[7].mxu1 }
 0x103   :  { %v425_v10 = vadd.f32 %v639_v6, %v555_v47  ;;  %v667_v12 = vadd.f32 %v666_v11, %v665_v9  ;;  %v471_v13 = vadd.f32 %v664_v8, %v422_v5 }
 0x105   :  { %v684_v14 = vpop.f32.mrb[8].mxu0  ;;  %v474_v15 = vadd.f32 %v667_v12, %v425_v10 }
 0x106   :  { %v520_v16 = vadd.f32 %v684_v14, %v471_v13  ;;  %v511_v17 = vpop.f32.mrb[9].mxu0 }
 0x107   :  { %v512_v18 = vadd.f32 %v511_v17, %v463_v61  ;;  %v685_v19 = vpop.f32.mrb[10].mxu0 }
 0x108   :  { %v528_v20 = vmax.f32 %v520_v16, 0.0  ;;  %v523_v21 = vadd.f32 %v685_v19, %v474_v15  ;;  %v514_v22 = vpop.f32.mrb[11].mxu0 }
 0x109   :  { %v526_v23 = vmax.f32 %v512_v18, 0.0  ;;  %v515_v24 = vadd.f32 %v514_v22, %v466_v0 }
 0x10a   :  { %v610_v25 = vpack.c.bf16 %v528_v20, %v528_v20  ;;  %v529_v26 = vmax.f32 %v523_v21, 0.0 }
 0x10b   :  { %v608_v27 = vpack.c.bf16 %v526_v23, %v526_v23  ;;  %v527_v28 = vmax.f32 %v515_v24, 0.0 }
 0x10c   :  { %549 = vst.msk [vmem:[%s912_s3 + $0x8] sm:$0xf] %vm546_vm1, %v610_v25  ;;  %v611_v29 = vpack.c.bf16 %v529_v26, %v529_v26 }
 0x10d   :  { %547 = vst.msk [vmem:[%s912_s3] sm:$0xf] %vm546_vm1, %v608_v27  ;;  %v609_v30 = vpack.c.bf16 %v527_v28, %v527_v28 }
 0x10e   :  { %550 = vst.msk [vmem:[%s912_s3 + $0xc] sm:$0xf] %vm546_vm1, %v611_v29 }
 0x10f   :  { %548 = vst.msk [vmem:[%s912_s3 + $0x4] sm:$0xf] %vm546_vm1, %v609_v30 }

// kernel: unet_forward.41
= control target key start
LH: loop header
LB: loop body
LE: loop exit
PB: predicated region body
PF: predicated region fallthrough
CT: control target
= control target key end

     0   :  { %vm1125_vm0 = vmmov 0   ;;  %s1383_s1 = inlined_call_operand.vmem [shape: bf16[1152,128], index: 1, kind: input, shape index: {}]   ;;  %s1384_s0 = inlined_call_operand.vmem [shape: bf16[8,1152], index: 0, kind: input, shape index: {}]   ;;  %s1385_s2 = inlined_call_operand.vmem [shape: f32[1,128], index: 2, kind: input, shape index: {}]   ;;  %s1386_s3 = inlined_call_operand.vmem [shape: bf16[8,128], index: 3, kind: output, shape index: {}]  }
   0x1   :  { %v1043_v0 = vld [vmem:[%s1383_s1 + $0x40] sm:$0xff]   ;;  %v1047_v4 = vld [vmem:[%s1383_s1 + $0x48] sm:$0xff]   ;;  %v1051_v8 = vld [vmem:[%s1383_s1 + $0x50] sm:$0xff]  }
   0x2   :  { %v1044_v1 = vld [vmem:[%s1383_s1] sm:$0xff]   ;;  %924 = vmatprep.subr.bf16.mxu0 %v1043_v0  ;;  %v1048_v5 = vld [vmem:[%s1383_s1 + $0x8] sm:$0xff]   ;;  %v1052_v9 = vld [vmem:[%s1383_s1 + $0x10] sm:$0xff]  }
   0x3   :  { %v1045_v2 = vld [vmem:[%s1383_s1 + $0xc0] sm:$0xff]   ;;  %925 = vmatpush3.bf16.msra.mxu0 %v1044_v1  ;;  %v1049_v6 = vld [vmem:[%s1383_s1 + $0xc8] sm:$0xff]   ;;  %v1053_v10 = vld [vmem:[%s1383_s1 + $0xd0] sm:$0xff]  }
   0x4   :  { %v1046_v3 = vld [vmem:[%s1383_s1 + $0x80] sm:$0xff]   ;;  %946 = vmatprep.subr.bf16.mxu1 %v1045_v2  ;;  %926 = vmatprep.subr.bf16.mxu0 %v1047_v4  ;;  %v1050_v7 = vld [vmem:[%s1383_s1 + $0x88] sm:$0xff]   ;;  %v1054_v11 = vld [vmem:[%s1383_s1 + $0x90] sm:$0xff]  }
   0x5   :  { %947 = vmatpush3.bf16.msra.mxu1 %v1046_v3  ;;  %v1055_v12 = vld [vmem:[%s1383_s1 + $0x58] sm:$0xff]   ;;  %v1059_v16 = vld [vmem:[%s1383_s1 + $0x60] sm:$0xff]   ;;  %v1063_v20 = vld [vmem:[%s1383_s1 + $0x68] sm:$0xff]  }
   0x6   :  { %948 = vmatprep.subr.bf16.mxu1 %v1049_v6  ;;  %v1056_v13 = vld [vmem:[%s1383_s1 + $0x18] sm:$0xff]   ;;  %v1060_v17 = vld [vmem:[%s1383_s1 + $0x20] sm:$0xff]   ;;  %v1064_v21 = vld [vmem:[%s1383_s1 + $0x28] sm:$0xff]  }
   0x7   :  { %927 = vmatpush3.bf16.msra.mxu0 %v1048_v5  ;;  %v1057_v14 = vld [vmem:[%s1383_s1 + $0xd8] sm:$0xff]   ;;  %v1061_v18 = vld [vmem:[%s1383_s1 + $0xe0] sm:$0xff]   ;;  %v1065_v22 = vld [vmem:[%s1383_s1 + $0xe8] sm:$0xff]  }
   0x8   :  { %928 = vmatprep.subr.bf16.mxu0 %v1051_v8  ;;  %v1058_v15 = vld [vmem:[%s1383_s1 + $0x98] sm:$0xff]   ;;  %v1062_v19 = vld [vmem:[%s1383_s1 + $0xa0] sm:$0xff]   ;;  %v1066_v23 = vld [vmem:[%s1383_s1 + $0xa8] sm:$0xff]  }
   0x9   :  { %949 = vmatpush3.bf16.msra.mxu1 %v1050_v7  ;;  %v1067_v24 = vld [vmem:[%s1383_s1 + $0x70] sm:$0xff]   ;;  %v1071_v28 = vld [vmem:[%s1383_s1 + $0x78] sm:$0xff]   ;;  %v15_v31 = vld [vmem:[%s1384_s0] sm:$0xff] }
   0xa   :  { %950 = vmatprep.subr.bf16.mxu1 %v1053_v10  ;;  %v1068_v25 = vld [vmem:[%s1383_s1 + $0x30] sm:$0xff]   ;;  %v1072_v29 = vld [vmem:[%s1383_s1 + $0x38] sm:$0xff]   ;;  %v843_v32 = vcombine.low %v15_v31, %v15_v31  ;;  %v844_v33 = vcombine.high %v15_v31, %v15_v31  ;;  %v1077_v35 = vld [vmem:[%s1383_s1 + $0x140] sm:$0xff]  }
   0xb   :  { %929 = vmatpush3.bf16.msra.mxu0 %v1052_v9  ;;  %v1069_v26 = vld [vmem:[%s1383_s1 + $0xf0] sm:$0xff]   ;;  %v1073_v30 = vld [vmem:[%s1383_s1 + $0xf8] sm:$0xff]   ;;  %v16_v36 = vld [vmem:[%s1384_s0 + $0x8] sm:$0xff]  ;;  %v1124_v9 = vmov 0.0  }
   0xc   :  { %930 = vmatprep.subr.bf16.mxu0 %v1055_v12  ;;  %v1070_v27 = vld [vmem:[%s1383_s1 + $0xb0] sm:$0xff]   ;;  %v1076_v34 = vld [vmem:[%s1383_s1 + $0xb8] sm:$0xff]   ;;  %667 = vmatprep.mubr.bf16.mxu0 %v844_v33  ;;  %v845_v37 = vcombine.low %v16_v36, %v16_v36  ;;  %v846_v38 = vcombine.high %v16_v36, %v16_v36  ;;  %v1080_v39 = vld [vmem:[%s1383_s1 + $0x100] sm:$0xff]  }
   0xd   :  { %951 = vmatpush3.bf16.msra.mxu1 %v1054_v11  ;;  %v1081_v40 = vld [vmem:[%s1383_s1 + $0x1c0] sm:$0xff]   ;;  %v1083_v42 = vld [vmem:[%s1383_s1 + $0x148] sm:$0xff]   ;;  %v1087_v46 = vld [vmem:[%s1383_s1 + $0x150] sm:$0xff]  }
   0xe   :  { %952 = vmatprep.subr.bf16.mxu1 %v1057_v14  ;;  %707 = vmatprep.mubr.bf16.mxu1 %v846_v38  ;;  %v1082_v41 = vld [vmem:[%s1383_s1 + $0x180] sm:$0xff]   ;;  %v1084_v43 = vld [vmem:[%s1383_s1 + $0x108] sm:$0xff]   ;;  %v1088_v47 = vld [vmem:[%s1383_s1 + $0x110] sm:$0xff]  }
   0xf   :  { %931 = vmatpush3.bf16.msra.mxu0 %v1056_v13  ;;  %v1085_v44 = vld [vmem:[%s1383_s1 + $0x1c8] sm:$0xff]   ;;  %v1089_v48 = vld [vmem:[%s1383_s1 + $0x1d0] sm:$0xff]   ;;  %v1091_v50 = vld [vmem:[%s1383_s1 + $0x158] sm:$0xff]  }
  0x10   :  { %932 = vmatprep.subr.bf16.mxu0 %v1059_v16  ;;  %v1086_v45 = vld [vmem:[%s1383_s1 + $0x188] sm:$0xff]   ;;  %v1090_v49 = vld [vmem:[%s1383_s1 + $0x190] sm:$0xff]   ;;  %v1092_v51 = vld [vmem:[%s1383_s1 + $0x118] sm:$0xff]  }
  0x11   :  { %953 = vmatpush3.bf16.msra.mxu1 %v1058_v15  ;;  %v1093_v52 = vld [vmem:[%s1383_s1 + $0x1d8] sm:$0xff]   ;;  %v1095_v54 = vld [vmem:[%s1383_s1 + $0x160] sm:$0xff]   ;;  %v1099_v58 = vld [vmem:[%s1383_s1 + $0x168] sm:$0xff]  }
  0x12   :  { %954 = vmatprep.subr.bf16.mxu1 %v1061_v18  ;;  %v1094_v53 = vld [vmem:[%s1383_s1 + $0x198] sm:$0xff]   ;;  %v1096_v55 = vld [vmem:[%s1383_s1 + $0x120] sm:$0xff]   ;;  %v1100_v59 = vld [vmem:[%s1383_s1 + $0x128] sm:$0xff]  }
  0x13   :  { %933 = vmatpush3.bf16.msra.mxu0 %v1060_v17  ;;  %v1097_v56 = vld [vmem:[%s1383_s1 + $0x1e0] sm:$0xff]   ;;  %v1101_v60 = vld [vmem:[%s1383_s1 + $0x1e8] sm:$0xff]   ;;  %v1103_v62 = vld [vmem:[%s1383_s1 + $0x170] sm:$0xff]  }
  0x14   :  { %934 = vmatprep.subr.bf16.mxu0 %v1063_v20  ;;  %v1098_v57 = vld [vmem:[%s1383_s1 + $0x1a0] sm:$0xff]   ;;  %v1102_v61 = vld [vmem:[%s1383_s1 + $0x1a8] sm:$0xff]   ;;  %v1104_v63 = vld [vmem:[%s1383_s1 + $0x130] sm:$0xff]  }
  0x15   :  { %955 = vmatpush3.bf16.msra.mxu1 %v1062_v19  ;;  %v1105_v0 = vld [vmem:[%s1383_s1 + $0x1f0] sm:$0xff]   ;;  %v1107_v2 = vld [vmem:[%s1383_s1 + $0x178] sm:$0xff]   ;;  %v1115_v13 = vld [vmem:[%s1383_s1 + $0x200] sm:$0xff]  }
  0x16   :  { %956 = vmatprep.subr.bf16.mxu1 %v1065_v22  ;;  %v1106_v1 = vld [vmem:[%s1383_s1 + $0x1b0] sm:$0xff]   ;;  %v1108_v3 = vld [vmem:[%s1383_s1 + $0x138] sm:$0xff]   ;;  %v1116_v14 = vld [vmem:[%s1383_s1 + $0x208] sm:$0xff]  }
  0x17   :  { %935 = vmatpush3.bf16.msra.mxu0 %v1064_v21  ;;  %v1109_v4 = vld [vmem:[%s1383_s1 + $0x1f8] sm:$0xff]   ;;  %v17_v5 = vld [vmem:[%s1384_s0 + $0x10] sm:$0xff]  ;;  %v1119_v17 = vld [vmem:[%s1383_s1 + $0x220] sm:$0xff]  }
  0x18   :  { %936 = vmatprep.subr.bf16.mxu0 %v1067_v24  ;;  %v847_v6 = vcombine.low %v17_v5, %v17_v5  ;;  %v848_v7 = vcombine.high %v17_v5, %v17_v5  ;;  %v1112_v8 = vld [vmem:[%s1383_s1 + $0x1b8] sm:$0xff]   ;;  %v1117_v15 = vld [vmem:[%s1383_s1 + $0x210] sm:$0xff]   ;;  %v1120_v18 = vld [vmem:[%s1383_s1 + $0x228] sm:$0xff]  }
  0x19   :  { %957 = vmatpush3.bf16.msra.mxu1 %v1066_v23  ;;  %v18_v10 = vld [vmem:[%s1384_s0 + $0x18] sm:$0xff]  ;;  %v1121_v19 = vld [vmem:[%s1383_s1 + $0x230] sm:$0xff]   ;;  %v1123_v21 = vld [vmem:[%s1384_s0 + $0x20] ss:$0 sps:$4 sm:$0xff]  }
  0x1a   :  { %958 = vmatprep.subr.bf16.mxu1 %v1069_v26  ;;  %v849_v11 = vcombine.low %v18_v10, %v18_v10  ;;  %v850_v12 = vcombine.high %v18_v10, %v18_v10  ;;  %v1118_v16 = vld [vmem:[%s1383_s1 + $0x218] sm:$0xff]   ;;  %v842_v23 = vld [vmem:[%s1385_s2] ss:$0 sm:$0xff] }
  0x1b   :  { %937 = vmatpush3.bf16.msra.mxu0 %v1068_v25  ;;  %v1122_v20 = vld [vmem:[%s1383_s1 + $0x238] sm:$0xff]  }
  0x1c   :  { %938 = vmatprep.subr.bf16.mxu0 %v1071_v28 }
  0x1d   :  { %959 = vmatpush3.bf16.msra.mxu1 %v1070_v27 }
  0x1e   :  { %960 = vmatprep.subr.bf16.mxu1 %v1073_v30 }
  0x1f   :  { %939 = vmatpush3.bf16.msra.mxu0 %v1072_v29 }
  0x20   :  { %968 = vmatprep.subr.bf16.mxu0 %v1077_v35 }
  0x21   :  { %961 = vmatpush3.bf16.msra.mxu1 %v1076_v34 }
  0x22   :  { %668 = vmatmul.mubr.bf16.vlgmr.msra.gmra.mrb[0].mxu0 %v843_v32  ;;  %990 = vmatprep.subr.bf16.mxu1 %v1081_v40 }
  0x23   :  { %969 = vmatpush3.bf16.msra.mxu0 %v1080_v39  ;;  %747 = vmatprep.mubr.bf16.mxu0 %v848_v7 }
  0x24   :  { %708 = vmatmul.mubr.bf16.vlgmr.msra.gmra.mrb[0].mxu1 %v845_v37  ;;  %970 = vmatprep.subr.bf16.mxu0 %v1083_v42 }
  0x25   :  { %991 = vmatpush3.bf16.msra.mxu1 %v1082_v41  ;;  %787 = vmatprep.mubr.bf16.mxu1 %v850_v12 }
  0x26   :  { %992 = vmatprep.subr.bf16.mxu1 %v1085_v44 }
  0x27   :  { %971 = vmatpush3.bf16.msra.mxu0 %v1084_v43 }
  0x28   :  { %972 = vmatprep.subr.bf16.mxu0 %v1087_v46 }
  0x29   :  { %993 = vmatpush3.bf16.msra.mxu1 %v1086_v45 }
  0x2a   :  { %994 = vmatprep.subr.bf16.mxu1 %v1089_v48 }
  0x2b   :  { %973 = vmatpush3.bf16.msra.mxu0 %v1088_v47 }
  0x2c   :  { %974 = vmatprep.subr.bf16.mxu0 %v1091_v50 }
  0x2d   :  { %995 = vmatpush3.bf16.msra.mxu1 %v1090_v49 }
  0x2e   :  { %996 = vmatprep.subr.bf16.mxu1 %v1093_v52 }
  0x2f   :  { %975 = vmatpush3.bf16.msra.mxu0 %v1092_v51 }
  0x30   :  { %976 = vmatprep.subr.bf16.mxu0 %v1095_v54 }
  0x31   :  { %997 = vmatpush3.bf16.msra.mxu1 %v1094_v53 }
  0x32   :  { %998 = vmatprep.subr.bf16.mxu1 %v1097_v56 }
  0x33   :  { %977 = vmatpush3.bf16.msra.mxu0 %v1096_v55 }
  0x34   :  { %978 = vmatprep.subr.bf16.mxu0 %v1099_v58 }
  0x35   :  { %999 = vmatpush3.bf16.msra.mxu1 %v1098_v57 }
  0x36   :  { %1000 = vmatprep.subr.bf16.mxu1 %v1101_v60 }
  0x37   :  { %979 = vmatpush3.bf16.msra.mxu0 %v1100_v59 }
  0x38   :  { %980 = vmatprep.subr.bf16.mxu0 %v1103_v62 }
  0x39   :  { %1001 = vmatpush3.bf16.msra.mxu1 %v1102_v61 }
  0x3a   :  { %1002 = vmatprep.subr.bf16.mxu1 %v1105_v0 }
  0x3b   :  { %981 = vmatpush3.bf16.msra.mxu0 %v1104_v63 }
  0x3c   :  { %982 = vmatprep.subr.bf16.mxu0 %v1107_v2 }
  0x3d   :  { %1003 = vmatpush3.bf16.msra.mxu1 %v1106_v1 }
  0x3e   :  { %1004 = vmatprep.subr.bf16.mxu1 %v1109_v4 }
  0x3f   :  { %983 = vmatpush3.bf16.msra.mxu0 %v1108_v3 }
  0x40   :  { %1021 = vmatprep.subr.bf16.mxu0 %v1124_v9 }
  0x41   :  { %1005 = vmatpush3.bf16.msra.mxu1 %v1112_v8 }
  0x42   :  { %748 = vmatmul.mubr.bf16.vlgmr.msra.gmra.mrb[4].mxu0 %v847_v6 }
  0x43   :  { %1022 = vmatpush3.bf16.msra.mxu0 %v1115_v13  ;;  %1037 = vmatprep.mubr.msk.bf16.mxu0 %vm1125_vm0, %v1124_v9 }
  0x44   :  { %788 = vmatmul.mubr.bf16.vlgmr.msra.gmra.mrb[4].mxu1 %v849_v11  ;;  %1023 = vmatprep.subr.bf16.mxu0 %v1124_v9 }
  0x47   :  { %1024 = vmatpush3.bf16.msra.mxu0 %v1116_v14 }
  0x48   :  { %1025 = vmatprep.subr.bf16.mxu0 %v1124_v9 }
  0x4b   :  { %1026 = vmatpush3.bf16.msra.mxu0 %v1117_v15 }
  0x4c   :  { %1027 = vmatprep.subr.bf16.mxu0 %v1124_v9 }
  0x4f   :  { %1028 = vmatpush3.bf16.msra.mxu0 %v1118_v16 }
  0x50   :  { %1029 = vmatprep.subr.bf16.mxu0 %v1124_v9 }
  0x53   :  { %1030 = vmatpush3.bf16.msra.mxu0 %v1119_v17 }
  0x54   :  { %1031 = vmatprep.subr.bf16.mxu0 %v1124_v9 }
  0x57   :  { %1032 = vmatpush3.bf16.msra.mxu0 %v1120_v18 }
  0x58   :  { %1033 = vmatprep.subr.bf16.mxu0 %v1124_v9 }
  0x5b   :  { %1034 = vmatpush3.bf16.msra.mxu0 %v1121_v19 }
  0x5c   :  { %1035 = vmatprep.subr.bf16.mxu0 %v1124_v9 }
  0x5f   :  { %1036 = vmatpush3.bf16.msra.mxu0 %v1122_v20 }
  0x62   :  { %1038 = vmatmul.mubr.bf16.vlgmr.msra.gmra.mrb[8].mxu0 %v1123_v21 }
  0xf5   :  { %v940_v22 = vpop.f32.mrb[0].mxu0 }
  0xf6   :  { %v941_v24 = vpop.f32.mrb[1].mxu0 }
  0xf7   :  { %v942_v25 = vadd.f32 %v941_v24, %v940_v22  ;;  %v943_v26 = vpop.f32.mrb[2].mxu0  ;;  %v962_v27 = vpop.f32.mrb[0].mxu1 }
  0xf8   :  { %v944_v28 = vpop.f32.mrb[3].mxu0  ;;  %v963_v29 = vpop.f32.mrb[1].mxu1 }
  0xf9   :  { %v670_v30 = vadd.f32 %v942_v25, %v842_v23  ;;  %v964_v31 = vadd.f32 %v963_v29, %v962_v27  ;;  %v965_v32 = vpop.f32.mrb[2].mxu1 }
  0xfa   :  { %v966_v33 = vpop.f32.mrb[3].mxu1 }
  0xfb   :  { %v710_v34 = vadd.f32 %v964_v31, %v670_v30 }
 0x115   :  { %v984_v35 = vpop.f32.mrb[4].mxu0 }
 0x116   :  { %v985_v36 = vpop.f32.mrb[5].mxu0 }
 0x117   :  { %v986_v37 = vadd.f32 %v985_v36, %v984_v35  ;;  %v987_v38 = vpop.f32.mrb[6].mxu0  ;;  %v1006_v39 = vpop.f32.mrb[4].mxu1 }
 0x118   :  { %v988_v40 = vpop.f32.mrb[7].mxu0  ;;  %v1007_v41 = vpop.f32.mrb[5].mxu1 }
 0x119   :  { %v750_v42 = vadd.f32 %v986_v37, %v710_v34  ;;  %v1008_v43 = vadd.f32 %v1007_v41, %v1006_v39  ;;  %v1009_v44 = vpop.f32.mrb[6].mxu1 }
 0x11a   :  { %v1010_v45 = vpop.f32.mrb[7].mxu1 }
 0x11b   :  { %v790_v46 = vadd.f32 %v1008_v43, %v750_v42 }
 0x135   :  { %v829_v47 = vpop.f32.mrb[8].mxu0 }
 0x136   :  { %v830_v48 = vadd.f32 %v829_v47, %v790_v46  ;;  %v1039_v49 = vpop.f32.mrb[9].mxu0 }
 0x137   :  { %v832_v50 = vpop.f32.mrb[10].mxu0 }
 0x138   :  { %v835_v51 = vmax.f32 %v830_v48, 0.0  ;;  %v1040_v52 = vpop.f32.mrb[11].mxu0 }
 0x13a   :  { %v836_v53 = vpack.c.bf16 %v835_v51, %v835_v51 }
 0x13c   :  { %837 = vst [vmem:[%s1386_s3] sm:$0xf] %v836_v53 }

// kernel: unet_forward.43
= control target key start
LH: loop header
LB: loop body
LE: loop exit
PB: predicated region body
PF: predicated region fallthrough
CT: control target
= control target key end

     0   :  { %vm1131_vm0 = vmmov 0   ;;  %s1397_s1 = inlined_call_operand.vmem [shape: bf16[1152,128], index: 1, kind: input, shape index: {}]   ;;  %s1398_s0 = inlined_call_operand.vmem [shape: bf16[8,1152], index: 0, kind: input, shape index: {}]   ;;  %s1399_s2 = inlined_call_operand.vmem [shape: f32[1,128], index: 2, kind: input, shape index: {}]   ;;  %s1400_s3 = inlined_call_operand.vmem [shape: bf16[8,128], index: 3, kind: input, shape index: {}]   ;;  %s1401_s4 = inlined_call_operand.vmem [shape: bf16[8,128], index: 4, kind: output, shape index: {}]  }
   0x1   :  { %v1049_v0 = vld [vmem:[%s1397_s1 + $0x40] sm:$0xff]   ;;  %v1053_v4 = vld [vmem:[%s1397_s1 + $0x48] sm:$0xff]   ;;  %v1057_v8 = vld [vmem:[%s1397_s1 + $0x50] sm:$0xff]  }
   0x2   :  { %v1050_v1 = vld [vmem:[%s1397_s1] sm:$0xff]   ;;  %930 = vmatprep.subr.bf16.mxu0 %v1049_v0  ;;  %v1054_v5 = vld [vmem:[%s1397_s1 + $0x8] sm:$0xff]   ;;  %v1058_v9 = vld [vmem:[%s1397_s1 + $0x10] sm:$0xff]  }
   0x3   :  { %v1051_v2 = vld [vmem:[%s1397_s1 + $0xc0] sm:$0xff]   ;;  %931 = vmatpush3.bf16.msra.mxu0 %v1050_v1  ;;  %v1055_v6 = vld [vmem:[%s1397_s1 + $0xc8] sm:$0xff]   ;;  %v1059_v10 = vld [vmem:[%s1397_s1 + $0xd0] sm:$0xff]  }
   0x4   :  { %v1052_v3 = vld [vmem:[%s1397_s1 + $0x80] sm:$0xff]   ;;  %952 = vmatprep.subr.bf16.mxu1 %v1051_v2  ;;  %932 = vmatprep.subr.bf16.mxu0 %v1053_v4  ;;  %v1056_v7 = vld [vmem:[%s1397_s1 + $0x88] sm:$0xff]   ;;  %v1060_v11 = vld [vmem:[%s1397_s1 + $0x90] sm:$0xff]  }
   0x5   :  { %953 = vmatpush3.bf16.msra.mxu1 %v1052_v3  ;;  %v1061_v12 = vld [vmem:[%s1397_s1 + $0x58] sm:$0xff]   ;;  %v1065_v16 = vld [vmem:[%s1397_s1 + $0x60] sm:$0xff]   ;;  %v1069_v20 = vld [vmem:[%s1397_s1 + $0x68] sm:$0xff]  }
   0x6   :  { %954 = vmatprep.subr.bf16.mxu1 %v1055_v6  ;;  %v1062_v13 = vld [vmem:[%s1397_s1 + $0x18] sm:$0xff]   ;;  %v1066_v17 = vld [vmem:[%s1397_s1 + $0x20] sm:$0xff]   ;;  %v1070_v21 = vld [vmem:[%s1397_s1 + $0x28] sm:$0xff]  }
   0x7   :  { %933 = vmatpush3.bf16.msra.mxu0 %v1054_v5  ;;  %v1063_v14 = vld [vmem:[%s1397_s1 + $0xd8] sm:$0xff]   ;;  %v1067_v18 = vld [vmem:[%s1397_s1 + $0xe0] sm:$0xff]   ;;  %v1071_v22 = vld [vmem:[%s1397_s1 + $0xe8] sm:$0xff]  }
   0x8   :  { %934 = vmatprep.subr.bf16.mxu0 %v1057_v8  ;;  %v1064_v15 = vld [vmem:[%s1397_s1 + $0x98] sm:$0xff]   ;;  %v1068_v19 = vld [vmem:[%s1397_s1 + $0xa0] sm:$0xff]   ;;  %v1072_v23 = vld [vmem:[%s1397_s1 + $0xa8] sm:$0xff]  }
   0x9   :  { %955 = vmatpush3.bf16.msra.mxu1 %v1056_v7  ;;  %v1073_v24 = vld [vmem:[%s1397_s1 + $0x70] sm:$0xff]   ;;  %v1077_v28 = vld [vmem:[%s1397_s1 + $0x78] sm:$0xff]   ;;  %v18_v31 = vld [vmem:[%s1398_s0] sm:$0xff] }
   0xa   :  { %956 = vmatprep.subr.bf16.mxu1 %v1059_v10  ;;  %v1074_v25 = vld [vmem:[%s1397_s1 + $0x30] sm:$0xff]   ;;  %v1078_v29 = vld [vmem:[%s1397_s1 + $0x38] sm:$0xff]   ;;  %v849_v32 = vcombine.low %v18_v31, %v18_v31  ;;  %v850_v33 = vcombine.high %v18_v31, %v18_v31  ;;  %v1083_v35 = vld [vmem:[%s1397_s1 + $0x140] sm:$0xff]  }
   0xb   :  { %935 = vmatpush3.bf16.msra.mxu0 %v1058_v9  ;;  %v1075_v26 = vld [vmem:[%s1397_s1 + $0xf0] sm:$0xff]   ;;  %v1079_v30 = vld [vmem:[%s1397_s1 + $0xf8] sm:$0xff]   ;;  %v19_v36 = vld [vmem:[%s1398_s0 + $0x8] sm:$0xff]  ;;  %v1130_v9 = vmov 0.0  }
   0xc   :  { %936 = vmatprep.subr.bf16.mxu0 %v1061_v12  ;;  %v1076_v27 = vld [vmem:[%s1397_s1 + $0xb0] sm:$0xff]   ;;  %v1082_v34 = vld [vmem:[%s1397_s1 + $0xb8] sm:$0xff]   ;;  %670 = vmatprep.mubr.bf16.mxu0 %v850_v33  ;;  %v851_v37 = vcombine.low %v19_v36, %v19_v36  ;;  %v852_v38 = vcombine.high %v19_v36, %v19_v36  ;;  %v1086_v39 = vld [vmem:[%s1397_s1 + $0x100] sm:$0xff]  }
   0xd   :  { %957 = vmatpush3.bf16.msra.mxu1 %v1060_v11  ;;  %v1087_v40 = vld [vmem:[%s1397_s1 + $0x1c0] sm:$0xff]   ;;  %v1089_v42 = vld [vmem:[%s1397_s1 + $0x148] sm:$0xff]   ;;  %v1093_v46 = vld [vmem:[%s1397_s1 + $0x150] sm:$0xff]  }
   0xe   :  { %958 = vmatprep.subr.bf16.mxu1 %v1063_v14  ;;  %710 = vmatprep.mubr.bf16.mxu1 %v852_v38  ;;  %v1088_v41 = vld [vmem:[%s1397_s1 + $0x180] sm:$0xff]   ;;  %v1090_v43 = vld [vmem:[%s1397_s1 + $0x108] sm:$0xff]   ;;  %v1094_v47 = vld [vmem:[%s1397_s1 + $0x110] sm:$0xff]  }
   0xf   :  { %937 = vmatpush3.bf16.msra.mxu0 %v1062_v13  ;;  %v1091_v44 = vld [vmem:[%s1397_s1 + $0x1c8] sm:$0xff]   ;;  %v1095_v48 = vld [vmem:[%s1397_s1 + $0x1d0] sm:$0xff]   ;;  %v1097_v50 = vld [vmem:[%s1397_s1 + $0x158] sm:$0xff]  }
  0x10   :  { %938 = vmatprep.subr.bf16.mxu0 %v1065_v16  ;;  %v1092_v45 = vld [vmem:[%s1397_s1 + $0x188] sm:$0xff]   ;;  %v1096_v49 = vld [vmem:[%s1397_s1 + $0x190] sm:$0xff]   ;;  %v1098_v51 = vld [vmem:[%s1397_s1 + $0x118] sm:$0xff]  }
  0x11   :  { %959 = vmatpush3.bf16.msra.mxu1 %v1064_v15  ;;  %v1099_v52 = vld [vmem:[%s1397_s1 + $0x1d8] sm:$0xff]   ;;  %v1101_v54 = vld [vmem:[%s1397_s1 + $0x160] sm:$0xff]   ;;  %v1105_v58 = vld [vmem:[%s1397_s1 + $0x168] sm:$0xff]  }
  0x12   :  { %960 = vmatprep.subr.bf16.mxu1 %v1067_v18  ;;  %v1100_v53 = vld [vmem:[%s1397_s1 + $0x198] sm:$0xff]   ;;  %v1102_v55 = vld [vmem:[%s1397_s1 + $0x120] sm:$0xff]   ;;  %v1106_v59 = vld [vmem:[%s1397_s1 + $0x128] sm:$0xff]  }
  0x13   :  { %939 = vmatpush3.bf16.msra.mxu0 %v1066_v17  ;;  %v1103_v56 = vld [vmem:[%s1397_s1 + $0x1e0] sm:$0xff]   ;;  %v1107_v60 = vld [vmem:[%s1397_s1 + $0x1e8] sm:$0xff]   ;;  %v1109_v62 = vld [vmem:[%s1397_s1 + $0x170] sm:$0xff]  }
  0x14   :  { %940 = vmatprep.subr.bf16.mxu0 %v1069_v20  ;;  %v1104_v57 = vld [vmem:[%s1397_s1 + $0x1a0] sm:$0xff]   ;;  %v1108_v61 = vld [vmem:[%s1397_s1 + $0x1a8] sm:$0xff]   ;;  %v1110_v63 = vld [vmem:[%s1397_s1 + $0x130] sm:$0xff]  }
  0x15   :  { %961 = vmatpush3.bf16.msra.mxu1 %v1068_v19  ;;  %v1111_v0 = vld [vmem:[%s1397_s1 + $0x1f0] sm:$0xff]   ;;  %v1113_v2 = vld [vmem:[%s1397_s1 + $0x178] sm:$0xff]   ;;  %v1121_v13 = vld [vmem:[%s1397_s1 + $0x200] sm:$0xff]  }
  0x16   :  { %962 = vmatprep.subr.bf16.mxu1 %v1071_v22  ;;  %v1112_v1 = vld [vmem:[%s1397_s1 + $0x1b0] sm:$0xff]   ;;  %v1114_v3 = vld [vmem:[%s1397_s1 + $0x138] sm:$0xff]   ;;  %v1122_v14 = vld [vmem:[%s1397_s1 + $0x208] sm:$0xff]  }
  0x17   :  { %941 = vmatpush3.bf16.msra.mxu0 %v1070_v21  ;;  %v1115_v4 = vld [vmem:[%s1397_s1 + $0x1f8] sm:$0xff]   ;;  %v20_v5 = vld [vmem:[%s1398_s0 + $0x10] sm:$0xff]  ;;  %v1125_v17 = vld [vmem:[%s1397_s1 + $0x220] sm:$0xff]  }
  0x18   :  { %942 = vmatprep.subr.bf16.mxu0 %v1073_v24  ;;  %v853_v6 = vcombine.low %v20_v5, %v20_v5  ;;  %v854_v7 = vcombine.high %v20_v5, %v20_v5  ;;  %v1118_v8 = vld [vmem:[%s1397_s1 + $0x1b8] sm:$0xff]   ;;  %v1123_v15 = vld [vmem:[%s1397_s1 + $0x210] sm:$0xff]   ;;  %v1126_v18 = vld [vmem:[%s1397_s1 + $0x228] sm:$0xff]  }
  0x19   :  { %963 = vmatpush3.bf16.msra.mxu1 %v1072_v23  ;;  %v21_v10 = vld [vmem:[%s1398_s0 + $0x18] sm:$0xff]  ;;  %v1127_v19 = vld [vmem:[%s1397_s1 + $0x230] sm:$0xff]   ;;  %v1129_v21 = vld [vmem:[%s1398_s0 + $0x20] ss:$0 sps:$4 sm:$0xff]  }
  0x1a   :  { %964 = vmatprep.subr.bf16.mxu1 %v1075_v26  ;;  %v855_v11 = vcombine.low %v21_v10, %v21_v10  ;;  %v856_v12 = vcombine.high %v21_v10, %v21_v10  ;;  %v1124_v16 = vld [vmem:[%s1397_s1 + $0x218] sm:$0xff]   ;;  %v848_v23 = vld [vmem:[%s1399_s2] ss:$0 sm:$0xff] }
  0x1b   :  { %943 = vmatpush3.bf16.msra.mxu0 %v1074_v25  ;;  %v1128_v20 = vld [vmem:[%s1397_s1 + $0x238] sm:$0xff]  }
  0x1c   :  { %944 = vmatprep.subr.bf16.mxu0 %v1077_v28 }
  0x1d   :  { %965 = vmatpush3.bf16.msra.mxu1 %v1076_v27 }
  0x1e   :  { %966 = vmatprep.subr.bf16.mxu1 %v1079_v30 }
  0x1f   :  { %945 = vmatpush3.bf16.msra.mxu0 %v1078_v29 }
  0x20   :  { %974 = vmatprep.subr.bf16.mxu0 %v1083_v35 }
  0x21   :  { %967 = vmatpush3.bf16.msra.mxu1 %v1082_v34 }
  0x22   :  { %671 = vmatmul.mubr.bf16.vlgmr.msra.gmra.mrb[0].mxu0 %v849_v32  ;;  %996 = vmatprep.subr.bf16.mxu1 %v1087_v40 }
  0x23   :  { %975 = vmatpush3.bf16.msra.mxu0 %v1086_v39  ;;  %750 = vmatprep.mubr.bf16.mxu0 %v854_v7 }
  0x24   :  { %711 = vmatmul.mubr.bf16.vlgmr.msra.gmra.mrb[0].mxu1 %v851_v37  ;;  %976 = vmatprep.subr.bf16.mxu0 %v1089_v42 }
  0x25   :  { %997 = vmatpush3.bf16.msra.mxu1 %v1088_v41  ;;  %790 = vmatprep.mubr.bf16.mxu1 %v856_v12 }
  0x26   :  { %998 = vmatprep.subr.bf16.mxu1 %v1091_v44 }
  0x27   :  { %977 = vmatpush3.bf16.msra.mxu0 %v1090_v43 }
  0x28   :  { %978 = vmatprep.subr.bf16.mxu0 %v1093_v46 }
  0x29   :  { %999 = vmatpush3.bf16.msra.mxu1 %v1092_v45 }
  0x2a   :  { %1000 = vmatprep.subr.bf16.mxu1 %v1095_v48 }
  0x2b   :  { %979 = vmatpush3.bf16.msra.mxu0 %v1094_v47  ;;  %v839_v47 = vld [vmem:[%s1400_s3] sm:$0xf] }
  0x2c   :  { %980 = vmatprep.subr.bf16.mxu0 %v1097_v50  ;;  %v840_v50 = vunpack.c.l.bf16 %v839_v47 }
  0x2d   :  { %1001 = vmatpush3.bf16.msra.mxu1 %v1096_v49 }
  0x2e   :  { %1002 = vmatprep.subr.bf16.mxu1 %v1099_v52 }
  0x2f   :  { %981 = vmatpush3.bf16.msra.mxu0 %v1098_v51 }
  0x30   :  { %982 = vmatprep.subr.bf16.mxu0 %v1101_v54 }
  0x31   :  { %1003 = vmatpush3.bf16.msra.mxu1 %v1100_v53 }
  0x32   :  { %1004 = vmatprep.subr.bf16.mxu1 %v1103_v56 }
  0x33   :  { %983 = vmatpush3.bf16.msra.mxu0 %v1102_v55 }
  0x34   :  { %984 = vmatprep.subr.bf16.mxu0 %v1105_v58 }
  0x35   :  { %1005 = vmatpush3.bf16.msra.mxu1 %v1104_v57 }
  0x36   :  { %1006 = vmatprep.subr.bf16.mxu1 %v1107_v60 }
  0x37   :  { %985 = vmatpush3.bf16.msra.mxu0 %v1106_v59 }
  0x38   :  { %986 = vmatprep.subr.bf16.mxu0 %v1109_v62 }
  0x39   :  { %1007 = vmatpush3.bf16.msra.mxu1 %v1108_v61 }
  0x3a   :  { %1008 = vmatprep.subr.bf16.mxu1 %v1111_v0 }
  0x3b   :  { %987 = vmatpush3.bf16.msra.mxu0 %v1110_v63 }
  0x3c   :  { %988 = vmatprep.subr.bf16.mxu0 %v1113_v2 }
  0x3d   :  { %1009 = vmatpush3.bf16.msra.mxu1 %v1112_v1 }
  0x3e   :  { %1010 = vmatprep.subr.bf16.mxu1 %v1115_v4 }
  0x3f   :  { %989 = vmatpush3.bf16.msra.mxu0 %v1114_v3 }
  0x40   :  { %1027 = vmatprep.subr.bf16.mxu0 %v1130_v9 }
  0x41   :  { %1011 = vmatpush3.bf16.msra.mxu1 %v1118_v8 }
  0x42   :  { %751 = vmatmul.mubr.bf16.vlgmr.msra.gmra.mrb[4].mxu0 %v853_v6 }
  0x43   :  { %1028 = vmatpush3.bf16.msra.mxu0 %v1121_v13  ;;  %1043 = vmatprep.mubr.msk.bf16.mxu0 %vm1131_vm0, %v1130_v9 }
  0x44   :  { %791 = vmatmul.mubr.bf16.vlgmr.msra.gmra.mrb[4].mxu1 %v855_v11  ;;  %1029 = vmatprep.subr.bf16.mxu0 %v1130_v9 }
  0x47   :  { %1030 = vmatpush3.bf16.msra.mxu0 %v1122_v14 }
  0x48   :  { %1031 = vmatprep.subr.bf16.mxu0 %v1130_v9 }
  0x4b   :  { %1032 = vmatpush3.bf16.msra.mxu0 %v1123_v15 }
  0x4c   :  { %1033 = vmatprep.subr.bf16.mxu0 %v1130_v9 }
  0x4f   :  { %1034 = vmatpush3.bf16.msra.mxu0 %v1124_v16 }
  0x50   :  { %1035 = vmatprep.subr.bf16.mxu0 %v1130_v9 }
  0x53   :  { %1036 = vmatpush3.bf16.msra.mxu0 %v1125_v17 }
  0x54   :  { %1037 = vmatprep.subr.bf16.mxu0 %v1130_v9 }
  0x57   :  { %1038 = vmatpush3.bf16.msra.mxu0 %v1126_v18 }
  0x58   :  { %1039 = vmatprep.subr.bf16.mxu0 %v1130_v9 }
  0x5b   :  { %1040 = vmatpush3.bf16.msra.mxu0 %v1127_v19 }
  0x5c   :  { %1041 = vmatprep.subr.bf16.mxu0 %v1130_v9 }
  0x5f   :  { %1042 = vmatpush3.bf16.msra.mxu0 %v1128_v20 }
  0x62   :  { %1044 = vmatmul.mubr.bf16.vlgmr.msra.gmra.mrb[8].mxu0 %v1129_v21 }
  0xf5   :  { %v946_v22 = vpop.f32.mrb[0].mxu0 }
  0xf6   :  { %v947_v24 = vpop.f32.mrb[1].mxu0 }
  0xf7   :  { %v948_v25 = vadd.f32 %v947_v24, %v946_v22  ;;  %v949_v26 = vpop.f32.mrb[2].mxu0  ;;  %v968_v27 = vpop.f32.mrb[0].mxu1 }
  0xf8   :  { %v950_v28 = vpop.f32.mrb[3].mxu0  ;;  %v969_v29 = vpop.f32.mrb[1].mxu1 }
  0xf9   :  { %v673_v30 = vadd.f32 %v948_v25, %v848_v23  ;;  %v970_v31 = vadd.f32 %v969_v29, %v968_v27  ;;  %v971_v32 = vpop.f32.mrb[2].mxu1 }
  0xfa   :  { %v972_v33 = vpop.f32.mrb[3].mxu1 }
  0xfb   :  { %v713_v34 = vadd.f32 %v970_v31, %v673_v30 }
 0x115   :  { %v990_v35 = vpop.f32.mrb[4].mxu0 }
 0x116   :  { %v991_v36 = vpop.f32.mrb[5].mxu0 }
 0x117   :  { %v992_v37 = vadd.f32 %v991_v36, %v990_v35  ;;  %v993_v38 = vpop.f32.mrb[6].mxu0  ;;  %v1012_v39 = vpop.f32.mrb[4].mxu1 }
 0x118   :  { %v994_v40 = vpop.f32.mrb[7].mxu0  ;;  %v1013_v41 = vpop.f32.mrb[5].mxu1 }
 0x119   :  { %v753_v42 = vadd.f32 %v992_v37, %v713_v34  ;;  %v1014_v43 = vadd.f32 %v1013_v41, %v1012_v39  ;;  %v1015_v44 = vpop.f32.mrb[6].mxu1 }
 0x11a   :  { %v1016_v45 = vpop.f32.mrb[7].mxu1 }
 0x11b   :  { %v793_v46 = vadd.f32 %v1014_v43, %v753_v42 }
 0x135   :  { %v832_v48 = vpop.f32.mrb[8].mxu0 }
 0x136   :  { %v833_v49 = vadd.f32 %v832_v48, %v793_v46  ;;  %v1045_v51 = vpop.f32.mrb[9].mxu0 }
 0x137   :  { %v835_v52 = vpop.f32.mrb[10].mxu0 }
 0x138   :  { %v838_v53 = vmax.f32 %v833_v49, 0.0  ;;  %v1046_v54 = vpop.f32.mrb[11].mxu0 }
 0x13a   :  { %v841_v55 = vadd.f32 %v840_v50, %v838_v53 }
 0x13c   :  { %v842_v56 = vpack.c.bf16 %v841_v55, %v841_v55 }
 0x13e   :  { %843 = vst [vmem:[%s1401_s4] sm:$0xf] %v842_v56 }

// kernel: unet_forward.44
= control target key start
LH: loop header
LB: loop body
LE: loop exit
PB: predicated region body
PF: predicated region fallthrough
CT: control target
= control target key end

     0   :  { %v81_v38 = vlaneseq  ;;  %v717_v39 = vmov 1966171168   ;;  %s949_s1 = inlined_call_operand.vmem [shape: bf16[512,256], index: 1, kind: input, shape index: {}]   ;;  %s950_s0 = inlined_call_operand.vmem [shape: bf16[2,512], index: 0, kind: input, shape index: {}]   ;;  %s951_s2 = inlined_call_operand.vmem [shape: f32[1,256], index: 2, kind: input, shape index: {}]   ;;  %s952_s3 = inlined_call_operand.vmem [shape: bf16[2,256], index: 3, kind: output, shape index: {}]  }
   0x1   :  { %v621_v0 = vld [vmem:[%s949_s1 + $0x4] ss:$8 sps:$4 sm:$0xff]   ;;  %v625_v2 = vld [vmem:[%s949_s1] ss:$8 sps:$4 sm:$0xff]   ;;  %v627_v4 = vld [vmem:[%s949_s1 + $0x14] ss:$8 sps:$4 sm:$0xff]   ;;  %v101_v40 = vunpack.c.l.s4 %v717_v39 }
   0x2   :  { %v623_v1 = vld [vmem:[%s949_s1 + $0x104] ss:$8 sps:$4 sm:$0xff]   ;;  %440 = vmatprep.subr.bf16.mxu1 %v621_v0  ;;  %v626_v3 = vld [vmem:[%s949_s1 + $0x100] ss:$8 sps:$4 sm:$0xff]   ;;  %v629_v5 = vld [vmem:[%s949_s1 + $0x114] ss:$8 sps:$4 sm:$0xff]  }
   0x3   :  { %481 = vmatprep.subr.bf16.mxu0 %v623_v1  ;;  %441 = vmatpush1.bf16.msra.mxu1 %v625_v2  ;;  %v631_v6 = vld [vmem:[%s949_s1 + $0x10] ss:$8 sps:$4 sm:$0xff]   ;;  %v633_v8 = vld [vmem:[%s949_s1 + $0x24] ss:$8 sps:$4 sm:$0xff]   ;;  %v637_v10 = vld [vmem:[%s949_s1 + $0x20] ss:$8 sps:$4 sm:$0xff]   ;;  %v102_v46 = vunpack.c.0.s8 %v101_v40 }
   0x4   :  { %482 = vmatpush1.bf16.msra.mxu0 %v626_v3  ;;  %442 = vmatprep.subr.bf16.mxu1 %v627_v4  ;;  %v632_v7 = vld [vmem:[%s949_s1 + $0x110] ss:$8 sps:$4 sm:$0xff]   ;;  %v635_v9 = vld [vmem:[%s949_s1 + $0x124] ss:$8 sps:$4 sm:$0xff]   ;;  %v638_v11 = vld [vmem:[%s949_s1 + $0x120] ss:$8 sps:$4 sm:$0xff]  }
   0x5   :  { %483 = vmatprep.subr.bf16.mxu0 %v629_v5  ;;  %v639_v12 = vld [vmem:[%s949_s1 + $0x34] ss:$8 sps:$4 sm:$0xff]   ;;  %v643_v14 = vld [vmem:[%s949_s1 + $0x30] ss:$8 sps:$4 sm:$0xff]   ;;  %v645_v16 = vld [vmem:[%s949_s1 + $0x44] ss:$8 sps:$4 sm:$0xff]  }
   0x6   :  { %v641_v13 = vld [vmem:[%s949_s1 + $0x134] ss:$8 sps:$4 sm:$0xff]   ;;  %v644_v15 = vld [vmem:[%s949_s1 + $0x130] ss:$8 sps:$4 sm:$0xff]   ;;  %v647_v17 = vld [vmem:[%s949_s1 + $0x144] ss:$8 sps:$4 sm:$0xff]  }
   0x7   :  { %443 = vmatpush1.bf16.msra.mxu1 %v631_v6  ;;  %v649_v18 = vld [vmem:[%s949_s1 + $0x40] ss:$8 sps:$4 sm:$0xff]   ;;  %v651_v20 = vld [vmem:[%s949_s1 + $0x54] ss:$8 sps:$4 sm:$0xff]   ;;  %v655_v22 = vld [vmem:[%s949_s1 + $0x50] ss:$8 sps:$4 sm:$0xff]  }
   0x8   :  { %484 = vmatpush1.bf16.msra.mxu0 %v632_v7  ;;  %444 = vmatprep.subr.bf16.mxu1 %v633_v8  ;;  %v650_v19 = vld [vmem:[%s949_s1 + $0x140] ss:$8 sps:$4 sm:$0xff]   ;;  %v653_v21 = vld [vmem:[%s949_s1 + $0x154] ss:$8 sps:$4 sm:$0xff]   ;;  %v656_v23 = vld [vmem:[%s949_s1 + $0x150] ss:$8 sps:$4 sm:$0xff]  }
   0x9   :  { %485 = vmatprep.subr.bf16.mxu0 %v635_v9  ;;  %v657_v24 = vld [vmem:[%s949_s1 + $0x64] ss:$8 sps:$4 sm:$0xff]   ;;  %v661_v26 = vld [vmem:[%s949_s1 + $0x60] ss:$8 sps:$4 sm:$0xff]   ;;  %v663_v28 = vld [vmem:[%s949_s1 + $0x74] ss:$8 sps:$4 sm:$0xff]  }
   0xa   :  { %v659_v25 = vld [vmem:[%s949_s1 + $0x164] ss:$8 sps:$4 sm:$0xff]   ;;  %v662_v27 = vld [vmem:[%s949_s1 + $0x160] ss:$8 sps:$4 sm:$0xff]   ;;  %v665_v29 = vld [vmem:[%s949_s1 + $0x174] ss:$8 sps:$4 sm:$0xff]  }
   0xb   :  { %445 = vmatpush1.bf16.msra.mxu1 %v637_v10  ;;  %v667_v30 = vld [vmem:[%s949_s1 + $0x70] ss:$8 sps:$4 sm:$0xff]   ;;  %v669_v32 = vld [vmem:[%s949_s1 + $0x84] ss:$8 sps:$4 sm:$0xff]   ;;  %v673_v34 = vld [vmem:[%s949_s1 + $0x80] ss:$8 sps:$4 sm:$0xff]  }
   0xc   :  { %486 = vmatpush1.bf16.msra.mxu0 %v638_v11  ;;  %446 = vmatprep.subr.bf16.mxu1 %v639_v12  ;;  %v668_v31 = vld [vmem:[%s949_s1 + $0x170] ss:$8 sps:$4 sm:$0xff]   ;;  %v671_v33 = vld [vmem:[%s949_s1 + $0x184] ss:$8 sps:$4 sm:$0xff]   ;;  %v674_v35 = vld [vmem:[%s949_s1 + $0x180] ss:$8 sps:$4 sm:$0xff]  }
   0xd   :  { %487 = vmatprep.subr.bf16.mxu0 %v641_v13  ;;  %v675_v36 = vld [vmem:[%s949_s1 + $0x94] ss:$8 sps:$4 sm:$0xff]   ;;  %v679_v41 = vld [vmem:[%s949_s1 + $0x90] ss:$8 sps:$4 sm:$0xff]   ;;  %v681_v43 = vld [vmem:[%s949_s1 + $0xa4] ss:$8 sps:$4 sm:$0xff]  }
   0xe   :  { %v677_v37 = vld [vmem:[%s949_s1 + $0x194] ss:$8 sps:$4 sm:$0xff]   ;;  %v680_v42 = vld [vmem:[%s949_s1 + $0x190] ss:$8 sps:$4 sm:$0xff]   ;;  %v683_v44 = vld [vmem:[%s949_s1 + $0x1a4] ss:$8 sps:$4 sm:$0xff]  }
   0xf   :  { %447 = vmatpush1.bf16.msra.mxu1 %v643_v14  ;;  %v864_v45 = vshrl.u32 %v81_v38, 7  ;;  %v685_v47 = vld [vmem:[%s949_s1 + $0xa0] ss:$8 sps:$4 sm:$0xff]   ;;  %v687_v49 = vld [vmem:[%s949_s1 + $0xb4] ss:$8 sps:$4 sm:$0xff]  }
  0x10   :  { %488 = vmatpush1.bf16.msra.mxu0 %v644_v15  ;;  %448 = vmatprep.subr.bf16.mxu1 %v645_v16  ;;  %v686_v48 = vld [vmem:[%s949_s1 + $0x1a0] ss:$8 sps:$4 sm:$0xff]   ;;  %v689_v50 = vld [vmem:[%s949_s1 + $0x1b4] ss:$8 sps:$4 sm:$0xff]   ;;  %v691_v53 = vld [vmem:[%s949_s1 + $0xb0] ss:$8 sps:$4 sm:$0xff]  }
  0x11   :  { %489 = vmatprep.subr.bf16.mxu0 %v647_v17  ;;  %v879_v51 = vsub.s32 %v102_v46, %v864_v45  ;;  %v549_v52 = vld.sshfl [vmem:[%s950_s0] sm:$0x33 pattern:$0x75316420]  ;;  %v692_v54 = vld [vmem:[%s949_s1 + $0x1b0] ss:$8 sps:$4 sm:$0xff]  }
  0x12   :  { %v99_v55 = vcombine.high %v549_v52, %v549_v52  ;;  %v693_v56 = vld [vmem:[%s949_s1 + $0xc4] ss:$8 sps:$4 sm:$0xff]   ;;  %v697_v59 = vld [vmem:[%s949_s1 + $0xc0] ss:$8 sps:$4 sm:$0xff]   ;;  %v699_v62 = vld [vmem:[%s949_s1 + $0xd4] ss:$8 sps:$4 sm:$0xff]  }
  0x13   :  { %449 = vmatpush1.bf16.msra.mxu1 %v649_v18  ;;  %v695_v57 = vld [vmem:[%s949_s1 + $0x1c4] ss:$8 sps:$4 sm:$0xff]   ;;  %v698_v60 = vld [vmem:[%s949_s1 + $0x1c0] ss:$8 sps:$4 sm:$0xff]   ;;  %v701_v63 = vld [vmem:[%s949_s1 + $0x1d4] ss:$8 sps:$4 sm:$0xff]   ;;  %v106_v8 = vrot.slane %v549_v52, %v879_v51 }
  0x14   :  { %490 = vmatpush1.bf16.msra.mxu0 %v650_v19  ;;  %450 = vmatprep.subr.bf16.mxu1 %v651_v20  ;;  %v113_v58 = vrot.slane %v99_v55, %v879_v51  ;;  %v703_v0 = vld [vmem:[%s949_s1 + $0xd0] ss:$8 sps:$4 sm:$0xff]   ;;  %v705_v2 = vld [vmem:[%s949_s1 + $0xe4] ss:$8 sps:$4 sm:$0xff]   ;;  %v709_v4 = vld [vmem:[%s949_s1 + $0xe0] ss:$8 sps:$4 sm:$0xff]  }
  0x15   :  { %491 = vmatprep.subr.bf16.mxu0 %v653_v21  ;;  %v704_v1 = vld [vmem:[%s949_s1 + $0x1d0] ss:$8 sps:$4 sm:$0xff]   ;;  %v707_v3 = vld [vmem:[%s949_s1 + $0x1e4] ss:$8 sps:$4 sm:$0xff]   ;;  %v710_v5 = vld [vmem:[%s949_s1 + $0x1e0] ss:$8 sps:$4 sm:$0xff]   ;;  %v114_v11 = vcombine.high %v106_v8, %v106_v8 }
  0x16   :  { %v115_v61 = vcombine.high %v113_v58, %v113_v58  ;;  %472 = vmatprep.mubr.bf16.mxu1 %v113_v58  ;;  %v711_v6 = vld [vmem:[%s949_s1 + $0xf4] ss:$8 sps:$4 sm:$0xff]   ;;  %v715_v9 = vld [vmem:[%s949_s1 + $0xf0] ss:$8 sps:$4 sm:$0xff]   ;;  %v83_v12 = vsub.s32 0, %v864_v45  ;;  %v87_v14 = vsub.s32 1, %v864_v45 }
  0x17   :  { %451 = vmatpush1.bf16.msra.mxu1 %v655_v22  ;;  %v713_v7 = vld [vmem:[%s949_s1 + $0x1f4] ss:$8 sps:$4 sm:$0xff]   ;;  %v716_v10 = vld [vmem:[%s949_s1 + $0x1f0] ss:$8 sps:$4 sm:$0xff]   ;;  %v79_v13 = vld [vmem:[%s951_s2] sm:$0x3] }
  0x18   :  { %492 = vmatpush1.bf16.msra.mxu0 %v656_v23  ;;  %452 = vmatprep.subr.bf16.mxu1 %v657_v24  ;;  %v84_v15 = vrot.slane %v79_v13, %v83_v12  ;;  %v88_v16 = vrot.slane %v79_v13, %v87_v14 }
  0x19   :  { %493 = vmatprep.subr.bf16.mxu0 %v659_v25  ;;  %513 = vmatprep.mubr.bf16.mxu0 %v115_v61 }
  0x1b   :  { %453 = vmatpush1.bf16.msra.mxu1 %v661_v26 }
  0x1c   :  { %494 = vmatpush1.bf16.msra.mxu0 %v662_v27  ;;  %454 = vmatprep.subr.bf16.mxu1 %v663_v28 }
  0x1d   :  { %495 = vmatprep.subr.bf16.mxu0 %v665_v29 }
  0x1f   :  { %455 = vmatpush1.bf16.msra.mxu1 %v667_v30 }
  0x20   :  { %496 = vmatpush1.bf16.msra.mxu0 %v668_v31  ;;  %456 = vmatprep.subr.bf16.mxu1 %v669_v32 }
  0x21   :  { %497 = vmatprep.subr.bf16.mxu0 %v671_v33 }
  0x23   :  { %457 = vmatpush1.bf16.msra.mxu1 %v673_v34 }
  0x24   :  { %498 = vmatpush1.bf16.msra.mxu0 %v674_v35  ;;  %458 = vmatprep.subr.bf16.mxu1 %v675_v36 }
  0x25   :  { %499 = vmatprep.subr.bf16.mxu0 %v677_v37 }
  0x27   :  { %459 = vmatpush1.bf16.msra.mxu1 %v679_v41 }
  0x28   :  { %500 = vmatpush1.bf16.msra.mxu0 %v680_v42  ;;  %460 = vmatprep.subr.bf16.mxu1 %v681_v43 }
  0x29   :  { %501 = vmatprep.subr.bf16.mxu0 %v683_v44 }
  0x2b   :  { %461 = vmatpush1.bf16.msra.mxu1 %v685_v47 }
  0x2c   :  { %502 = vmatpush1.bf16.msra.mxu0 %v686_v48  ;;  %462 = vmatprep.subr.bf16.mxu1 %v687_v49 }
  0x2d   :  { %503 = vmatprep.subr.bf16.mxu0 %v689_v50 }
  0x2f   :  { %463 = vmatpush1.bf16.msra.mxu1 %v691_v53 }
  0x30   :  { %504 = vmatpush1.bf16.msra.mxu0 %v692_v54  ;;  %464 = vmatprep.subr.bf16.mxu1 %v693_v56 }
  0x31   :  { %505 = vmatprep.subr.bf16.mxu0 %v695_v57 }
  0x33   :  { %465 = vmatpush1.bf16.msra.mxu1 %v697_v59 }
  0x34   :  { %506 = vmatpush1.bf16.msra.mxu0 %v698_v60  ;;  %466 = vmatprep.subr.bf16.mxu1 %v699_v62 }
  0x35   :  { %507 = vmatprep.subr.bf16.mxu0 %v701_v63 }
  0x37   :  { %467 = vmatpush1.bf16.msra.mxu1 %v703_v0 }
  0x38   :  { %508 = vmatpush1.bf16.msra.mxu0 %v704_v1  ;;  %468 = vmatprep.subr.bf16.mxu1 %v705_v2 }
  0x39   :  { %509 = vmatprep.subr.bf16.mxu0 %v707_v3 }
  0x3b   :  { %469 = vmatpush1.bf16.msra.mxu1 %v709_v4 }
  0x3c   :  { %510 = vmatpush1.bf16.msra.mxu0 %v710_v5  ;;  %470 = vmatprep.subr.bf16.mxu1 %v711_v6 }
  0x3d   :  { %511 = vmatprep.subr.bf16.mxu0 %v713_v7 }
  0x3f   :  { %471 = vmatpush1.bf16.msra.mxu1 %v715_v9 }
  0x40   :  { %512 = vmatpush1.bf16.msra.mxu0 %v716_v10 }
  0x42   :  { %473 = vmatmul.mubr.bf16.vlgmr.msra.gmra.mrb[0].mxu1 %v106_v8 }
  0x43   :  { %514 = vmatmul.mubr.bf16.vlgmr.msra.gmra.mrb[0].mxu0 %v114_v11 }
 0x115   :  { %v474_v17 = vpop.f32.mrb[0].mxu1 }
 0x116   :  { %v515_v18 = vpop.f32.mrb[0].mxu0  ;;  %v475_v19 = vadd.f32 %v474_v17, %v84_v15  ;;  %v476_v20 = vpop.f32.mrb[1].mxu1 }
 0x117   :  { %v517_v21 = vpop.f32.mrb[1].mxu0  ;;  %v477_v22 = vadd.f32 %v476_v20, %v88_v16  ;;  %v478_v23 = vpop.f32.mrb[2].mxu1 }
 0x118   :  { %v519_v24 = vpop.f32.mrb[2].mxu0  ;;  %v516_v25 = vadd.f32 %v515_v18, %v475_v19  ;;  %v479_v26 = vpop.f32.mrb[3].mxu1 }
 0x119   :  { %v520_v27 = vpop.f32.mrb[3].mxu0  ;;  %v518_v28 = vadd.f32 %v517_v21, %v477_v22 }
 0x11a   :  { %v522_v29 = vmax.f32 %v516_v25, 0.0 }
 0x11b   :  { %v523_v30 = vmax.f32 %v518_v28, 0.0 }
 0x11d   :  { %v614_v31 = vpack.c.bf16 %v523_v30, %v522_v29 }
 0x11f   :  { %v535_v32 = vrot.slane %v614_v31, %v879_v51 }
 0x121   :  { %615 = vst.sshfl [vmem:[%s952_s3] sm:$0x5 pattern:$0x73625140] %v535_v32 }

// kernel: tile.23
= control target key start
LH: loop header
LB: loop body
LE: loop exit
PB: predicated region body
PF: predicated region fallthrough
CT: control target
= control target key end

     0   :  { %s22_s0 = inlined_call_operand.vmem [shape: f32[128], index: 0, kind: input, shape index: {}]   ;;  %s23_s1 = inlined_call_operand.vmem [shape: f32[4,128], index: 1, kind: output, shape index: {}]  }
   0x1   :  { %v4_v0 = vld [vmem:[%s22_s0] ss:$0 sm:$0xff] }
   0x2   :  { %5 = vst [vmem:[%s23_s1] sm:$0xf] %v4_v0 }

// kernel: unet_forward.47
= control target key start
LH: loop header
LB: loop body
LE: loop exit
PB: predicated region body
PF: predicated region fallthrough
CT: control target
= control target key end

     0   :  { %v310_v36 = vlaneseq  ;;  %v3071_v37 = vmov 1966171168   ;;  %s4058_s1 = inlined_call_operand.vmem [shape: bf16[2304,256], index: 1, kind: input, shape index: {}]   ;;  %s4059_s0 = inlined_call_operand.vmem [shape: bf16[2,2304], index: 0, kind: input, shape index: {}]   ;;  %s4060_s3 = inlined_call_operand.vmem [shape: bf16[2,256], index: 3, kind: input, shape index: {}]   ;;  %s4061_s2 = inlined_call_operand.vmem [shape: f32[1,256], index: 2, kind: input, shape index: {}]   ;;  %s4062_s4 = inlined_call_operand.vmem [shape: bf16[2,256], index: 4, kind: output, shape index: {}]  }
   0x1   :  { %v2637_v0 = vld [vmem:[%s4058_s1 + $0x4] ss:$8 sps:$4 sm:$0xff]   ;;  %v2641_v2 = vld [vmem:[%s4058_s1] ss:$8 sps:$4 sm:$0xff]   ;;  %v2643_v4 = vld [vmem:[%s4058_s1 + $0x14] ss:$8 sps:$4 sm:$0xff]   ;;  %v325_v38 = vunpack.c.l.s4 %v3071_v37 }
   0x2   :  { %v2639_v1 = vld [vmem:[%s4058_s1 + $0x404] ss:$8 sps:$4 sm:$0xff]   ;;  %1901 = vmatprep.subr.bf16.mxu1 %v2637_v0  ;;  %v2642_v3 = vld [vmem:[%s4058_s1 + $0x400] ss:$8 sps:$4 sm:$0xff]   ;;  %v2645_v5 = vld [vmem:[%s4058_s1 + $0x414] ss:$8 sps:$4 sm:$0xff]  }
   0x3   :  { %2065 = vmatprep.subr.bf16.mxu0 %v2639_v1  ;;  %1902 = vmatpush1.bf16.msra.mxu1 %v2641_v2  ;;  %v2647_v6 = vld [vmem:[%s4058_s1 + $0x10] ss:$8 sps:$4 sm:$0xff]   ;;  %v2649_v8 = vld [vmem:[%s4058_s1 + $0x24] ss:$8 sps:$4 sm:$0xff]   ;;  %v2653_v10 = vld [vmem:[%s4058_s1 + $0x20] ss:$8 sps:$4 sm:$0xff]   ;;  %v326_v43 = vunpack.c.0.s8 %v325_v38 }
   0x4   :  { %2066 = vmatpush1.bf16.msra.mxu0 %v2642_v3  ;;  %1903 = vmatprep.subr.bf16.mxu1 %v2643_v4  ;;  %v2648_v7 = vld [vmem:[%s4058_s1 + $0x410] ss:$8 sps:$4 sm:$0xff]   ;;  %v2651_v9 = vld [vmem:[%s4058_s1 + $0x424] ss:$8 sps:$4 sm:$0xff]   ;;  %v2654_v11 = vld [vmem:[%s4058_s1 + $0x420] ss:$8 sps:$4 sm:$0xff]  }
   0x5   :  { %2067 = vmatprep.subr.bf16.mxu0 %v2645_v5  ;;  %v2655_v12 = vld [vmem:[%s4058_s1 + $0x34] ss:$8 sps:$4 sm:$0xff]   ;;  %v2659_v14 = vld [vmem:[%s4058_s1 + $0x30] ss:$8 sps:$4 sm:$0xff]   ;;  %v2661_v16 = vld [vmem:[%s4058_s1 + $0x44] ss:$8 sps:$4 sm:$0xff]  }
   0x6   :  { %v2657_v13 = vld [vmem:[%s4058_s1 + $0x434] ss:$8 sps:$4 sm:$0xff]   ;;  %v2660_v15 = vld [vmem:[%s4058_s1 + $0x430] ss:$8 sps:$4 sm:$0xff]   ;;  %v2663_v17 = vld [vmem:[%s4058_s1 + $0x444] ss:$8 sps:$4 sm:$0xff]  }
   0x7   :  { %1904 = vmatpush1.bf16.msra.mxu1 %v2647_v6  ;;  %v2665_v18 = vld [vmem:[%s4058_s1 + $0x40] ss:$8 sps:$4 sm:$0xff]   ;;  %v2667_v20 = vld [vmem:[%s4058_s1 + $0x54] ss:$8 sps:$4 sm:$0xff]   ;;  %v2671_v22 = vld [vmem:[%s4058_s1 + $0x50] ss:$8 sps:$4 sm:$0xff]  }
   0x8   :  { %2068 = vmatpush1.bf16.msra.mxu0 %v2648_v7  ;;  %1905 = vmatprep.subr.bf16.mxu1 %v2649_v8  ;;  %v2666_v19 = vld [vmem:[%s4058_s1 + $0x440] ss:$8 sps:$4 sm:$0xff]   ;;  %v2669_v21 = vld [vmem:[%s4058_s1 + $0x454] ss:$8 sps:$4 sm:$0xff]   ;;  %v2672_v23 = vld [vmem:[%s4058_s1 + $0x450] ss:$8 sps:$4 sm:$0xff]  }
   0x9   :  { %2069 = vmatprep.subr.bf16.mxu0 %v2651_v9  ;;  %v2673_v24 = vld [vmem:[%s4058_s1 + $0x64] ss:$8 sps:$4 sm:$0xff]   ;;  %v2677_v26 = vld [vmem:[%s4058_s1 + $0x60] ss:$8 sps:$4 sm:$0xff]   ;;  %v2679_v28 = vld [vmem:[%s4058_s1 + $0x74] ss:$8 sps:$4 sm:$0xff]  }
   0xa   :  { %v2675_v25 = vld [vmem:[%s4058_s1 + $0x464] ss:$8 sps:$4 sm:$0xff]   ;;  %v2678_v27 = vld [vmem:[%s4058_s1 + $0x460] ss:$8 sps:$4 sm:$0xff]   ;;  %v2681_v29 = vld [vmem:[%s4058_s1 + $0x474] ss:$8 sps:$4 sm:$0xff]  }
   0xb   :  { %1906 = vmatpush1.bf16.msra.mxu1 %v2653_v10  ;;  %v2683_v30 = vld [vmem:[%s4058_s1 + $0x70] ss:$8 sps:$4 sm:$0xff]   ;;  %v2685_v32 = vld [vmem:[%s4058_s1 + $0x84] ss:$8 sps:$4 sm:$0xff]   ;;  %v2689_v34 = vld [vmem:[%s4058_s1 + $0x80] ss:$8 sps:$4 sm:$0xff]  }
   0xc   :  { %2070 = vmatpush1.bf16.msra.mxu0 %v2654_v11  ;;  %1907 = vmatprep.subr.bf16.mxu1 %v2655_v12  ;;  %v2684_v31 = vld [vmem:[%s4058_s1 + $0x470] ss:$8 sps:$4 sm:$0xff]   ;;  %v2687_v33 = vld [vmem:[%s4058_s1 + $0x484] ss:$8 sps:$4 sm:$0xff]   ;;  %v2690_v35 = vld [vmem:[%s4058_s1 + $0x480] ss:$8 sps:$4 sm:$0xff]  }
   0xd   :  { %2071 = vmatprep.subr.bf16.mxu0 %v2657_v13  ;;  %v2691_v39 = vld [vmem:[%s4058_s1 + $0x94] ss:$8 sps:$4 sm:$0xff]   ;;  %v2695_v41 = vld [vmem:[%s4058_s1 + $0x90] ss:$8 sps:$4 sm:$0xff]   ;;  %v3215_v42 = vshrl.u32 %v310_v36, 7  ;;  %v3244_v52 = vld [vmem:[%s4059_s0] sm:$0xff] }
   0xe   :  { %v2693_v40 = vld [vmem:[%s4058_s1 + $0x494] ss:$8 sps:$4 sm:$0xff]   ;;  %v2696_v44 = vld [vmem:[%s4058_s1 + $0x490] ss:$8 sps:$4 sm:$0xff]   ;;  %v2697_v45 = vld [vmem:[%s4058_s1 + $0xa4] ss:$8 sps:$4 sm:$0xff]  }
   0xf   :  { %1908 = vmatpush1.bf16.msra.mxu1 %v2659_v14  ;;  %v2699_v46 = vld [vmem:[%s4058_s1 + $0x4a4] ss:$8 sps:$4 sm:$0xff]   ;;  %v2701_v47 = vld [vmem:[%s4058_s1 + $0xa0] ss:$8 sps:$4 sm:$0xff]   ;;  %v3233_v49 = vsub.s32 %v326_v43, %v3215_v42  ;;  %v2703_v50 = vld [vmem:[%s4058_s1 + $0xb4] ss:$8 sps:$4 sm:$0xff]  }
  0x10   :  { %2072 = vmatpush1.bf16.msra.mxu0 %v2660_v15  ;;  %1909 = vmatprep.subr.bf16.mxu1 %v2661_v16  ;;  %v2702_v48 = vld [vmem:[%s4058_s1 + $0x4a0] ss:$8 sps:$4 sm:$0xff]   ;;  %v2705_v51 = vld [vmem:[%s4058_s1 + $0x4b4] ss:$8 sps:$4 sm:$0xff]   ;;  %v2707_v53 = vld [vmem:[%s4058_s1 + $0xb0] ss:$8 sps:$4 sm:$0xff]  }
  0x11   :  { %2073 = vmatprep.subr.bf16.mxu0 %v2663_v17  ;;  %v330_v54 = vrot.slane %v3244_v52, %v3233_v49  ;;  %v2708_v55 = vld [vmem:[%s4058_s1 + $0x4b0] ss:$8 sps:$4 sm:$0xff]   ;;  %v3257_v56 = vld [vmem:[%s4059_s0 + $0x8] sm:$0xff]  ;;  %v2715_v1 = vld [vmem:[%s4058_s1 + $0xd4] ss:$8 sps:$4 sm:$0xff]  }
  0x12   :  { %v2709_v57 = vld [vmem:[%s4058_s1 + $0xc4] ss:$8 sps:$4 sm:$0xff]   ;;  %v379_v60 = vrot.slane %v3257_v56, %v3233_v49  ;;  %v2713_v63 = vld [vmem:[%s4058_s1 + $0xc0] ss:$8 sps:$4 sm:$0xff]   ;;  %v2717_v2 = vld [vmem:[%s4058_s1 + $0x4d4] ss:$8 sps:$4 sm:$0xff]  }
  0x13   :  { %1910 = vmatpush1.bf16.msra.mxu1 %v2665_v18  ;;  %v2711_v58 = vld [vmem:[%s4058_s1 + $0x4c4] ss:$8 sps:$4 sm:$0xff]   ;;  %v338_v59 = vcombine.high %v330_v54, %v330_v54  ;;  %v2714_v0 = vld [vmem:[%s4058_s1 + $0x4c0] ss:$8 sps:$4 sm:$0xff]   ;;  %v2719_v4 = vld [vmem:[%s4058_s1 + $0xd0] ss:$8 sps:$4 sm:$0xff]   ;;  %v3318_v16 = vrot.slane %v330_v54, %v3233_v49 }
  0x14   :  { %2074 = vmatpush1.bf16.msra.mxu0 %v2666_v19  ;;  %1911 = vmatprep.subr.bf16.mxu1 %v2667_v20  ;;  %v387_v62 = vcombine.high %v379_v60, %v379_v60  ;;  %v2720_v5 = vld [vmem:[%s4058_s1 + $0x4d0] ss:$8 sps:$4 sm:$0xff]   ;;  %v2721_v6 = vld [vmem:[%s4058_s1 + $0xe4] ss:$8 sps:$4 sm:$0xff]   ;;  %v2725_v8 = vld [vmem:[%s4058_s1 + $0xe0] ss:$8 sps:$4 sm:$0xff]   ;;  %v3321_v17 = vrot.slane %v379_v60, %v3233_v49 }
  0x15   :  { %2075 = vmatprep.subr.bf16.mxu0 %v2669_v21  ;;  %v360_v61 = vrot.slane %v338_v59, %v3233_v49  ;;  %v2723_v7 = vld [vmem:[%s4058_s1 + $0x4e4] ss:$8 sps:$4 sm:$0xff]   ;;  %v2726_v9 = vld [vmem:[%s4058_s1 + $0x4e0] ss:$8 sps:$4 sm:$0xff]   ;;  %v2727_v10 = vld [vmem:[%s4058_s1 + $0xf4] ss:$8 sps:$4 sm:$0xff]  }
  0x16   :  { %v409_v3 = vrot.slane %v387_v62, %v3233_v49  ;;  %v2729_v11 = vld [vmem:[%s4058_s1 + $0x4f4] ss:$8 sps:$4 sm:$0xff]   ;;  %v2731_v12 = vld [vmem:[%s4058_s1 + $0xf0] ss:$8 sps:$4 sm:$0xff]   ;;  %v2736_v14 = vld [vmem:[%s4058_s1 + $0x104] ss:$8 sps:$4 sm:$0xff]  }
  0x17   :  { %1912 = vmatpush1.bf16.msra.mxu1 %v2671_v22  ;;  %1933 = vmatprep.mubr.bf16.mxu1 %v360_v61  ;;  %v2732_v13 = vld [vmem:[%s4058_s1 + $0x4f0] ss:$8 sps:$4 sm:$0xff]   ;;  %v2740_v15 = vld [vmem:[%s4058_s1 + $0x504] ss:$8 sps:$4 sm:$0xff]   ;;  %v2734_v18 = vld [vmem:[%s4058_s1 + $0x100] ss:$8 sps:$4 sm:$0xff]   ;;  %v370_v22 = vcombine.high %v360_v61, %v360_v61 }
  0x18   :  { %2076 = vmatpush1.bf16.msra.mxu0 %v2672_v23  ;;  %1913 = vmatprep.subr.bf16.mxu1 %v2673_v24  ;;  %v2738_v19 = vld [vmem:[%s4058_s1 + $0x500] ss:$8 sps:$4 sm:$0xff]   ;;  %v2743_v20 = vld [vmem:[%s4058_s1 + $0x114] ss:$8 sps:$4 sm:$0xff]   ;;  %v419_v23 = vcombine.high %v409_v3, %v409_v3  ;;  %v2741_v24 = vld [vmem:[%s4058_s1 + $0x110] ss:$8 sps:$4 sm:$0xff]  }
  0x19   :  { %2077 = vmatprep.subr.bf16.mxu0 %v2675_v25  ;;  %2097 = vmatprep.mubr.bf16.mxu0 %v409_v3  ;;  %v2746_v21 = vld [vmem:[%s4058_s1 + $0x514] ss:$8 sps:$4 sm:$0xff]   ;;  %v2744_v25 = vld [vmem:[%s4058_s1 + $0x510] ss:$8 sps:$4 sm:$0xff]   ;;  %v2759_v36 = vld [vmem:[%s4058_s1 + $0x140] ss:$8 sps:$4 sm:$0xff]  }
  0x1a   :  { %v2762_v37 = vld [vmem:[%s4058_s1 + $0x540] ss:$8 sps:$4 sm:$0xff]   ;;  %v2767_v38 = vld [vmem:[%s4058_s1 + $0x154] ss:$8 sps:$4 sm:$0xff]   ;;  %v2773_v43 = vld [vmem:[%s4058_s1 + $0x164] ss:$8 sps:$4 sm:$0xff]  }
  0x1b   :  { %1914 = vmatpush1.bf16.msra.mxu1 %v2677_v26  ;;  %v2749_v26 = vld [vmem:[%s4058_s1 + $0x124] ss:$8 sps:$4 sm:$0xff]   ;;  %v2794_v59 = vld [vmem:[%s4058_s1 + $0x594] ss:$8 sps:$4 sm:$0xff]   ;;  %v2789_v60 = vld [vmem:[%s4058_s1 + $0x190] ss:$8 sps:$4 sm:$0xff]  }
  0x1c   :  { %2078 = vmatpush1.bf16.msra.mxu0 %v2678_v27  ;;  %1915 = vmatprep.subr.bf16.mxu1 %v2679_v28  ;;  %v2752_v27 = vld [vmem:[%s4058_s1 + $0x524] ss:$8 sps:$4 sm:$0xff]   ;;  %v2747_v28 = vld [vmem:[%s4058_s1 + $0x120] ss:$8 sps:$4 sm:$0xff]   ;;  %v2792_v61 = vld [vmem:[%s4058_s1 + $0x590] ss:$8 sps:$4 sm:$0xff]  }
  0x1d   :  { %2079 = vmatprep.subr.bf16.mxu0 %v2681_v29  ;;  %v2750_v29 = vld [vmem:[%s4058_s1 + $0x520] ss:$8 sps:$4 sm:$0xff]   ;;  %v2788_v54 = vld [vmem:[%s4058_s1 + $0x584] ss:$8 sps:$4 sm:$0xff]   ;;  %v2806_v3 = vld [vmem:[%s4058_s1 + $0x5b4] ss:$8 sps:$4 sm:$0xff]  }
  0x1e   :  { %v2797_v62 = vld [vmem:[%s4058_s1 + $0x1a4] ss:$8 sps:$4 sm:$0xff]  }
  0x1f   :  { %1916 = vmatpush1.bf16.msra.mxu1 %v2683_v30  ;;  %v2755_v30 = vld [vmem:[%s4058_s1 + $0x134] ss:$8 sps:$4 sm:$0xff]  }
  0x20   :  { %2080 = vmatpush1.bf16.msra.mxu0 %v2684_v31  ;;  %1917 = vmatprep.subr.bf16.mxu1 %v2685_v32  ;;  %v2758_v31 = vld [vmem:[%s4058_s1 + $0x534] ss:$8 sps:$4 sm:$0xff]   ;;  %v2753_v32 = vld [vmem:[%s4058_s1 + $0x130] ss:$8 sps:$4 sm:$0xff]  }
  0x21   :  { %2081 = vmatprep.subr.bf16.mxu0 %v2687_v33  ;;  %v2756_v33 = vld [vmem:[%s4058_s1 + $0x530] ss:$8 sps:$4 sm:$0xff]  }
  0x23   :  { %1918 = vmatpush1.bf16.msra.mxu1 %v2689_v34  ;;  %v2761_v34 = vld [vmem:[%s4058_s1 + $0x144] ss:$8 sps:$4 sm:$0xff]  }
  0x24   :  { %2082 = vmatpush1.bf16.msra.mxu0 %v2690_v35  ;;  %1919 = vmatprep.subr.bf16.mxu1 %v2691_v39  ;;  %v2764_v35 = vld [vmem:[%s4058_s1 + $0x544] ss:$8 sps:$4 sm:$0xff]   ;;  %v2770_v39 = vld [vmem:[%s4058_s1 + $0x554] ss:$8 sps:$4 sm:$0xff]  }
  0x25   :  { %2083 = vmatprep.subr.bf16.mxu0 %v2693_v40  ;;  %v2765_v40 = vld [vmem:[%s4058_s1 + $0x150] ss:$8 sps:$4 sm:$0xff]  }
  0x27   :  { %1920 = vmatpush1.bf16.msra.mxu1 %v2695_v41  ;;  %v2768_v41 = vld [vmem:[%s4058_s1 + $0x550] ss:$8 sps:$4 sm:$0xff]  }
  0x28   :  { %2084 = vmatpush1.bf16.msra.mxu0 %v2696_v44  ;;  %1921 = vmatprep.subr.bf16.mxu1 %v2697_v45  ;;  %v2776_v44 = vld [vmem:[%s4058_s1 + $0x564] ss:$8 sps:$4 sm:$0xff]   ;;  %v2771_v45 = vld [vmem:[%s4058_s1 + $0x160] ss:$8 sps:$4 sm:$0xff]  }
  0x29   :  { %2085 = vmatprep.subr.bf16.mxu0 %v2699_v46  ;;  %v2774_v46 = vld [vmem:[%s4058_s1 + $0x560] ss:$8 sps:$4 sm:$0xff]  }
  0x2b   :  { %1922 = vmatpush1.bf16.msra.mxu1 %v2701_v47  ;;  %v2779_v47 = vld [vmem:[%s4058_s1 + $0x174] ss:$8 sps:$4 sm:$0xff]  }
  0x2c   :  { %2086 = vmatpush1.bf16.msra.mxu0 %v2702_v48  ;;  %1923 = vmatprep.subr.bf16.mxu1 %v2703_v50  ;;  %v2782_v48 = vld [vmem:[%s4058_s1 + $0x574] ss:$8 sps:$4 sm:$0xff]   ;;  %v2777_v50 = vld [vmem:[%s4058_s1 + $0x170] ss:$8 sps:$4 sm:$0xff]  }
  0x2d   :  { %2087 = vmatprep.subr.bf16.mxu0 %v2705_v51  ;;  %v2780_v51 = vld [vmem:[%s4058_s1 + $0x570] ss:$8 sps:$4 sm:$0xff]  }
  0x2f   :  { %1924 = vmatpush1.bf16.msra.mxu1 %v2707_v53  ;;  %v2785_v53 = vld [vmem:[%s4058_s1 + $0x184] ss:$8 sps:$4 sm:$0xff]  }
  0x30   :  { %2088 = vmatpush1.bf16.msra.mxu0 %v2708_v55  ;;  %1925 = vmatprep.subr.bf16.mxu1 %v2709_v57  ;;  %v2783_v55 = vld [vmem:[%s4058_s1 + $0x180] ss:$8 sps:$4 sm:$0xff]  }
  0x31   :  { %2089 = vmatprep.subr.bf16.mxu0 %v2711_v58  ;;  %v2786_v57 = vld [vmem:[%s4058_s1 + $0x580] ss:$8 sps:$4 sm:$0xff]   ;;  %v2791_v58 = vld [vmem:[%s4058_s1 + $0x194] ss:$8 sps:$4 sm:$0xff]  }
  0x33   :  { %1926 = vmatpush1.bf16.msra.mxu1 %v2713_v63  ;;  %v2800_v63 = vld [vmem:[%s4058_s1 + $0x5a4] ss:$8 sps:$4 sm:$0xff]  }
  0x34   :  { %2090 = vmatpush1.bf16.msra.mxu0 %v2714_v0  ;;  %1927 = vmatprep.subr.bf16.mxu1 %v2715_v1  ;;  %v2795_v0 = vld [vmem:[%s4058_s1 + $0x1a0] ss:$8 sps:$4 sm:$0xff]  }
  0x35   :  { %2091 = vmatprep.subr.bf16.mxu0 %v2717_v2  ;;  %v2798_v1 = vld [vmem:[%s4058_s1 + $0x5a0] ss:$8 sps:$4 sm:$0xff]   ;;  %v2803_v2 = vld [vmem:[%s4058_s1 + $0x1b4] ss:$8 sps:$4 sm:$0xff]  }
  0x37   :  { %1928 = vmatpush1.bf16.msra.mxu1 %v2719_v4  ;;  %v2801_v4 = vld [vmem:[%s4058_s1 + $0x1b0] ss:$8 sps:$4 sm:$0xff]  }
  0x38   :  { %2092 = vmatpush1.bf16.msra.mxu0 %v2720_v5  ;;  %1929 = vmatprep.subr.bf16.mxu1 %v2721_v6  ;;  %v2804_v5 = vld [vmem:[%s4058_s1 + $0x5b0] ss:$8 sps:$4 sm:$0xff]   ;;  %v2809_v6 = vld [vmem:[%s4058_s1 + $0x1c4] ss:$8 sps:$4 sm:$0xff]  }
  0x39   :  { %2093 = vmatprep.subr.bf16.mxu0 %v2723_v7  ;;  %v2812_v7 = vld [vmem:[%s4058_s1 + $0x5c4] ss:$8 sps:$4 sm:$0xff]  }
  0x3b   :  { %1930 = vmatpush1.bf16.msra.mxu1 %v2725_v8  ;;  %v2807_v8 = vld [vmem:[%s4058_s1 + $0x1c0] ss:$8 sps:$4 sm:$0xff]  }
  0x3c   :  { %2094 = vmatpush1.bf16.msra.mxu0 %v2726_v9  ;;  %1931 = vmatprep.subr.bf16.mxu1 %v2727_v10  ;;  %v2810_v9 = vld [vmem:[%s4058_s1 + $0x5c0] ss:$8 sps:$4 sm:$0xff]   ;;  %v2815_v10 = vld [vmem:[%s4058_s1 + $0x1d4] ss:$8 sps:$4 sm:$0xff]  }
  0x3d   :  { %2095 = vmatprep.subr.bf16.mxu0 %v2729_v11  ;;  %v2818_v11 = vld [vmem:[%s4058_s1 + $0x5d4] ss:$8 sps:$4 sm:$0xff]  }
  0x3f   :  { %1932 = vmatpush1.bf16.msra.mxu1 %v2731_v12  ;;  %v2813_v12 = vld [vmem:[%s4058_s1 + $0x1d0] ss:$8 sps:$4 sm:$0xff]  }
  0x40   :  { %2096 = vmatpush1.bf16.msra.mxu0 %v2732_v13  ;;  %1942 = vmatprep.subr.bf16.mxu1 %v2736_v14  ;;  %v2816_v13 = vld [vmem:[%s4058_s1 + $0x5d0] ss:$8 sps:$4 sm:$0xff]   ;;  %v2821_v14 = vld [vmem:[%s4058_s1 + $0x1e4] ss:$8 sps:$4 sm:$0xff]  }
  0x41   :  { %2106 = vmatprep.subr.bf16.mxu0 %v2740_v15  ;;  %v2824_v15 = vld [vmem:[%s4058_s1 + $0x5e4] ss:$8 sps:$4 sm:$0xff]  }
  0x42   :  { %1934 = vmatmul.mubr.bf16.vlgmr.msra.gmra.mrb[0].mxu1 %v3318_v16 }
  0x43   :  { %2098 = vmatmul.mubr.bf16.vlgmr.msra.gmra.mrb[0].mxu0 %v3321_v17  ;;  %1943 = vmatpush1.bf16.msra.mxu1 %v2734_v18  ;;  %v323_v18 = vcombine.high %v3244_v52, %v3244_v52  ;;  %v2830_v52 = vld [vmem:[%s4058_s1 + $0x5f4] ss:$8 sps:$4 sm:$0xff]  }
  0x44   :  { %2107 = vmatpush1.bf16.msra.mxu0 %v2738_v19  ;;  %1944 = vmatprep.subr.bf16.mxu1 %v2743_v20  ;;  %v372_v19 = vcombine.high %v3257_v56, %v3257_v56  ;;  %v2819_v20 = vld [vmem:[%s4058_s1 + $0x1e0] ss:$8 sps:$4 sm:$0xff]  }
  0x45   :  { %2108 = vmatprep.subr.bf16.mxu0 %v2746_v21  ;;  %1974 = vmatprep.mubr.bf16.mxu1 %v370_v22  ;;  %v2822_v21 = vld [vmem:[%s4058_s1 + $0x5e0] ss:$8 sps:$4 sm:$0xff]   ;;  %v2827_v22 = vld [vmem:[%s4058_s1 + $0x1f4] ss:$8 sps:$4 sm:$0xff]   ;;  %v3510_v56 = vrot.slane %v323_v18, %v3233_v49  ;;  %v2897_v18 = vld [vmem:[%s4058_s1 + $0x2b0] ss:$8 sps:$4 sm:$0xff]  }
  0x46   :  { %2138 = vmatprep.mubr.bf16.mxu0 %v419_v23  ;;  %v3513_v23 = vrot.slane %v372_v19, %v3233_v49  ;;  %v2900_v19 = vld [vmem:[%s4058_s1 + $0x6b0] ss:$8 sps:$4 sm:$0xff]  }
  0x47   :  { %1945 = vmatpush1.bf16.msra.mxu1 %v2741_v24  ;;  %v2825_v24 = vld [vmem:[%s4058_s1 + $0x1f0] ss:$8 sps:$4 sm:$0xff]  }
  0x48   :  { %2109 = vmatpush1.bf16.msra.mxu0 %v2744_v25  ;;  %1946 = vmatprep.subr.bf16.mxu1 %v2749_v26  ;;  %v2828_v25 = vld [vmem:[%s4058_s1 + $0x5f0] ss:$8 sps:$4 sm:$0xff]   ;;  %v2833_v26 = vld [vmem:[%s4058_s1 + $0x204] ss:$8 sps:$4 sm:$0xff]  }
  0x49   :  { %2110 = vmatprep.subr.bf16.mxu0 %v2752_v27  ;;  %v2836_v27 = vld [vmem:[%s4058_s1 + $0x604] ss:$8 sps:$4 sm:$0xff]  }
  0x4b   :  { %1947 = vmatpush1.bf16.msra.mxu1 %v2747_v28  ;;  %v339_v28 = vcombine.high %v3510_v56, %v3510_v56 }
  0x4c   :  { %2111 = vmatpush1.bf16.msra.mxu0 %v2750_v29  ;;  %1948 = vmatprep.subr.bf16.mxu1 %v2755_v30  ;;  %v388_v29 = vcombine.high %v3513_v23, %v3513_v23  ;;  %v368_v30 = vcombine.high %v3318_v16, %v3318_v16  ;;  %v2842_v16 = vld [vmem:[%s4058_s1 + $0x614] ss:$8 sps:$4 sm:$0xff]  }
  0x4d   :  { %2112 = vmatprep.subr.bf16.mxu0 %v2758_v31  ;;  %v417_v31 = vcombine.high %v3321_v17, %v3321_v17  ;;  %v3548_v17 = vrot.slane %v339_v28, %v3233_v49  ;;  %v2917_v28 = vld [vmem:[%s4058_s1 + $0x2e4] ss:$8 sps:$4 sm:$0xff]  }
  0x4f   :  { %1949 = vmatpush1.bf16.msra.mxu1 %v2753_v32  ;;  %v2831_v32 = vld [vmem:[%s4058_s1 + $0x200] ss:$8 sps:$4 sm:$0xff]  }
  0x50   :  { %2113 = vmatpush1.bf16.msra.mxu0 %v2756_v33  ;;  %1950 = vmatprep.subr.bf16.mxu1 %v2761_v34  ;;  %v2834_v33 = vld [vmem:[%s4058_s1 + $0x600] ss:$8 sps:$4 sm:$0xff]   ;;  %v2839_v34 = vld [vmem:[%s4058_s1 + $0x214] ss:$8 sps:$4 sm:$0xff]  }
  0x51   :  { %2114 = vmatprep.subr.bf16.mxu0 %v2764_v35  ;;  %v3551_v35 = vrot.slane %v388_v29, %v3233_v49  ;;  %v2920_v29 = vld [vmem:[%s4058_s1 + $0x6e4] ss:$8 sps:$4 sm:$0xff]  }
  0x53   :  { %1951 = vmatpush1.bf16.msra.mxu1 %v2759_v36  ;;  %v2837_v36 = vld [vmem:[%s4058_s1 + $0x210] ss:$8 sps:$4 sm:$0xff]  }
  0x54   :  { %2115 = vmatpush1.bf16.msra.mxu0 %v2762_v37  ;;  %1952 = vmatprep.subr.bf16.mxu1 %v2767_v38  ;;  %v2840_v37 = vld [vmem:[%s4058_s1 + $0x610] ss:$8 sps:$4 sm:$0xff]   ;;  %v2845_v38 = vld [vmem:[%s4058_s1 + $0x224] ss:$8 sps:$4 sm:$0xff]  }
  0x55   :  { %2116 = vmatprep.subr.bf16.mxu0 %v2770_v39  ;;  %v2848_v39 = vld [vmem:[%s4058_s1 + $0x624] ss:$8 sps:$4 sm:$0xff]  }
  0x57   :  { %1953 = vmatpush1.bf16.msra.mxu1 %v2765_v40  ;;  %v2843_v40 = vld [vmem:[%s4058_s1 + $0x220] ss:$8 sps:$4 sm:$0xff]  }
  0x58   :  { %2117 = vmatpush1.bf16.msra.mxu0 %v2768_v41  ;;  %1954 = vmatprep.subr.bf16.mxu1 %v2773_v43  ;;  %v2846_v41 = vld [vmem:[%s4058_s1 + $0x620] ss:$8 sps:$4 sm:$0xff]   ;;  %v2851_v43 = vld [vmem:[%s4058_s1 + $0x234] ss:$8 sps:$4 sm:$0xff]  }
  0x59   :  { %2118 = vmatprep.subr.bf16.mxu0 %v2776_v44  ;;  %v2854_v44 = vld [vmem:[%s4058_s1 + $0x634] ss:$8 sps:$4 sm:$0xff]  }
  0x5b   :  { %1955 = vmatpush1.bf16.msra.mxu1 %v2771_v45  ;;  %v2849_v45 = vld [vmem:[%s4058_s1 + $0x230] ss:$8 sps:$4 sm:$0xff]  }
  0x5c   :  { %2119 = vmatpush1.bf16.msra.mxu0 %v2774_v46  ;;  %1956 = vmatprep.subr.bf16.mxu1 %v2779_v47  ;;  %v2852_v46 = vld [vmem:[%s4058_s1 + $0x630] ss:$8 sps:$4 sm:$0xff]   ;;  %v2857_v47 = vld [vmem:[%s4058_s1 + $0x244] ss:$8 sps:$4 sm:$0xff]  }
  0x5d   :  { %2120 = vmatprep.subr.bf16.mxu0 %v2782_v48  ;;  %v2860_v48 = vld [vmem:[%s4058_s1 + $0x644] ss:$8 sps:$4 sm:$0xff]  }
  0x5f   :  { %1957 = vmatpush1.bf16.msra.mxu1 %v2777_v50  ;;  %v2855_v50 = vld [vmem:[%s4058_s1 + $0x240] ss:$8 sps:$4 sm:$0xff]  }
  0x60   :  { %2121 = vmatpush1.bf16.msra.mxu0 %v2780_v51  ;;  %1958 = vmatprep.subr.bf16.mxu1 %v2785_v53  ;;  %v2858_v51 = vld [vmem:[%s4058_s1 + $0x640] ss:$8 sps:$4 sm:$0xff]   ;;  %v2863_v53 = vld [vmem:[%s4058_s1 + $0x254] ss:$8 sps:$4 sm:$0xff]  }
  0x61   :  { %2122 = vmatprep.subr.bf16.mxu0 %v2788_v54  ;;  %v2866_v54 = vld [vmem:[%s4058_s1 + $0x654] ss:$8 sps:$4 sm:$0xff]  }
  0x63   :  { %1959 = vmatpush1.bf16.msra.mxu1 %v2783_v55  ;;  %v2861_v55 = vld [vmem:[%s4058_s1 + $0x250] ss:$8 sps:$4 sm:$0xff]  }
  0x64   :  { %2123 = vmatpush1.bf16.msra.mxu0 %v2786_v57  ;;  %1960 = vmatprep.subr.bf16.mxu1 %v2791_v58  ;;  %v2864_v57 = vld [vmem:[%s4058_s1 + $0x650] ss:$8 sps:$4 sm:$0xff]   ;;  %v2869_v58 = vld [vmem:[%s4058_s1 + $0x264] ss:$8 sps:$4 sm:$0xff]  }
  0x65   :  { %2124 = vmatprep.subr.bf16.mxu0 %v2794_v59  ;;  %v2872_v59 = vld [vmem:[%s4058_s1 + $0x664] ss:$8 sps:$4 sm:$0xff]  }
  0x67   :  { %1961 = vmatpush1.bf16.msra.mxu1 %v2789_v60  ;;  %v2867_v60 = vld [vmem:[%s4058_s1 + $0x260] ss:$8 sps:$4 sm:$0xff]  }
  0x68   :  { %2125 = vmatpush1.bf16.msra.mxu0 %v2792_v61  ;;  %1962 = vmatprep.subr.bf16.mxu1 %v2797_v62  ;;  %v2870_v61 = vld [vmem:[%s4058_s1 + $0x660] ss:$8 sps:$4 sm:$0xff]   ;;  %v2875_v62 = vld [vmem:[%s4058_s1 + $0x274] ss:$8 sps:$4 sm:$0xff]  }
  0x69   :  { %2126 = vmatprep.subr.bf16.mxu0 %v2800_v63  ;;  %v2878_v63 = vld [vmem:[%s4058_s1 + $0x674] ss:$8 sps:$4 sm:$0xff]  }
  0x6b   :  { %1963 = vmatpush1.bf16.msra.mxu1 %v2795_v0  ;;  %v2873_v0 = vld [vmem:[%s4058_s1 + $0x270] ss:$8 sps:$4 sm:$0xff]  }
  0x6c   :  { %2127 = vmatpush1.bf16.msra.mxu0 %v2798_v1  ;;  %1964 = vmatprep.subr.bf16.mxu1 %v2803_v2  ;;  %v2876_v1 = vld [vmem:[%s4058_s1 + $0x670] ss:$8 sps:$4 sm:$0xff]   ;;  %v2881_v2 = vld [vmem:[%s4058_s1 + $0x284] ss:$8 sps:$4 sm:$0xff]  }
  0x6d   :  { %2128 = vmatprep.subr.bf16.mxu0 %v2806_v3  ;;  %v2884_v3 = vld [vmem:[%s4058_s1 + $0x684] ss:$8 sps:$4 sm:$0xff]  }
  0x6f   :  { %1965 = vmatpush1.bf16.msra.mxu1 %v2801_v4  ;;  %v2879_v4 = vld [vmem:[%s4058_s1 + $0x280] ss:$8 sps:$4 sm:$0xff]  }
  0x70   :  { %2129 = vmatpush1.bf16.msra.mxu0 %v2804_v5  ;;  %1966 = vmatprep.subr.bf16.mxu1 %v2809_v6  ;;  %v2882_v5 = vld [vmem:[%s4058_s1 + $0x680] ss:$8 sps:$4 sm:$0xff]   ;;  %v2887_v6 = vld [vmem:[%s4058_s1 + $0x294] ss:$8 sps:$4 sm:$0xff]  }
  0x71   :  { %2130 = vmatprep.subr.bf16.mxu0 %v2812_v7  ;;  %v2890_v7 = vld [vmem:[%s4058_s1 + $0x694] ss:$8 sps:$4 sm:$0xff]  }
  0x73   :  { %1967 = vmatpush1.bf16.msra.mxu1 %v2807_v8  ;;  %v2885_v8 = vld [vmem:[%s4058_s1 + $0x290] ss:$8 sps:$4 sm:$0xff]  }
  0x74   :  { %2131 = vmatpush1.bf16.msra.mxu0 %v2810_v9  ;;  %1968 = vmatprep.subr.bf16.mxu1 %v2815_v10  ;;  %v2888_v9 = vld [vmem:[%s4058_s1 + $0x690] ss:$8 sps:$4 sm:$0xff]   ;;  %v2893_v10 = vld [vmem:[%s4058_s1 + $0x2a4] ss:$8 sps:$4 sm:$0xff]  }
  0x75   :  { %2132 = vmatprep.subr.bf16.mxu0 %v2818_v11  ;;  %v2896_v11 = vld [vmem:[%s4058_s1 + $0x6a4] ss:$8 sps:$4 sm:$0xff]  }
  0x77   :  { %1969 = vmatpush1.bf16.msra.mxu1 %v2813_v12  ;;  %v2891_v12 = vld [vmem:[%s4058_s1 + $0x2a0] ss:$8 sps:$4 sm:$0xff]  }
  0x78   :  { %2133 = vmatpush1.bf16.msra.mxu0 %v2816_v13  ;;  %1970 = vmatprep.subr.bf16.mxu1 %v2821_v14  ;;  %v2894_v13 = vld [vmem:[%s4058_s1 + $0x6a0] ss:$8 sps:$4 sm:$0xff]   ;;  %v2899_v14 = vld [vmem:[%s4058_s1 + $0x2b4] ss:$8 sps:$4 sm:$0xff]  }
  0x79   :  { %2134 = vmatprep.subr.bf16.mxu0 %v2824_v15  ;;  %v2902_v15 = vld [vmem:[%s4058_s1 + $0x6b4] ss:$8 sps:$4 sm:$0xff]  }
  0x7b   :  { %1971 = vmatpush1.bf16.msra.mxu1 %v2819_v20  ;;  %v2905_v20 = vld [vmem:[%s4058_s1 + $0x2c4] ss:$8 sps:$4 sm:$0xff]  }
  0x7c   :  { %2135 = vmatpush1.bf16.msra.mxu0 %v2822_v21  ;;  %1972 = vmatprep.subr.bf16.mxu1 %v2827_v22  ;;  %v2908_v21 = vld [vmem:[%s4058_s1 + $0x6c4] ss:$8 sps:$4 sm:$0xff]   ;;  %v2903_v22 = vld [vmem:[%s4058_s1 + $0x2c0] ss:$8 sps:$4 sm:$0xff]  }
  0x7d   :  { %2136 = vmatprep.subr.bf16.mxu0 %v2830_v52  ;;  %v2906_v52 = vld [vmem:[%s4058_s1 + $0x6c0] ss:$8 sps:$4 sm:$0xff]  }
  0x7f   :  { %1973 = vmatpush1.bf16.msra.mxu1 %v2825_v24  ;;  %v2911_v24 = vld [vmem:[%s4058_s1 + $0x2d4] ss:$8 sps:$4 sm:$0xff]  }
  0x80   :  { %2137 = vmatpush1.bf16.msra.mxu0 %v2828_v25  ;;  %1983 = vmatprep.subr.bf16.mxu1 %v2833_v26  ;;  %v2914_v25 = vld [vmem:[%s4058_s1 + $0x6d4] ss:$8 sps:$4 sm:$0xff]   ;;  %v2909_v26 = vld [vmem:[%s4058_s1 + $0x2d0] ss:$8 sps:$4 sm:$0xff]  }
  0x81   :  { %2147 = vmatprep.subr.bf16.mxu0 %v2836_v27  ;;  %v2912_v27 = vld [vmem:[%s4058_s1 + $0x6d0] ss:$8 sps:$4 sm:$0xff]  }
  0x82   :  { %1975 = vmatmul.mubr.bf16.vlgmr.msra.gmra.mrb[0].mxu1 %v368_v30  ;;  %v2915_v30 = vld [vmem:[%s4058_s1 + $0x2e0] ss:$8 sps:$4 sm:$0xff]  }
  0x83   :  { %2139 = vmatmul.mubr.bf16.vlgmr.msra.gmra.mrb[0].mxu0 %v417_v31  ;;  %1984 = vmatpush1.bf16.msra.mxu1 %v2831_v32  ;;  %v2918_v31 = vld [vmem:[%s4058_s1 + $0x6e0] ss:$8 sps:$4 sm:$0xff]   ;;  %v2923_v32 = vld [vmem:[%s4058_s1 + $0x2f4] ss:$8 sps:$4 sm:$0xff]  }
  0x84   :  { %2148 = vmatpush1.bf16.msra.mxu0 %v2834_v33  ;;  %1985 = vmatprep.subr.bf16.mxu1 %v2839_v34  ;;  %v2926_v33 = vld [vmem:[%s4058_s1 + $0x6f4] ss:$8 sps:$4 sm:$0xff]   ;;  %v2921_v34 = vld [vmem:[%s4058_s1 + $0x2f0] ss:$8 sps:$4 sm:$0xff]  }
  0x85   :  { %2149 = vmatprep.subr.bf16.mxu0 %v2842_v16  ;;  %2015 = vmatprep.mubr.bf16.mxu1 %v3548_v17  ;;  %v2924_v16 = vld [vmem:[%s4058_s1 + $0x6f0] ss:$8 sps:$4 sm:$0xff]  }
  0x86   :  { %2179 = vmatprep.mubr.bf16.mxu0 %v3551_v35 }
  0x87   :  { %1986 = vmatpush1.bf16.msra.mxu1 %v2837_v36  ;;  %v2929_v36 = vld [vmem:[%s4058_s1 + $0x304] ss:$8 sps:$4 sm:$0xff]  }
  0x88   :  { %2150 = vmatpush1.bf16.msra.mxu0 %v2840_v37  ;;  %1987 = vmatprep.subr.bf16.mxu1 %v2845_v38  ;;  %v2932_v37 = vld [vmem:[%s4058_s1 + $0x704] ss:$8 sps:$4 sm:$0xff]   ;;  %v3737_v38 = vrot.slane %v3510_v56, %v3233_v49  ;;  %v2935_v56 = vld [vmem:[%s4058_s1 + $0x314] ss:$8 sps:$4 sm:$0xff]  }
  0x89   :  { %2151 = vmatprep.subr.bf16.mxu0 %v2848_v39  ;;  %v3741_v39 = vrot.slane %v3513_v23, %v3233_v49  ;;  %v2938_v23 = vld [vmem:[%s4058_s1 + $0x714] ss:$8 sps:$4 sm:$0xff]  }
  0x8b   :  { %1988 = vmatpush1.bf16.msra.mxu1 %v2843_v40  ;;  %v2927_v40 = vld [vmem:[%s4058_s1 + $0x300] ss:$8 sps:$4 sm:$0xff]  }
  0x8c   :  { %2152 = vmatpush1.bf16.msra.mxu0 %v2846_v41  ;;  %1989 = vmatprep.subr.bf16.mxu1 %v2851_v43  ;;  %v2930_v41 = vld [vmem:[%s4058_s1 + $0x700] ss:$8 sps:$4 sm:$0xff]   ;;  %v371_v43 = vcombine.high %v3548_v17, %v3548_v17  ;;  %v2941_v17 = vld [vmem:[%s4058_s1 + $0x324] ss:$8 sps:$4 sm:$0xff]  }
  0x8d   :  { %2153 = vmatprep.subr.bf16.mxu0 %v2854_v44  ;;  %v420_v44 = vcombine.high %v3551_v35, %v3551_v35  ;;  %v2944_v35 = vld [vmem:[%s4058_s1 + $0x724] ss:$8 sps:$4 sm:$0xff]  }
  0x8f   :  { %1990 = vmatpush1.bf16.msra.mxu1 %v2849_v45  ;;  %v2933_v45 = vld [vmem:[%s4058_s1 + $0x310] ss:$8 sps:$4 sm:$0xff]  }
  0x90   :  { %2154 = vmatpush1.bf16.msra.mxu0 %v2852_v46  ;;  %1991 = vmatprep.subr.bf16.mxu1 %v2857_v47  ;;  %v2936_v46 = vld [vmem:[%s4058_s1 + $0x710] ss:$8 sps:$4 sm:$0xff]   ;;  %v2939_v47 = vld [vmem:[%s4058_s1 + $0x320] ss:$8 sps:$4 sm:$0xff]  }
  0x91   :  { %2155 = vmatprep.subr.bf16.mxu0 %v2860_v48  ;;  %v2942_v48 = vld [vmem:[%s4058_s1 + $0x720] ss:$8 sps:$4 sm:$0xff]  }
  0x93   :  { %1992 = vmatpush1.bf16.msra.mxu1 %v2855_v50  ;;  %v2947_v50 = vld [vmem:[%s4058_s1 + $0x334] ss:$8 sps:$4 sm:$0xff]  }
  0x94   :  { %2156 = vmatpush1.bf16.msra.mxu0 %v2858_v51  ;;  %1993 = vmatprep.subr.bf16.mxu1 %v2863_v53  ;;  %v2950_v51 = vld [vmem:[%s4058_s1 + $0x734] ss:$8 sps:$4 sm:$0xff]   ;;  %v2945_v53 = vld [vmem:[%s4058_s1 + $0x330] ss:$8 sps:$4 sm:$0xff]  }
  0x95   :  { %2157 = vmatprep.subr.bf16.mxu0 %v2866_v54  ;;  %v2948_v54 = vld [vmem:[%s4058_s1 + $0x730] ss:$8 sps:$4 sm:$0xff]  }
  0x97   :  { %1994 = vmatpush1.bf16.msra.mxu1 %v2861_v55  ;;  %v2953_v55 = vld [vmem:[%s4058_s1 + $0x344] ss:$8 sps:$4 sm:$0xff]  }
  0x98   :  { %2158 = vmatpush1.bf16.msra.mxu0 %v2864_v57  ;;  %1995 = vmatprep.subr.bf16.mxu1 %v2869_v58  ;;  %v2956_v57 = vld [vmem:[%s4058_s1 + $0x744] ss:$8 sps:$4 sm:$0xff]   ;;  %v2951_v58 = vld [vmem:[%s4058_s1 + $0x340] ss:$8 sps:$4 sm:$0xff]  }
  0x99   :  { %2159 = vmatprep.subr.bf16.mxu0 %v2872_v59  ;;  %v2954_v59 = vld [vmem:[%s4058_s1 + $0x740] ss:$8 sps:$4 sm:$0xff]  }
  0x9b   :  { %1996 = vmatpush1.bf16.msra.mxu1 %v2867_v60  ;;  %v2959_v60 = vld [vmem:[%s4058_s1 + $0x354] ss:$8 sps:$4 sm:$0xff]  }
  0x9c   :  { %2160 = vmatpush1.bf16.msra.mxu0 %v2870_v61  ;;  %1997 = vmatprep.subr.bf16.mxu1 %v2875_v62  ;;  %v2962_v61 = vld [vmem:[%s4058_s1 + $0x754] ss:$8 sps:$4 sm:$0xff]   ;;  %v2957_v62 = vld [vmem:[%s4058_s1 + $0x350] ss:$8 sps:$4 sm:$0xff]  }
  0x9d   :  { %2161 = vmatprep.subr.bf16.mxu0 %v2878_v63  ;;  %v2960_v63 = vld [vmem:[%s4058_s1 + $0x750] ss:$8 sps:$4 sm:$0xff]  }
  0x9f   :  { %1998 = vmatpush1.bf16.msra.mxu1 %v2873_v0  ;;  %v2965_v0 = vld [vmem:[%s4058_s1 + $0x364] ss:$8 sps:$4 sm:$0xff]  }
  0xa0   :  { %2162 = vmatpush1.bf16.msra.mxu0 %v2876_v1  ;;  %1999 = vmatprep.subr.bf16.mxu1 %v2881_v2  ;;  %v2968_v1 = vld [vmem:[%s4058_s1 + $0x764] ss:$8 sps:$4 sm:$0xff]   ;;  %v2963_v2 = vld [vmem:[%s4058_s1 + $0x360] ss:$8 sps:$4 sm:$0xff]  }
  0xa1   :  { %2163 = vmatprep.subr.bf16.mxu0 %v2884_v3  ;;  %v2966_v3 = vld [vmem:[%s4058_s1 + $0x760] ss:$8 sps:$4 sm:$0xff]  }
  0xa3   :  { %2000 = vmatpush1.bf16.msra.mxu1 %v2879_v4  ;;  %v2971_v4 = vld [vmem:[%s4058_s1 + $0x374] ss:$8 sps:$4 sm:$0xff]  }
  0xa4   :  { %2164 = vmatpush1.bf16.msra.mxu0 %v2882_v5  ;;  %2001 = vmatprep.subr.bf16.mxu1 %v2887_v6  ;;  %v2974_v5 = vld [vmem:[%s4058_s1 + $0x774] ss:$8 sps:$4 sm:$0xff]   ;;  %v2969_v6 = vld [vmem:[%s4058_s1 + $0x370] ss:$8 sps:$4 sm:$0xff]  }
  0xa5   :  { %2165 = vmatprep.subr.bf16.mxu0 %v2890_v7  ;;  %v2972_v7 = vld [vmem:[%s4058_s1 + $0x770] ss:$8 sps:$4 sm:$0xff]  }
  0xa7   :  { %2002 = vmatpush1.bf16.msra.mxu1 %v2885_v8  ;;  %v2977_v8 = vld [vmem:[%s4058_s1 + $0x384] ss:$8 sps:$4 sm:$0xff]  }
  0xa8   :  { %2166 = vmatpush1.bf16.msra.mxu0 %v2888_v9  ;;  %2003 = vmatprep.subr.bf16.mxu1 %v2893_v10  ;;  %v2980_v9 = vld [vmem:[%s4058_s1 + $0x784] ss:$8 sps:$4 sm:$0xff]   ;;  %v2975_v10 = vld [vmem:[%s4058_s1 + $0x380] ss:$8 sps:$4 sm:$0xff]  }
  0xa9   :  { %2167 = vmatprep.subr.bf16.mxu0 %v2896_v11  ;;  %v2978_v11 = vld [vmem:[%s4058_s1 + $0x780] ss:$8 sps:$4 sm:$0xff]  }
  0xab   :  { %2004 = vmatpush1.bf16.msra.mxu1 %v2891_v12  ;;  %v2983_v12 = vld [vmem:[%s4058_s1 + $0x394] ss:$8 sps:$4 sm:$0xff]  }
  0xac   :  { %2168 = vmatpush1.bf16.msra.mxu0 %v2894_v13  ;;  %2005 = vmatprep.subr.bf16.mxu1 %v2899_v14  ;;  %v2986_v13 = vld [vmem:[%s4058_s1 + $0x794] ss:$8 sps:$4 sm:$0xff]   ;;  %v2981_v14 = vld [vmem:[%s4058_s1 + $0x390] ss:$8 sps:$4 sm:$0xff]  }
  0xad   :  { %2169 = vmatprep.subr.bf16.mxu0 %v2902_v15  ;;  %v2984_v15 = vld [vmem:[%s4058_s1 + $0x790] ss:$8 sps:$4 sm:$0xff]  }
  0xaf   :  { %2006 = vmatpush1.bf16.msra.mxu1 %v2897_v18  ;;  %v2989_v18 = vld [vmem:[%s4058_s1 + $0x3a4] ss:$8 sps:$4 sm:$0xff]  }
  0xb0   :  { %2170 = vmatpush1.bf16.msra.mxu0 %v2900_v19  ;;  %2007 = vmatprep.subr.bf16.mxu1 %v2905_v20  ;;  %v2992_v19 = vld [vmem:[%s4058_s1 + $0x7a4] ss:$8 sps:$4 sm:$0xff]   ;;  %v2987_v20 = vld [vmem:[%s4058_s1 + $0x3a0] ss:$8 sps:$4 sm:$0xff]  }
  0xb1   :  { %2171 = vmatprep.subr.bf16.mxu0 %v2908_v21  ;;  %v2990_v21 = vld [vmem:[%s4058_s1 + $0x7a0] ss:$8 sps:$4 sm:$0xff]  }
  0xb3   :  { %2008 = vmatpush1.bf16.msra.mxu1 %v2903_v22  ;;  %v2995_v22 = vld [vmem:[%s4058_s1 + $0x3b4] ss:$8 sps:$4 sm:$0xff]  }
  0xb4   :  { %2172 = vmatpush1.bf16.msra.mxu0 %v2906_v52  ;;  %2009 = vmatprep.subr.bf16.mxu1 %v2911_v24  ;;  %v2998_v52 = vld [vmem:[%s4058_s1 + $0x7b4] ss:$8 sps:$4 sm:$0xff]   ;;  %v2993_v24 = vld [vmem:[%s4058_s1 + $0x3b0] ss:$8 sps:$4 sm:$0xff]  }
  0xb5   :  { %2173 = vmatprep.subr.bf16.mxu0 %v2914_v25  ;;  %v2996_v25 = vld [vmem:[%s4058_s1 + $0x7b0] ss:$8 sps:$4 sm:$0xff]  }
  0xb7   :  { %2010 = vmatpush1.bf16.msra.mxu1 %v2909_v26  ;;  %v3001_v26 = vld [vmem:[%s4058_s1 + $0x3c4] ss:$8 sps:$4 sm:$0xff]  }
  0xb8   :  { %2174 = vmatpush1.bf16.msra.mxu0 %v2912_v27  ;;  %2011 = vmatprep.subr.bf16.mxu1 %v2917_v28  ;;  %v3004_v27 = vld [vmem:[%s4058_s1 + $0x7c4] ss:$8 sps:$4 sm:$0xff]   ;;  %v2999_v28 = vld [vmem:[%s4058_s1 + $0x3c0] ss:$8 sps:$4 sm:$0xff]  }
  0xb9   :  { %2175 = vmatprep.subr.bf16.mxu0 %v2920_v29  ;;  %v3002_v29 = vld [vmem:[%s4058_s1 + $0x7c0] ss:$8 sps:$4 sm:$0xff]  }
  0xbb   :  { %2012 = vmatpush1.bf16.msra.mxu1 %v2915_v30  ;;  %v3007_v30 = vld [vmem:[%s4058_s1 + $0x3d4] ss:$8 sps:$4 sm:$0xff]  }
  0xbc   :  { %2176 = vmatpush1.bf16.msra.mxu0 %v2918_v31  ;;  %2013 = vmatprep.subr.bf16.mxu1 %v2923_v32  ;;  %v3010_v31 = vld [vmem:[%s4058_s1 + $0x7d4] ss:$8 sps:$4 sm:$0xff]   ;;  %v3005_v32 = vld [vmem:[%s4058_s1 + $0x3d0] ss:$8 sps:$4 sm:$0xff]  }
  0xbd   :  { %2177 = vmatprep.subr.bf16.mxu0 %v2926_v33  ;;  %v3008_v33 = vld [vmem:[%s4058_s1 + $0x7d0] ss:$8 sps:$4 sm:$0xff]  }
  0xbf   :  { %2014 = vmatpush1.bf16.msra.mxu1 %v2921_v34  ;;  %v3013_v34 = vld [vmem:[%s4058_s1 + $0x3e4] ss:$8 sps:$4 sm:$0xff]  }
  0xc0   :  { %2178 = vmatpush1.bf16.msra.mxu0 %v2924_v16  ;;  %2024 = vmatprep.subr.bf16.mxu1 %v2929_v36  ;;  %v3016_v16 = vld [vmem:[%s4058_s1 + $0x7e4] ss:$8 sps:$4 sm:$0xff]   ;;  %v3011_v36 = vld [vmem:[%s4058_s1 + $0x3e0] ss:$8 sps:$4 sm:$0xff]  }
  0xc1   :  { %2188 = vmatprep.subr.bf16.mxu0 %v2932_v37  ;;  %v3014_v37 = vld [vmem:[%s4058_s1 + $0x7e0] ss:$8 sps:$4 sm:$0xff]  }
  0xc2   :  { %2016 = vmatmul.mubr.bf16.vlgmr.msra.gmra.mrb[0].mxu1 %v3737_v38 }
  0xc3   :  { %2180 = vmatmul.mubr.bf16.vlgmr.msra.gmra.mrb[0].mxu0 %v3741_v39  ;;  %2025 = vmatpush1.bf16.msra.mxu1 %v2927_v40  ;;  %v3019_v40 = vld [vmem:[%s4058_s1 + $0x3f4] ss:$8 sps:$4 sm:$0xff]  }
  0xc4   :  { %2189 = vmatpush1.bf16.msra.mxu0 %v2930_v41  ;;  %2026 = vmatprep.subr.bf16.mxu1 %v2935_v56  ;;  %v3022_v41 = vld [vmem:[%s4058_s1 + $0x7f4] ss:$8 sps:$4 sm:$0xff]   ;;  %v3932_v56 = vld.sshfl [vmem:[%s4059_s0 + $0x10] sm:$0x11 pattern:$0x75316420] }
  0xc5   :  { %2190 = vmatprep.subr.bf16.mxu0 %v2938_v23  ;;  %2056 = vmatprep.mubr.bf16.mxu1 %v371_v43  ;;  %v3017_v23 = vld [vmem:[%s4058_s1 + $0x3f0] ss:$8 sps:$4 sm:$0xff]  }
  0xc6   :  { %2220 = vmatprep.mubr.bf16.mxu0 %v420_v44  ;;  %v3020_v43 = vld [vmem:[%s4058_s1 + $0x7f0] ss:$8 sps:$4 sm:$0xff]   ;;  %v428_v44 = vcombine.high %v3932_v56, %v3932_v56 }
  0xc7   :  { %2027 = vmatpush1.bf16.msra.mxu1 %v2933_v45  ;;  %v3025_v45 = vld [vmem:[%s4058_s1 + $0x804] ss:$8 sps:$4 sm:$0xff]  }
  0xc8   :  { %2191 = vmatpush1.bf16.msra.mxu0 %v2936_v46  ;;  %2028 = vmatprep.subr.bf16.mxu1 %v2941_v17  ;;  %v369_v46 = vcombine.high %v3737_v38, %v3737_v38  ;;  %v418_v17 = vcombine.high %v3741_v39, %v3741_v39  ;;  %v3026_v38 = vld [vmem:[%s4058_s1 + $0x810] ss:$8 sps:$4 sm:$0xff]   ;;  %v3031_v39 = vld [vmem:[%s4058_s1 + $0x824] ss:$8 sps:$4 sm:$0xff]  }
  0xc9   :  { %2192 = vmatprep.subr.bf16.mxu0 %v2944_v35  ;;  %v3023_v35 = vld [vmem:[%s4058_s1 + $0x800] ss:$8 sps:$4 sm:$0xff]  }
  0xcb   :  { %2029 = vmatpush1.bf16.msra.mxu1 %v2939_v47  ;;  %v442_v47 = vrot.slane %v428_v44, %v3233_v49 }
  0xcc   :  { %2193 = vmatpush1.bf16.msra.mxu0 %v2942_v48  ;;  %2030 = vmatprep.subr.bf16.mxu1 %v2947_v50  ;;  %v3028_v48 = vld [vmem:[%s4058_s1 + $0x814] ss:$8 sps:$4 sm:$0xff]   ;;  %v3029_v50 = vld [vmem:[%s4058_s1 + $0x820] ss:$8 sps:$4 sm:$0xff]  }
  0xcd   :  { %2194 = vmatprep.subr.bf16.mxu0 %v2950_v51  ;;  %v3034_v51 = vld [vmem:[%s4058_s1 + $0x834] ss:$8 sps:$4 sm:$0xff]  }
  0xcf   :  { %2031 = vmatpush1.bf16.msra.mxu1 %v2945_v53  ;;  %v3032_v53 = vld [vmem:[%s4058_s1 + $0x830] ss:$8 sps:$4 sm:$0xff]  }
  0xd0   :  { %2195 = vmatpush1.bf16.msra.mxu0 %v2948_v54  ;;  %2032 = vmatprep.subr.bf16.mxu1 %v2953_v55  ;;  %v3037_v54 = vld [vmem:[%s4058_s1 + $0x844] ss:$8 sps:$4 sm:$0xff]   ;;  %v3035_v55 = vld [vmem:[%s4058_s1 + $0x840] ss:$8 sps:$4 sm:$0xff]  }
  0xd1   :  { %2196 = vmatprep.subr.bf16.mxu0 %v2956_v57  ;;  %v3040_v57 = vld [vmem:[%s4058_s1 + $0x854] ss:$8 sps:$4 sm:$0xff]  }
  0xd3   :  { %2033 = vmatpush1.bf16.msra.mxu1 %v2951_v58  ;;  %v3038_v58 = vld [vmem:[%s4058_s1 + $0x850] ss:$8 sps:$4 sm:$0xff]  }
  0xd4   :  { %2197 = vmatpush1.bf16.msra.mxu0 %v2954_v59  ;;  %2034 = vmatprep.subr.bf16.mxu1 %v2959_v60  ;;  %v3043_v59 = vld [vmem:[%s4058_s1 + $0x864] ss:$8 sps:$4 sm:$0xff]   ;;  %v3041_v60 = vld [vmem:[%s4058_s1 + $0x860] ss:$8 sps:$4 sm:$0xff]  }
  0xd5   :  { %2198 = vmatprep.subr.bf16.mxu0 %v2962_v61  ;;  %v3046_v61 = vld [vmem:[%s4058_s1 + $0x874] ss:$8 sps:$4 sm:$0xff]  }
  0xd7   :  { %2035 = vmatpush1.bf16.msra.mxu1 %v2957_v62  ;;  %v3044_v62 = vld [vmem:[%s4058_s1 + $0x870] ss:$8 sps:$4 sm:$0xff]  }
  0xd8   :  { %2199 = vmatpush1.bf16.msra.mxu0 %v2960_v63  ;;  %2036 = vmatprep.subr.bf16.mxu1 %v2965_v0  ;;  %v3049_v63 = vld [vmem:[%s4058_s1 + $0x884] ss:$8 sps:$4 sm:$0xff]   ;;  %v3047_v0 = vld [vmem:[%s4058_s1 + $0x880] ss:$8 sps:$4 sm:$0xff]  }
  0xd9   :  { %2200 = vmatprep.subr.bf16.mxu0 %v2968_v1  ;;  %v3052_v1 = vld [vmem:[%s4058_s1 + $0x894] ss:$8 sps:$4 sm:$0xff]  }
  0xdb   :  { %2037 = vmatpush1.bf16.msra.mxu1 %v2963_v2  ;;  %v3050_v2 = vld [vmem:[%s4058_s1 + $0x890] ss:$8 sps:$4 sm:$0xff]  }
  0xdc   :  { %2201 = vmatpush1.bf16.msra.mxu0 %v2966_v3  ;;  %2038 = vmatprep.subr.bf16.mxu1 %v2971_v4  ;;  %v3055_v3 = vld [vmem:[%s4058_s1 + $0x8a4] ss:$8 sps:$4 sm:$0xff]   ;;  %v3053_v4 = vld [vmem:[%s4058_s1 + $0x8a0] ss:$8 sps:$4 sm:$0xff]  }
  0xdd   :  { %2202 = vmatprep.subr.bf16.mxu0 %v2974_v5  ;;  %v3058_v5 = vld [vmem:[%s4058_s1 + $0x8b4] ss:$8 sps:$4 sm:$0xff]  }
  0xdf   :  { %2039 = vmatpush1.bf16.msra.mxu1 %v2969_v6  ;;  %v3056_v6 = vld [vmem:[%s4058_s1 + $0x8b0] ss:$8 sps:$4 sm:$0xff]  }
  0xe0   :  { %2203 = vmatpush1.bf16.msra.mxu0 %v2972_v7  ;;  %2040 = vmatprep.subr.bf16.mxu1 %v2977_v8  ;;  %v3061_v7 = vld [vmem:[%s4058_s1 + $0x8c4] ss:$8 sps:$4 sm:$0xff]   ;;  %v3059_v8 = vld [vmem:[%s4058_s1 + $0x8c0] ss:$8 sps:$4 sm:$0xff]  }
  0xe1   :  { %2204 = vmatprep.subr.bf16.mxu0 %v2980_v9  ;;  %v3064_v9 = vld [vmem:[%s4058_s1 + $0x8d4] ss:$8 sps:$4 sm:$0xff]  }
  0xe3   :  { %2041 = vmatpush1.bf16.msra.mxu1 %v2975_v10  ;;  %v3062_v10 = vld [vmem:[%s4058_s1 + $0x8d0] ss:$8 sps:$4 sm:$0xff]  }
  0xe4   :  { %2205 = vmatpush1.bf16.msra.mxu0 %v2978_v11  ;;  %2042 = vmatprep.subr.bf16.mxu1 %v2983_v12  ;;  %v3067_v11 = vld [vmem:[%s4058_s1 + $0x8e4] ss:$8 sps:$4 sm:$0xff]   ;;  %v3065_v12 = vld [vmem:[%s4058_s1 + $0x8e0] ss:$8 sps:$4 sm:$0xff]  }
  0xe5   :  { %2206 = vmatprep.subr.bf16.mxu0 %v2986_v13  ;;  %v3070_v13 = vld [vmem:[%s4058_s1 + $0x8f4] ss:$8 sps:$4 sm:$0xff]  }
  0xe7   :  { %2043 = vmatpush1.bf16.msra.mxu1 %v2981_v14  ;;  %v3068_v14 = vld [vmem:[%s4058_s1 + $0x8f0] ss:$8 sps:$4 sm:$0xff]  }
  0xe8   :  { %2207 = vmatpush1.bf16.msra.mxu0 %v2984_v15  ;;  %2044 = vmatprep.subr.bf16.mxu1 %v2989_v18  ;;  %v435_v15 = vrot.slane %v3932_v56, %v3233_v49 }
  0xe9   :  { %2208 = vmatprep.subr.bf16.mxu0 %v2992_v19 }
  0xeb   :  { %2045 = vmatpush1.bf16.msra.mxu1 %v2987_v20 }
  0xec   :  { %2209 = vmatpush1.bf16.msra.mxu0 %v2990_v21  ;;  %2046 = vmatprep.subr.bf16.mxu1 %v2995_v22  ;;  %v3072_v22 = vmov 1983009808  }
  0xed   :  { %2210 = vmatprep.subr.bf16.mxu0 %v2998_v52  ;;  %v2276_v52 = vunpack.c.l.s4 %v3072_v22 }
  0xef   :  { %2047 = vmatpush1.bf16.msra.mxu1 %v2993_v24  ;;  %v2277_v24 = vunpack.c.0.s8 %v2276_v52 }
  0xf0   :  { %2211 = vmatpush1.bf16.msra.mxu0 %v2996_v25  ;;  %2048 = vmatprep.subr.bf16.mxu1 %v3001_v26  ;;  %v312_v25 = vsub.s32 0, %v3215_v42  ;;  %v2272_v26 = vld [vmem:[%s4060_s3] sm:$0x3] }
  0xf1   :  { %2212 = vmatprep.subr.bf16.mxu0 %v3004_v27  ;;  %v308_v27 = vld [vmem:[%s4061_s2] sm:$0x3] }
  0xf3   :  { %2049 = vmatpush1.bf16.msra.mxu1 %v2999_v28  ;;  %v316_v28 = vsub.s32 1, %v3215_v42 }
  0xf4   :  { %2213 = vmatpush1.bf16.msra.mxu0 %v3002_v29  ;;  %2050 = vmatprep.subr.bf16.mxu1 %v3007_v30  ;;  %v2273_v29 = vunpack.c.l.bf16 %v2272_v26  ;;  %v2280_v30 = vsub.s32 %v2277_v24, %v3215_v42 }
  0xf5   :  { %2214 = vmatprep.subr.bf16.mxu0 %v3010_v31  ;;  %v313_v31 = vrot.slane %v308_v27, %v312_v25 }
  0xf7   :  { %2051 = vmatpush1.bf16.msra.mxu1 %v3005_v32  ;;  %v317_v32 = vrot.slane %v308_v27, %v316_v28 }
  0xf8   :  { %2215 = vmatpush1.bf16.msra.mxu0 %v3008_v33  ;;  %2052 = vmatprep.subr.bf16.mxu1 %v3013_v34  ;;  %v2281_v33 = vrot.slane %v2273_v29, %v2280_v30 }
  0xf9   :  { %2216 = vmatprep.subr.bf16.mxu0 %v3016_v16 }
  0xfa   :  { %v2282_v56 = vcombine.high %v2281_v33, %v2281_v33 }
  0xfb   :  { %2053 = vmatpush1.bf16.msra.mxu1 %v3011_v36 }
  0xfc   :  { %2217 = vmatpush1.bf16.msra.mxu0 %v3014_v37  ;;  %2054 = vmatprep.subr.bf16.mxu1 %v3019_v40 }
  0xfd   :  { %2218 = vmatprep.subr.bf16.mxu0 %v3022_v41 }
  0xff   :  { %2055 = vmatpush1.bf16.msra.mxu1 %v3017_v23 }
 0x100   :  { %2219 = vmatpush1.bf16.msra.mxu0 %v3020_v43 }
 0x101   :  { %2229 = vmatprep.subr.bf16.mxu0 %v3025_v45 }
 0x102   :  { %2057 = vmatmul.mubr.bf16.vlgmr.msra.gmra.mrb[0].mxu1 %v369_v46 }
 0x103   :  { %2221 = vmatmul.mubr.bf16.vlgmr.msra.gmra.mrb[0].mxu0 %v418_v17 }
 0x104   :  { %2230 = vmatpush1.bf16.msra.mxu0 %v3023_v35  ;;  %2261 = vmatprep.mubr.bf16.mxu0 %v442_v47 }
 0x105   :  { %2231 = vmatprep.subr.bf16.mxu0 %v3028_v48 }
 0x108   :  { %2232 = vmatpush1.bf16.msra.mxu0 %v3026_v38 }
 0x109   :  { %2233 = vmatprep.subr.bf16.mxu0 %v3031_v39 }
 0x10c   :  { %2234 = vmatpush1.bf16.msra.mxu0 %v3029_v50 }
 0x10d   :  { %2235 = vmatprep.subr.bf16.mxu0 %v3034_v51 }
 0x110   :  { %2236 = vmatpush1.bf16.msra.mxu0 %v3032_v53 }
 0x111   :  { %2237 = vmatprep.subr.bf16.mxu0 %v3037_v54 }
 0x114   :  { %2238 = vmatpush1.bf16.msra.mxu0 %v3035_v55 }
 0x115   :  { %2239 = vmatprep.subr.bf16.mxu0 %v3040_v57 }
 0x118   :  { %2240 = vmatpush1.bf16.msra.mxu0 %v3038_v58 }
 0x119   :  { %2241 = vmatprep.subr.bf16.mxu0 %v3043_v59 }
 0x11c   :  { %2242 = vmatpush1.bf16.msra.mxu0 %v3041_v60 }
 0x11d   :  { %2243 = vmatprep.subr.bf16.mxu0 %v3046_v61 }
 0x120   :  { %2244 = vmatpush1.bf16.msra.mxu0 %v3044_v62 }
 0x121   :  { %2245 = vmatprep.subr.bf16.mxu0 %v3049_v63 }
 0x124   :  { %2246 = vmatpush1.bf16.msra.mxu0 %v3047_v0 }
 0x125   :  { %2247 = vmatprep.subr.bf16.mxu0 %v3052_v1 }
 0x128   :  { %2248 = vmatpush1.bf16.msra.mxu0 %v3050_v2 }
 0x129   :  { %2249 = vmatprep.subr.bf16.mxu0 %v3055_v3 }
 0x12c   :  { %2250 = vmatpush1.bf16.msra.mxu0 %v3053_v4 }
 0x12d   :  { %2251 = vmatprep.subr.bf16.mxu0 %v3058_v5 }
 0x130   :  { %2252 = vmatpush1.bf16.msra.mxu0 %v3056_v6 }
 0x131   :  { %2253 = vmatprep.subr.bf16.mxu0 %v3061_v7 }
 0x134   :  { %2254 = vmatpush1.bf16.msra.mxu0 %v3059_v8 }
 0x135   :  { %2255 = vmatprep.subr.bf16.mxu0 %v3064_v9 }
 0x138   :  { %2256 = vmatpush1.bf16.msra.mxu0 %v3062_v10 }
 0x139   :  { %2257 = vmatprep.subr.bf16.mxu0 %v3067_v11 }
 0x13c   :  { %2258 = vmatpush1.bf16.msra.mxu0 %v3065_v12 }
 0x13d   :  { %2259 = vmatprep.subr.bf16.mxu0 %v3070_v13 }
 0x140   :  { %2260 = vmatpush1.bf16.msra.mxu0 %v3068_v14 }
 0x143   :  { %2262 = vmatmul.mubr.bf16.vlgmr.msra.gmra.mrb[0].mxu0 %v435_v15 }
 0x1d5   :  { %v2058_v18 = vpop.f32.mrb[0].mxu1 }
 0x1d6   :  { %v2060_v19 = vpop.f32.mrb[1].mxu1  ;;  %v2603_v34 = vadd.f32 %v2058_v18, %v313_v31 }
 0x1d7   :  { %v2062_v20 = vpop.f32.mrb[2].mxu1  ;;  %v2605_v16 = vadd.f32 %v2060_v19, %v317_v32 }
 0x1d8   :  { %v2063_v21 = vpop.f32.mrb[3].mxu1 }
 0x216   :  { %v2263_v36 = vpop.f32.mrb[0].mxu0 }
 0x217   :  { %v2604_v37 = vadd.f32 %v2603_v34, %v2263_v36  ;;  %v2265_v40 = vpop.f32.mrb[1].mxu0 }
 0x218   :  { %v2606_v41 = vadd.f32 %v2605_v16, %v2265_v40  ;;  %v2267_v23 = vpop.f32.mrb[2].mxu0 }
 0x219   :  { %v2270_v43 = vmax.f32 %v2604_v37, 0.0  ;;  %v2268_v44 = vpop.f32.mrb[3].mxu0 }
 0x21a   :  { %v2271_v45 = vmax.f32 %v2606_v41, 0.0 }
 0x21b   :  { %v2285_v46 = vadd.f32 %v2281_v33, %v2270_v43 }
 0x21c   :  { %v2286_v17 = vadd.f32 %v2282_v56, %v2271_v45 }
 0x21e   :  { %v2601_v35 = vpack.c.bf16 %v2286_v17, %v2285_v46 }
 0x220   :  { %v2298_v47 = vrot.slane %v2601_v35, %v3233_v49 }
 0x222   :  { %2602 = vst.sshfl [vmem:[%s4062_s4] sm:$0x5 pattern:$0x73625140] %v2298_v47 }

// kernel: unet_forward.45
= control target key start
LH: loop header
LB: loop body
LE: loop exit
PB: predicated region body
PF: predicated region fallthrough
CT: control target
= control target key end

     0   :  { %v307_v36 = vlaneseq  ;;  %v3052_v37 = vmov 1966171168   ;;  %s4029_s1 = inlined_call_operand.vmem [shape: bf16[2304,256], index: 1, kind: input, shape index: {}]   ;;  %s4030_s0 = inlined_call_operand.vmem [shape: bf16[2,2304], index: 0, kind: input, shape index: {}]   ;;  %s4031_s2 = inlined_call_operand.vmem [shape: f32[1,256], index: 2, kind: input, shape index: {}]   ;;  %s4032_s3 = inlined_call_operand.vmem [shape: bf16[2,256], index: 3, kind: output, shape index: {}]  }
   0x1   :  { %v2618_v0 = vld [vmem:[%s4029_s1 + $0x4] ss:$8 sps:$4 sm:$0xff]   ;;  %v2622_v2 = vld [vmem:[%s4029_s1] ss:$8 sps:$4 sm:$0xff]   ;;  %v2624_v4 = vld [vmem:[%s4029_s1 + $0x14] ss:$8 sps:$4 sm:$0xff]   ;;  %v322_v38 = vunpack.c.l.s4 %v3052_v37 }
   0x2   :  { %v2620_v1 = vld [vmem:[%s4029_s1 + $0x404] ss:$8 sps:$4 sm:$0xff]   ;;  %1898 = vmatprep.subr.bf16.mxu1 %v2618_v0  ;;  %v2623_v3 = vld [vmem:[%s4029_s1 + $0x400] ss:$8 sps:$4 sm:$0xff]   ;;  %v2626_v5 = vld [vmem:[%s4029_s1 + $0x414] ss:$8 sps:$4 sm:$0xff]  }
   0x3   :  { %2062 = vmatprep.subr.bf16.mxu0 %v2620_v1  ;;  %1899 = vmatpush1.bf16.msra.mxu1 %v2622_v2  ;;  %v2628_v6 = vld [vmem:[%s4029_s1 + $0x10] ss:$8 sps:$4 sm:$0xff]   ;;  %v2630_v8 = vld [vmem:[%s4029_s1 + $0x24] ss:$8 sps:$4 sm:$0xff]   ;;  %v2634_v10 = vld [vmem:[%s4029_s1 + $0x20] ss:$8 sps:$4 sm:$0xff]   ;;  %v323_v43 = vunpack.c.0.s8 %v322_v38 }
   0x4   :  { %2063 = vmatpush1.bf16.msra.mxu0 %v2623_v3  ;;  %1900 = vmatprep.subr.bf16.mxu1 %v2624_v4  ;;  %v2629_v7 = vld [vmem:[%s4029_s1 + $0x410] ss:$8 sps:$4 sm:$0xff]   ;;  %v2632_v9 = vld [vmem:[%s4029_s1 + $0x424] ss:$8 sps:$4 sm:$0xff]   ;;  %v2635_v11 = vld [vmem:[%s4029_s1 + $0x420] ss:$8 sps:$4 sm:$0xff]  }
   0x5   :  { %2064 = vmatprep.subr.bf16.mxu0 %v2626_v5  ;;  %v2636_v12 = vld [vmem:[%s4029_s1 + $0x34] ss:$8 sps:$4 sm:$0xff]   ;;  %v2640_v14 = vld [vmem:[%s4029_s1 + $0x30] ss:$8 sps:$4 sm:$0xff]   ;;  %v2642_v16 = vld [vmem:[%s4029_s1 + $0x44] ss:$8 sps:$4 sm:$0xff]  }
   0x6   :  { %v2638_v13 = vld [vmem:[%s4029_s1 + $0x434] ss:$8 sps:$4 sm:$0xff]   ;;  %v2641_v15 = vld [vmem:[%s4029_s1 + $0x430] ss:$8 sps:$4 sm:$0xff]   ;;  %v2644_v17 = vld [vmem:[%s4029_s1 + $0x444] ss:$8 sps:$4 sm:$0xff]  }
   0x7   :  { %1901 = vmatpush1.bf16.msra.mxu1 %v2628_v6  ;;  %v2646_v18 = vld [vmem:[%s4029_s1 + $0x40] ss:$8 sps:$4 sm:$0xff]   ;;  %v2648_v20 = vld [vmem:[%s4029_s1 + $0x54] ss:$8 sps:$4 sm:$0xff]   ;;  %v2652_v22 = vld [vmem:[%s4029_s1 + $0x50] ss:$8 sps:$4 sm:$0xff]  }
   0x8   :  { %2065 = vmatpush1.bf16.msra.mxu0 %v2629_v7  ;;  %1902 = vmatprep.subr.bf16.mxu1 %v2630_v8  ;;  %v2647_v19 = vld [vmem:[%s4029_s1 + $0x440] ss:$8 sps:$4 sm:$0xff]   ;;  %v2650_v21 = vld [vmem:[%s4029_s1 + $0x454] ss:$8 sps:$4 sm:$0xff]   ;;  %v2653_v23 = vld [vmem:[%s4029_s1 + $0x450] ss:$8 sps:$4 sm:$0xff]  }
   0x9   :  { %2066 = vmatprep.subr.bf16.mxu0 %v2632_v9  ;;  %v2654_v24 = vld [vmem:[%s4029_s1 + $0x64] ss:$8 sps:$4 sm:$0xff]   ;;  %v2658_v26 = vld [vmem:[%s4029_s1 + $0x60] ss:$8 sps:$4 sm:$0xff]   ;;  %v2660_v28 = vld [vmem:[%s4029_s1 + $0x74] ss:$8 sps:$4 sm:$0xff]  }
   0xa   :  { %v2656_v25 = vld [vmem:[%s4029_s1 + $0x464] ss:$8 sps:$4 sm:$0xff]   ;;  %v2659_v27 = vld [vmem:[%s4029_s1 + $0x460] ss:$8 sps:$4 sm:$0xff]   ;;  %v2662_v29 = vld [vmem:[%s4029_s1 + $0x474] ss:$8 sps:$4 sm:$0xff]  }
   0xb   :  { %1903 = vmatpush1.bf16.msra.mxu1 %v2634_v10  ;;  %v2664_v30 = vld [vmem:[%s4029_s1 + $0x70] ss:$8 sps:$4 sm:$0xff]   ;;  %v2666_v32 = vld [vmem:[%s4029_s1 + $0x84] ss:$8 sps:$4 sm:$0xff]   ;;  %v2670_v34 = vld [vmem:[%s4029_s1 + $0x80] ss:$8 sps:$4 sm:$0xff]  }
   0xc   :  { %2067 = vmatpush1.bf16.msra.mxu0 %v2635_v11  ;;  %1904 = vmatprep.subr.bf16.mxu1 %v2636_v12  ;;  %v2665_v31 = vld [vmem:[%s4029_s1 + $0x470] ss:$8 sps:$4 sm:$0xff]   ;;  %v2668_v33 = vld [vmem:[%s4029_s1 + $0x484] ss:$8 sps:$4 sm:$0xff]   ;;  %v2671_v35 = vld [vmem:[%s4029_s1 + $0x480] ss:$8 sps:$4 sm:$0xff]  }
   0xd   :  { %2068 = vmatprep.subr.bf16.mxu0 %v2638_v13  ;;  %v2672_v39 = vld [vmem:[%s4029_s1 + $0x94] ss:$8 sps:$4 sm:$0xff]   ;;  %v2676_v41 = vld [vmem:[%s4029_s1 + $0x90] ss:$8 sps:$4 sm:$0xff]   ;;  %v3190_v42 = vshrl.u32 %v307_v36, 7  ;;  %v3219_v52 = vld [vmem:[%s4030_s0] sm:$0xff] }
   0xe   :  { %v2674_v40 = vld [vmem:[%s4029_s1 + $0x494] ss:$8 sps:$4 sm:$0xff]   ;;  %v2677_v44 = vld [vmem:[%s4029_s1 + $0x490] ss:$8 sps:$4 sm:$0xff]   ;;  %v2678_v45 = vld [vmem:[%s4029_s1 + $0xa4] ss:$8 sps:$4 sm:$0xff]  }
   0xf   :  { %1905 = vmatpush1.bf16.msra.mxu1 %v2640_v14  ;;  %v2680_v46 = vld [vmem:[%s4029_s1 + $0x4a4] ss:$8 sps:$4 sm:$0xff]   ;;  %v2682_v47 = vld [vmem:[%s4029_s1 + $0xa0] ss:$8 sps:$4 sm:$0xff]   ;;  %v3208_v49 = vsub.s32 %v323_v43, %v3190_v42  ;;  %v2684_v50 = vld [vmem:[%s4029_s1 + $0xb4] ss:$8 sps:$4 sm:$0xff]  }
  0x10   :  { %2069 = vmatpush1.bf16.msra.mxu0 %v2641_v15  ;;  %1906 = vmatprep.subr.bf16.mxu1 %v2642_v16  ;;  %v2683_v48 = vld [vmem:[%s4029_s1 + $0x4a0] ss:$8 sps:$4 sm:$0xff]   ;;  %v2686_v51 = vld [vmem:[%s4029_s1 + $0x4b4] ss:$8 sps:$4 sm:$0xff]   ;;  %v2688_v53 = vld [vmem:[%s4029_s1 + $0xb0] ss:$8 sps:$4 sm:$0xff]  }
  0x11   :  { %2070 = vmatprep.subr.bf16.mxu0 %v2644_v17  ;;  %v327_v54 = vrot.slane %v3219_v52, %v3208_v49  ;;  %v2689_v55 = vld [vmem:[%s4029_s1 + $0x4b0] ss:$8 sps:$4 sm:$0xff]   ;;  %v3232_v56 = vld [vmem:[%s4030_s0 + $0x8] sm:$0xff]  ;;  %v2696_v1 = vld [vmem:[%s4029_s1 + $0xd4] ss:$8 sps:$4 sm:$0xff]  }
  0x12   :  { %v2690_v57 = vld [vmem:[%s4029_s1 + $0xc4] ss:$8 sps:$4 sm:$0xff]   ;;  %v376_v60 = vrot.slane %v3232_v56, %v3208_v49  ;;  %v2694_v63 = vld [vmem:[%s4029_s1 + $0xc0] ss:$8 sps:$4 sm:$0xff]   ;;  %v2698_v2 = vld [vmem:[%s4029_s1 + $0x4d4] ss:$8 sps:$4 sm:$0xff]  }
  0x13   :  { %1907 = vmatpush1.bf16.msra.mxu1 %v2646_v18  ;;  %v2692_v58 = vld [vmem:[%s4029_s1 + $0x4c4] ss:$8 sps:$4 sm:$0xff]   ;;  %v335_v59 = vcombine.high %v327_v54, %v327_v54  ;;  %v2695_v0 = vld [vmem:[%s4029_s1 + $0x4c0] ss:$8 sps:$4 sm:$0xff]   ;;  %v2700_v4 = vld [vmem:[%s4029_s1 + $0xd0] ss:$8 sps:$4 sm:$0xff]   ;;  %v3293_v16 = vrot.slane %v327_v54, %v3208_v49 }
  0x14   :  { %2071 = vmatpush1.bf16.msra.mxu0 %v2647_v19  ;;  %1908 = vmatprep.subr.bf16.mxu1 %v2648_v20  ;;  %v384_v62 = vcombine.high %v376_v60, %v376_v60  ;;  %v2701_v5 = vld [vmem:[%s4029_s1 + $0x4d0] ss:$8 sps:$4 sm:$0xff]   ;;  %v2702_v6 = vld [vmem:[%s4029_s1 + $0xe4] ss:$8 sps:$4 sm:$0xff]   ;;  %v2706_v8 = vld [vmem:[%s4029_s1 + $0xe0] ss:$8 sps:$4 sm:$0xff]   ;;  %v3296_v17 = vrot.slane %v376_v60, %v3208_v49 }
  0x15   :  { %2072 = vmatprep.subr.bf16.mxu0 %v2650_v21  ;;  %v357_v61 = vrot.slane %v335_v59, %v3208_v49  ;;  %v2704_v7 = vld [vmem:[%s4029_s1 + $0x4e4] ss:$8 sps:$4 sm:$0xff]   ;;  %v2707_v9 = vld [vmem:[%s4029_s1 + $0x4e0] ss:$8 sps:$4 sm:$0xff]   ;;  %v2708_v10 = vld [vmem:[%s4029_s1 + $0xf4] ss:$8 sps:$4 sm:$0xff]  }
  0x16   :  { %v406_v3 = vrot.slane %v384_v62, %v3208_v49  ;;  %v2710_v11 = vld [vmem:[%s4029_s1 + $0x4f4] ss:$8 sps:$4 sm:$0xff]   ;;  %v2712_v12 = vld [vmem:[%s4029_s1 + $0xf0] ss:$8 sps:$4 sm:$0xff]   ;;  %v2717_v14 = vld [vmem:[%s4029_s1 + $0x104] ss:$8 sps:$4 sm:$0xff]  }
  0x17   :  { %1909 = vmatpush1.bf16.msra.mxu1 %v2652_v22  ;;  %1930 = vmatprep.mubr.bf16.mxu1 %v357_v61  ;;  %v2713_v13 = vld [vmem:[%s4029_s1 + $0x4f0] ss:$8 sps:$4 sm:$0xff]   ;;  %v2721_v15 = vld [vmem:[%s4029_s1 + $0x504] ss:$8 sps:$4 sm:$0xff]   ;;  %v2715_v18 = vld [vmem:[%s4029_s1 + $0x100] ss:$8 sps:$4 sm:$0xff]   ;;  %v367_v22 = vcombine.high %v357_v61, %v357_v61 }
  0x18   :  { %2073 = vmatpush1.bf16.msra.mxu0 %v2653_v23  ;;  %1910 = vmatprep.subr.bf16.mxu1 %v2654_v24  ;;  %v2719_v19 = vld [vmem:[%s4029_s1 + $0x500] ss:$8 sps:$4 sm:$0xff]   ;;  %v2724_v20 = vld [vmem:[%s4029_s1 + $0x114] ss:$8 sps:$4 sm:$0xff]   ;;  %v416_v23 = vcombine.high %v406_v3, %v406_v3  ;;  %v2722_v24 = vld [vmem:[%s4029_s1 + $0x110] ss:$8 sps:$4 sm:$0xff]  }
  0x19   :  { %2074 = vmatprep.subr.bf16.mxu0 %v2656_v25  ;;  %2094 = vmatprep.mubr.bf16.mxu0 %v406_v3  ;;  %v2727_v21 = vld [vmem:[%s4029_s1 + $0x514] ss:$8 sps:$4 sm:$0xff]   ;;  %v2725_v25 = vld [vmem:[%s4029_s1 + $0x510] ss:$8 sps:$4 sm:$0xff]   ;;  %v2740_v36 = vld [vmem:[%s4029_s1 + $0x140] ss:$8 sps:$4 sm:$0xff]  }
  0x1a   :  { %v2743_v37 = vld [vmem:[%s4029_s1 + $0x540] ss:$8 sps:$4 sm:$0xff]   ;;  %v2748_v38 = vld [vmem:[%s4029_s1 + $0x154] ss:$8 sps:$4 sm:$0xff]   ;;  %v2754_v43 = vld [vmem:[%s4029_s1 + $0x164] ss:$8 sps:$4 sm:$0xff]  }
  0x1b   :  { %1911 = vmatpush1.bf16.msra.mxu1 %v2658_v26  ;;  %v2730_v26 = vld [vmem:[%s4029_s1 + $0x124] ss:$8 sps:$4 sm:$0xff]   ;;  %v2775_v59 = vld [vmem:[%s4029_s1 + $0x594] ss:$8 sps:$4 sm:$0xff]   ;;  %v2770_v60 = vld [vmem:[%s4029_s1 + $0x190] ss:$8 sps:$4 sm:$0xff]  }
  0x1c   :  { %2075 = vmatpush1.bf16.msra.mxu0 %v2659_v27  ;;  %1912 = vmatprep.subr.bf16.mxu1 %v2660_v28  ;;  %v2733_v27 = vld [vmem:[%s4029_s1 + $0x524] ss:$8 sps:$4 sm:$0xff]   ;;  %v2728_v28 = vld [vmem:[%s4029_s1 + $0x120] ss:$8 sps:$4 sm:$0xff]   ;;  %v2773_v61 = vld [vmem:[%s4029_s1 + $0x590] ss:$8 sps:$4 sm:$0xff]  }
  0x1d   :  { %2076 = vmatprep.subr.bf16.mxu0 %v2662_v29  ;;  %v2731_v29 = vld [vmem:[%s4029_s1 + $0x520] ss:$8 sps:$4 sm:$0xff]   ;;  %v2769_v54 = vld [vmem:[%s4029_s1 + $0x584] ss:$8 sps:$4 sm:$0xff]   ;;  %v2787_v3 = vld [vmem:[%s4029_s1 + $0x5b4] ss:$8 sps:$4 sm:$0xff]  }
  0x1e   :  { %v2778_v62 = vld [vmem:[%s4029_s1 + $0x1a4] ss:$8 sps:$4 sm:$0xff]  }
  0x1f   :  { %1913 = vmatpush1.bf16.msra.mxu1 %v2664_v30  ;;  %v2736_v30 = vld [vmem:[%s4029_s1 + $0x134] ss:$8 sps:$4 sm:$0xff]  }
  0x20   :  { %2077 = vmatpush1.bf16.msra.mxu0 %v2665_v31  ;;  %1914 = vmatprep.subr.bf16.mxu1 %v2666_v32  ;;  %v2739_v31 = vld [vmem:[%s4029_s1 + $0x534] ss:$8 sps:$4 sm:$0xff]   ;;  %v2734_v32 = vld [vmem:[%s4029_s1 + $0x130] ss:$8 sps:$4 sm:$0xff]  }
  0x21   :  { %2078 = vmatprep.subr.bf16.mxu0 %v2668_v33  ;;  %v2737_v33 = vld [vmem:[%s4029_s1 + $0x530] ss:$8 sps:$4 sm:$0xff]  }
  0x23   :  { %1915 = vmatpush1.bf16.msra.mxu1 %v2670_v34  ;;  %v2742_v34 = vld [vmem:[%s4029_s1 + $0x144] ss:$8 sps:$4 sm:$0xff]  }
  0x24   :  { %2079 = vmatpush1.bf16.msra.mxu0 %v2671_v35  ;;  %1916 = vmatprep.subr.bf16.mxu1 %v2672_v39  ;;  %v2745_v35 = vld [vmem:[%s4029_s1 + $0x544] ss:$8 sps:$4 sm:$0xff]   ;;  %v2751_v39 = vld [vmem:[%s4029_s1 + $0x554] ss:$8 sps:$4 sm:$0xff]  }
  0x25   :  { %2080 = vmatprep.subr.bf16.mxu0 %v2674_v40  ;;  %v2746_v40 = vld [vmem:[%s4029_s1 + $0x150] ss:$8 sps:$4 sm:$0xff]  }
  0x27   :  { %1917 = vmatpush1.bf16.msra.mxu1 %v2676_v41  ;;  %v2749_v41 = vld [vmem:[%s4029_s1 + $0x550] ss:$8 sps:$4 sm:$0xff]  }
  0x28   :  { %2081 = vmatpush1.bf16.msra.mxu0 %v2677_v44  ;;  %1918 = vmatprep.subr.bf16.mxu1 %v2678_v45  ;;  %v2757_v44 = vld [vmem:[%s4029_s1 + $0x564] ss:$8 sps:$4 sm:$0xff]   ;;  %v2752_v45 = vld [vmem:[%s4029_s1 + $0x160] ss:$8 sps:$4 sm:$0xff]  }
  0x29   :  { %2082 = vmatprep.subr.bf16.mxu0 %v2680_v46  ;;  %v2755_v46 = vld [vmem:[%s4029_s1 + $0x560] ss:$8 sps:$4 sm:$0xff]  }
  0x2b   :  { %1919 = vmatpush1.bf16.msra.mxu1 %v2682_v47  ;;  %v2760_v47 = vld [vmem:[%s4029_s1 + $0x174] ss:$8 sps:$4 sm:$0xff]  }
  0x2c   :  { %2083 = vmatpush1.bf16.msra.mxu0 %v2683_v48  ;;  %1920 = vmatprep.subr.bf16.mxu1 %v2684_v50  ;;  %v2763_v48 = vld [vmem:[%s4029_s1 + $0x574] ss:$8 sps:$4 sm:$0xff]   ;;  %v2758_v50 = vld [vmem:[%s4029_s1 + $0x170] ss:$8 sps:$4 sm:$0xff]  }
  0x2d   :  { %2084 = vmatprep.subr.bf16.mxu0 %v2686_v51  ;;  %v2761_v51 = vld [vmem:[%s4029_s1 + $0x570] ss:$8 sps:$4 sm:$0xff]  }
  0x2f   :  { %1921 = vmatpush1.bf16.msra.mxu1 %v2688_v53  ;;  %v2766_v53 = vld [vmem:[%s4029_s1 + $0x184] ss:$8 sps:$4 sm:$0xff]  }
  0x30   :  { %2085 = vmatpush1.bf16.msra.mxu0 %v2689_v55  ;;  %1922 = vmatprep.subr.bf16.mxu1 %v2690_v57  ;;  %v2764_v55 = vld [vmem:[%s4029_s1 + $0x180] ss:$8 sps:$4 sm:$0xff]  }
  0x31   :  { %2086 = vmatprep.subr.bf16.mxu0 %v2692_v58  ;;  %v2767_v57 = vld [vmem:[%s4029_s1 + $0x580] ss:$8 sps:$4 sm:$0xff]   ;;  %v2772_v58 = vld [vmem:[%s4029_s1 + $0x194] ss:$8 sps:$4 sm:$0xff]  }
  0x33   :  { %1923 = vmatpush1.bf16.msra.mxu1 %v2694_v63  ;;  %v2781_v63 = vld [vmem:[%s4029_s1 + $0x5a4] ss:$8 sps:$4 sm:$0xff]  }
  0x34   :  { %2087 = vmatpush1.bf16.msra.mxu0 %v2695_v0  ;;  %1924 = vmatprep.subr.bf16.mxu1 %v2696_v1  ;;  %v2776_v0 = vld [vmem:[%s4029_s1 + $0x1a0] ss:$8 sps:$4 sm:$0xff]  }
  0x35   :  { %2088 = vmatprep.subr.bf16.mxu0 %v2698_v2  ;;  %v2779_v1 = vld [vmem:[%s4029_s1 + $0x5a0] ss:$8 sps:$4 sm:$0xff]   ;;  %v2784_v2 = vld [vmem:[%s4029_s1 + $0x1b4] ss:$8 sps:$4 sm:$0xff]  }
  0x37   :  { %1925 = vmatpush1.bf16.msra.mxu1 %v2700_v4  ;;  %v2782_v4 = vld [vmem:[%s4029_s1 + $0x1b0] ss:$8 sps:$4 sm:$0xff]  }
  0x38   :  { %2089 = vmatpush1.bf16.msra.mxu0 %v2701_v5  ;;  %1926 = vmatprep.subr.bf16.mxu1 %v2702_v6  ;;  %v2785_v5 = vld [vmem:[%s4029_s1 + $0x5b0] ss:$8 sps:$4 sm:$0xff]   ;;  %v2790_v6 = vld [vmem:[%s4029_s1 + $0x1c4] ss:$8 sps:$4 sm:$0xff]  }
  0x39   :  { %2090 = vmatprep.subr.bf16.mxu0 %v2704_v7  ;;  %v2793_v7 = vld [vmem:[%s4029_s1 + $0x5c4] ss:$8 sps:$4 sm:$0xff]  }
  0x3b   :  { %1927 = vmatpush1.bf16.msra.mxu1 %v2706_v8  ;;  %v2788_v8 = vld [vmem:[%s4029_s1 + $0x1c0] ss:$8 sps:$4 sm:$0xff]  }
  0x3c   :  { %2091 = vmatpush1.bf16.msra.mxu0 %v2707_v9  ;;  %1928 = vmatprep.subr.bf16.mxu1 %v2708_v10  ;;  %v2791_v9 = vld [vmem:[%s4029_s1 + $0x5c0] ss:$8 sps:$4 sm:$0xff]   ;;  %v2796_v10 = vld [vmem:[%s4029_s1 + $0x1d4] ss:$8 sps:$4 sm:$0xff]  }
  0x3d   :  { %2092 = vmatprep.subr.bf16.mxu0 %v2710_v11  ;;  %v2799_v11 = vld [vmem:[%s4029_s1 + $0x5d4] ss:$8 sps:$4 sm:$0xff]  }
  0x3f   :  { %1929 = vmatpush1.bf16.msra.mxu1 %v2712_v12  ;;  %v2794_v12 = vld [vmem:[%s4029_s1 + $0x1d0] ss:$8 sps:$4 sm:$0xff]  }
  0x40   :  { %2093 = vmatpush1.bf16.msra.mxu0 %v2713_v13  ;;  %1939 = vmatprep.subr.bf16.mxu1 %v2717_v14  ;;  %v2797_v13 = vld [vmem:[%s4029_s1 + $0x5d0] ss:$8 sps:$4 sm:$0xff]   ;;  %v2802_v14 = vld [vmem:[%s4029_s1 + $0x1e4] ss:$8 sps:$4 sm:$0xff]  }
  0x41   :  { %2103 = vmatprep.subr.bf16.mxu0 %v2721_v15  ;;  %v2805_v15 = vld [vmem:[%s4029_s1 + $0x5e4] ss:$8 sps:$4 sm:$0xff]  }
  0x42   :  { %1931 = vmatmul.mubr.bf16.vlgmr.msra.gmra.mrb[0].mxu1 %v3293_v16 }
  0x43   :  { %2095 = vmatmul.mubr.bf16.vlgmr.msra.gmra.mrb[0].mxu0 %v3296_v17  ;;  %1940 = vmatpush1.bf16.msra.mxu1 %v2715_v18  ;;  %v320_v18 = vcombine.high %v3219_v52, %v3219_v52  ;;  %v2811_v52 = vld [vmem:[%s4029_s1 + $0x5f4] ss:$8 sps:$4 sm:$0xff]  }
  0x44   :  { %2104 = vmatpush1.bf16.msra.mxu0 %v2719_v19  ;;  %1941 = vmatprep.subr.bf16.mxu1 %v2724_v20  ;;  %v369_v19 = vcombine.high %v3232_v56, %v3232_v56  ;;  %v2800_v20 = vld [vmem:[%s4029_s1 + $0x1e0] ss:$8 sps:$4 sm:$0xff]  }
  0x45   :  { %2105 = vmatprep.subr.bf16.mxu0 %v2727_v21  ;;  %1971 = vmatprep.mubr.bf16.mxu1 %v367_v22  ;;  %v2803_v21 = vld [vmem:[%s4029_s1 + $0x5e0] ss:$8 sps:$4 sm:$0xff]   ;;  %v2808_v22 = vld [vmem:[%s4029_s1 + $0x1f4] ss:$8 sps:$4 sm:$0xff]   ;;  %v3485_v56 = vrot.slane %v320_v18, %v3208_v49  ;;  %v2878_v18 = vld [vmem:[%s4029_s1 + $0x2b0] ss:$8 sps:$4 sm:$0xff]  }
  0x46   :  { %2135 = vmatprep.mubr.bf16.mxu0 %v416_v23  ;;  %v3488_v23 = vrot.slane %v369_v19, %v3208_v49  ;;  %v2881_v19 = vld [vmem:[%s4029_s1 + $0x6b0] ss:$8 sps:$4 sm:$0xff]  }
  0x47   :  { %1942 = vmatpush1.bf16.msra.mxu1 %v2722_v24  ;;  %v2806_v24 = vld [vmem:[%s4029_s1 + $0x1f0] ss:$8 sps:$4 sm:$0xff]  }
  0x48   :  { %2106 = vmatpush1.bf16.msra.mxu0 %v2725_v25  ;;  %1943 = vmatprep.subr.bf16.mxu1 %v2730_v26  ;;  %v2809_v25 = vld [vmem:[%s4029_s1 + $0x5f0] ss:$8 sps:$4 sm:$0xff]   ;;  %v2814_v26 = vld [vmem:[%s4029_s1 + $0x204] ss:$8 sps:$4 sm:$0xff]  }
  0x49   :  { %2107 = vmatprep.subr.bf16.mxu0 %v2733_v27  ;;  %v2817_v27 = vld [vmem:[%s4029_s1 + $0x604] ss:$8 sps:$4 sm:$0xff]  }
  0x4b   :  { %1944 = vmatpush1.bf16.msra.mxu1 %v2728_v28  ;;  %v336_v28 = vcombine.high %v3485_v56, %v3485_v56 }
  0x4c   :  { %2108 = vmatpush1.bf16.msra.mxu0 %v2731_v29  ;;  %1945 = vmatprep.subr.bf16.mxu1 %v2736_v30  ;;  %v385_v29 = vcombine.high %v3488_v23, %v3488_v23  ;;  %v365_v30 = vcombine.high %v3293_v16, %v3293_v16  ;;  %v2823_v16 = vld [vmem:[%s4029_s1 + $0x614] ss:$8 sps:$4 sm:$0xff]  }
  0x4d   :  { %2109 = vmatprep.subr.bf16.mxu0 %v2739_v31  ;;  %v414_v31 = vcombine.high %v3296_v17, %v3296_v17  ;;  %v3523_v17 = vrot.slane %v336_v28, %v3208_v49  ;;  %v2898_v28 = vld [vmem:[%s4029_s1 + $0x2e4] ss:$8 sps:$4 sm:$0xff]  }
  0x4f   :  { %1946 = vmatpush1.bf16.msra.mxu1 %v2734_v32  ;;  %v2812_v32 = vld [vmem:[%s4029_s1 + $0x200] ss:$8 sps:$4 sm:$0xff]  }
  0x50   :  { %2110 = vmatpush1.bf16.msra.mxu0 %v2737_v33  ;;  %1947 = vmatprep.subr.bf16.mxu1 %v2742_v34  ;;  %v2815_v33 = vld [vmem:[%s4029_s1 + $0x600] ss:$8 sps:$4 sm:$0xff]   ;;  %v2820_v34 = vld [vmem:[%s4029_s1 + $0x214] ss:$8 sps:$4 sm:$0xff]  }
  0x51   :  { %2111 = vmatprep.subr.bf16.mxu0 %v2745_v35  ;;  %v3526_v35 = vrot.slane %v385_v29, %v3208_v49  ;;  %v2901_v29 = vld [vmem:[%s4029_s1 + $0x6e4] ss:$8 sps:$4 sm:$0xff]  }
  0x53   :  { %1948 = vmatpush1.bf16.msra.mxu1 %v2740_v36  ;;  %v2818_v36 = vld [vmem:[%s4029_s1 + $0x210] ss:$8 sps:$4 sm:$0xff]  }
  0x54   :  { %2112 = vmatpush1.bf16.msra.mxu0 %v2743_v37  ;;  %1949 = vmatprep.subr.bf16.mxu1 %v2748_v38  ;;  %v2821_v37 = vld [vmem:[%s4029_s1 + $0x610] ss:$8 sps:$4 sm:$0xff]   ;;  %v2826_v38 = vld [vmem:[%s4029_s1 + $0x224] ss:$8 sps:$4 sm:$0xff]  }
  0x55   :  { %2113 = vmatprep.subr.bf16.mxu0 %v2751_v39  ;;  %v2829_v39 = vld [vmem:[%s4029_s1 + $0x624] ss:$8 sps:$4 sm:$0xff]  }
  0x57   :  { %1950 = vmatpush1.bf16.msra.mxu1 %v2746_v40  ;;  %v2824_v40 = vld [vmem:[%s4029_s1 + $0x220] ss:$8 sps:$4 sm:$0xff]  }
  0x58   :  { %2114 = vmatpush1.bf16.msra.mxu0 %v2749_v41  ;;  %1951 = vmatprep.subr.bf16.mxu1 %v2754_v43  ;;  %v2827_v41 = vld [vmem:[%s4029_s1 + $0x620] ss:$8 sps:$4 sm:$0xff]   ;;  %v2832_v43 = vld [vmem:[%s4029_s1 + $0x234] ss:$8 sps:$4 sm:$0xff]  }
  0x59   :  { %2115 = vmatprep.subr.bf16.mxu0 %v2757_v44  ;;  %v2835_v44 = vld [vmem:[%s4029_s1 + $0x634] ss:$8 sps:$4 sm:$0xff]  }
  0x5b   :  { %1952 = vmatpush1.bf16.msra.mxu1 %v2752_v45  ;;  %v2830_v45 = vld [vmem:[%s4029_s1 + $0x230] ss:$8 sps:$4 sm:$0xff]  }
  0x5c   :  { %2116 = vmatpush1.bf16.msra.mxu0 %v2755_v46  ;;  %1953 = vmatprep.subr.bf16.mxu1 %v2760_v47  ;;  %v2833_v46 = vld [vmem:[%s4029_s1 + $0x630] ss:$8 sps:$4 sm:$0xff]   ;;  %v2838_v47 = vld [vmem:[%s4029_s1 + $0x244] ss:$8 sps:$4 sm:$0xff]  }
  0x5d   :  { %2117 = vmatprep.subr.bf16.mxu0 %v2763_v48  ;;  %v2841_v48 = vld [vmem:[%s4029_s1 + $0x644] ss:$8 sps:$4 sm:$0xff]  }
  0x5f   :  { %1954 = vmatpush1.bf16.msra.mxu1 %v2758_v50  ;;  %v2836_v50 = vld [vmem:[%s4029_s1 + $0x240] ss:$8 sps:$4 sm:$0xff]  }
  0x60   :  { %2118 = vmatpush1.bf16.msra.mxu0 %v2761_v51  ;;  %1955 = vmatprep.subr.bf16.mxu1 %v2766_v53  ;;  %v2839_v51 = vld [vmem:[%s4029_s1 + $0x640] ss:$8 sps:$4 sm:$0xff]   ;;  %v2844_v53 = vld [vmem:[%s4029_s1 + $0x254] ss:$8 sps:$4 sm:$0xff]  }
  0x61   :  { %2119 = vmatprep.subr.bf16.mxu0 %v2769_v54  ;;  %v2847_v54 = vld [vmem:[%s4029_s1 + $0x654] ss:$8 sps:$4 sm:$0xff]  }
  0x63   :  { %1956 = vmatpush1.bf16.msra.mxu1 %v2764_v55  ;;  %v2842_v55 = vld [vmem:[%s4029_s1 + $0x250] ss:$8 sps:$4 sm:$0xff]  }
  0x64   :  { %2120 = vmatpush1.bf16.msra.mxu0 %v2767_v57  ;;  %1957 = vmatprep.subr.bf16.mxu1 %v2772_v58  ;;  %v2845_v57 = vld [vmem:[%s4029_s1 + $0x650] ss:$8 sps:$4 sm:$0xff]   ;;  %v2850_v58 = vld [vmem:[%s4029_s1 + $0x264] ss:$8 sps:$4 sm:$0xff]  }
  0x65   :  { %2121 = vmatprep.subr.bf16.mxu0 %v2775_v59  ;;  %v2853_v59 = vld [vmem:[%s4029_s1 + $0x664] ss:$8 sps:$4 sm:$0xff]  }
  0x67   :  { %1958 = vmatpush1.bf16.msra.mxu1 %v2770_v60  ;;  %v2848_v60 = vld [vmem:[%s4029_s1 + $0x260] ss:$8 sps:$4 sm:$0xff]  }
  0x68   :  { %2122 = vmatpush1.bf16.msra.mxu0 %v2773_v61  ;;  %1959 = vmatprep.subr.bf16.mxu1 %v2778_v62  ;;  %v2851_v61 = vld [vmem:[%s4029_s1 + $0x660] ss:$8 sps:$4 sm:$0xff]   ;;  %v2856_v62 = vld [vmem:[%s4029_s1 + $0x274] ss:$8 sps:$4 sm:$0xff]  }
  0x69   :  { %2123 = vmatprep.subr.bf16.mxu0 %v2781_v63  ;;  %v2859_v63 = vld [vmem:[%s4029_s1 + $0x674] ss:$8 sps:$4 sm:$0xff]  }
  0x6b   :  { %1960 = vmatpush1.bf16.msra.mxu1 %v2776_v0  ;;  %v2854_v0 = vld [vmem:[%s4029_s1 + $0x270] ss:$8 sps:$4 sm:$0xff]  }
  0x6c   :  { %2124 = vmatpush1.bf16.msra.mxu0 %v2779_v1  ;;  %1961 = vmatprep.subr.bf16.mxu1 %v2784_v2  ;;  %v2857_v1 = vld [vmem:[%s4029_s1 + $0x670] ss:$8 sps:$4 sm:$0xff]   ;;  %v2862_v2 = vld [vmem:[%s4029_s1 + $0x284] ss:$8 sps:$4 sm:$0xff]  }
  0x6d   :  { %2125 = vmatprep.subr.bf16.mxu0 %v2787_v3  ;;  %v2865_v3 = vld [vmem:[%s4029_s1 + $0x684] ss:$8 sps:$4 sm:$0xff]  }
  0x6f   :  { %1962 = vmatpush1.bf16.msra.mxu1 %v2782_v4  ;;  %v2860_v4 = vld [vmem:[%s4029_s1 + $0x280] ss:$8 sps:$4 sm:$0xff]  }
  0x70   :  { %2126 = vmatpush1.bf16.msra.mxu0 %v2785_v5  ;;  %1963 = vmatprep.subr.bf16.mxu1 %v2790_v6  ;;  %v2863_v5 = vld [vmem:[%s4029_s1 + $0x680] ss:$8 sps:$4 sm:$0xff]   ;;  %v2868_v6 = vld [vmem:[%s4029_s1 + $0x294] ss:$8 sps:$4 sm:$0xff]  }
  0x71   :  { %2127 = vmatprep.subr.bf16.mxu0 %v2793_v7  ;;  %v2871_v7 = vld [vmem:[%s4029_s1 + $0x694] ss:$8 sps:$4 sm:$0xff]  }
  0x73   :  { %1964 = vmatpush1.bf16.msra.mxu1 %v2788_v8  ;;  %v2866_v8 = vld [vmem:[%s4029_s1 + $0x290] ss:$8 sps:$4 sm:$0xff]  }
  0x74   :  { %2128 = vmatpush1.bf16.msra.mxu0 %v2791_v9  ;;  %1965 = vmatprep.subr.bf16.mxu1 %v2796_v10  ;;  %v2869_v9 = vld [vmem:[%s4029_s1 + $0x690] ss:$8 sps:$4 sm:$0xff]   ;;  %v2874_v10 = vld [vmem:[%s4029_s1 + $0x2a4] ss:$8 sps:$4 sm:$0xff]  }
  0x75   :  { %2129 = vmatprep.subr.bf16.mxu0 %v2799_v11  ;;  %v2877_v11 = vld [vmem:[%s4029_s1 + $0x6a4] ss:$8 sps:$4 sm:$0xff]  }
  0x77   :  { %1966 = vmatpush1.bf16.msra.mxu1 %v2794_v12  ;;  %v2872_v12 = vld [vmem:[%s4029_s1 + $0x2a0] ss:$8 sps:$4 sm:$0xff]  }
  0x78   :  { %2130 = vmatpush1.bf16.msra.mxu0 %v2797_v13  ;;  %1967 = vmatprep.subr.bf16.mxu1 %v2802_v14  ;;  %v2875_v13 = vld [vmem:[%s4029_s1 + $0x6a0] ss:$8 sps:$4 sm:$0xff]   ;;  %v2880_v14 = vld [vmem:[%s4029_s1 + $0x2b4] ss:$8 sps:$4 sm:$0xff]  }
  0x79   :  { %2131 = vmatprep.subr.bf16.mxu0 %v2805_v15  ;;  %v2883_v15 = vld [vmem:[%s4029_s1 + $0x6b4] ss:$8 sps:$4 sm:$0xff]  }
  0x7b   :  { %1968 = vmatpush1.bf16.msra.mxu1 %v2800_v20  ;;  %v2886_v20 = vld [vmem:[%s4029_s1 + $0x2c4] ss:$8 sps:$4 sm:$0xff]  }
  0x7c   :  { %2132 = vmatpush1.bf16.msra.mxu0 %v2803_v21  ;;  %1969 = vmatprep.subr.bf16.mxu1 %v2808_v22  ;;  %v2889_v21 = vld [vmem:[%s4029_s1 + $0x6c4] ss:$8 sps:$4 sm:$0xff]   ;;  %v2884_v22 = vld [vmem:[%s4029_s1 + $0x2c0] ss:$8 sps:$4 sm:$0xff]  }
  0x7d   :  { %2133 = vmatprep.subr.bf16.mxu0 %v2811_v52  ;;  %v2887_v52 = vld [vmem:[%s4029_s1 + $0x6c0] ss:$8 sps:$4 sm:$0xff]  }
  0x7f   :  { %1970 = vmatpush1.bf16.msra.mxu1 %v2806_v24  ;;  %v2892_v24 = vld [vmem:[%s4029_s1 + $0x2d4] ss:$8 sps:$4 sm:$0xff]  }
  0x80   :  { %2134 = vmatpush1.bf16.msra.mxu0 %v2809_v25  ;;  %1980 = vmatprep.subr.bf16.mxu1 %v2814_v26  ;;  %v2895_v25 = vld [vmem:[%s4029_s1 + $0x6d4] ss:$8 sps:$4 sm:$0xff]   ;;  %v2890_v26 = vld [vmem:[%s4029_s1 + $0x2d0] ss:$8 sps:$4 sm:$0xff]  }
  0x81   :  { %2144 = vmatprep.subr.bf16.mxu0 %v2817_v27  ;;  %v2893_v27 = vld [vmem:[%s4029_s1 + $0x6d0] ss:$8 sps:$4 sm:$0xff]  }
  0x82   :  { %1972 = vmatmul.mubr.bf16.vlgmr.msra.gmra.mrb[0].mxu1 %v365_v30  ;;  %v2896_v30 = vld [vmem:[%s4029_s1 + $0x2e0] ss:$8 sps:$4 sm:$0xff]  }
  0x83   :  { %2136 = vmatmul.mubr.bf16.vlgmr.msra.gmra.mrb[0].mxu0 %v414_v31  ;;  %1981 = vmatpush1.bf16.msra.mxu1 %v2812_v32  ;;  %v2899_v31 = vld [vmem:[%s4029_s1 + $0x6e0] ss:$8 sps:$4 sm:$0xff]   ;;  %v2904_v32 = vld [vmem:[%s4029_s1 + $0x2f4] ss:$8 sps:$4 sm:$0xff]  }
  0x84   :  { %2145 = vmatpush1.bf16.msra.mxu0 %v2815_v33  ;;  %1982 = vmatprep.subr.bf16.mxu1 %v2820_v34  ;;  %v2907_v33 = vld [vmem:[%s4029_s1 + $0x6f4] ss:$8 sps:$4 sm:$0xff]   ;;  %v2902_v34 = vld [vmem:[%s4029_s1 + $0x2f0] ss:$8 sps:$4 sm:$0xff]  }
  0x85   :  { %2146 = vmatprep.subr.bf16.mxu0 %v2823_v16  ;;  %2012 = vmatprep.mubr.bf16.mxu1 %v3523_v17  ;;  %v2905_v16 = vld [vmem:[%s4029_s1 + $0x6f0] ss:$8 sps:$4 sm:$0xff]  }
  0x86   :  { %2176 = vmatprep.mubr.bf16.mxu0 %v3526_v35 }
  0x87   :  { %1983 = vmatpush1.bf16.msra.mxu1 %v2818_v36  ;;  %v2910_v36 = vld [vmem:[%s4029_s1 + $0x304] ss:$8 sps:$4 sm:$0xff]  }
  0x88   :  { %2147 = vmatpush1.bf16.msra.mxu0 %v2821_v37  ;;  %1984 = vmatprep.subr.bf16.mxu1 %v2826_v38  ;;  %v2913_v37 = vld [vmem:[%s4029_s1 + $0x704] ss:$8 sps:$4 sm:$0xff]   ;;  %v3712_v38 = vrot.slane %v3485_v56, %v3208_v49  ;;  %v2916_v56 = vld [vmem:[%s4029_s1 + $0x314] ss:$8 sps:$4 sm:$0xff]  }
  0x89   :  { %2148 = vmatprep.subr.bf16.mxu0 %v2829_v39  ;;  %v3716_v39 = vrot.slane %v3488_v23, %v3208_v49  ;;  %v2919_v23 = vld [vmem:[%s4029_s1 + $0x714] ss:$8 sps:$4 sm:$0xff]  }
  0x8b   :  { %1985 = vmatpush1.bf16.msra.mxu1 %v2824_v40  ;;  %v2908_v40 = vld [vmem:[%s4029_s1 + $0x300] ss:$8 sps:$4 sm:$0xff]  }
  0x8c   :  { %2149 = vmatpush1.bf16.msra.mxu0 %v2827_v41  ;;  %1986 = vmatprep.subr.bf16.mxu1 %v2832_v43  ;;  %v2911_v41 = vld [vmem:[%s4029_s1 + $0x700] ss:$8 sps:$4 sm:$0xff]   ;;  %v368_v43 = vcombine.high %v3523_v17, %v3523_v17  ;;  %v2922_v17 = vld [vmem:[%s4029_s1 + $0x324] ss:$8 sps:$4 sm:$0xff]  }
  0x8d   :  { %2150 = vmatprep.subr.bf16.mxu0 %v2835_v44  ;;  %v417_v44 = vcombine.high %v3526_v35, %v3526_v35  ;;  %v2925_v35 = vld [vmem:[%s4029_s1 + $0x724] ss:$8 sps:$4 sm:$0xff]  }
  0x8f   :  { %1987 = vmatpush1.bf16.msra.mxu1 %v2830_v45  ;;  %v2914_v45 = vld [vmem:[%s4029_s1 + $0x310] ss:$8 sps:$4 sm:$0xff]  }
  0x90   :  { %2151 = vmatpush1.bf16.msra.mxu0 %v2833_v46  ;;  %1988 = vmatprep.subr.bf16.mxu1 %v2838_v47  ;;  %v2917_v46 = vld [vmem:[%s4029_s1 + $0x710] ss:$8 sps:$4 sm:$0xff]   ;;  %v2920_v47 = vld [vmem:[%s4029_s1 + $0x320] ss:$8 sps:$4 sm:$0xff]  }
  0x91   :  { %2152 = vmatprep.subr.bf16.mxu0 %v2841_v48  ;;  %v2923_v48 = vld [vmem:[%s4029_s1 + $0x720] ss:$8 sps:$4 sm:$0xff]  }
  0x93   :  { %1989 = vmatpush1.bf16.msra.mxu1 %v2836_v50  ;;  %v2928_v50 = vld [vmem:[%s4029_s1 + $0x334] ss:$8 sps:$4 sm:$0xff]  }
  0x94   :  { %2153 = vmatpush1.bf16.msra.mxu0 %v2839_v51  ;;  %1990 = vmatprep.subr.bf16.mxu1 %v2844_v53  ;;  %v2931_v51 = vld [vmem:[%s4029_s1 + $0x734] ss:$8 sps:$4 sm:$0xff]   ;;  %v2926_v53 = vld [vmem:[%s4029_s1 + $0x330] ss:$8 sps:$4 sm:$0xff]  }
  0x95   :  { %2154 = vmatprep.subr.bf16.mxu0 %v2847_v54  ;;  %v2929_v54 = vld [vmem:[%s4029_s1 + $0x730] ss:$8 sps:$4 sm:$0xff]  }
  0x97   :  { %1991 = vmatpush1.bf16.msra.mxu1 %v2842_v55  ;;  %v2934_v55 = vld [vmem:[%s4029_s1 + $0x344] ss:$8 sps:$4 sm:$0xff]  }
  0x98   :  { %2155 = vmatpush1.bf16.msra.mxu0 %v2845_v57  ;;  %1992 = vmatprep.subr.bf16.mxu1 %v2850_v58  ;;  %v2937_v57 = vld [vmem:[%s4029_s1 + $0x744] ss:$8 sps:$4 sm:$0xff]   ;;  %v2932_v58 = vld [vmem:[%s4029_s1 + $0x340] ss:$8 sps:$4 sm:$0xff]  }
  0x99   :  { %2156 = vmatprep.subr.bf16.mxu0 %v2853_v59  ;;  %v2935_v59 = vld [vmem:[%s4029_s1 + $0x740] ss:$8 sps:$4 sm:$0xff]  }
  0x9b   :  { %1993 = vmatpush1.bf16.msra.mxu1 %v2848_v60  ;;  %v2940_v60 = vld [vmem:[%s4029_s1 + $0x354] ss:$8 sps:$4 sm:$0xff]  }
  0x9c   :  { %2157 = vmatpush1.bf16.msra.mxu0 %v2851_v61  ;;  %1994 = vmatprep.subr.bf16.mxu1 %v2856_v62  ;;  %v2943_v61 = vld [vmem:[%s4029_s1 + $0x754] ss:$8 sps:$4 sm:$0xff]   ;;  %v2938_v62 = vld [vmem:[%s4029_s1 + $0x350] ss:$8 sps:$4 sm:$0xff]  }
  0x9d   :  { %2158 = vmatprep.subr.bf16.mxu0 %v2859_v63  ;;  %v2941_v63 = vld [vmem:[%s4029_s1 + $0x750] ss:$8 sps:$4 sm:$0xff]  }
  0x9f   :  { %1995 = vmatpush1.bf16.msra.mxu1 %v2854_v0  ;;  %v2946_v0 = vld [vmem:[%s4029_s1 + $0x364] ss:$8 sps:$4 sm:$0xff]  }
  0xa0   :  { %2159 = vmatpush1.bf16.msra.mxu0 %v2857_v1  ;;  %1996 = vmatprep.subr.bf16.mxu1 %v2862_v2  ;;  %v2949_v1 = vld [vmem:[%s4029_s1 + $0x764] ss:$8 sps:$4 sm:$0xff]   ;;  %v2944_v2 = vld [vmem:[%s4029_s1 + $0x360] ss:$8 sps:$4 sm:$0xff]  }
  0xa1   :  { %2160 = vmatprep.subr.bf16.mxu0 %v2865_v3  ;;  %v2947_v3 = vld [vmem:[%s4029_s1 + $0x760] ss:$8 sps:$4 sm:$0xff]  }
  0xa3   :  { %1997 = vmatpush1.bf16.msra.mxu1 %v2860_v4  ;;  %v2952_v4 = vld [vmem:[%s4029_s1 + $0x374] ss:$8 sps:$4 sm:$0xff]  }
  0xa4   :  { %2161 = vmatpush1.bf16.msra.mxu0 %v2863_v5  ;;  %1998 = vmatprep.subr.bf16.mxu1 %v2868_v6  ;;  %v2955_v5 = vld [vmem:[%s4029_s1 + $0x774] ss:$8 sps:$4 sm:$0xff]   ;;  %v2950_v6 = vld [vmem:[%s4029_s1 + $0x370] ss:$8 sps:$4 sm:$0xff]  }
  0xa5   :  { %2162 = vmatprep.subr.bf16.mxu0 %v2871_v7  ;;  %v2953_v7 = vld [vmem:[%s4029_s1 + $0x770] ss:$8 sps:$4 sm:$0xff]  }
  0xa7   :  { %1999 = vmatpush1.bf16.msra.mxu1 %v2866_v8  ;;  %v2958_v8 = vld [vmem:[%s4029_s1 + $0x384] ss:$8 sps:$4 sm:$0xff]  }
  0xa8   :  { %2163 = vmatpush1.bf16.msra.mxu0 %v2869_v9  ;;  %2000 = vmatprep.subr.bf16.mxu1 %v2874_v10  ;;  %v2961_v9 = vld [vmem:[%s4029_s1 + $0x784] ss:$8 sps:$4 sm:$0xff]   ;;  %v2956_v10 = vld [vmem:[%s4029_s1 + $0x380] ss:$8 sps:$4 sm:$0xff]  }
  0xa9   :  { %2164 = vmatprep.subr.bf16.mxu0 %v2877_v11  ;;  %v2959_v11 = vld [vmem:[%s4029_s1 + $0x780] ss:$8 sps:$4 sm:$0xff]  }
  0xab   :  { %2001 = vmatpush1.bf16.msra.mxu1 %v2872_v12  ;;  %v2964_v12 = vld [vmem:[%s4029_s1 + $0x394] ss:$8 sps:$4 sm:$0xff]  }
  0xac   :  { %2165 = vmatpush1.bf16.msra.mxu0 %v2875_v13  ;;  %2002 = vmatprep.subr.bf16.mxu1 %v2880_v14  ;;  %v2967_v13 = vld [vmem:[%s4029_s1 + $0x794] ss:$8 sps:$4 sm:$0xff]   ;;  %v2962_v14 = vld [vmem:[%s4029_s1 + $0x390] ss:$8 sps:$4 sm:$0xff]  }
  0xad   :  { %2166 = vmatprep.subr.bf16.mxu0 %v2883_v15  ;;  %v2965_v15 = vld [vmem:[%s4029_s1 + $0x790] ss:$8 sps:$4 sm:$0xff]  }
  0xaf   :  { %2003 = vmatpush1.bf16.msra.mxu1 %v2878_v18  ;;  %v2970_v18 = vld [vmem:[%s4029_s1 + $0x3a4] ss:$8 sps:$4 sm:$0xff]  }
  0xb0   :  { %2167 = vmatpush1.bf16.msra.mxu0 %v2881_v19  ;;  %2004 = vmatprep.subr.bf16.mxu1 %v2886_v20  ;;  %v2973_v19 = vld [vmem:[%s4029_s1 + $0x7a4] ss:$8 sps:$4 sm:$0xff]   ;;  %v2968_v20 = vld [vmem:[%s4029_s1 + $0x3a0] ss:$8 sps:$4 sm:$0xff]  }
  0xb1   :  { %2168 = vmatprep.subr.bf16.mxu0 %v2889_v21  ;;  %v2971_v21 = vld [vmem:[%s4029_s1 + $0x7a0] ss:$8 sps:$4 sm:$0xff]  }
  0xb3   :  { %2005 = vmatpush1.bf16.msra.mxu1 %v2884_v22  ;;  %v2976_v22 = vld [vmem:[%s4029_s1 + $0x3b4] ss:$8 sps:$4 sm:$0xff]  }
  0xb4   :  { %2169 = vmatpush1.bf16.msra.mxu0 %v2887_v52  ;;  %2006 = vmatprep.subr.bf16.mxu1 %v2892_v24  ;;  %v2979_v52 = vld [vmem:[%s4029_s1 + $0x7b4] ss:$8 sps:$4 sm:$0xff]   ;;  %v2974_v24 = vld [vmem:[%s4029_s1 + $0x3b0] ss:$8 sps:$4 sm:$0xff]  }
  0xb5   :  { %2170 = vmatprep.subr.bf16.mxu0 %v2895_v25  ;;  %v2977_v25 = vld [vmem:[%s4029_s1 + $0x7b0] ss:$8 sps:$4 sm:$0xff]  }
  0xb7   :  { %2007 = vmatpush1.bf16.msra.mxu1 %v2890_v26  ;;  %v2982_v26 = vld [vmem:[%s4029_s1 + $0x3c4] ss:$8 sps:$4 sm:$0xff]  }
  0xb8   :  { %2171 = vmatpush1.bf16.msra.mxu0 %v2893_v27  ;;  %2008 = vmatprep.subr.bf16.mxu1 %v2898_v28  ;;  %v2985_v27 = vld [vmem:[%s4029_s1 + $0x7c4] ss:$8 sps:$4 sm:$0xff]   ;;  %v2980_v28 = vld [vmem:[%s4029_s1 + $0x3c0] ss:$8 sps:$4 sm:$0xff]  }
  0xb9   :  { %2172 = vmatprep.subr.bf16.mxu0 %v2901_v29  ;;  %v2983_v29 = vld [vmem:[%s4029_s1 + $0x7c0] ss:$8 sps:$4 sm:$0xff]  }
  0xbb   :  { %2009 = vmatpush1.bf16.msra.mxu1 %v2896_v30  ;;  %v2988_v30 = vld [vmem:[%s4029_s1 + $0x3d4] ss:$8 sps:$4 sm:$0xff]  }
  0xbc   :  { %2173 = vmatpush1.bf16.msra.mxu0 %v2899_v31  ;;  %2010 = vmatprep.subr.bf16.mxu1 %v2904_v32  ;;  %v2991_v31 = vld [vmem:[%s4029_s1 + $0x7d4] ss:$8 sps:$4 sm:$0xff]   ;;  %v2986_v32 = vld [vmem:[%s4029_s1 + $0x3d0] ss:$8 sps:$4 sm:$0xff]  }
  0xbd   :  { %2174 = vmatprep.subr.bf16.mxu0 %v2907_v33  ;;  %v2989_v33 = vld [vmem:[%s4029_s1 + $0x7d0] ss:$8 sps:$4 sm:$0xff]  }
  0xbf   :  { %2011 = vmatpush1.bf16.msra.mxu1 %v2902_v34  ;;  %v2994_v34 = vld [vmem:[%s4029_s1 + $0x3e4] ss:$8 sps:$4 sm:$0xff]  }
  0xc0   :  { %2175 = vmatpush1.bf16.msra.mxu0 %v2905_v16  ;;  %2021 = vmatprep.subr.bf16.mxu1 %v2910_v36  ;;  %v2997_v16 = vld [vmem:[%s4029_s1 + $0x7e4] ss:$8 sps:$4 sm:$0xff]   ;;  %v2992_v36 = vld [vmem:[%s4029_s1 + $0x3e0] ss:$8 sps:$4 sm:$0xff]  }
  0xc1   :  { %2185 = vmatprep.subr.bf16.mxu0 %v2913_v37  ;;  %v2995_v37 = vld [vmem:[%s4029_s1 + $0x7e0] ss:$8 sps:$4 sm:$0xff]  }
  0xc2   :  { %2013 = vmatmul.mubr.bf16.vlgmr.msra.gmra.mrb[0].mxu1 %v3712_v38 }
  0xc3   :  { %2177 = vmatmul.mubr.bf16.vlgmr.msra.gmra.mrb[0].mxu0 %v3716_v39  ;;  %2022 = vmatpush1.bf16.msra.mxu1 %v2908_v40  ;;  %v3000_v40 = vld [vmem:[%s4029_s1 + $0x3f4] ss:$8 sps:$4 sm:$0xff]  }
  0xc4   :  { %2186 = vmatpush1.bf16.msra.mxu0 %v2911_v41  ;;  %2023 = vmatprep.subr.bf16.mxu1 %v2916_v56  ;;  %v3003_v41 = vld [vmem:[%s4029_s1 + $0x7f4] ss:$8 sps:$4 sm:$0xff]   ;;  %v3907_v56 = vld.sshfl [vmem:[%s4030_s0 + $0x10] sm:$0x11 pattern:$0x75316420] }
  0xc5   :  { %2187 = vmatprep.subr.bf16.mxu0 %v2919_v23  ;;  %2053 = vmatprep.mubr.bf16.mxu1 %v368_v43  ;;  %v2998_v23 = vld [vmem:[%s4029_s1 + $0x3f0] ss:$8 sps:$4 sm:$0xff]  }
  0xc6   :  { %2217 = vmatprep.mubr.bf16.mxu0 %v417_v44  ;;  %v3001_v43 = vld [vmem:[%s4029_s1 + $0x7f0] ss:$8 sps:$4 sm:$0xff]   ;;  %v425_v44 = vcombine.high %v3907_v56, %v3907_v56 }
  0xc7   :  { %2024 = vmatpush1.bf16.msra.mxu1 %v2914_v45  ;;  %v3006_v45 = vld [vmem:[%s4029_s1 + $0x804] ss:$8 sps:$4 sm:$0xff]  }
  0xc8   :  { %2188 = vmatpush1.bf16.msra.mxu0 %v2917_v46  ;;  %2025 = vmatprep.subr.bf16.mxu1 %v2922_v17  ;;  %v366_v46 = vcombine.high %v3712_v38, %v3712_v38  ;;  %v415_v17 = vcombine.high %v3716_v39, %v3716_v39  ;;  %v3007_v38 = vld [vmem:[%s4029_s1 + $0x810] ss:$8 sps:$4 sm:$0xff]   ;;  %v3012_v39 = vld [vmem:[%s4029_s1 + $0x824] ss:$8 sps:$4 sm:$0xff]  }
  0xc9   :  { %2189 = vmatprep.subr.bf16.mxu0 %v2925_v35  ;;  %v3004_v35 = vld [vmem:[%s4029_s1 + $0x800] ss:$8 sps:$4 sm:$0xff]  }
  0xcb   :  { %2026 = vmatpush1.bf16.msra.mxu1 %v2920_v47  ;;  %v439_v47 = vrot.slane %v425_v44, %v3208_v49 }
  0xcc   :  { %2190 = vmatpush1.bf16.msra.mxu0 %v2923_v48  ;;  %2027 = vmatprep.subr.bf16.mxu1 %v2928_v50  ;;  %v3009_v48 = vld [vmem:[%s4029_s1 + $0x814] ss:$8 sps:$4 sm:$0xff]   ;;  %v3010_v50 = vld [vmem:[%s4029_s1 + $0x820] ss:$8 sps:$4 sm:$0xff]  }
  0xcd   :  { %2191 = vmatprep.subr.bf16.mxu0 %v2931_v51  ;;  %v3015_v51 = vld [vmem:[%s4029_s1 + $0x834] ss:$8 sps:$4 sm:$0xff]  }
  0xcf   :  { %2028 = vmatpush1.bf16.msra.mxu1 %v2926_v53  ;;  %v3013_v53 = vld [vmem:[%s4029_s1 + $0x830] ss:$8 sps:$4 sm:$0xff]  }
  0xd0   :  { %2192 = vmatpush1.bf16.msra.mxu0 %v2929_v54  ;;  %2029 = vmatprep.subr.bf16.mxu1 %v2934_v55  ;;  %v3018_v54 = vld [vmem:[%s4029_s1 + $0x844] ss:$8 sps:$4 sm:$0xff]   ;;  %v3016_v55 = vld [vmem:[%s4029_s1 + $0x840] ss:$8 sps:$4 sm:$0xff]  }
  0xd1   :  { %2193 = vmatprep.subr.bf16.mxu0 %v2937_v57  ;;  %v3021_v57 = vld [vmem:[%s4029_s1 + $0x854] ss:$8 sps:$4 sm:$0xff]  }
  0xd3   :  { %2030 = vmatpush1.bf16.msra.mxu1 %v2932_v58  ;;  %v3019_v58 = vld [vmem:[%s4029_s1 + $0x850] ss:$8 sps:$4 sm:$0xff]  }
  0xd4   :  { %2194 = vmatpush1.bf16.msra.mxu0 %v2935_v59  ;;  %2031 = vmatprep.subr.bf16.mxu1 %v2940_v60  ;;  %v3024_v59 = vld [vmem:[%s4029_s1 + $0x864] ss:$8 sps:$4 sm:$0xff]   ;;  %v3022_v60 = vld [vmem:[%s4029_s1 + $0x860] ss:$8 sps:$4 sm:$0xff]  }
  0xd5   :  { %2195 = vmatprep.subr.bf16.mxu0 %v2943_v61  ;;  %v3027_v61 = vld [vmem:[%s4029_s1 + $0x874] ss:$8 sps:$4 sm:$0xff]  }
  0xd7   :  { %2032 = vmatpush1.bf16.msra.mxu1 %v2938_v62  ;;  %v3025_v62 = vld [vmem:[%s4029_s1 + $0x870] ss:$8 sps:$4 sm:$0xff]  }
  0xd8   :  { %2196 = vmatpush1.bf16.msra.mxu0 %v2941_v63  ;;  %2033 = vmatprep.subr.bf16.mxu1 %v2946_v0  ;;  %v3030_v63 = vld [vmem:[%s4029_s1 + $0x884] ss:$8 sps:$4 sm:$0xff]   ;;  %v3028_v0 = vld [vmem:[%s4029_s1 + $0x880] ss:$8 sps:$4 sm:$0xff]  }
  0xd9   :  { %2197 = vmatprep.subr.bf16.mxu0 %v2949_v1  ;;  %v3033_v1 = vld [vmem:[%s4029_s1 + $0x894] ss:$8 sps:$4 sm:$0xff]  }
  0xdb   :  { %2034 = vmatpush1.bf16.msra.mxu1 %v2944_v2  ;;  %v3031_v2 = vld [vmem:[%s4029_s1 + $0x890] ss:$8 sps:$4 sm:$0xff]  }
  0xdc   :  { %2198 = vmatpush1.bf16.msra.mxu0 %v2947_v3  ;;  %2035 = vmatprep.subr.bf16.mxu1 %v2952_v4  ;;  %v3036_v3 = vld [vmem:[%s4029_s1 + $0x8a4] ss:$8 sps:$4 sm:$0xff]   ;;  %v3034_v4 = vld [vmem:[%s4029_s1 + $0x8a0] ss:$8 sps:$4 sm:$0xff]  }
  0xdd   :  { %2199 = vmatprep.subr.bf16.mxu0 %v2955_v5  ;;  %v3039_v5 = vld [vmem:[%s4029_s1 + $0x8b4] ss:$8 sps:$4 sm:$0xff]  }
  0xdf   :  { %2036 = vmatpush1.bf16.msra.mxu1 %v2950_v6  ;;  %v3037_v6 = vld [vmem:[%s4029_s1 + $0x8b0] ss:$8 sps:$4 sm:$0xff]  }
  0xe0   :  { %2200 = vmatpush1.bf16.msra.mxu0 %v2953_v7  ;;  %2037 = vmatprep.subr.bf16.mxu1 %v2958_v8  ;;  %v3042_v7 = vld [vmem:[%s4029_s1 + $0x8c4] ss:$8 sps:$4 sm:$0xff]   ;;  %v3040_v8 = vld [vmem:[%s4029_s1 + $0x8c0] ss:$8 sps:$4 sm:$0xff]  }
  0xe1   :  { %2201 = vmatprep.subr.bf16.mxu0 %v2961_v9  ;;  %v3045_v9 = vld [vmem:[%s4029_s1 + $0x8d4] ss:$8 sps:$4 sm:$0xff]  }
  0xe3   :  { %2038 = vmatpush1.bf16.msra.mxu1 %v2956_v10  ;;  %v3043_v10 = vld [vmem:[%s4029_s1 + $0x8d0] ss:$8 sps:$4 sm:$0xff]  }
  0xe4   :  { %2202 = vmatpush1.bf16.msra.mxu0 %v2959_v11  ;;  %2039 = vmatprep.subr.bf16.mxu1 %v2964_v12  ;;  %v3048_v11 = vld [vmem:[%s4029_s1 + $0x8e4] ss:$8 sps:$4 sm:$0xff]   ;;  %v3046_v12 = vld [vmem:[%s4029_s1 + $0x8e0] ss:$8 sps:$4 sm:$0xff]  }
  0xe5   :  { %2203 = vmatprep.subr.bf16.mxu0 %v2967_v13  ;;  %v3051_v13 = vld [vmem:[%s4029_s1 + $0x8f4] ss:$8 sps:$4 sm:$0xff]  }
  0xe7   :  { %2040 = vmatpush1.bf16.msra.mxu1 %v2962_v14  ;;  %v3049_v14 = vld [vmem:[%s4029_s1 + $0x8f0] ss:$8 sps:$4 sm:$0xff]  }
  0xe8   :  { %2204 = vmatpush1.bf16.msra.mxu0 %v2965_v15  ;;  %2041 = vmatprep.subr.bf16.mxu1 %v2970_v18  ;;  %v432_v15 = vrot.slane %v3907_v56, %v3208_v49 }
  0xe9   :  { %2205 = vmatprep.subr.bf16.mxu0 %v2973_v19 }
  0xeb   :  { %2042 = vmatpush1.bf16.msra.mxu1 %v2968_v20 }
  0xec   :  { %2206 = vmatpush1.bf16.msra.mxu0 %v2971_v21  ;;  %2043 = vmatprep.subr.bf16.mxu1 %v2976_v22  ;;  %v309_v22 = vsub.s32 0, %v3190_v42 }
  0xed   :  { %2207 = vmatprep.subr.bf16.mxu0 %v2979_v52  ;;  %v305_v52 = vld [vmem:[%s4031_s2] sm:$0x3] }
  0xef   :  { %2044 = vmatpush1.bf16.msra.mxu1 %v2974_v24  ;;  %v313_v24 = vsub.s32 1, %v3190_v42 }
  0xf0   :  { %2208 = vmatpush1.bf16.msra.mxu0 %v2977_v25  ;;  %2045 = vmatprep.subr.bf16.mxu1 %v2982_v26  ;;  %v310_v25 = vrot.slane %v305_v52, %v309_v22 }
  0xf1   :  { %2209 = vmatprep.subr.bf16.mxu0 %v2985_v27  ;;  %v314_v26 = vrot.slane %v305_v52, %v313_v24 }
  0xf3   :  { %2046 = vmatpush1.bf16.msra.mxu1 %v2980_v28 }
  0xf4   :  { %2210 = vmatpush1.bf16.msra.mxu0 %v2983_v29  ;;  %2047 = vmatprep.subr.bf16.mxu1 %v2988_v30 }
  0xf5   :  { %2211 = vmatprep.subr.bf16.mxu0 %v2991_v31 }
  0xf7   :  { %2048 = vmatpush1.bf16.msra.mxu1 %v2986_v32 }
  0xf8   :  { %2212 = vmatpush1.bf16.msra.mxu0 %v2989_v33  ;;  %2049 = vmatprep.subr.bf16.mxu1 %v2994_v34 }
  0xf9   :  { %2213 = vmatprep.subr.bf16.mxu0 %v2997_v16 }
  0xfb   :  { %2050 = vmatpush1.bf16.msra.mxu1 %v2992_v36 }
  0xfc   :  { %2214 = vmatpush1.bf16.msra.mxu0 %v2995_v37  ;;  %2051 = vmatprep.subr.bf16.mxu1 %v3000_v40 }
  0xfd   :  { %2215 = vmatprep.subr.bf16.mxu0 %v3003_v41 }
  0xff   :  { %2052 = vmatpush1.bf16.msra.mxu1 %v2998_v23 }
 0x100   :  { %2216 = vmatpush1.bf16.msra.mxu0 %v3001_v43 }
 0x101   :  { %2226 = vmatprep.subr.bf16.mxu0 %v3006_v45 }
 0x102   :  { %2054 = vmatmul.mubr.bf16.vlgmr.msra.gmra.mrb[0].mxu1 %v366_v46 }
 0x103   :  { %2218 = vmatmul.mubr.bf16.vlgmr.msra.gmra.mrb[0].mxu0 %v415_v17 }
 0x104   :  { %2227 = vmatpush1.bf16.msra.mxu0 %v3004_v35  ;;  %2258 = vmatprep.mubr.bf16.mxu0 %v439_v47 }
 0x105   :  { %2228 = vmatprep.subr.bf16.mxu0 %v3009_v48 }
 0x108   :  { %2229 = vmatpush1.bf16.msra.mxu0 %v3007_v38 }
 0x109   :  { %2230 = vmatprep.subr.bf16.mxu0 %v3012_v39 }
 0x10c   :  { %2231 = vmatpush1.bf16.msra.mxu0 %v3010_v50 }
 0x10d   :  { %2232 = vmatprep.subr.bf16.mxu0 %v3015_v51 }
 0x110   :  { %2233 = vmatpush1.bf16.msra.mxu0 %v3013_v53 }
 0x111   :  { %2234 = vmatprep.subr.bf16.mxu0 %v3018_v54 }
 0x114   :  { %2235 = vmatpush1.bf16.msra.mxu0 %v3016_v55 }
 0x115   :  { %2236 = vmatprep.subr.bf16.mxu0 %v3021_v57 }
 0x118   :  { %2237 = vmatpush1.bf16.msra.mxu0 %v3019_v58 }
 0x119   :  { %2238 = vmatprep.subr.bf16.mxu0 %v3024_v59 }
 0x11c   :  { %2239 = vmatpush1.bf16.msra.mxu0 %v3022_v60 }
 0x11d   :  { %2240 = vmatprep.subr.bf16.mxu0 %v3027_v61 }
 0x120   :  { %2241 = vmatpush1.bf16.msra.mxu0 %v3025_v62 }
 0x121   :  { %2242 = vmatprep.subr.bf16.mxu0 %v3030_v63 }
 0x124   :  { %2243 = vmatpush1.bf16.msra.mxu0 %v3028_v0 }
 0x125   :  { %2244 = vmatprep.subr.bf16.mxu0 %v3033_v1 }
 0x128   :  { %2245 = vmatpush1.bf16.msra.mxu0 %v3031_v2 }
 0x129   :  { %2246 = vmatprep.subr.bf16.mxu0 %v3036_v3 }
 0x12c   :  { %2247 = vmatpush1.bf16.msra.mxu0 %v3034_v4 }
 0x12d   :  { %2248 = vmatprep.subr.bf16.mxu0 %v3039_v5 }
 0x130   :  { %2249 = vmatpush1.bf16.msra.mxu0 %v3037_v6 }
 0x131   :  { %2250 = vmatprep.subr.bf16.mxu0 %v3042_v7 }
 0x134   :  { %2251 = vmatpush1.bf16.msra.mxu0 %v3040_v8 }
 0x135   :  { %2252 = vmatprep.subr.bf16.mxu0 %v3045_v9 }
 0x138   :  { %2253 = vmatpush1.bf16.msra.mxu0 %v3043_v10 }
 0x139   :  { %2254 = vmatprep.subr.bf16.mxu0 %v3048_v11 }
 0x13c   :  { %2255 = vmatpush1.bf16.msra.mxu0 %v3046_v12 }
 0x13d   :  { %2256 = vmatprep.subr.bf16.mxu0 %v3051_v13 }
 0x140   :  { %2257 = vmatpush1.bf16.msra.mxu0 %v3049_v14 }
 0x143   :  { %2259 = vmatmul.mubr.bf16.vlgmr.msra.gmra.mrb[0].mxu0 %v432_v15 }
 0x1d5   :  { %v2055_v18 = vpop.f32.mrb[0].mxu1 }
 0x1d6   :  { %v2057_v19 = vpop.f32.mrb[1].mxu1  ;;  %v2585_v27 = vadd.f32 %v2055_v18, %v310_v25 }
 0x1d7   :  { %v2059_v20 = vpop.f32.mrb[2].mxu1  ;;  %v2587_v28 = vadd.f32 %v2057_v19, %v314_v26 }
 0x1d8   :  { %v2060_v21 = vpop.f32.mrb[3].mxu1 }
 0x216   :  { %v2260_v29 = vpop.f32.mrb[0].mxu0 }
 0x217   :  { %v2586_v30 = vadd.f32 %v2585_v27, %v2260_v29  ;;  %v2262_v31 = vpop.f32.mrb[1].mxu0 }
 0x218   :  { %v2588_v32 = vadd.f32 %v2587_v28, %v2262_v31  ;;  %v2264_v33 = vpop.f32.mrb[2].mxu0 }
 0x219   :  { %v2267_v34 = vmax.f32 %v2586_v30, 0.0  ;;  %v2265_v16 = vpop.f32.mrb[3].mxu0 }
 0x21a   :  { %v2268_v36 = vmax.f32 %v2588_v32, 0.0 }
 0x21c   :  { %v2583_v37 = vpack.c.bf16 %v2268_v36, %v2267_v34 }
 0x21e   :  { %v2280_v40 = vrot.slane %v2583_v37, %v3208_v49 }
 0x220   :  { %2584 = vst.sshfl [vmem:[%s4032_s3] sm:$0x5 pattern:$0x73625140] %v2280_v40 }

// kernel: unet_forward.48
= control target key start
LH: loop header
LB: loop body
LE: loop exit
PB: predicated region body
PF: predicated region fallthrough
CT: control target
= control target key end

     0   :  { %v84_v38 = vlaneseq  ;;  %v767_v39 = vmov 1966171168   ;;  %s1012_s1 = inlined_call_operand.vmem [shape: bf16[256,512], index: 1, kind: input, shape index: {}]   ;;  %s1013_s0 = inlined_call_operand.vmem [shape: bf16[2,256], index: 0, kind: input, shape index: {}]   ;;  %s1014_s3 = inlined_call_operand.vmem [shape: bf16[2,512], index: 3, kind: input, shape index: {}]   ;;  %s1015_s2 = inlined_call_operand.vmem [shape: f32[1,512], index: 2, kind: input, shape index: {}]   ;;  %s1016_s4 = inlined_call_operand.vmem [shape: bf16[2,512], index: 4, kind: output, shape index: {}]  }
   0x1   :  { %v671_v0 = vld [vmem:[%s1012_s1 + $0x4] ss:$16 sps:$4 sm:$0xff]   ;;  %v673_v1 = vld [vmem:[%s1012_s1 + $0xc] ss:$16 sps:$4 sm:$0xff]   ;;  %v675_v2 = vld [vmem:[%s1012_s1] ss:$16 sps:$4 sm:$0xff]   ;;  %v114_v40 = vunpack.c.l.s4 %v767_v39 }
   0x2   :  { %449 = vmatprep.subr.bf16.mxu0 %v671_v0  ;;  %v676_v3 = vld [vmem:[%s1012_s1 + $0x8] ss:$16 sps:$4 sm:$0xff]   ;;  %490 = vmatprep.subr.bf16.mxu1 %v673_v1  ;;  %v677_v4 = vld [vmem:[%s1012_s1 + $0x24] ss:$16 sps:$4 sm:$0xff]   ;;  %v679_v5 = vld [vmem:[%s1012_s1 + $0x2c] ss:$16 sps:$4 sm:$0xff]  }
   0x3   :  { %450 = vmatpush1.bf16.msra.mxu0 %v675_v2  ;;  %491 = vmatpush1.bf16.msra.mxu1 %v676_v3  ;;  %v681_v6 = vld [vmem:[%s1012_s1 + $0x20] ss:$16 sps:$4 sm:$0xff]   ;;  %v682_v7 = vld [vmem:[%s1012_s1 + $0x28] ss:$16 sps:$4 sm:$0xff]   ;;  %v683_v8 = vld [vmem:[%s1012_s1 + $0x44] ss:$16 sps:$4 sm:$0xff]   ;;  %v115_v46 = vunpack.c.0.s8 %v114_v40 }
   0x4   :  { %451 = vmatprep.subr.bf16.mxu0 %v677_v4  ;;  %492 = vmatprep.subr.bf16.mxu1 %v679_v5  ;;  %v685_v9 = vld [vmem:[%s1012_s1 + $0x4c] ss:$16 sps:$4 sm:$0xff]   ;;  %v687_v10 = vld [vmem:[%s1012_s1 + $0x40] ss:$16 sps:$4 sm:$0xff]   ;;  %v688_v11 = vld [vmem:[%s1012_s1 + $0x48] ss:$16 sps:$4 sm:$0xff]  }
   0x5   :  { %v689_v12 = vld [vmem:[%s1012_s1 + $0x64] ss:$16 sps:$4 sm:$0xff]   ;;  %v691_v13 = vld [vmem:[%s1012_s1 + $0x6c] ss:$16 sps:$4 sm:$0xff]   ;;  %v693_v14 = vld [vmem:[%s1012_s1 + $0x60] ss:$16 sps:$4 sm:$0xff]  }
   0x6   :  { %v694_v15 = vld [vmem:[%s1012_s1 + $0x68] ss:$16 sps:$4 sm:$0xff]   ;;  %v695_v16 = vld [vmem:[%s1012_s1 + $0x84] ss:$16 sps:$4 sm:$0xff]   ;;  %v697_v17 = vld [vmem:[%s1012_s1 + $0x8c] ss:$16 sps:$4 sm:$0xff]  }
   0x7   :  { %452 = vmatpush1.bf16.msra.mxu0 %v681_v6  ;;  %493 = vmatpush1.bf16.msra.mxu1 %v682_v7  ;;  %v699_v18 = vld [vmem:[%s1012_s1 + $0x80] ss:$16 sps:$4 sm:$0xff]   ;;  %v700_v19 = vld [vmem:[%s1012_s1 + $0x88] ss:$16 sps:$4 sm:$0xff]   ;;  %v701_v20 = vld [vmem:[%s1012_s1 + $0xa4] ss:$16 sps:$4 sm:$0xff]  }
   0x8   :  { %453 = vmatprep.subr.bf16.mxu0 %v683_v8  ;;  %494 = vmatprep.subr.bf16.mxu1 %v685_v9  ;;  %v703_v21 = vld [vmem:[%s1012_s1 + $0xac] ss:$16 sps:$4 sm:$0xff]   ;;  %v705_v22 = vld [vmem:[%s1012_s1 + $0xa0] ss:$16 sps:$4 sm:$0xff]   ;;  %v706_v23 = vld [vmem:[%s1012_s1 + $0xa8] ss:$16 sps:$4 sm:$0xff]  }
   0x9   :  { %v707_v24 = vld [vmem:[%s1012_s1 + $0xc4] ss:$16 sps:$4 sm:$0xff]   ;;  %v709_v25 = vld [vmem:[%s1012_s1 + $0xcc] ss:$16 sps:$4 sm:$0xff]   ;;  %v711_v26 = vld [vmem:[%s1012_s1 + $0xc0] ss:$16 sps:$4 sm:$0xff]  }
   0xa   :  { %v712_v27 = vld [vmem:[%s1012_s1 + $0xc8] ss:$16 sps:$4 sm:$0xff]   ;;  %v713_v28 = vld [vmem:[%s1012_s1 + $0xe4] ss:$16 sps:$4 sm:$0xff]   ;;  %v715_v29 = vld [vmem:[%s1012_s1 + $0xec] ss:$16 sps:$4 sm:$0xff]  }
   0xb   :  { %454 = vmatpush1.bf16.msra.mxu0 %v687_v10  ;;  %495 = vmatpush1.bf16.msra.mxu1 %v688_v11  ;;  %v717_v30 = vld [vmem:[%s1012_s1 + $0xe0] ss:$16 sps:$4 sm:$0xff]   ;;  %v718_v31 = vld [vmem:[%s1012_s1 + $0xe8] ss:$16 sps:$4 sm:$0xff]   ;;  %v719_v32 = vld [vmem:[%s1012_s1 + $0x104] ss:$16 sps:$4 sm:$0xff]  }
   0xc   :  { %455 = vmatprep.subr.bf16.mxu0 %v689_v12  ;;  %496 = vmatprep.subr.bf16.mxu1 %v691_v13  ;;  %v721_v33 = vld [vmem:[%s1012_s1 + $0x10c] ss:$16 sps:$4 sm:$0xff]   ;;  %v723_v34 = vld [vmem:[%s1012_s1 + $0x100] ss:$16 sps:$4 sm:$0xff]   ;;  %v724_v35 = vld [vmem:[%s1012_s1 + $0x108] ss:$16 sps:$4 sm:$0xff]  }
   0xd   :  { %v725_v36 = vld [vmem:[%s1012_s1 + $0x124] ss:$16 sps:$4 sm:$0xff]   ;;  %v727_v37 = vld [vmem:[%s1012_s1 + $0x12c] ss:$16 sps:$4 sm:$0xff]   ;;  %v729_v41 = vld [vmem:[%s1012_s1 + $0x120] ss:$16 sps:$4 sm:$0xff]  }
   0xe   :  { %v730_v42 = vld [vmem:[%s1012_s1 + $0x128] ss:$16 sps:$4 sm:$0xff]   ;;  %v731_v43 = vld [vmem:[%s1012_s1 + $0x144] ss:$16 sps:$4 sm:$0xff]   ;;  %v733_v44 = vld [vmem:[%s1012_s1 + $0x14c] ss:$16 sps:$4 sm:$0xff]  }
   0xf   :  { %456 = vmatpush1.bf16.msra.mxu0 %v693_v14  ;;  %497 = vmatpush1.bf16.msra.mxu1 %v694_v15  ;;  %v920_v45 = vshrl.u32 %v84_v38, 7  ;;  %v735_v47 = vld [vmem:[%s1012_s1 + $0x140] ss:$16 sps:$4 sm:$0xff]   ;;  %v736_v48 = vld [vmem:[%s1012_s1 + $0x148] ss:$16 sps:$4 sm:$0xff]  }
  0x10   :  { %457 = vmatprep.subr.bf16.mxu0 %v695_v16  ;;  %498 = vmatprep.subr.bf16.mxu1 %v697_v17  ;;  %v737_v49 = vld [vmem:[%s1012_s1 + $0x164] ss:$16 sps:$4 sm:$0xff]   ;;  %v739_v50 = vld [vmem:[%s1012_s1 + $0x16c] ss:$16 sps:$4 sm:$0xff]   ;;  %v741_v53 = vld [vmem:[%s1012_s1 + $0x160] ss:$16 sps:$4 sm:$0xff]  }
  0x11   :  { %v935_v51 = vsub.s32 %v115_v46, %v920_v45  ;;  %v601_v52 = vld.sshfl [vmem:[%s1013_s0] sm:$0x11 pattern:$0x75316420]  ;;  %v742_v54 = vld [vmem:[%s1012_s1 + $0x168] ss:$16 sps:$4 sm:$0xff]  }
  0x12   :  { %v112_v55 = vcombine.high %v601_v52, %v601_v52  ;;  %v743_v56 = vld [vmem:[%s1012_s1 + $0x184] ss:$16 sps:$4 sm:$0xff]   ;;  %v745_v57 = vld [vmem:[%s1012_s1 + $0x18c] ss:$16 sps:$4 sm:$0xff]   ;;  %v747_v59 = vld [vmem:[%s1012_s1 + $0x180] ss:$16 sps:$4 sm:$0xff]  }
  0x13   :  { %458 = vmatpush1.bf16.msra.mxu0 %v699_v18  ;;  %499 = vmatpush1.bf16.msra.mxu1 %v700_v19  ;;  %v748_v60 = vld [vmem:[%s1012_s1 + $0x188] ss:$16 sps:$4 sm:$0xff]   ;;  %v749_v61 = vld [vmem:[%s1012_s1 + $0x1a4] ss:$16 sps:$4 sm:$0xff]   ;;  %v751_v62 = vld [vmem:[%s1012_s1 + $0x1ac] ss:$16 sps:$4 sm:$0xff]   ;;  %v119_v9 = vrot.slane %v601_v52, %v935_v51 }
  0x14   :  { %459 = vmatprep.subr.bf16.mxu0 %v701_v20  ;;  %500 = vmatprep.subr.bf16.mxu1 %v703_v21  ;;  %v126_v58 = vrot.slane %v112_v55, %v935_v51  ;;  %v753_v63 = vld [vmem:[%s1012_s1 + $0x1a0] ss:$16 sps:$4 sm:$0xff]   ;;  %v754_v0 = vld [vmem:[%s1012_s1 + $0x1a8] ss:$16 sps:$4 sm:$0xff]   ;;  %v755_v1 = vld [vmem:[%s1012_s1 + $0x1c4] ss:$16 sps:$4 sm:$0xff]  }
  0x15   :  { %v757_v2 = vld [vmem:[%s1012_s1 + $0x1cc] ss:$16 sps:$4 sm:$0xff]   ;;  %v759_v3 = vld [vmem:[%s1012_s1 + $0x1c0] ss:$16 sps:$4 sm:$0xff]   ;;  %v760_v4 = vld [vmem:[%s1012_s1 + $0x1c8] ss:$16 sps:$4 sm:$0xff]  }
  0x16   :  { %481 = vmatprep.mubr.bf16.mxu0 %v126_v58  ;;  %522 = vmatprep.mubr.bf16.mxu1 %v126_v58  ;;  %v761_v5 = vld [vmem:[%s1012_s1 + $0x1e4] ss:$16 sps:$4 sm:$0xff]   ;;  %v763_v6 = vld [vmem:[%s1012_s1 + $0x1ec] ss:$16 sps:$4 sm:$0xff]   ;;  %v765_v7 = vld [vmem:[%s1012_s1 + $0x1e0] ss:$16 sps:$4 sm:$0xff]  }
  0x17   :  { %460 = vmatpush1.bf16.msra.mxu0 %v705_v22  ;;  %501 = vmatpush1.bf16.msra.mxu1 %v706_v23  ;;  %v766_v8 = vld [vmem:[%s1012_s1 + $0x1e8] ss:$16 sps:$4 sm:$0xff]   ;;  %v768_v10 = vmov 1983009808   ;;  %v535_v12 = vld [vmem:[%s1014_s3] sm:$0xf] }
  0x18   :  { %461 = vmatprep.subr.bf16.mxu0 %v707_v24  ;;  %502 = vmatprep.subr.bf16.mxu1 %v709_v25  ;;  %v540_v11 = vunpack.c.l.s4 %v768_v10  ;;  %v536_v13 = vunpack.c.l.bf16 %v535_v12  ;;  %v86_v15 = vsub.s32 0, %v920_v45  ;;  %v94_v16 = vsub.s32 2, %v920_v45  ;;  %v82_v17 = vld [vmem:[%s1015_s2] sm:$0xf] }
  0x19   :  { %v90_v20 = vsub.s32 1, %v920_v45  ;;  %v98_v21 = vsub.s32 3, %v920_v45 }
  0x1a   :  { %v541_v14 = vunpack.c.0.s8 %v540_v11  ;;  %v538_v19 = vcombine.high %v536_v13, %v536_v13  ;;  %v87_v22 = vrot.slane %v82_v17, %v86_v15  ;;  %v95_v23 = vrot.slane %v82_v17, %v94_v16 }
  0x1b   :  { %462 = vmatpush1.bf16.msra.mxu0 %v711_v26  ;;  %503 = vmatpush1.bf16.msra.mxu1 %v712_v27  ;;  %v91_v26 = vrot.slane %v82_v17, %v90_v20  ;;  %v99_v27 = vrot.slane %v82_v17, %v98_v21 }
  0x1c   :  { %463 = vmatprep.subr.bf16.mxu0 %v713_v28  ;;  %504 = vmatprep.subr.bf16.mxu1 %v715_v29  ;;  %v544_v18 = vsub.s32 %v541_v14, %v920_v45 }
  0x1e   :  { %v545_v24 = vrot.slane %v536_v13, %v544_v18  ;;  %v552_v25 = vrot.slane %v538_v19, %v544_v18 }
  0x1f   :  { %464 = vmatpush1.bf16.msra.mxu0 %v717_v30  ;;  %505 = vmatpush1.bf16.msra.mxu1 %v718_v31 }
  0x20   :  { %465 = vmatprep.subr.bf16.mxu0 %v719_v32  ;;  %506 = vmatprep.subr.bf16.mxu1 %v721_v33 }
  0x23   :  { %466 = vmatpush1.bf16.msra.mxu0 %v723_v34  ;;  %507 = vmatpush1.bf16.msra.mxu1 %v724_v35  ;;  %v553_v35 = vcombine.high %v545_v24, %v545_v24 }
  0x24   :  { %467 = vmatprep.subr.bf16.mxu0 %v725_v36  ;;  %508 = vmatprep.subr.bf16.mxu1 %v727_v37  ;;  %v554_v37 = vcombine.high %v552_v25, %v552_v25 }
  0x27   :  { %468 = vmatpush1.bf16.msra.mxu0 %v729_v41  ;;  %509 = vmatpush1.bf16.msra.mxu1 %v730_v42 }
  0x28   :  { %469 = vmatprep.subr.bf16.mxu0 %v731_v43  ;;  %510 = vmatprep.subr.bf16.mxu1 %v733_v44 }
  0x2b   :  { %470 = vmatpush1.bf16.msra.mxu0 %v735_v47  ;;  %511 = vmatpush1.bf16.msra.mxu1 %v736_v48 }
  0x2c   :  { %471 = vmatprep.subr.bf16.mxu0 %v737_v49  ;;  %512 = vmatprep.subr.bf16.mxu1 %v739_v50 }
  0x2f   :  { %472 = vmatpush1.bf16.msra.mxu0 %v741_v53  ;;  %513 = vmatpush1.bf16.msra.mxu1 %v742_v54 }
  0x30   :  { %473 = vmatprep.subr.bf16.mxu0 %v743_v56  ;;  %514 = vmatprep.subr.bf16.mxu1 %v745_v57 }
  0x33   :  { %474 = vmatpush1.bf16.msra.mxu0 %v747_v59  ;;  %515 = vmatpush1.bf16.msra.mxu1 %v748_v60 }
  0x34   :  { %475 = vmatprep.subr.bf16.mxu0 %v749_v61  ;;  %516 = vmatprep.subr.bf16.mxu1 %v751_v62 }
  0x37   :  { %476 = vmatpush1.bf16.msra.mxu0 %v753_v63  ;;  %517 = vmatpush1.bf16.msra.mxu1 %v754_v0 }
  0x38   :  { %477 = vmatprep.subr.bf16.mxu0 %v755_v1  ;;  %518 = vmatprep.subr.bf16.mxu1 %v757_v2 }
  0x3b   :  { %478 = vmatpush1.bf16.msra.mxu0 %v759_v3  ;;  %519 = vmatpush1.bf16.msra.mxu1 %v760_v4 }
  0x3c   :  { %479 = vmatprep.subr.bf16.mxu0 %v761_v5  ;;  %520 = vmatprep.subr.bf16.mxu1 %v763_v6 }
  0x3f   :  { %480 = vmatpush1.bf16.msra.mxu0 %v765_v7  ;;  %521 = vmatpush1.bf16.msra.mxu1 %v766_v8 }
  0x42   :  { %482 = vmatmul.mubr.bf16.vlgmr.msra.gmra.mrb[0].mxu0 %v119_v9  ;;  %523 = vmatmul.mubr.bf16.vlgmr.msra.gmra.mrb[0].mxu1 %v119_v9 }
 0x115   :  { %v483_v28 = vpop.f32.mrb[0].mxu0  ;;  %v524_v29 = vpop.f32.mrb[0].mxu1 }
 0x116   :  { %v484_v30 = vadd.f32 %v483_v28, %v87_v22  ;;  %v525_v31 = vadd.f32 %v524_v29, %v95_v23  ;;  %v485_v32 = vpop.f32.mrb[1].mxu0  ;;  %v526_v33 = vpop.f32.mrb[1].mxu1 }
 0x117   :  { %v486_v34 = vadd.f32 %v485_v32, %v91_v26  ;;  %v527_v36 = vadd.f32 %v526_v33, %v99_v27  ;;  %v487_v38 = vpop.f32.mrb[2].mxu0  ;;  %v528_v39 = vpop.f32.mrb[2].mxu1 }
 0x118   :  { %v531_v40 = vmax.f32 %v484_v30, 0.0  ;;  %v533_v41 = vmax.f32 %v525_v31, 0.0  ;;  %v488_v42 = vpop.f32.mrb[3].mxu0  ;;  %v529_v43 = vpop.f32.mrb[3].mxu1 }
 0x119   :  { %v532_v44 = vmax.f32 %v486_v34, 0.0  ;;  %v534_v45 = vmax.f32 %v527_v36, 0.0 }
 0x11a   :  { %v559_v46 = vadd.f32 %v545_v24, %v531_v40  ;;  %v561_v47 = vadd.f32 %v552_v25, %v533_v41 }
 0x11b   :  { %v560_v48 = vadd.f32 %v553_v35, %v532_v44  ;;  %v562_v49 = vadd.f32 %v554_v37, %v534_v45 }
 0x11d   :  { %v666_v50 = vpack.c.bf16 %v560_v48, %v559_v46  ;;  %v667_v52 = vpack.c.bf16 %v562_v49, %v561_v47 }
 0x11f   :  { %v579_v53 = vrot.slane %v666_v50, %v935_v51  ;;  %v586_v54 = vrot.slane %v667_v52, %v935_v51 }
 0x121   :  { %v587_v55 = vcombine.low %v579_v53, %v586_v54 }
 0x123   :  { %668 = vst.sshfl [vmem:[%s1016_s4] sm:$0x55 pattern:$0x73625140] %v587_v55 }

// kernel: tile.28
= control target key start
LH: loop header
LB: loop body
LE: loop exit
PB: predicated region body
PF: predicated region fallthrough
CT: control target
= control target key end

     0   :  { %s22_s0 = inlined_call_operand.vmem [shape: f32[64], index: 0, kind: input, shape index: {}]   ;;  %s23_s1 = inlined_call_operand.vmem [shape: f32[4,64], index: 1, kind: output, shape index: {}]  }
   0x1   :  { %v4_v0 = vld [vmem:[%s22_s0] ss:$0 sm:$0xff] }
   0x2   :  { %5 = vst [vmem:[%s23_s1] sm:$0xf] %v4_v0 }

// kernel: tile.29
= control target key start
LH: loop header
LB: loop body
LE: loop exit
PB: predicated region body
PF: predicated region fallthrough
CT: control target
= control target key end

     0   :  { %s6_s8 = smov 3  ;;  %vm8_vm0 = vcmask 523264   ;;  %s30_s9 = smov 64   ;;  %vm15_vm1 = vcmask 1048064   ;;  %s50_s0 = inlined_call_operand.vmem [shape: f32[4,64], index: 0, kind: input, shape index: {}]   ;;  %s51_s1 = inlined_call_operand.vmem [shape: f32[1,256], index: 1, kind: output, shape index: {}]  }
   0x1   :  { %v4_v0 = vld [vmem:[%s50_s0] sm:$0xf]  ;;  %s11_s0 = smov 3 }
   0x2   :  { %5 = vst [vmem:[#allocation1] sm:$0xf] %v4_v0 }
   0x9   :  { %v12_v1 = vld [vmem:[#allocation1 + $0x1] ss:$2 sm:%s11_s0]   ;;  %v7_v2 = vld [vmem:[#allocation1] ss:$2 sm:%s6_s8]  }
   0xa   :  { %13 = vrot.lane.b32.xlu0 %v12_v1, %s30_s9  ;;  %9 = vst.msk [vmem:[#allocation0] ss:$8 sm:$0x3] %vm8_vm0, %v7_v2  }
  0x7c   :  { %v14_v3 = vpop.permute.xlu0 %13  }
  0x7d   :  { %16 = vst.msk [vmem:[#allocation0] ss:$8 sm:$0x3] %vm15_vm1, %v14_v3  }
  0x84   :  { %v20_v4 = vld [vmem:[#allocation0] sm:$0x1]  ;;  %v24_v5 = vld [vmem:[#allocation0 + $0x8] sm:$0x1] }
  0x85   :  { %22 = vst [vmem:[%s51_s1] sm:$0x1] %v20_v4  ;;  %28 = vst [vmem:[%s51_s1 + $0x1] sm:$0x1] %v24_v5 }

// kernel: tile.33
= control target key start
LH: loop header
LB: loop body
LE: loop exit
PB: predicated region body
PF: predicated region fallthrough
CT: control target
= control target key end

     0   :  { %s22_s0 = inlined_call_operand.vmem [shape: f32[32], index: 0, kind: input, shape index: {}]   ;;  %s23_s1 = inlined_call_operand.vmem [shape: f32[4,32], index: 1, kind: output, shape index: {}]  }
   0x1   :  { %v4_v0 = vld [vmem:[%s22_s0] ss:$0 sm:$0xff] }
   0x2   :  { %5 = vst [vmem:[%s23_s1] sm:$0xf] %v4_v0 }

// kernel: tile.34
= control target key start
LH: loop header
LB: loop body
LE: loop exit
PB: predicated region body
PF: predicated region fallthrough
CT: control target
= control target key end

     0   :  { %vm7_vm0 = vcmask 261120   ;;  %s37_s8 = smov 32   ;;  %s38_s9 = smov 64   ;;  %vm13_vm1 = vcmask 1048320   ;;  %vm19_vm2 = vcmask 785920   ;;  %vm25_vm3 = vcmask 523520   ;;  %s55_s0 = inlined_call_operand.vmem [shape: f32[4,32], index: 0, kind: input, shape index: {}]   ;;  %s56_s1 = inlined_call_operand.vmem [shape: f32[1,128], index: 1, kind: output, shape index: {}]  }
   0x1   :  { %v4_v0 = vld [vmem:[%s55_s0] sm:$0xf]  ;;  %s36_s0 = smov 96  }
   0x2   :  { %5 = vst [vmem:[#allocation1] sm:$0xf] %v4_v0 }
   0x9   :  { %v10_v1 = vld [vmem:[#allocation1 + $0x3] sm:$0x1]   ;;  %v22_v2 = vld [vmem:[#allocation1 + $0x1] sm:$0x1]   ;;  %v6_v3 = vld [vmem:[#allocation1] sm:$0x1]  }
   0xa   :  { %11 = vrot.lane.b32.xlu0 %v10_v1, %s36_s0  ;;  %23 = vrot.lane.b32.xlu1 %v22_v2, %s37_s8  ;;  %v16_v4 = vld [vmem:[#allocation1 + $0x2] sm:$0x1]   ;;  %8 = vst.msk [vmem:[#allocation0] sm:$0x1] %vm7_vm0, %v6_v3  }
   0xe   :  { %17 = vrot.lane.b32.xlu0 %v16_v4, %s38_s9 }
  0x7c   :  { %v12_v5 = vpop.permute.xlu0 %11   ;;  %v24_v6 = vpop.permute.xlu1 %23  }
  0x7d   :  { %14 = vst.msk [vmem:[#allocation0] sm:$0x1] %vm13_vm1, %v12_v5  }
  0x80   :  { %v18_v7 = vpop.permute.xlu0 %17  }
  0x81   :  { %20 = vst.msk [vmem:[#allocation0] sm:$0x1] %vm19_vm2, %v18_v7  }
  0x82   :  { %26 = vst.msk [vmem:[#allocation0] sm:$0x1] %vm25_vm3, %v24_v6  }
  0x89   :  { %v30_v8 = vld [vmem:[#allocation0] sm:$0x1] }
  0x8a   :  { %32 = vst [vmem:[%s56_s1] sm:$0x1] %v30_v8 }

// kernel: unet_forward.52
= control target key start
LH: loop header
LB: loop body
LE: loop exit
PB: predicated region body
PF: predicated region fallthrough
CT: control target
= control target key end

     0   :  { %v231_v1 = vmov 0   ;;  %v37_v18 = vlaneseq  ;;  %s317_s1 = inlined_call_operand.vmem [shape: bf16[128,256], index: 1, kind: input, shape index: {}]   ;;  %s318_s0 = inlined_call_operand.vmem [shape: bf16[8,128], index: 0, kind: input, shape index: {}]   ;;  %s319_s2 = inlined_call_operand.vmem [shape: f32[1,256], index: 2, kind: input, shape index: {}]   ;;  %s320_s3 = inlined_call_operand.vmem [shape: bf16[8,256], index: 3, kind: input, shape index: {}]   ;;  %s321_s4 = inlined_call_operand.vmem [shape: bf16[8,256], index: 4, kind: output, shape index: {}]  }
   0x1   :  { %v207_v0 = vld [vmem:[%s317_s1 + $0x4] ss:$8 sps:$4 sm:$0xff]   ;;  %159 = vmatprep.mubr.bf16.mxu0 %v231_v1  ;;  %v209_v2 = vld [vmem:[%s317_s1] ss:$8 sps:$4 sm:$0xff]   ;;  %v210_v3 = vld [vmem:[%s317_s1 + $0x14] ss:$8 sps:$4 sm:$0xff]  }
   0x2   :  { %127 = vmatprep.subr.bf16.mxu0 %v207_v0  ;;  %v212_v4 = vld [vmem:[%s317_s1 + $0x10] ss:$8 sps:$4 sm:$0xff]   ;;  %v213_v5 = vld [vmem:[%s317_s1 + $0x24] ss:$8 sps:$4 sm:$0xff]   ;;  %v215_v6 = vld [vmem:[%s317_s1 + $0x20] ss:$8 sps:$4 sm:$0xff]  }
   0x3   :  { %128 = vmatpush1.bf16.msra.mxu0 %v209_v2  ;;  %v216_v7 = vld [vmem:[%s317_s1 + $0x34] ss:$8 sps:$4 sm:$0xff]   ;;  %v218_v8 = vld [vmem:[%s317_s1 + $0x30] ss:$8 sps:$4 sm:$0xff]   ;;  %v219_v9 = vld [vmem:[%s317_s1 + $0x44] ss:$8 sps:$4 sm:$0xff]  }
   0x4   :  { %129 = vmatprep.subr.bf16.mxu0 %v210_v3  ;;  %v221_v10 = vld [vmem:[%s317_s1 + $0x40] ss:$8 sps:$4 sm:$0xff]   ;;  %v222_v11 = vld [vmem:[%s317_s1 + $0x54] ss:$8 sps:$4 sm:$0xff]   ;;  %v224_v12 = vld [vmem:[%s317_s1 + $0x50] ss:$8 sps:$4 sm:$0xff]  }
   0x5   :  { %v225_v13 = vld [vmem:[%s317_s1 + $0x64] ss:$8 sps:$4 sm:$0xff]   ;;  %v227_v14 = vld [vmem:[%s317_s1 + $0x60] ss:$8 sps:$4 sm:$0xff]   ;;  %v228_v15 = vld [vmem:[%s317_s1 + $0x74] ss:$8 sps:$4 sm:$0xff]  }
   0x6   :  { %v230_v16 = vld [vmem:[%s317_s1 + $0x70] ss:$8 sps:$4 sm:$0xff]   ;;  %v18_v17 = vld [vmem:[%s318_s0] sm:$0xf]  ;;  %v38_v19 = vshrl.u32 %v37_v18, 7 }
   0x7   :  { %130 = vmatpush1.bf16.msra.mxu0 %v212_v4  ;;  %v35_v21 = vld [vmem:[%s319_s2] sm:$0x3] }
   0x8   :  { %131 = vmatprep.subr.bf16.mxu0 %v213_v5  ;;  %v39_v20 = vsub.s32 0, %v38_v19  ;;  %v43_v22 = vsub.s32 1, %v38_v19  ;;  %v170_v24 = vld [vmem:[%s320_s3] sm:$0xff] }
   0x9   :  { %v171_v28 = vunpack.c.l.bf16 %v170_v24  ;;  %v172_v31 = vunpack.c.h.bf16 %v170_v24 }
   0xa   :  { %v40_v23 = vrot.slane %v35_v21, %v39_v20  ;;  %v44_v25 = vrot.slane %v35_v21, %v43_v22 }
   0xb   :  { %132 = vmatpush1.bf16.msra.mxu0 %v215_v6 }
   0xc   :  { %133 = vmatprep.subr.bf16.mxu0 %v216_v7 }
   0xf   :  { %134 = vmatpush1.bf16.msra.mxu0 %v218_v8 }
  0x10   :  { %135 = vmatprep.subr.bf16.mxu0 %v219_v9 }
  0x13   :  { %136 = vmatpush1.bf16.msra.mxu0 %v221_v10 }
  0x14   :  { %137 = vmatprep.subr.bf16.mxu0 %v222_v11 }
  0x17   :  { %138 = vmatpush1.bf16.msra.mxu0 %v224_v12 }
  0x18   :  { %139 = vmatprep.subr.bf16.mxu0 %v225_v13 }
  0x1b   :  { %140 = vmatpush1.bf16.msra.mxu0 %v227_v14 }
  0x1c   :  { %141 = vmatprep.subr.bf16.mxu0 %v228_v15 }
  0x1f   :  { %142 = vmatpush1.bf16.msra.mxu0 %v230_v16 }
  0x22   :  { %160 = vmatmul.mubr.bf16.vlgmr.msra.gmra.mrb[0].mxu0 %v18_v17 }
  0xf5   :  { %v161_v26 = vpop.f32.mrb[0].mxu0 }
  0xf6   :  { %v162_v27 = vadd.f32 %v161_v26, %v40_v23  ;;  %v163_v29 = vpop.f32.mrb[1].mxu0 }
  0xf7   :  { %v164_v30 = vadd.f32 %v163_v29, %v44_v25  ;;  %v165_v32 = vpop.f32.mrb[2].mxu0 }
  0xf8   :  { %v168_v33 = vmax.f32 %v162_v27, 0.0  ;;  %v166_v34 = vpop.f32.mrb[3].mxu0 }
  0xf9   :  { %v169_v35 = vmax.f32 %v164_v30, 0.0 }
  0xfa   :  { %v173_v36 = vadd.f32 %v171_v28, %v168_v33 }
  0xfb   :  { %v174_v37 = vadd.f32 %v172_v31, %v169_v35 }
  0xfd   :  { %v205_v38 = vpack.c.bf16 %v174_v37, %v173_v36 }
  0xff   :  { %183 = vst [vmem:[%s321_s4] sm:$0xff] %v205_v38 }

// kernel: unet_forward.56
= control target key start
LH: loop header
LB: loop body
LE: loop exit
PB: predicated region body
PF: predicated region fallthrough
CT: control target
= control target key end

     0   :  { %vm71_vm0 = vcmask 523264   ;;  %s286_s1 = inlined_call_operand.vmem [shape: bf16[64,128], index: 1, kind: input, shape index: {}]   ;;  %s287_s0 = inlined_call_operand.vmem [shape: bf16[32,64], index: 0, kind: input, shape index: {}]   ;;  %s288_s2 = inlined_call_operand.vmem [shape: f32[1,128], index: 2, kind: input, shape index: {}]   ;;  %s289_s3 = inlined_call_operand.vmem [shape: bf16[32,128], index: 3, kind: input, shape index: {}]   ;;  %s290_s4 = inlined_call_operand.vmem [shape: bf16[32,128], index: 4, kind: output, shape index: {}]  }
   0x1   :  { %v222_v0 = vld [vmem:[%s286_s1] sm:$0xff]   ;;  %v223_v1 = vld [vmem:[%s286_s1 + $0x8] sm:$0xff]   ;;  %v224_v2 = vld [vmem:[%s286_s1 + $0x10] sm:$0xff]  }
   0x2   :  { %210 = vmatprep.subr.bf16.mxu0 %v222_v0  ;;  %v226_v3 = vld [vmem:[%s287_s0] sm:$0xff]   ;;  %v225_v4 = vld [vmem:[%s286_s1 + $0x18] sm:$0xff]   ;;  %v227_v5 = vld [vmem:[%s287_s0 + $0x8] sm:$0xff]  }
   0x3   :  { %211 = vmatpush3.bf16.msra.mxu0 %v222_v0  ;;  %218 = vmatprep.mubr.msk.bf16.mxu0 %vm71_vm0, %v226_v3  ;;  %v167_v6 = vld [vmem:[%s288_s2] ss:$0 sm:$0xff]  ;;  %v202_v8 = vld [vmem:[%s289_s3 + $0x8] sm:$0xff]  }
   0x4   :  { %212 = vmatprep.subr.bf16.mxu0 %v223_v1  ;;  %v185_v11 = vld [vmem:[%s289_s3] sm:$0xff]   ;;  %v190_v15 = vunpack.c.l.bf16 %v202_v8  ;;  %v191_v17 = vunpack.c.h.bf16 %v202_v8 }
   0x5   :  { %v186_v20 = vunpack.c.l.bf16 %v185_v11  ;;  %v187_v22 = vunpack.c.h.bf16 %v185_v11 }
   0x7   :  { %213 = vmatpush3.bf16.msra.mxu0 %v223_v1 }
   0x8   :  { %214 = vmatprep.subr.bf16.mxu0 %v224_v2 }
   0xb   :  { %215 = vmatpush3.bf16.msra.mxu0 %v224_v2 }
   0xc   :  { %216 = vmatprep.subr.bf16.mxu0 %v225_v4 }
   0xf   :  { %217 = vmatpush3.bf16.msra.mxu0 %v225_v4 }
  0x12   :  { %219 = vmatmul.mubr.msk.bf16.vlgmr.msra.gmra.mrb[0].mxu0 %vm71_vm0, %v227_v5 }
  0xe5   :  { %v220_v7 = vpop.f32.mrb[0].mxu0 }
  0xe6   :  { %v121_v9 = vadd.f32 %v220_v7, %v167_v6  ;;  %v112_v10 = vpop.f32.mrb[1].mxu0 }
  0xe7   :  { %v113_v12 = vadd.f32 %v167_v6, %v112_v10  ;;  %v221_v13 = vpop.f32.mrb[2].mxu0 }
  0xe8   :  { %v129_v14 = vmax.f32 %v121_v9, 0.0  ;;  %v124_v16 = vadd.f32 %v221_v13, %v167_v6  ;;  %v115_v18 = vpop.f32.mrb[3].mxu0 }
  0xe9   :  { %v127_v19 = vmax.f32 %v113_v12, 0.0  ;;  %v116_v21 = vadd.f32 %v167_v6, %v115_v18 }
  0xea   :  { %v130_v23 = vmax.f32 %v124_v16, 0.0  ;;  %v141_v25 = vadd.f32 %v190_v15, %v129_v14 }
  0xeb   :  { %v128_v24 = vmax.f32 %v116_v21, 0.0  ;;  %v139_v27 = vadd.f32 %v186_v20, %v127_v19 }
  0xec   :  { %v142_v26 = vadd.f32 %v191_v17, %v130_v23 }
  0xed   :  { %v140_v28 = vadd.f32 %v187_v22, %v128_v24 }
  0xee   :  { %v200_v29 = vpack.c.bf16 %v142_v26, %v141_v25 }
  0xef   :  { %v195_v30 = vpack.c.bf16 %v140_v28, %v139_v27 }
  0xf0   :  { %203 = vst [vmem:[%s290_s4 + $0x8] sm:$0xff] %v200_v29  }
  0xf1   :  { %196 = vst [vmem:[%s290_s4] sm:$0xff] %v195_v30  }

// kernel: tile.38
= control target key start
LH: loop header
LB: loop body
LE: loop exit
PB: predicated region body
PF: predicated region fallthrough
CT: control target
= control target key end

     0   :  { %s22_s0 = inlined_call_operand.vmem [shape: f32[16], index: 0, kind: input, shape index: {}]   ;;  %s23_s1 = inlined_call_operand.vmem [shape: f32[4,16], index: 1, kind: output, shape index: {}]  }
   0x1   :  { %v4_v0 = vld [vmem:[%s22_s0] ss:$0 sm:$0xff] }
   0x2   :  { %5 = vst [vmem:[%s23_s1] sm:$0xf] %v4_v0 }

// kernel: tile.39
= control target key start
LH: loop header
LB: loop body
LE: loop exit
PB: predicated region body
PF: predicated region fallthrough
CT: control target
= control target key end

     0   :  { %vm7_vm0 = vcmask 130048   ;;  %s37_s8 = smov 16   ;;  %s38_s9 = smov 32   ;;  %vm13_vm1 = vcmask 523648   ;;  %vm19_vm2 = vcmask 392448   ;;  %vm25_vm3 = vcmask 261248   ;;  %s55_s0 = inlined_call_operand.vmem [shape: f32[4,16], index: 0, kind: input, shape index: {}]   ;;  %s56_s1 = inlined_call_operand.vmem [shape: f32[1,64], index: 1, kind: output, shape index: {}]  }
   0x1   :  { %v4_v0 = vld [vmem:[%s55_s0] sm:$0xf]  ;;  %s36_s0 = smov 48  }
   0x2   :  { %5 = vst [vmem:[#allocation1] sm:$0xf] %v4_v0 }
   0x9   :  { %v10_v1 = vld [vmem:[#allocation1 + $0x3] sm:$0x1]   ;;  %v22_v2 = vld [vmem:[#allocation1 + $0x1] sm:$0x1]   ;;  %v6_v3 = vld [vmem:[#allocation1] sm:$0x1]  }
   0xa   :  { %11 = vrot.lane.b32.xlu0 %v10_v1, %s36_s0  ;;  %23 = vrot.lane.b32.xlu1 %v22_v2, %s37_s8  ;;  %v16_v4 = vld [vmem:[#allocation1 + $0x2] sm:$0x1]   ;;  %8 = vst.msk [vmem:[#allocation0] sm:$0x1] %vm7_vm0, %v6_v3  }
   0xe   :  { %17 = vrot.lane.b32.xlu0 %v16_v4, %s38_s9 }
  0x7c   :  { %v12_v5 = vpop.permute.xlu0 %11   ;;  %v24_v6 = vpop.permute.xlu1 %23  }
  0x7d   :  { %14 = vst.msk [vmem:[#allocation0] sm:$0x1] %vm13_vm1, %v12_v5  }
  0x80   :  { %v18_v7 = vpop.permute.xlu0 %17  }
  0x81   :  { %20 = vst.msk [vmem:[#allocation0] sm:$0x1] %vm19_vm2, %v18_v7  }
  0x82   :  { %26 = vst.msk [vmem:[#allocation0] sm:$0x1] %vm25_vm3, %v24_v6  }
  0x89   :  { %v30_v8 = vld [vmem:[#allocation0] sm:$0x1] }
  0x8a   :  { %32 = vst [vmem:[%s56_s1] sm:$0x1] %v30_v8 }

// kernel: unet_forward.59
= control target key start
LH: loop header
LB: loop body
LE: loop exit
PB: predicated region body
PF: predicated region fallthrough
CT: control target
= control target key end

     0   :  { %vm97_vm0 = vcmask 261120   ;;  %vm347_vm1 = vcmask 519168   ;;  %s706_s1 = inlined_call_operand.vmem [shape: bf16[32,64], index: 1, kind: input, shape index: {}]   ;;  %s707_s0 = inlined_call_operand.vmem [shape: bf16[128,32], index: 0, kind: input, shape index: {}]   ;;  %s708_s3 = inlined_call_operand.vmem [shape: bf16[128,64], index: 3, kind: input, shape index: {}]   ;;  %s709_s2 = inlined_call_operand.vmem [shape: f32[1,64], index: 2, kind: input, shape index: {}]   ;;  %s710_s4 = inlined_call_operand.vmem [shape: bf16[128,64], index: 4, kind: output, shape index: {}]  }
   0x1   :  { %v492_v0 = vld [vmem:[%s706_s1] sm:$0xff]   ;;  %v493_v1 = vld [vmem:[%s706_s1 + $0x8] sm:$0xff]   ;;  %v498_v6 = vld [vmem:[%s707_s0 + $0x10] sm:$0xff]  }
   0x2   :  { %468 = vmatprep.subr.bf16.mxu0 %v492_v0  ;;  %488 = vmatprep.subr.bf16.mxu1 %v492_v0  ;;  %v494_v2 = vld [vmem:[%s707_s0] sm:$0xff]   ;;  %v496_v4 = vld [vmem:[%s707_s0 + $0x8] sm:$0xff]   ;;  %v499_v7 = vld [vmem:[%s707_s0 + $0x30] sm:$0xff]  }
   0x3   :  { %469 = vmatpush3.bf16.msra.mxu0 %v492_v0  ;;  %490 = vmatpush3.bf16.msra.mxu1 %v492_v0  ;;  %v495_v3 = vld [vmem:[%s707_s0 + $0x20] sm:$0xff]   ;;  %v497_v5 = vld [vmem:[%s707_s0 + $0x28] sm:$0xff]   ;;  %v500_v8 = vld [vmem:[%s707_s0 + $0x18] sm:$0xff]  }
   0x4   :  { %470 = vmatprep.subr.bf16.mxu0 %v493_v1  ;;  %489 = vmatprep.subr.bf16.mxu1 %v493_v1  ;;  %v501_v9 = vld [vmem:[%s707_s0 + $0x38] sm:$0xff]   ;;  %v451_v10 = vld [vmem:[%s708_s3 + $0x8] sm:$0xff]   ;;  %v420_v12 = vld [vmem:[%s708_s3] sm:$0xff]  }
   0x5   :  { %472 = vmatprep.mubr.msk.bf16.mxu0 %vm97_vm0, %v494_v2  ;;  %480 = vmatprep.mubr.msk.bf16.mxu1 %vm97_vm0, %v495_v3  ;;  %v455_v11 = vld [vmem:[%s708_s3 + $0x28] sm:$0xff]   ;;  %v454_v13 = vld [vmem:[%s708_s3 + $0x20] sm:$0xff]   ;;  %v580_v14 = vld [vmem:[%s708_s3 + $0x18] sm:$0xff]   ;;  %v425_v15 = vunpack.c.l.bf16 %v451_v10  ;;  %v421_v21 = vunpack.c.l.bf16 %v420_v12  ;;  %v426_v23 = vunpack.c.h.bf16 %v451_v10  ;;  %v422_v25 = vunpack.c.h.bf16 %v420_v12 }
   0x6   :  { %v585_v16 = vld [vmem:[%s708_s3 + $0x38] sm:$0xff]   ;;  %v590_v17 = vld [vmem:[%s708_s3 + $0x10] sm:$0xff]   ;;  %v600_v19 = vld [vmem:[%s709_s2] ss:$0 sm:$0xff]  ;;  %v441_v20 = vunpack.c.l.bf16 %v455_v11  ;;  %v437_v22 = vunpack.c.l.bf16 %v454_v13  ;;  %v442_v24 = vunpack.c.h.bf16 %v455_v11  ;;  %v438_v26 = vunpack.c.h.bf16 %v454_v13 }
   0x7   :  { %471 = vmatpush3.bf16.msra.mxu0 %v493_v1  ;;  %491 = vmatpush3.bf16.msra.mxu1 %v493_v1  ;;  %v595_v18 = vld [vmem:[%s708_s3 + $0x30] sm:$0xff]   ;;  %v433_v29 = vunpack.c.l.bf16 %v580_v14  ;;  %v449_v30 = vunpack.c.l.bf16 %v585_v16  ;;  %v429_v31 = vunpack.c.l.bf16 %v590_v17  ;;  %v434_v37 = vunpack.c.h.bf16 %v580_v14 }
   0x8   :  { %v445_v32 = vunpack.c.l.bf16 %v595_v18  ;;  %v450_v38 = vunpack.c.h.bf16 %v585_v16  ;;  %v430_v43 = vunpack.c.h.bf16 %v590_v17  ;;  %v446_v44 = vunpack.c.h.bf16 %v595_v18 }
   0xa   :  { %473 = vmatmul.mubr.msk.bf16.vlgmr.msra.gmra.mrb[0].mxu0 %vm97_vm0, %v496_v4  ;;  %481 = vmatmul.mubr.msk.bf16.vlgmr.msra.gmra.mrb[0].mxu1 %vm97_vm0, %v497_v5 }
   0xb   :  { %476 = vmatprep.mubr.msk.bf16.mxu0 %vm97_vm0, %v498_v6  ;;  %484 = vmatprep.mubr.msk.bf16.mxu1 %vm97_vm0, %v499_v7 }
  0x12   :  { %477 = vmatmul.mubr.msk.bf16.gmra.mrb[4].mxu0 %vm97_vm0, %v500_v8  ;;  %485 = vmatmul.mubr.msk.bf16.gmra.mrb[4].mxu1 %vm97_vm0, %v501_v9 }
  0xdd   :  { %v474_v27 = vpop.f32.mrb[0].mxu0  ;;  %v482_v28 = vpop.f32.mrb[0].mxu1 }
  0xde   :  { %v165_v33 = vadd.f32 %v474_v27, %v600_v19  ;;  %v197_v34 = vadd.f32 %v482_v28, %v600_v19  ;;  %v156_v35 = vpop.f32.mrb[1].mxu0  ;;  %v188_v36 = vpop.f32.mrb[1].mxu1 }
  0xdf   :  { %v157_v39 = vadd.f32 %v600_v19, %v156_v35  ;;  %v189_v40 = vadd.f32 %v600_v19, %v188_v36  ;;  %v475_v41 = vpop.f32.mrb[2].mxu0  ;;  %v483_v42 = vpop.f32.mrb[2].mxu1 }
  0xe0   :  { %v221_v45 = vmax.f32 %v165_v33, 0.0  ;;  %v229_v46 = vmax.f32 %v197_v34, 0.0  ;;  %v168_v47 = vadd.f32 %v475_v41, %v600_v19  ;;  %v200_v48 = vadd.f32 %v483_v42, %v600_v19  ;;  %v159_v49 = vpop.f32.mrb[3].mxu0  ;;  %v191_v50 = vpop.f32.mrb[3].mxu1 }
  0xe1   :  { %v219_v51 = vmax.f32 %v157_v39, 0.0  ;;  %v227_v52 = vmax.f32 %v189_v40, 0.0  ;;  %v160_v53 = vadd.f32 %v600_v19, %v159_v49  ;;  %v192_v54 = vadd.f32 %v600_v19, %v191_v50 }
  0xe2   :  { %v269_v55 = vadd.f32 %v425_v15, %v221_v45  ;;  %v277_v56 = vadd.f32 %v441_v20, %v229_v46  ;;  %v222_v57 = vmax.f32 %v168_v47, 0.0  ;;  %v230_v58 = vmax.f32 %v200_v48, 0.0 }
  0xe3   :  { %v267_v59 = vadd.f32 %v421_v21, %v219_v51  ;;  %v275_v60 = vadd.f32 %v437_v22, %v227_v52  ;;  %v220_v61 = vmax.f32 %v160_v53, 0.0  ;;  %v228_v62 = vmax.f32 %v192_v54, 0.0 }
  0xe4   :  { %v405_v63 = vpack.c.bf16 %v269_v55, %v269_v55  ;;  %v413_v0 = vpack.c.bf16 %v277_v56, %v277_v56  ;;  %v270_v1 = vadd.f32 %v426_v23, %v222_v57  ;;  %v278_v2 = vadd.f32 %v442_v24, %v230_v58 }
  0xe5   :  { %v403_v3 = vpack.c.bf16 %v267_v59, %v267_v59  ;;  %v411_v4 = vpack.c.bf16 %v275_v60, %v275_v60  ;;  %v268_v5 = vadd.f32 %v422_v25, %v220_v61  ;;  %v276_v6 = vadd.f32 %v438_v26, %v228_v62  ;;  %v478_v7 = vpop.f32.mrb[4].mxu0  ;;  %v486_v8 = vpop.f32.mrb[4].mxu1 }
  0xe6   :  { %350 = vst.msk [vmem:[%s710_s4 + $0x8] sm:$0xf] %vm347_vm1, %v405_v63  ;;  %358 = vst.msk [vmem:[%s710_s4 + $0x28] sm:$0xf] %vm347_vm1, %v413_v0  ;;  %v406_v9 = vpack.c.bf16 %v270_v1, %v270_v1  ;;  %v414_v10 = vpack.c.bf16 %v278_v2, %v278_v2  ;;  %v181_v11 = vadd.f32 %v478_v7, %v600_v19  ;;  %v172_v13 = vpop.f32.mrb[5].mxu0  ;;  %v204_v15 = vpop.f32.mrb[5].mxu1 }
  0xe7   :  { %v213_v12 = vadd.f32 %v486_v8, %v600_v19  ;;  %348 = vst.msk [vmem:[%s710_s4] sm:$0xf] %vm347_vm1, %v403_v3  ;;  %356 = vst.msk [vmem:[%s710_s4 + $0x20] sm:$0xf] %vm347_vm1, %v411_v4  ;;  %v404_v20 = vpack.c.bf16 %v268_v5, %v268_v5  ;;  %v412_v21 = vpack.c.bf16 %v276_v6, %v276_v6  ;;  %v479_v24 = vpop.f32.mrb[6].mxu0  ;;  %v487_v25 = vpop.f32.mrb[6].mxu1 }
  0xe8   :  { %v173_v22 = vadd.f32 %v600_v19, %v172_v13  ;;  %v205_v23 = vadd.f32 %v600_v19, %v204_v15  ;;  %351 = vst.msk [vmem:[%s710_s4 + $0xc] sm:$0xf] %vm347_vm1, %v406_v9  ;;  %359 = vst.msk [vmem:[%s710_s4 + $0x2c] sm:$0xf] %vm347_vm1, %v414_v10  ;;  %v225_v26 = vmax.f32 %v181_v11, 0.0  ;;  %v184_v28 = vadd.f32 %v479_v24, %v600_v19  ;;  %v175_v34 = vpop.f32.mrb[7].mxu0 }
  0xe9   :  { %v233_v27 = vmax.f32 %v213_v12, 0.0  ;;  %v216_v33 = vadd.f32 %v487_v25, %v600_v19  ;;  %v207_v35 = vpop.f32.mrb[7].mxu1  ;;  %349 = vst.msk [vmem:[%s710_s4 + $0x4] sm:$0xf] %vm347_vm1, %v404_v20  ;;  %357 = vst.msk [vmem:[%s710_s4 + $0x24] sm:$0xf] %vm347_vm1, %v412_v21  ;;  %v176_v40 = vadd.f32 %v600_v19, %v175_v34 }
  0xea   :  { %v223_v36 = vmax.f32 %v173_v22, 0.0  ;;  %v231_v39 = vmax.f32 %v205_v23, 0.0  ;;  %v208_v41 = vadd.f32 %v600_v19, %v207_v35  ;;  %v273_v42 = vadd.f32 %v433_v29, %v225_v26 }
  0xeb   :  { %v281_v45 = vadd.f32 %v449_v30, %v233_v27  ;;  %v226_v46 = vmax.f32 %v184_v28, 0.0  ;;  %v234_v47 = vmax.f32 %v216_v33, 0.0  ;;  %v224_v50 = vmax.f32 %v176_v40, 0.0 }
  0xec   :  { %v271_v48 = vadd.f32 %v429_v31, %v223_v36  ;;  %v279_v49 = vadd.f32 %v445_v32, %v231_v39  ;;  %v232_v51 = vmax.f32 %v208_v41, 0.0  ;;  %v409_v52 = vpack.c.bf16 %v273_v42, %v273_v42 }
  0xed   :  { %v417_v53 = vpack.c.bf16 %v281_v45, %v281_v45  ;;  %v274_v19 = vadd.f32 %v434_v37, %v226_v46  ;;  %v282_v29 = vadd.f32 %v450_v38, %v234_v47  ;;  %v272_v55 = vadd.f32 %v430_v43, %v224_v50 }
  0xee   :  { %v407_v54 = vpack.c.bf16 %v271_v48, %v271_v48  ;;  %v415_v30 = vpack.c.bf16 %v279_v49, %v279_v49  ;;  %v280_v31 = vadd.f32 %v446_v44, %v232_v51  ;;  %354 = vst.msk [vmem:[%s710_s4 + $0x18] sm:$0xf] %vm347_vm1, %v409_v52 }
  0xef   :  { %362 = vst.msk [vmem:[%s710_s4 + $0x38] sm:$0xf] %vm347_vm1, %v417_v53  ;;  %v410_v14 = vpack.c.bf16 %v274_v19, %v274_v19  ;;  %v418_v16 = vpack.c.bf16 %v282_v29, %v282_v29  ;;  %v408_v17 = vpack.c.bf16 %v272_v55, %v272_v55 }
  0xf0   :  { %352 = vst.msk [vmem:[%s710_s4 + $0x10] sm:$0xf] %vm347_vm1, %v407_v54  ;;  %360 = vst.msk [vmem:[%s710_s4 + $0x30] sm:$0xf] %vm347_vm1, %v415_v30  ;;  %v416_v18 = vpack.c.bf16 %v280_v31, %v280_v31 }
  0xf1   :  { %355 = vst.msk [vmem:[%s710_s4 + $0x1c] sm:$0xf] %vm347_vm1, %v410_v14  ;;  %363 = vst.msk [vmem:[%s710_s4 + $0x3c] sm:$0xf] %vm347_vm1, %v418_v16 }
  0xf2   :  { %353 = vst.msk [vmem:[%s710_s4 + $0x14] sm:$0xf] %vm347_vm1, %v408_v17  ;;  %361 = vst.msk [vmem:[%s710_s4 + $0x34] sm:$0xf] %vm347_vm1, %v416_v18 }

// kernel: unet_forward.60
= control target key start
LH: loop header
LB: loop body
LE: loop exit
PB: predicated region body
PF: predicated region fallthrough
CT: control target
= control target key end

     0   :  { %s1383_s15 = smov 0   ;;  %s1609_s0 = inlined_call_operand.vmem [shape: bf16[512,144], index: 0, kind: input, shape index: {}]   ;;  %s1610_s1 = inlined_call_operand.vmem [shape: bf16[144,16], index: 1, kind: input, shape index: {}]   ;;  %s1611_s2 = inlined_call_operand.vmem [shape: f32[1,16], index: 2, kind: input, shape index: {}]   ;;  %s1612_s3 = inlined_call_operand.vmem [shape: bf16[512,16], index: 3, kind: input, shape index: {}]   ;;  %s1613_s4 = inlined_call_operand.vmem [shape: bf16[512,16], index: 4, kind: output, shape index: {}]  }
   0x1 LB: > { %s1049_s16 = sadd.s32 4294967295, %s1355_s15   ;;  %p1053_p0 = scmp.ge.s32.totalorder %s1355_s15, 1  ;;  %s1355_s15 = sphi %s1383_s15, %s14_s15  }
   0x2   : > { %p175_p1 = scmp.lt.s32.totalorder %s1355_s15, 3 }
   0x4   : > { %p176_p2 = pnand %p1053_p0, %p175_p1 }
   0x5   : > { %v1292_v0 = vld [vmem:[%s1610_s1] sm:$0xff] (!%p176_p2)   ;;  %v1357_v1 = vmov (!%p176_p2), 0   ;;  %s1054_s19 = sshll.u32 (!%p176_p2), %s1049_s16, 5  ;;  %v1293_v2 = vld [vmem:[%s1610_s1 + $0x8] sm:$0xff] (!%p176_p2)   ;;  %v1294_v3 = vld [vmem:[%s1610_s1 + $0x10] sm:$0xff] (!%p176_p2)   ;;  %vm482_vm0 = vcmask (!%p176_p2), 130048  }
   0x6   : > { %179 = sbr.rel (%p176_p2) target bundleno = 321 (0x141), region = 36  ;;  %531 = vmatprep.subr.bf16.mxu0 (!%p176_p2), %v1357_v1  ;;  %1265 = vmatprep.subr.bf16.mxu1 (!%p176_p2), %v1357_v1  ;;  %p208_p3 = scmp.lt.s32.totalorder (!%p176_p2), %s1054_s19, 63  ;;  %v1295_v4 = vld [vmem:[%s1610_s1 + $0x18] sm:$0xff] (!%p176_p2)   ;;  %v1296_v7 = vld [vmem:[%s1610_s1 + $0x20] sm:$0xff] (!%p176_p2)   ;;  %v1297_v8 = vld [vmem:[%s1610_s1 + $0x28] sm:$0xff] (!%p176_p2)   ;;  %vm948_vm1 = vcmask (!%p176_p2), 125952  }
   0x7   : > { %532 = vmatpush1.bf16.msra.mxu0 (!%p176_p2), %v1292_v0  ;;  %1274 = vmatpush1.bf16.msra.mxu1 (!%p176_p2), %v1292_v0  ;;  %v1298_v9 = vld [vmem:[%s1610_s1 + $0x30] sm:$0xff] (!%p176_p2)   ;;  %v1299_v10 = vld [vmem:[%s1610_s1 + $0x38] sm:$0xff] (!%p176_p2)   ;;  %v1300_v11 = vld [vmem:[%s1610_s1 + $0x40] sm:$0xff] (!%p176_p2)  }
   0x8   : > { %533 = vmatprep.subr.bf16.mxu0 (!%p176_p2), %v1357_v1  ;;  %1266 = vmatprep.subr.bf16.mxu1 (!%p176_p2), %v1357_v1  ;;  %v1485_v42 = vld [vmem:[%s1611_s2] ss:$0 sm:$0xff] (!%p176_p2) }
   0xb   : > { %534 = vmatpush1.bf16.msra.mxu0 (!%p176_p2), %v1293_v2  ;;  %1275 = vmatpush1.bf16.msra.mxu1 (!%p176_p2), %v1293_v2 }
   0xc   : > { %535 = vmatprep.subr.bf16.mxu0 (!%p176_p2), %v1357_v1  ;;  %1267 = vmatprep.subr.bf16.mxu1 (!%p176_p2), %v1357_v1 }
   0xd   : > { %s1615_s19 = smov (!%p208_p3, %s1054_s19), 63 }
   0xe   : > { %s1153_s24 = sshll.u32 %s1615_s19, 3  ;;  %s1058_s14 = sshll.u32 %s1615_s19, 2 }
   0xf   : > { %s1406_s27 = scalar_lea.vmem %s1609_s0, %s1153_s24  ;;  %536 = vmatpush1.bf16.msra.mxu0 %v1294_v3  ;;  %1276 = vmatpush1.bf16.msra.mxu1 %v1294_v3  ;;  %s1480_s18 = scalar_lea.vmem %s1612_s3, %s1058_s14 }
  0x10   : > { %v1303_v5 = vld [vmem:[%s1406_s27 + $0x4] ss:$8 sps:$4 sm:$0xff]   ;;  %537 = vmatprep.subr.bf16.mxu0 %v1357_v1  ;;  %1268 = vmatprep.subr.bf16.mxu1 %v1357_v1  ;;  %v1301_v12 = vld [vmem:[%s1406_s27] ss:$8 sps:$4 sm:$0xff]   ;;  %v1307_v14 = vld [vmem:[%s1406_s27 + $0x14] ss:$8 sps:$4 sm:$0xff]   ;;  %s1500_s24 = scalar_lea.vmem %s1613_s4, %s1058_s14 }
  0x11   : > { %v1306_v6 = vld [vmem:[%s1406_s27 + $0x84] ss:$8 sps:$4 sm:$0xff]   ;;  %1103 = vmatprep.mubr.msk.bf16.mxu0 %vm482_vm0, %v1303_v5  ;;  %v1304_v13 = vld [vmem:[%s1406_s27 + $0x80] ss:$8 sps:$4 sm:$0xff]   ;;  %v1309_v15 = vld [vmem:[%s1406_s27 + $0x94] ss:$8 sps:$4 sm:$0xff]  }
  0x12   : > { %1111 = vmatprep.mubr.msk.bf16.mxu1 %vm482_vm0, %v1306_v6  ;;  %v1311_v16 = vld [vmem:[%s1406_s27 + $0x10] ss:$8 sps:$4 sm:$0xff]   ;;  %v1313_v18 = vld [vmem:[%s1406_s27 + $0x24] ss:$8 sps:$4 sm:$0xff]   ;;  %v1317_v20 = vld [vmem:[%s1406_s27 + $0x20] ss:$8 sps:$4 sm:$0xff]  }
  0x13   : > { %538 = vmatpush1.bf16.msra.mxu0 %v1295_v4  ;;  %1277 = vmatpush1.bf16.msra.mxu1 %v1295_v4  ;;  %v1312_v17 = vld [vmem:[%s1406_s27 + $0x90] ss:$8 sps:$4 sm:$0xff]   ;;  %v1315_v19 = vld [vmem:[%s1406_s27 + $0xa4] ss:$8 sps:$4 sm:$0xff]   ;;  %v1318_v21 = vld [vmem:[%s1406_s27 + $0xa0] ss:$8 sps:$4 sm:$0xff]  }
  0x14   : > { %539 = vmatprep.subr.bf16.mxu0 %v1357_v1  ;;  %1269 = vmatprep.subr.bf16.mxu1 %v1357_v1  ;;  %v1319_v22 = vld [vmem:[%s1406_s27 + $0x34] ss:$8 sps:$4 sm:$0xff]   ;;  %v1323_v24 = vld [vmem:[%s1406_s27 + $0x30] ss:$8 sps:$4 sm:$0xff]   ;;  %v1325_v26 = vld [vmem:[%s1406_s27 + $0x44] ss:$8 sps:$4 sm:$0xff]  }
  0x15   : > { %v1321_v23 = vld [vmem:[%s1406_s27 + $0xb4] ss:$8 sps:$4 sm:$0xff]   ;;  %v1324_v25 = vld [vmem:[%s1406_s27 + $0xb0] ss:$8 sps:$4 sm:$0xff]   ;;  %v1327_v27 = vld [vmem:[%s1406_s27 + $0xc4] ss:$8 sps:$4 sm:$0xff]  }
  0x16   : > { %v1329_v28 = vld [vmem:[%s1406_s27 + $0x40] ss:$8 sps:$4 sm:$0xff]   ;;  %v1331_v30 = vld [vmem:[%s1406_s27 + $0x54] ss:$8 sps:$4 sm:$0xff]   ;;  %v1335_v32 = vld [vmem:[%s1406_s27 + $0x50] ss:$8 sps:$4 sm:$0xff]  }
  0x17   : > { %540 = vmatpush1.bf16.msra.mxu0 %v1296_v7  ;;  %1278 = vmatpush1.bf16.msra.mxu1 %v1296_v7  ;;  %v1330_v29 = vld [vmem:[%s1406_s27 + $0xc0] ss:$8 sps:$4 sm:$0xff]   ;;  %v1333_v31 = vld [vmem:[%s1406_s27 + $0xd4] ss:$8 sps:$4 sm:$0xff]   ;;  %v1336_v33 = vld [vmem:[%s1406_s27 + $0xd0] ss:$8 sps:$4 sm:$0xff]  }
  0x18   : > { %541 = vmatprep.subr.bf16.mxu0 %v1357_v1  ;;  %1270 = vmatprep.subr.bf16.mxu1 %v1357_v1  ;;  %v1337_v34 = vld [vmem:[%s1406_s27 + $0x64] ss:$8 sps:$4 sm:$0xff]   ;;  %v1341_v36 = vld [vmem:[%s1406_s27 + $0x60] ss:$8 sps:$4 sm:$0xff]   ;;  %v1343_v38 = vld [vmem:[%s1406_s27 + $0x74] ss:$8 sps:$4 sm:$0xff]  }
  0x19   : > { %v1339_v35 = vld [vmem:[%s1406_s27 + $0xe4] ss:$8 sps:$4 sm:$0xff]   ;;  %v1342_v37 = vld [vmem:[%s1406_s27 + $0xe0] ss:$8 sps:$4 sm:$0xff]   ;;  %v1345_v39 = vld [vmem:[%s1406_s27 + $0xf4] ss:$8 sps:$4 sm:$0xff]  }
  0x1a   : > { %v1347_v40 = vld [vmem:[%s1406_s27 + $0x70] ss:$8 sps:$4 sm:$0xff]   ;;  %v1187_v43 = vld [vmem:[%s1480_s18] sm:$0xff]   ;;  %v1250_v3 = vld [vmem:[%s1480_s18 + $0x8] sm:$0xff]  }
  0x1b   : > { %542 = vmatpush1.bf16.msra.mxu0 %v1297_v8  ;;  %1279 = vmatpush1.bf16.msra.mxu1 %v1297_v8  ;;  %v1348_v41 = vld [vmem:[%s1406_s27 + $0xf0] ss:$8 sps:$4 sm:$0xff]   ;;  %v1257_v44 = vld [vmem:[%s1480_s18 + $0x40] sm:$0xff]   ;;  %v1188_v48 = vunpack.c.l.bf16 %v1187_v43  ;;  %v1189_v54 = vunpack.c.h.bf16 %v1187_v43  ;;  %v1258_v4 = vld [vmem:[%s1480_s18 + $0x48] sm:$0xff]  }
  0x1c   : > { %543 = vmatprep.subr.bf16.mxu0 %v1357_v1  ;;  %1271 = vmatprep.subr.bf16.mxu1 %v1357_v1  ;;  %v1220_v50 = vunpack.c.l.bf16 %v1257_v44  ;;  %v1221_v56 = vunpack.c.h.bf16 %v1257_v44 }
  0x1f   : > { %544 = vmatpush1.bf16.msra.mxu0 %v1298_v9  ;;  %1280 = vmatpush1.bf16.msra.mxu1 %v1298_v9 }
  0x20   : > { %545 = vmatprep.subr.bf16.mxu0 %v1357_v1  ;;  %1272 = vmatprep.subr.bf16.mxu1 %v1357_v1 }
  0x23   : > { %546 = vmatpush1.bf16.msra.mxu0 %v1299_v10  ;;  %1281 = vmatpush1.bf16.msra.mxu1 %v1299_v10  ;;  %v1192_v10 = vunpack.c.l.bf16 %v1250_v3 }
  0x24   : > { %547 = vmatprep.subr.bf16.mxu0 %v1357_v1  ;;  %1273 = vmatprep.subr.bf16.mxu1 %v1357_v1 }
  0x27   : > { %548 = vmatpush1.bf16.msra.mxu0 %v1300_v11  ;;  %1282 = vmatpush1.bf16.msra.mxu1 %v1300_v11 }
  0x2a   : > { %564 = vmatmul.mubr.bf16.vlgmr.msra.gmra.mrb[0].mxu0 %v1301_v12  ;;  %628 = vmatmul.mubr.bf16.vlgmr.msra.gmra.mrb[0].mxu1 %v1304_v13  ;;  %v1224_v12 = vunpack.c.l.bf16 %v1258_v4 }
  0x2b   : > { %1104 = vmatprep.mubr.msk.bf16.mxu0 %vm482_vm0, %v1307_v14  ;;  %1112 = vmatprep.mubr.msk.bf16.mxu1 %vm482_vm0, %v1309_v15 }
  0x32   : > { %572 = vmatmul.mubr.bf16.gmra.mrb[4].mxu0 %v1311_v16  ;;  %636 = vmatmul.mubr.bf16.gmra.mrb[4].mxu1 %v1312_v17 }
  0x33   : > { %1105 = vmatprep.mubr.msk.bf16.mxu0 %vm482_vm0, %v1313_v18  ;;  %1113 = vmatprep.mubr.msk.bf16.mxu1 %vm482_vm0, %v1315_v19 }
  0x3a   : > { %580 = vmatmul.mubr.bf16.gmra.mrb[8].mxu0 %v1317_v20  ;;  %644 = vmatmul.mubr.bf16.gmra.mrb[8].mxu1 %v1318_v21  ;;  %v1193_v20 = vunpack.c.h.bf16 %v1250_v3 }
  0x3b   : > { %1106 = vmatprep.mubr.msk.bf16.mxu0 %vm482_vm0, %v1319_v22  ;;  %1114 = vmatprep.mubr.msk.bf16.mxu1 %vm482_vm0, %v1321_v23  ;;  %v1225_v22 = vunpack.c.h.bf16 %v1258_v4 }
  0x42   : > { %588 = vmatmul.mubr.bf16.gmra.mrb[12].mxu0 %v1323_v24  ;;  %652 = vmatmul.mubr.bf16.gmra.mrb[12].mxu1 %v1324_v25 }
  0x43   : > { %1107 = vmatprep.mubr.msk.bf16.mxu0 %vm482_vm0, %v1325_v26  ;;  %1115 = vmatprep.mubr.msk.bf16.mxu1 %vm482_vm0, %v1327_v27 }
  0x4a   : > { %596 = vmatmul.mubr.bf16.gmra.mrb[16].mxu0 %v1329_v28  ;;  %660 = vmatmul.mubr.bf16.gmra.mrb[16].mxu1 %v1330_v29 }
  0x4b   : > { %1108 = vmatprep.mubr.msk.bf16.mxu0 %vm482_vm0, %v1331_v30  ;;  %1116 = vmatprep.mubr.msk.bf16.mxu1 %vm482_vm0, %v1333_v31 }
  0x52   : > { %604 = vmatmul.mubr.bf16.gmra.mrb[20].mxu0 %v1335_v32  ;;  %668 = vmatmul.mubr.bf16.gmra.mrb[20].mxu1 %v1336_v33  ;;  %v1251_v33 = vld [vmem:[%s1480_s18 + $0x10] sm:$0xff]  }
  0x53   : > { %1109 = vmatprep.mubr.msk.bf16.mxu0 %vm482_vm0, %v1337_v34  ;;  %1117 = vmatprep.mubr.msk.bf16.mxu1 %vm482_vm0, %v1339_v35  ;;  %v1259_v34 = vld [vmem:[%s1480_s18 + $0x50] sm:$0xff]  }
  0x54   : > { %v1228_v43 = vunpack.c.l.bf16 %v1259_v34 }
  0x5a   : > { %612 = vmatmul.mubr.bf16.gmra.mrb[24].mxu0 %v1341_v36  ;;  %676 = vmatmul.mubr.bf16.gmra.mrb[24].mxu1 %v1342_v37 }
  0x5b   : > { %1110 = vmatprep.mubr.msk.bf16.mxu0 %vm482_vm0, %v1343_v38  ;;  %1118 = vmatprep.mubr.msk.bf16.mxu1 %vm482_vm0, %v1345_v39 }
  0x62   : > { %620 = vmatmul.mubr.bf16.gmra.mrb[28].mxu0 %v1347_v40  ;;  %684 = vmatmul.mubr.bf16.gmra.mrb[28].mxu1 %v1348_v41  ;;  %v1196_v40 = vunpack.c.l.bf16 %v1251_v33 }
  0xfd   : > { %v565_v45 = vpop.f32.mrb[0].mxu0  ;;  %v629_v46 = vpop.f32.mrb[0].mxu1 }
  0xfe   : > { %v566_v47 = vadd.f32 %v1485_v42, %v565_v45  ;;  %v630_v49 = vadd.f32 %v1485_v42, %v629_v46  ;;  %v567_v51 = vpop.f32.mrb[1].mxu0  ;;  %v631_v52 = vpop.f32.mrb[1].mxu1 }
  0xff   : > { %v568_v53 = vpop.f32.mrb[2].mxu0  ;;  %v632_v55 = vpop.f32.mrb[2].mxu1  ;;  %v1197_v51 = vunpack.c.h.bf16 %v1251_v33 }
 0x100   : > { %v692_v57 = vmax.f32 %v566_v47, 0.0  ;;  %v708_v58 = vmax.f32 %v630_v49, 0.0  ;;  %v569_v59 = vadd.f32 %v1485_v42, %v568_v53  ;;  %v633_v60 = vadd.f32 %v1485_v42, %v632_v55  ;;  %v570_v61 = vpop.f32.mrb[3].mxu0  ;;  %v634_v62 = vpop.f32.mrb[3].mxu1 }
 0x101   : > { %v1229_v53 = vunpack.c.h.bf16 %v1259_v34 }
 0x102   : > { %v788_v63 = vadd.f32 %v1188_v48, %v692_v57  ;;  %v804_v0 = vadd.f32 %v1220_v50, %v708_v58  ;;  %v693_v1 = vmax.f32 %v569_v59, 0.0  ;;  %v709_v2 = vmax.f32 %v633_v60, 0.0 }
 0x104   : > { %v1154_v5 = vpack.c.bf16 %v788_v63, %v788_v63  ;;  %v1170_v6 = vpack.c.bf16 %v804_v0, %v804_v0  ;;  %v789_v7 = vadd.f32 %v1189_v54, %v693_v1  ;;  %v805_v8 = vadd.f32 %v1221_v56, %v709_v2  ;;  %v1252_v0 = vld [vmem:[%s1480_s18 + $0x18] sm:$0xff]  }
 0x105   : > { %v573_v9 = vpop.f32.mrb[4].mxu0  ;;  %v637_v11 = vpop.f32.mrb[4].mxu1  ;;  %v1260_v1 = vld [vmem:[%s1480_s18 + $0x58] sm:$0xff]  }
 0x106   : > { %949 = vst.msk [vmem:[%s1500_s24] sm:$0xf] %vm948_vm1, %v1154_v5  ;;  %965 = vst.msk [vmem:[%s1500_s24 + $0x40] sm:$0xf] %vm948_vm1, %v1170_v6  ;;  %v1155_v13 = vpack.c.bf16 %v789_v7, %v789_v7  ;;  %v1171_v14 = vpack.c.bf16 %v805_v8, %v805_v8  ;;  %v574_v15 = vadd.f32 %v1485_v42, %v573_v9  ;;  %v575_v17 = vpop.f32.mrb[5].mxu0  ;;  %v639_v18 = vpop.f32.mrb[5].mxu1  ;;  %v1200_v7 = vunpack.c.l.bf16 %v1252_v0 }
 0x107   : > { %v638_v16 = vadd.f32 %v1485_v42, %v637_v11  ;;  %v576_v19 = vpop.f32.mrb[6].mxu0  ;;  %v640_v21 = vpop.f32.mrb[6].mxu1  ;;  %v1232_v9 = vunpack.c.l.bf16 %v1260_v1  ;;  %v1201_v17 = vunpack.c.h.bf16 %v1252_v0 }
 0x108   : > { %950 = vst.msk [vmem:[%s1500_s24 + $0x4] sm:$0xf] %vm948_vm1, %v1155_v13  ;;  %966 = vst.msk [vmem:[%s1500_s24 + $0x44] sm:$0xf] %vm948_vm1, %v1171_v14  ;;  %v694_v23 = vmax.f32 %v574_v15, 0.0  ;;  %v577_v25 = vadd.f32 %v1485_v42, %v576_v19  ;;  %v641_v26 = vadd.f32 %v1485_v42, %v640_v21  ;;  %v578_v27 = vpop.f32.mrb[7].mxu0  ;;  %v1233_v19 = vunpack.c.h.bf16 %v1260_v1 }
 0x109   : > { %v710_v24 = vmax.f32 %v638_v16, 0.0  ;;  %v642_v28 = vpop.f32.mrb[7].mxu1 }
 0x10a   : > { %v790_v29 = vadd.f32 %v1192_v10, %v694_v23  ;;  %v695_v31 = vmax.f32 %v577_v25, 0.0  ;;  %v711_v32 = vmax.f32 %v641_v26, 0.0 }
 0x10b   : > { %v806_v30 = vadd.f32 %v1224_v12, %v710_v24 }
 0x10c   : > { %v1156_v35 = vpack.c.bf16 %v790_v29, %v790_v29  ;;  %v791_v37 = vadd.f32 %v1193_v20, %v695_v31  ;;  %v807_v38 = vadd.f32 %v1225_v22, %v711_v32  ;;  %v1261_v31 = vld [vmem:[%s1480_s18 + $0x60] sm:$0xff]  }
 0x10d   : > { %v1172_v36 = vpack.c.bf16 %v806_v30, %v806_v30  ;;  %v581_v39 = vpop.f32.mrb[8].mxu0  ;;  %v645_v41 = vpop.f32.mrb[8].mxu1  ;;  %v1253_v30 = vld [vmem:[%s1480_s18 + $0x20] sm:$0xff]  }
 0x10e   : > { %951 = vst.msk [vmem:[%s1500_s24 + $0x8] sm:$0xf] %vm948_vm1, %v1156_v35  ;;  %v1157_v44 = vpack.c.bf16 %v791_v37, %v791_v37  ;;  %v1173_v45 = vpack.c.bf16 %v807_v38, %v807_v38  ;;  %v582_v46 = vadd.f32 %v1485_v42, %v581_v39  ;;  %v646_v47 = vadd.f32 %v1485_v42, %v645_v41  ;;  %v583_v48 = vpop.f32.mrb[9].mxu0  ;;  %v647_v49 = vpop.f32.mrb[9].mxu1 }
 0x10f   : > { %967 = vst.msk [vmem:[%s1500_s24 + $0x48] sm:$0xf] %vm948_vm1, %v1172_v36  ;;  %v584_v50 = vpop.f32.mrb[10].mxu0  ;;  %v648_v52 = vpop.f32.mrb[10].mxu1  ;;  %v1204_v37 = vunpack.c.l.bf16 %v1253_v30  ;;  %v1236_v39 = vunpack.c.l.bf16 %v1261_v31  ;;  %v1205_v48 = vunpack.c.h.bf16 %v1253_v30 }
 0x110   : > { %952 = vst.msk [vmem:[%s1500_s24 + $0xc] sm:$0xf] %vm948_vm1, %v1157_v44  ;;  %968 = vst.msk [vmem:[%s1500_s24 + $0x4c] sm:$0xf] %vm948_vm1, %v1173_v45  ;;  %v696_v54 = vmax.f32 %v582_v46, 0.0  ;;  %v712_v55 = vmax.f32 %v646_v47, 0.0  ;;  %v585_v56 = vadd.f32 %v1485_v42, %v584_v50  ;;  %v649_v57 = vadd.f32 %v1485_v42, %v648_v52 }
 0x111   : > { %v586_v58 = vpop.f32.mrb[11].mxu0  ;;  %v650_v59 = vpop.f32.mrb[11].mxu1  ;;  %v1237_v50 = vunpack.c.h.bf16 %v1261_v31 }
 0x112   : > { %v792_v60 = vadd.f32 %v1196_v40, %v696_v54  ;;  %v808_v61 = vadd.f32 %v1228_v43, %v712_v55  ;;  %v697_v62 = vmax.f32 %v585_v56, 0.0  ;;  %v713_v63 = vmax.f32 %v649_v57, 0.0 }
 0x114   : > { %v1158_v2 = vpack.c.bf16 %v792_v60, %v792_v60  ;;  %v1174_v3 = vpack.c.bf16 %v808_v61, %v808_v61  ;;  %v793_v4 = vadd.f32 %v1197_v51, %v697_v62  ;;  %v809_v5 = vadd.f32 %v1229_v53, %v713_v63  ;;  %v1254_v61 = vld [vmem:[%s1480_s18 + $0x28] sm:$0xff]  }
 0x115   : > { %v589_v6 = vpop.f32.mrb[12].mxu0  ;;  %v653_v8 = vpop.f32.mrb[12].mxu1  ;;  %v1262_v62 = vld [vmem:[%s1480_s18 + $0x68] sm:$0xff]  }
 0x116   : > { %953 = vst.msk [vmem:[%s1500_s24 + $0x10] sm:$0xf] %vm948_vm1, %v1158_v2  ;;  %969 = vst.msk [vmem:[%s1500_s24 + $0x50] sm:$0xf] %vm948_vm1, %v1174_v3  ;;  %v1159_v10 = vpack.c.bf16 %v793_v4, %v793_v4  ;;  %v1175_v11 = vpack.c.bf16 %v809_v5, %v809_v5  ;;  %v590_v12 = vadd.f32 %v1485_v42, %v589_v6  ;;  %v591_v14 = vpop.f32.mrb[13].mxu0  ;;  %v655_v15 = vpop.f32.mrb[13].mxu1  ;;  %v1208_v4 = vunpack.c.l.bf16 %v1254_v61 }
 0x117   : > { %v654_v13 = vadd.f32 %v1485_v42, %v653_v8  ;;  %v592_v16 = vpop.f32.mrb[14].mxu0  ;;  %v656_v18 = vpop.f32.mrb[14].mxu1  ;;  %v1240_v6 = vunpack.c.l.bf16 %v1262_v62  ;;  %v1209_v14 = vunpack.c.h.bf16 %v1254_v61 }
 0x118   : > { %954 = vst.msk [vmem:[%s1500_s24 + $0x14] sm:$0xf] %vm948_vm1, %v1159_v10  ;;  %970 = vst.msk [vmem:[%s1500_s24 + $0x54] sm:$0xf] %vm948_vm1, %v1175_v11  ;;  %v698_v20 = vmax.f32 %v590_v12, 0.0  ;;  %v593_v22 = vadd.f32 %v1485_v42, %v592_v16  ;;  %v657_v23 = vadd.f32 %v1485_v42, %v656_v18  ;;  %v594_v24 = vpop.f32.mrb[15].mxu0  ;;  %v1241_v16 = vunpack.c.h.bf16 %v1262_v62 }
 0x119   : > { %v714_v21 = vmax.f32 %v654_v13, 0.0  ;;  %v658_v25 = vpop.f32.mrb[15].mxu1 }
 0x11a   : > { %v794_v26 = vadd.f32 %v1200_v7, %v698_v20  ;;  %v699_v28 = vmax.f32 %v593_v22, 0.0  ;;  %v715_v29 = vmax.f32 %v657_v23, 0.0 }
 0x11b   : > { %v810_v27 = vadd.f32 %v1232_v9, %v714_v21 }
 0x11c   : > { %v1160_v32 = vpack.c.bf16 %v794_v26, %v794_v26  ;;  %v795_v34 = vadd.f32 %v1201_v17, %v699_v28  ;;  %v811_v35 = vadd.f32 %v1233_v19, %v715_v29  ;;  %v1263_v28 = vld [vmem:[%s1480_s18 + $0x70] sm:$0xff]  }
 0x11d   : > { %v1176_v33 = vpack.c.bf16 %v810_v27, %v810_v27  ;;  %v597_v36 = vpop.f32.mrb[16].mxu0  ;;  %v661_v38 = vpop.f32.mrb[16].mxu1  ;;  %v1255_v27 = vld [vmem:[%s1480_s18 + $0x30] sm:$0xff]  }
 0x11e   : > { %955 = vst.msk [vmem:[%s1500_s24 + $0x18] sm:$0xf] %vm948_vm1, %v1160_v32  ;;  %v1161_v40 = vpack.c.bf16 %v795_v34, %v795_v34  ;;  %v1177_v41 = vpack.c.bf16 %v811_v35, %v811_v35  ;;  %v598_v43 = vadd.f32 %v1485_v42, %v597_v36  ;;  %v662_v44 = vadd.f32 %v1485_v42, %v661_v38  ;;  %v599_v45 = vpop.f32.mrb[17].mxu0  ;;  %v663_v46 = vpop.f32.mrb[17].mxu1 }
 0x11f   : > { %971 = vst.msk [vmem:[%s1500_s24 + $0x58] sm:$0xf] %vm948_vm1, %v1176_v33  ;;  %v600_v47 = vpop.f32.mrb[18].mxu0  ;;  %v664_v49 = vpop.f32.mrb[18].mxu1  ;;  %v1212_v34 = vunpack.c.l.bf16 %v1255_v27  ;;  %v1244_v36 = vunpack.c.l.bf16 %v1263_v28  ;;  %v1213_v45 = vunpack.c.h.bf16 %v1255_v27 }
 0x120   : > { %956 = vst.msk [vmem:[%s1500_s24 + $0x1c] sm:$0xf] %vm948_vm1, %v1161_v40  ;;  %972 = vst.msk [vmem:[%s1500_s24 + $0x5c] sm:$0xf] %vm948_vm1, %v1177_v41  ;;  %v700_v51 = vmax.f32 %v598_v43, 0.0  ;;  %v716_v52 = vmax.f32 %v662_v44, 0.0  ;;  %v601_v53 = vadd.f32 %v1485_v42, %v600_v47  ;;  %v665_v54 = vadd.f32 %v1485_v42, %v664_v49 }
 0x121   : > { %v602_v55 = vpop.f32.mrb[19].mxu0  ;;  %v666_v56 = vpop.f32.mrb[19].mxu1  ;;  %v1245_v47 = vunpack.c.h.bf16 %v1263_v28 }
 0x122   : > { %v796_v57 = vadd.f32 %v1204_v37, %v700_v51  ;;  %v812_v58 = vadd.f32 %v1236_v39, %v716_v52  ;;  %v701_v59 = vmax.f32 %v601_v53, 0.0  ;;  %v717_v60 = vmax.f32 %v665_v54, 0.0 }
 0x124   : > { %v1162_v63 = vpack.c.bf16 %v796_v57, %v796_v57  ;;  %v1178_v0 = vpack.c.bf16 %v812_v58, %v812_v58  ;;  %v797_v1 = vadd.f32 %v1205_v48, %v701_v59  ;;  %v813_v2 = vadd.f32 %v1237_v50, %v717_v60  ;;  %v1256_v58 = vld [vmem:[%s1480_s18 + $0x38] sm:$0xff]  }
 0x125   : > { %v605_v3 = vpop.f32.mrb[20].mxu0  ;;  %v669_v5 = vpop.f32.mrb[20].mxu1  ;;  %v1264_v59 = vld [vmem:[%s1480_s18 + $0x78] sm:$0xff]  }
 0x126   : > { %957 = vst.msk [vmem:[%s1500_s24 + $0x20] sm:$0xf] %vm948_vm1, %v1162_v63  ;;  %973 = vst.msk [vmem:[%s1500_s24 + $0x60] sm:$0xf] %vm948_vm1, %v1178_v0  ;;  %v1163_v7 = vpack.c.bf16 %v797_v1, %v797_v1  ;;  %v1179_v8 = vpack.c.bf16 %v813_v2, %v813_v2  ;;  %v606_v9 = vadd.f32 %v1485_v42, %v605_v3  ;;  %v607_v11 = vpop.f32.mrb[21].mxu0  ;;  %v671_v12 = vpop.f32.mrb[21].mxu1  ;;  %v1216_v1 = vunpack.c.l.bf16 %v1256_v58 }
 0x127   : > { %v670_v10 = vadd.f32 %v1485_v42, %v669_v5  ;;  %v608_v13 = vpop.f32.mrb[22].mxu0  ;;  %v672_v15 = vpop.f32.mrb[22].mxu1  ;;  %v1248_v3 = vunpack.c.l.bf16 %v1264_v59  ;;  %v1217_v11 = vunpack.c.h.bf16 %v1256_v58 }
 0x128   : > { %958 = vst.msk [vmem:[%s1500_s24 + $0x24] sm:$0xf] %vm948_vm1, %v1163_v7  ;;  %974 = vst.msk [vmem:[%s1500_s24 + $0x64] sm:$0xf] %vm948_vm1, %v1179_v8  ;;  %v702_v17 = vmax.f32 %v606_v9, 0.0  ;;  %v609_v19 = vadd.f32 %v1485_v42, %v608_v13  ;;  %v673_v20 = vadd.f32 %v1485_v42, %v672_v15  ;;  %v610_v21 = vpop.f32.mrb[23].mxu0  ;;  %v1249_v13 = vunpack.c.h.bf16 %v1264_v59 }
 0x129   : > { %v718_v18 = vmax.f32 %v670_v10, 0.0  ;;  %v674_v22 = vpop.f32.mrb[23].mxu1 }
 0x12a   : > { %v798_v23 = vadd.f32 %v1208_v4, %v702_v17  ;;  %v703_v25 = vmax.f32 %v609_v19, 0.0  ;;  %v719_v26 = vmax.f32 %v673_v20, 0.0 }
 0x12b   : > { %v814_v24 = vadd.f32 %v1240_v6, %v718_v18 }
 0x12c   : > { %v1164_v29 = vpack.c.bf16 %v798_v23, %v798_v23  ;;  %v799_v31 = vadd.f32 %v1209_v14, %v703_v25  ;;  %v815_v32 = vadd.f32 %v1241_v16, %v719_v26 }
 0x12d   : > { %v1180_v30 = vpack.c.bf16 %v814_v24, %v814_v24  ;;  %v613_v33 = vpop.f32.mrb[24].mxu0  ;;  %v677_v35 = vpop.f32.mrb[24].mxu1 }
 0x12e   : > { %959 = vst.msk [vmem:[%s1500_s24 + $0x28] sm:$0xf] %vm948_vm1, %v1164_v29  ;;  %v1165_v37 = vpack.c.bf16 %v799_v31, %v799_v31  ;;  %v1181_v38 = vpack.c.bf16 %v815_v32, %v815_v32  ;;  %v614_v39 = vadd.f32 %v1485_v42, %v613_v33  ;;  %v678_v40 = vadd.f32 %v1485_v42, %v677_v35  ;;  %v615_v41 = vpop.f32.mrb[25].mxu0  ;;  %v679_v43 = vpop.f32.mrb[25].mxu1 }
 0x12f   : > { %975 = vst.msk [vmem:[%s1500_s24 + $0x68] sm:$0xf] %vm948_vm1, %v1180_v30  ;;  %v616_v44 = vpop.f32.mrb[26].mxu0  ;;  %v680_v46 = vpop.f32.mrb[26].mxu1 }
 0x130   : > { %960 = vst.msk [vmem:[%s1500_s24 + $0x2c] sm:$0xf] %vm948_vm1, %v1165_v37  ;;  %976 = vst.msk [vmem:[%s1500_s24 + $0x6c] sm:$0xf] %vm948_vm1, %v1181_v38  ;;  %v704_v48 = vmax.f32 %v614_v39, 0.0  ;;  %v720_v49 = vmax.f32 %v678_v40, 0.0  ;;  %v617_v50 = vadd.f32 %v1485_v42, %v616_v44  ;;  %v681_v51 = vadd.f32 %v1485_v42, %v680_v46 }
 0x131   : > { %v618_v52 = vpop.f32.mrb[27].mxu0  ;;  %v682_v53 = vpop.f32.mrb[27].mxu1 }
 0x132   : > { %v800_v54 = vadd.f32 %v1212_v34, %v704_v48  ;;  %v816_v55 = vadd.f32 %v1244_v36, %v720_v49  ;;  %v705_v56 = vmax.f32 %v617_v50, 0.0  ;;  %v721_v57 = vmax.f32 %v681_v51, 0.0 }
 0x134   : > { %v1166_v60 = vpack.c.bf16 %v800_v54, %v800_v54  ;;  %v1182_v61 = vpack.c.bf16 %v816_v55, %v816_v55  ;;  %v801_v62 = vadd.f32 %v1213_v45, %v705_v56  ;;  %v817_v63 = vadd.f32 %v1245_v47, %v721_v57 }
 0x135   : > { %v621_v0 = vpop.f32.mrb[28].mxu0  ;;  %v685_v2 = vpop.f32.mrb[28].mxu1 }
 0x136   : > { %961 = vst.msk [vmem:[%s1500_s24 + $0x30] sm:$0xf] %vm948_vm1, %v1166_v60  ;;  %977 = vst.msk [vmem:[%s1500_s24 + $0x70] sm:$0xf] %vm948_vm1, %v1182_v61  ;;  %v1167_v4 = vpack.c.bf16 %v801_v62, %v801_v62  ;;  %v1183_v5 = vpack.c.bf16 %v817_v63, %v817_v63  ;;  %v622_v6 = vadd.f32 %v1485_v42, %v621_v0  ;;  %v623_v8 = vpop.f32.mrb[29].mxu0  ;;  %v687_v9 = vpop.f32.mrb[29].mxu1 }
 0x137   : > { %v686_v7 = vadd.f32 %v1485_v42, %v685_v2  ;;  %v624_v10 = vpop.f32.mrb[30].mxu0  ;;  %v688_v12 = vpop.f32.mrb[30].mxu1 }
 0x138   : > { %962 = vst.msk [vmem:[%s1500_s24 + $0x34] sm:$0xf] %vm948_vm1, %v1167_v4  ;;  %978 = vst.msk [vmem:[%s1500_s24 + $0x74] sm:$0xf] %vm948_vm1, %v1183_v5  ;;  %v706_v14 = vmax.f32 %v622_v6, 0.0  ;;  %v625_v16 = vadd.f32 %v1485_v42, %v624_v10  ;;  %v689_v17 = vadd.f32 %v1485_v42, %v688_v12  ;;  %v626_v18 = vpop.f32.mrb[31].mxu0 }
 0x139   : > { %v722_v15 = vmax.f32 %v686_v7, 0.0  ;;  %v690_v19 = vpop.f32.mrb[31].mxu1 }
 0x13a   : > { %v802_v20 = vadd.f32 %v1216_v1, %v706_v14  ;;  %v707_v22 = vmax.f32 %v625_v16, 0.0  ;;  %v723_v23 = vmax.f32 %v689_v17, 0.0 }
 0x13b   : > { %v818_v21 = vadd.f32 %v1248_v3, %v722_v15 }
 0x13c   : > { %v1168_v24 = vpack.c.bf16 %v802_v20, %v802_v20  ;;  %v803_v26 = vadd.f32 %v1217_v11, %v707_v22  ;;  %v819_v27 = vadd.f32 %v1249_v13, %v723_v23 }
 0x13d   : > { %v1184_v25 = vpack.c.bf16 %v818_v21, %v818_v21 }
 0x13e   : > { %963 = vst.msk [vmem:[%s1500_s24 + $0x38] sm:$0xf] %vm948_vm1, %v1168_v24  ;;  %v1169_v28 = vpack.c.bf16 %v803_v26, %v803_v26  ;;  %v1185_v29 = vpack.c.bf16 %v819_v27, %v819_v27 }
 0x13f   : > { %979 = vst.msk [vmem:[%s1500_s24 + $0x78] sm:$0xf] %vm948_vm1, %v1184_v25 }
 0x140   : > { %964 = vst.msk [vmem:[%s1500_s24 + $0x3c] sm:$0xf] %vm948_vm1, %v1169_v28  ;;  %980 = vst.msk [vmem:[%s1500_s24 + $0x7c] sm:$0xf] %vm948_vm1, %v1185_v29 }
 0x141 PF: > { %s14_s15 = sadd.s32 1, %s1355_s15  }
 0x142   : > { %p11_p4 = scmp.ge.s32.totalorder %s14_s15, 4  }
 0x144   :  { %13 = sbr.rel (!%p11_p4) target bundleno = 1 (0x1), region = 69 }

// kernel: unet_forward.61
= control target key start
LH: loop header
LB: loop body
LE: loop exit
PB: predicated region body
PF: predicated region fallthrough
CT: control target
= control target key end

     0   :  { %s1104_s12 = smov 0   ;;  %s1292_s0 = inlined_call_operand.vmem [shape: bf16[512,16], index: 0, kind: input, shape index: {}]   ;;  %s1293_s1 = inlined_call_operand.vmem [shape: bf16[16,2], index: 1, kind: input, shape index: {}]   ;;  %s1294_s2 = inlined_call_operand.vmem [shape: f32[1,2], index: 2, kind: input, shape index: {}]   ;;  %s1295_s3 = inlined_call_operand.vmem [shape: f32[512,2], index: 3, kind: output, shape index: {}]  }
   0x1 LB: > { %s793_s13 = sadd.s32 4294967295, %s1082_s12   ;;  %p797_p0 = scmp.ge.s32.totalorder %s1082_s12, 1  ;;  %s1082_s12 = sphi %s1104_s12, %s13_s12  }
   0x2   : > { %p138_p1 = scmp.lt.s32.totalorder %s1082_s12, 3 }
   0x4   : > { %p139_p2 = pnand %p797_p0, %p138_p1 }
   0x5   : > { %v931_v0 = vld [vmem:[%s1293_s1] sm:$0xff] (!%p139_p2)   ;;  %s798_s16 = sshll.u32 (!%p139_p2), %s793_s13, 5  ;;  %vm302_vm0 = vcmask (!%p139_p2), 130048   ;;  %vm704_vm1 = vcmask (!%p139_p2), 15360  }
   0x6   : > { %142 = sbr.rel (%p139_p2) target bundleno = 318 (0x13e), region = 32  ;;  %p163_p3 = scmp.lt.s32.totalorder (!%p139_p2), %s798_s16, 63  ;;  %887 = vmatprep.subr.bf16.mxu0 (!%p139_p2), %v931_v0  ;;  %921 = vmatprep.subr.bf16.mxu1 (!%p139_p2), %v931_v0  ;;  %v1158_v17 = vld [vmem:[%s1294_s2] ss:$0 sm:$0xff] (!%p139_p2) }
   0x7   : > { %888 = vmatpush3.bf16.msra.mxu0 (!%p139_p2), %v931_v0  ;;  %922 = vmatpush3.bf16.msra.mxu1 (!%p139_p2), %v931_v0 }
   0xd   : > { %s1297_s16 = smov (!%p163_p3, %s798_s16), 63 }
   0xe   : > { %s799_s17 = sshll.u32 %s1297_s16, 2  ;;  %s801_s23 = sshll.u32 %s1297_s16, 3 }
   0xf   : > { %s1121_s20 = scalar_lea.vmem %s1292_s0, %s799_s17  ;;  %s1188_s26 = scalar_lea.vmem %s1295_s3, %s801_s23 }
  0x10   : > { %v932_v1 = vld [vmem:[%s1121_s20] sm:$0xff]   ;;  %v934_v3 = vld [vmem:[%s1121_s20 + $0x8] sm:$0xff]   ;;  %v936_v5 = vld [vmem:[%s1121_s20 + $0x10] sm:$0xff]  }
  0x11   : > { %v933_v2 = vld [vmem:[%s1121_s20 + $0x40] sm:$0xff]   ;;  %889 = vmatprep.mubr.msk.bf16.mxu0 %vm302_vm0, %v932_v1  ;;  %v935_v4 = vld [vmem:[%s1121_s20 + $0x48] sm:$0xff]   ;;  %v937_v6 = vld [vmem:[%s1121_s20 + $0x50] sm:$0xff]  }
  0x12   : > { %905 = vmatprep.mubr.msk.bf16.mxu1 %vm302_vm0, %v933_v2  ;;  %890 = vmatmul.mubr.msk.bf16.vlgmr.msra.gmra.mrb[0].mxu0 %vm302_vm0, %v934_v3  ;;  %v938_v7 = vld [vmem:[%s1121_s20 + $0x18] sm:$0xff]   ;;  %v940_v9 = vld [vmem:[%s1121_s20 + $0x20] sm:$0xff]   ;;  %v942_v11 = vld [vmem:[%s1121_s20 + $0x28] sm:$0xff]  }
  0x13   : > { %906 = vmatmul.mubr.msk.bf16.vlgmr.msra.gmra.mrb[0].mxu1 %vm302_vm0, %v935_v4  ;;  %893 = vmatprep.mubr.msk.bf16.mxu0 %vm302_vm0, %v936_v5  ;;  %v939_v8 = vld [vmem:[%s1121_s20 + $0x58] sm:$0xff]   ;;  %v941_v10 = vld [vmem:[%s1121_s20 + $0x60] sm:$0xff]   ;;  %v943_v12 = vld [vmem:[%s1121_s20 + $0x68] sm:$0xff]  }
  0x14   : > { %909 = vmatprep.mubr.msk.bf16.mxu1 %vm302_vm0, %v937_v6  ;;  %v944_v13 = vld [vmem:[%s1121_s20 + $0x30] sm:$0xff]   ;;  %v946_v15 = vld [vmem:[%s1121_s20 + $0x38] sm:$0xff]  }
  0x15   : > { %v945_v14 = vld [vmem:[%s1121_s20 + $0x70] sm:$0xff]   ;;  %v947_v16 = vld [vmem:[%s1121_s20 + $0x78] sm:$0xff]  }
  0x1a   : > { %894 = vmatmul.mubr.msk.bf16.gmra.mrb[4].mxu0 %vm302_vm0, %v938_v7 }
  0x1b   : > { %910 = vmatmul.mubr.msk.bf16.gmra.mrb[4].mxu1 %vm302_vm0, %v939_v8  ;;  %897 = vmatprep.mubr.msk.bf16.mxu0 %vm302_vm0, %v940_v9 }
  0x1c   : > { %913 = vmatprep.mubr.msk.bf16.mxu1 %vm302_vm0, %v941_v10 }
  0x22   : > { %898 = vmatmul.mubr.msk.bf16.gmra.mrb[8].mxu0 %vm302_vm0, %v942_v11 }
  0x23   : > { %914 = vmatmul.mubr.msk.bf16.gmra.mrb[8].mxu1 %vm302_vm0, %v943_v12  ;;  %901 = vmatprep.mubr.msk.bf16.mxu0 %vm302_vm0, %v944_v13 }
  0x24   : > { %917 = vmatprep.mubr.msk.bf16.mxu1 %vm302_vm0, %v945_v14 }
  0x2a   : > { %902 = vmatmul.mubr.msk.bf16.gmra.mrb[12].mxu0 %vm302_vm0, %v946_v15 }
  0x2b   : > { %918 = vmatmul.mubr.msk.bf16.gmra.mrb[12].mxu1 %vm302_vm0, %v947_v16 }
  0xe5   : > { %v891_v18 = vpop.f32.mrb[0].mxu0 }
  0xe6   : > { %v394_v19 = vadd.f32 %v891_v18, %v1158_v17  ;;  %v907_v20 = vpop.f32.mrb[0].mxu1  ;;  %v385_v21 = vpop.f32.mrb[1].mxu0 }
  0xe7   : > { %v458_v22 = vadd.f32 %v907_v20, %v1158_v17  ;;  %v386_v23 = vadd.f32 %v1158_v17, %v385_v21  ;;  %v449_v24 = vpop.f32.mrb[1].mxu1  ;;  %v892_v25 = vpop.f32.mrb[2].mxu0 }
  0xe8   : > { %v838_v26 = vmul.f32 -1.442695, %v394_v19  ;;  %v450_v27 = vadd.f32 %v1158_v17, %v449_v24  ;;  %v397_v28 = vadd.f32 %v892_v25, %v1158_v17  ;;  %v908_v29 = vpop.f32.mrb[2].mxu1  ;;  %v388_v30 = vpop.f32.mrb[3].mxu0 }
  0xe9   : > { %v854_v31 = vmul.f32 -1.442695, %v458_v22  ;;  %v836_v32 = vmul.f32 -1.442695, %v386_v23  ;;  %v461_v33 = vadd.f32 %v908_v29, %v1158_v17  ;;  %v389_v34 = vadd.f32 %v1158_v17, %v388_v30  ;;  %v452_v35 = vpop.f32.mrb[3].mxu1 }
  0xea   : > { %948 = vpow2.f32 %v838_v26  ;;  %v852_v36 = vmul.f32 -1.442695, %v450_v27  ;;  %v839_v37 = vmul.f32 -1.442695, %v397_v28  ;;  %v453_v38 = vadd.f32 %v1158_v17, %v452_v35 }
  0xeb   : > { %950 = vpow2.f32 %v854_v31  ;;  %v855_v39 = vmul.f32 -1.442695, %v461_v33  ;;  %v837_v40 = vmul.f32 -1.442695, %v389_v34 }
  0xec   : > { %952 = vpow2.f32 %v836_v32  ;;  %v853_v41 = vmul.f32 -1.442695, %v453_v38 }
  0xed   : > { %954 = vpow2.f32 %v852_v36  ;;  %v895_v42 = vpop.f32.mrb[4].mxu0 }
  0xee   : > { %956 = vpow2.f32 %v839_v37  ;;  %v410_v43 = vadd.f32 %v895_v42, %v1158_v17  ;;  %v911_v44 = vpop.f32.mrb[4].mxu1  ;;  %v401_v45 = vpop.f32.mrb[5].mxu0 }
  0xef   : > { %958 = vpow2.f32 %v855_v39  ;;  %v474_v46 = vadd.f32 %v911_v44, %v1158_v17  ;;  %v402_v47 = vadd.f32 %v1158_v17, %v401_v45  ;;  %v465_v48 = vpop.f32.mrb[5].mxu1  ;;  %v896_v49 = vpop.f32.mrb[6].mxu0 }
  0xf0   : > { %960 = vpow2.f32 %v837_v40  ;;  %v842_v50 = vmul.f32 -1.442695, %v410_v43  ;;  %v466_v51 = vadd.f32 %v1158_v17, %v465_v48  ;;  %v413_v52 = vadd.f32 %v896_v49, %v1158_v17  ;;  %v912_v53 = vpop.f32.mrb[6].mxu1  ;;  %v404_v54 = vpop.f32.mrb[7].mxu0 }
  0xf1   : > { %962 = vpow2.f32 %v853_v41  ;;  %v858_v55 = vmul.f32 -1.442695, %v474_v46  ;;  %v840_v56 = vmul.f32 -1.442695, %v402_v47  ;;  %v468_v57 = vpop.f32.mrb[7].mxu1  ;;  %v477_v22 = vadd.f32 %v912_v53, %v1158_v17 }
  0xf2   : > { %964 = vpow2.f32 %v842_v50  ;;  %v856_v58 = vmul.f32 -1.442695, %v466_v51  ;;  %v843_v59 = vmul.f32 -1.442695, %v413_v52  ;;  %v405_v25 = vadd.f32 %v1158_v17, %v404_v54 }
  0xf3   : > { %966 = vpow2.f32 %v858_v55  ;;  %v469_v29 = vadd.f32 %v1158_v17, %v468_v57  ;;  %v859_v39 = vmul.f32 -1.442695, %v477_v22 }
  0xf4   : > { %v949_v60 = vpop.eup %948  ;;  %968 = vpow2.f32 %v840_v56  ;;  %v841_v45 = vmul.f32 -1.442695, %v405_v25 }
  0xf5   : > { %v951_v61 = vpop.eup %950  ;;  %v610_v62 = vadd.f32 1.0, %v949_v60  ;;  %970 = vpow2.f32 %v856_v58  ;;  %v899_v63 = vpop.f32.mrb[8].mxu0  ;;  %v857_v49 = vmul.f32 -1.442695, %v469_v29 }
  0xf6   : > { %v953_v0 = vpop.eup %952  ;;  %v626_v1 = vadd.f32 1.0, %v951_v61  ;;  %972 = vpow2.f32 %v843_v59  ;;  %v915_v2 = vpop.f32.mrb[8].mxu1  ;;  %v426_v34 = vadd.f32 %v899_v63, %v1158_v17 }
  0xf7   : > { %v417_v3 = vpop.f32.mrb[9].mxu0  ;;  %v955_v4 = vpop.eup %954  ;;  %974 = vrcp.f32 %v610_v62  ;;  %v608_v5 = vadd.f32 1.0, %v953_v0  ;;  %v490_v40 = vadd.f32 %v915_v2, %v1158_v17 }
  0xf8   : > { %v481_v6 = vpop.f32.mrb[9].mxu1  ;;  %v900_v7 = vpop.f32.mrb[10].mxu0  ;;  %976 = vrcp.f32 %v626_v1  ;;  %v624_v9 = vadd.f32 1.0, %v955_v4  ;;  %v418_v46 = vadd.f32 %v1158_v17, %v417_v3  ;;  %v846_v52 = vmul.f32 -1.442695, %v426_v34 }
  0xf9   : > { %v957_v8 = vpop.eup %956  ;;  %v1173_v10 = vpop.f32.mrb[10].mxu1  ;;  %978 = vrcp.f32 %v608_v5  ;;  %v482_v50 = vadd.f32 %v1158_v17, %v481_v6  ;;  %v429_v53 = vadd.f32 %v900_v7, %v1158_v17  ;;  %v862_v55 = vmul.f32 -1.442695, %v490_v40 }
  0xfa   : > { %v1175_v11 = vpop.f32.mrb[11].mxu0  ;;  %v959_v12 = vpop.eup %958  ;;  %v611_v13 = vadd.f32 1.0, %v957_v8  ;;  %980 = vrcp.f32 %v624_v9  ;;  %v493_v56 = vadd.f32 %v1173_v10, %v1158_v17  ;;  %v844_v58 = vmul.f32 -1.442695, %v418_v46 }
  0xfb   : > { %v1177_v14 = vpop.f32.mrb[11].mxu1  ;;  %v961_v15 = vpop.eup %960  ;;  %v627_v16 = vadd.f32 1.0, %v959_v12  ;;  %v421_v59 = vadd.f32 %v1158_v17, %v1175_v11  ;;  %v860_v61 = vmul.f32 -1.442695, %v482_v50  ;;  %v847_v0 = vmul.f32 -1.442695, %v429_v53 }
  0xfc   : > { %v963_v18 = vpop.eup %962  ;;  %982 = vrcp.f32 %v611_v13  ;;  %v609_v19 = vadd.f32 1.0, %v961_v15  ;;  %v485_v62 = vadd.f32 %v1158_v17, %v1177_v14  ;;  %v863_v3 = vmul.f32 -1.442695, %v493_v56 }
  0xfd   : > { %v965_v20 = vpop.eup %964  ;;  %984 = vrcp.f32 %v627_v16  ;;  %v625_v21 = vadd.f32 1.0, %v963_v18  ;;  %v903_v26 = vpop.f32.mrb[12].mxu0  ;;  %v845_v6 = vmul.f32 -1.442695, %v421_v59 }
  0xfe   : > { %v967_v23 = vpop.eup %966  ;;  %986 = vrcp.f32 %v609_v19  ;;  %v614_v24 = vadd.f32 1.0, %v965_v20  ;;  %v919_v30 = vpop.f32.mrb[12].mxu1  ;;  %v442_v1 = vadd.f32 %v903_v26, %v1158_v17  ;;  %v861_v8 = vmul.f32 -1.442695, %v485_v62 }
  0xff   : > { %v969_v27 = vpop.eup %968  ;;  %988 = vrcp.f32 %v625_v21  ;;  %v630_v28 = vadd.f32 1.0, %v967_v23  ;;  %v1183_v31 = vpop.f32.mrb[13].mxu0  ;;  %v506_v4 = vadd.f32 %v919_v30, %v1158_v17 }
 0x100   : > { %v971_v32 = vpop.eup %970  ;;  %990 = vrcp.f32 %v614_v24  ;;  %v612_v33 = vadd.f32 1.0, %v969_v27  ;;  %v1191_v35 = vpop.f32.mrb[13].mxu1  ;;  %v850_v10 = vmul.f32 -1.442695, %v442_v1 }
 0x101   : > { %v1193_v36 = vpop.f32.mrb[14].mxu0  ;;  %v973_v37 = vpop.eup %972  ;;  %992 = vrcp.f32 %v630_v28  ;;  %v628_v38 = vadd.f32 1.0, %v971_v32  ;;  %v866_v12 = vmul.f32 -1.442695, %v506_v4 }
 0x102   : > { %v1196_v41 = vpop.f32.mrb[14].mxu1  ;;  %v1198_v42 = vpop.f32.mrb[15].mxu0  ;;  %994 = vrcp.f32 %v612_v33  ;;  %v615_v44 = vadd.f32 1.0, %v973_v37  ;;  %v434_v33 = vadd.f32 %v1158_v17, %v1183_v31 }
 0x103   : > { %v975_v43 = vpop.eup %974  ;;  %v1201_v47 = vpop.f32.mrb[15].mxu1  ;;  %996 = vrcp.f32 %v628_v38  ;;  %v498_v38 = vadd.f32 %v1158_v17, %v1191_v35  ;;  %v509_v46 = vadd.f32 %v1196_v41, %v1158_v17  ;;  %v437_v35 = vadd.f32 %v1158_v17, %v1198_v42 }
 0x104   : > { %v977_v48 = vpop.eup %976  ;;  %707 = vst.msk [vmem:[%s1188_s26 + $0x10] sm:$0xff] %vm704_vm1, %v975_v43  ;;  %998 = vrcp.f32 %v615_v44  ;;  %v445_v43 = vadd.f32 %v1193_v36, %v1158_v17 }
 0x105   : > { %v979_v51 = vpop.eup %978  ;;  %723 = vst.msk [vmem:[%s1188_s26 + $0x90] sm:$0xff] %vm704_vm1, %v977_v48  ;;  %1000 = vpow2.f32 %v859_v39  ;;  %v864_v36 = vmul.f32 -1.442695, %v498_v38  ;;  %v867_v42 = vmul.f32 -1.442695, %v509_v46 }
 0x106   : > { %v981_v54 = vpop.eup %980  ;;  %705 = vst.msk [vmem:[%s1188_s26] sm:$0xff] %vm704_vm1, %v979_v51  ;;  %1002 = vpow2.f32 %v841_v45  ;;  %v851_v41 = vmul.f32 -1.442695, %v445_v43  ;;  %v849_v56 = vmul.f32 -1.442695, %v437_v35 }
 0x107   : > { %v983_v57 = vpop.eup %982  ;;  %721 = vst.msk [vmem:[%s1188_s26 + $0x80] sm:$0xff] %vm704_vm1, %v981_v54  ;;  %1004 = vpow2.f32 %v857_v49  ;;  %v848_v49 = vmul.f32 -1.442695, %v434_v33 }
 0x108   : > { %v985_v60 = vpop.eup %984  ;;  %708 = vst.msk [vmem:[%s1188_s26 + $0x18] sm:$0xff] %vm704_vm1, %v983_v57  ;;  %1006 = vpow2.f32 %v846_v52  ;;  %v501_v52 = vadd.f32 %v1158_v17, %v1201_v47 }
 0x109   : > { %v987_v63 = vpop.eup %986  ;;  %724 = vst.msk [vmem:[%s1188_s26 + $0x98] sm:$0xff] %vm704_vm1, %v985_v60  ;;  %1008 = vpow2.f32 %v862_v55 }
 0x10a   : > { %v989_v2 = vpop.eup %988  ;;  %706 = vst.msk [vmem:[%s1188_s26 + $0x8] sm:$0xff] %vm704_vm1, %v987_v63  ;;  %1010 = vpow2.f32 %v844_v58  ;;  %v865_v47 = vmul.f32 -1.442695, %v501_v52 }
 0x10b   : > { %v991_v5 = vpop.eup %990  ;;  %722 = vst.msk [vmem:[%s1188_s26 + $0x88] sm:$0xff] %vm704_vm1, %v989_v2  ;;  %1012 = vpow2.f32 %v860_v61 }
 0x10c   : > { %v993_v7 = vpop.eup %992  ;;  %711 = vst.msk [vmem:[%s1188_s26 + $0x30] sm:$0xff] %vm704_vm1, %v991_v5  ;;  %1014 = vpow2.f32 %v847_v0 }
 0x10d   : > { %v995_v9 = vpop.eup %994  ;;  %727 = vst.msk [vmem:[%s1188_s26 + $0xb0] sm:$0xff] %vm704_vm1, %v993_v7  ;;  %1016 = vpow2.f32 %v863_v3 }
 0x10e   : > { %v997_v11 = vpop.eup %996  ;;  %709 = vst.msk [vmem:[%s1188_s26 + $0x20] sm:$0xff] %vm704_vm1, %v995_v9  ;;  %1018 = vpow2.f32 %v845_v6 }
 0x10f   : > { %v999_v13 = vpop.eup %998  ;;  %725 = vst.msk [vmem:[%s1188_s26 + $0xa0] sm:$0xff] %vm704_vm1, %v997_v11  ;;  %1020 = vpow2.f32 %v861_v8 }
 0x110   : > { %v1001_v14 = vpop.eup %1000  ;;  %712 = vst.msk [vmem:[%s1188_s26 + $0x38] sm:$0xff] %vm704_vm1, %v999_v13  ;;  %1022 = vpow2.f32 %v850_v10 }
 0x111   : > { %v1003_v15 = vpop.eup %1002  ;;  %v631_v16 = vadd.f32 1.0, %v1001_v14  ;;  %1024 = vpow2.f32 %v866_v12 }
 0x112   : > { %v1005_v18 = vpop.eup %1004  ;;  %v613_v19 = vadd.f32 1.0, %v1003_v15 }
 0x113   : > { %v1007_v20 = vpop.eup %1006  ;;  %1026 = vrcp.f32 %v631_v16  ;;  %v629_v21 = vadd.f32 1.0, %v1005_v18 }
 0x114   : > { %v1009_v22 = vpop.eup %1008  ;;  %1028 = vrcp.f32 %v613_v19  ;;  %v618_v23 = vadd.f32 1.0, %v1007_v20 }
 0x115   : > { %v1011_v24 = vpop.eup %1010  ;;  %1030 = vrcp.f32 %v629_v21  ;;  %v634_v25 = vadd.f32 1.0, %v1009_v22 }
 0x116   : > { %v1013_v26 = vpop.eup %1012  ;;  %1032 = vrcp.f32 %v618_v23  ;;  %v616_v27 = vadd.f32 1.0, %v1011_v24 }
 0x117   : > { %v1015_v28 = vpop.eup %1014  ;;  %1034 = vrcp.f32 %v634_v25  ;;  %v632_v29 = vadd.f32 1.0, %v1013_v26 }
 0x118   : > { %v1017_v30 = vpop.eup %1016  ;;  %1036 = vrcp.f32 %v616_v27  ;;  %v619_v32 = vadd.f32 1.0, %v1015_v28 }
 0x119   : > { %v1019_v34 = vpop.eup %1018  ;;  %1038 = vrcp.f32 %v632_v29  ;;  %v635_v37 = vadd.f32 1.0, %v1017_v30 }
 0x11a   : > { %v1021_v39 = vpop.eup %1020  ;;  %1040 = vrcp.f32 %v619_v32  ;;  %v617_v40 = vadd.f32 1.0, %v1019_v34 }
 0x11b   : > { %v1023_v44 = vpop.eup %1022  ;;  %1042 = vrcp.f32 %v635_v37  ;;  %v633_v45 = vadd.f32 1.0, %v1021_v39 }
 0x11c   : > { %v1025_v31 = vpop.eup %1024  ;;  %1044 = vrcp.f32 %v617_v40  ;;  %v622_v48 = vadd.f32 1.0, %v1023_v44 }
 0x11d   : > { %v1027_v50 = vpop.eup %1026  ;;  %1046 = vrcp.f32 %v633_v45  ;;  %v638_v51 = vadd.f32 1.0, %v1025_v31 }
 0x11e   : > { %v1029_v53 = vpop.eup %1028  ;;  %728 = vst.msk [vmem:[%s1188_s26 + $0xb8] sm:$0xff] %vm704_vm1, %v1027_v50  ;;  %1048 = vrcp.f32 %v622_v48 }
 0x11f   : > { %v1031_v54 = vpop.eup %1030  ;;  %710 = vst.msk [vmem:[%s1188_s26 + $0x28] sm:$0xff] %vm704_vm1, %v1029_v53  ;;  %1050 = vrcp.f32 %v638_v51 }
 0x120   : > { %v1033_v55 = vpop.eup %1032  ;;  %726 = vst.msk [vmem:[%s1188_s26 + $0xa8] sm:$0xff] %vm704_vm1, %v1031_v54  ;;  %1052 = vpow2.f32 %v848_v49 }
 0x121   : > { %v1035_v17 = vpop.eup %1034  ;;  %715 = vst.msk [vmem:[%s1188_s26 + $0x50] sm:$0xff] %vm704_vm1, %v1033_v55  ;;  %1054 = vpow2.f32 %v864_v36 }
 0x122   : > { %v1037_v57 = vpop.eup %1036  ;;  %731 = vst.msk [vmem:[%s1188_s26 + $0xd0] sm:$0xff] %vm704_vm1, %v1035_v17  ;;  %1056 = vpow2.f32 %v851_v41 }
 0x123   : > { %v1039_v58 = vpop.eup %1038  ;;  %713 = vst.msk [vmem:[%s1188_s26 + $0x40] sm:$0xff] %vm704_vm1, %v1037_v57  ;;  %1058 = vpow2.f32 %v867_v42 }
 0x124   : > { %v1041_v59 = vpop.eup %1040  ;;  %729 = vst.msk [vmem:[%s1188_s26 + $0xc0] sm:$0xff] %vm704_vm1, %v1039_v58  ;;  %1060 = vpow2.f32 %v849_v56 }
 0x125   : > { %v1043_v60 = vpop.eup %1042  ;;  %716 = vst.msk [vmem:[%s1188_s26 + $0x58] sm:$0xff] %vm704_vm1, %v1041_v59  ;;  %1062 = vpow2.f32 %v865_v47 }
 0x126   : > { %v1045_v61 = vpop.eup %1044  ;;  %732 = vst.msk [vmem:[%s1188_s26 + $0xd8] sm:$0xff] %vm704_vm1, %v1043_v60 }
 0x127   : > { %v1047_v62 = vpop.eup %1046  ;;  %714 = vst.msk [vmem:[%s1188_s26 + $0x48] sm:$0xff] %vm704_vm1, %v1045_v61 }
 0x128   : > { %v1049_v63 = vpop.eup %1048  ;;  %730 = vst.msk [vmem:[%s1188_s26 + $0xc8] sm:$0xff] %vm704_vm1, %v1047_v62 }
 0x129   : > { %v1051_v0 = vpop.eup %1050  ;;  %719 = vst.msk [vmem:[%s1188_s26 + $0x70] sm:$0xff] %vm704_vm1, %v1049_v63 }
 0x12a   : > { %v1053_v1 = vpop.eup %1052  ;;  %735 = vst.msk [vmem:[%s1188_s26 + $0xf0] sm:$0xff] %vm704_vm1, %v1051_v0 }
 0x12b   : > { %v1055_v2 = vpop.eup %1054  ;;  %v620_v3 = vadd.f32 1.0, %v1053_v1 }
 0x12c   : > { %v1057_v4 = vpop.eup %1056  ;;  %v636_v5 = vadd.f32 1.0, %v1055_v2 }
 0x12d   : > { %v1059_v6 = vpop.eup %1058  ;;  %1064 = vrcp.f32 %v620_v3  ;;  %v623_v7 = vadd.f32 1.0, %v1057_v4 }
 0x12e   : > { %v1061_v8 = vpop.eup %1060  ;;  %1066 = vrcp.f32 %v636_v5  ;;  %v639_v9 = vadd.f32 1.0, %v1059_v6 }
 0x12f   : > { %v1063_v10 = vpop.eup %1062  ;;  %1068 = vrcp.f32 %v623_v7  ;;  %v621_v11 = vadd.f32 1.0, %v1061_v8 }
 0x130   : > { %1070 = vrcp.f32 %v639_v9  ;;  %v637_v12 = vadd.f32 1.0, %v1063_v10 }
 0x131   : > { %1072 = vrcp.f32 %v621_v11 }
 0x132   : > { %1074 = vrcp.f32 %v637_v12 }
 0x137   : > { %v1065_v13 = vpop.eup %1064 }
 0x138   : > { %v1067_v14 = vpop.eup %1066  ;;  %717 = vst.msk [vmem:[%s1188_s26 + $0x60] sm:$0xff] %vm704_vm1, %v1065_v13 }
 0x139   : > { %v1069_v15 = vpop.eup %1068  ;;  %733 = vst.msk [vmem:[%s1188_s26 + $0xe0] sm:$0xff] %vm704_vm1, %v1067_v14 }
 0x13a   : > { %v1071_v16 = vpop.eup %1070  ;;  %720 = vst.msk [vmem:[%s1188_s26 + $0x78] sm:$0xff] %vm704_vm1, %v1069_v15 }
 0x13b   : > { %v1073_v18 = vpop.eup %1072  ;;  %736 = vst.msk [vmem:[%s1188_s26 + $0xf8] sm:$0xff] %vm704_vm1, %v1071_v16 }
 0x13c   : > { %v1075_v19 = vpop.eup %1074  ;;  %718 = vst.msk [vmem:[%s1188_s26 + $0x68] sm:$0xff] %vm704_vm1, %v1073_v18 }
 0x13d   : > { %734 = vst.msk [vmem:[%s1188_s26 + $0xe8] sm:$0xff] %vm704_vm1, %v1075_v19 }
 0x13e PF: > { %s13_s12 = sadd.s32 1, %s1082_s12  }
 0x13f   : > { %p10_p4 = scmp.ge.s32.totalorder %s13_s12, 4  }
 0x141   :  { %12 = sbr.rel (!%p10_p4) target bundleno = 1 (0x1), region = 62 }

</bundles_post_ra>
